<compile_context>
chip_gen: v5e
topology: v5e:2x2
jax: 0.10.0
libtpu: 0.0.40
codegen_flags: <defaults>
</compile_context>

<pallas_src>
import jax
import jax.numpy as jnp
from jax import lax
from jax.experimental import pallas as pl
from jax.experimental.pallas import tpu as pltpu

_LANE = 128

try:  # per-generation VMEM budget (v7x: 64 MiB / TensorCore, v5e/v6e: 128 MiB)
    _VMEM_LIMIT = min(int(pltpu.get_tpu_info().vmem_capacity_bytes) * 3 // 4,
                      96 * 1024 * 1024)
except Exception:
    _VMEM_LIMIT = 32 * 1024 * 1024


def _round_up(x, m):
    return (x + m - 1) // m * m


def _pad_lane(v, n):
    return jnp.pad(v, (0, n - v.shape[0]))


def _pick_tile(m, limit=512):
    """Largest multiple-of-8 divisor of m that is <= limit (else m itself).

    Keeps m_pad == m: no padded rows, no row masks, no wasted MXU / store work.
    """
    if m <= limit:
        return m
    for t in range(limit - limit % 8, 7, -8):
        if m % t == 0:
            return t
    return m


def _params(sem):
    return pltpu.CompilerParams(dimension_semantics=sem,
                                vmem_limit_bytes=_VMEM_LIMIT)


# --------------------------------------------------------------------------- kernels
def _l1_kernel(x_ref, w_ref, y_ref, sum_ref, ssq_ref):
    """Layer 1 (1x1 input -> pure matmul), grid over N tiles.

    Per-column batch sum / sum-of-squares come from the f32 accumulator before the
    bf16 downcast, so the BatchNorm statistics stay exact.
    """
    y = jnp.dot(x_ref[...], w_ref[...], preferred_element_type=jnp.float32)
    y_ref[...] = y.astype(y_ref.dtype)
    sum_ref[...] = jnp.sum(y, axis=0, keepdims=True)
    ssq_ref[...] = jnp.sum(y * y, axis=0, keepdims=True)


def _deconv_kernel(p_ref, w_ref, y_ref, sum_ref, ssq_ref):
    """One row phase (pa) of ConvTranspose2d(k4 s2 p1) as an MXU matmul.

    N carries both column phases (pb) -> N = 2*OCp.  Stats accumulate over the inner
    ("arbitrary") M axis into a block indexed by pa, so the pa axis stays "parallel"
    (v7x megacore safe: each core owns its own stats block).
    """
    y = jnp.dot(p_ref[...], w_ref[...], preferred_element_type=jnp.float32)
    y_ref[...] = y.astype(y_ref.dtype)

    @pl.when(pl.program_id(1) == 0)
    def _():
        sum_ref[...] = jnp.zeros_like(sum_ref)
        ssq_ref[...] = jnp.zeros_like(ssq_ref)

    sum_ref[...] += jnp.sum(y, axis=0, keepdims=True)
    ssq_ref[...] += jnp.sum(y * y, axis=0, keepdims=True)


def _final_conv_kernel(p_ref, w_ref, b_ref, o_ref):
    """Final Conv2d(k3 s1 p1): matmul + bias + Tanh fused."""
    y = jnp.dot(p_ref[...], w_ref[...], preferred_element_type=jnp.float32)
    o_ref[...] = jnp.tanh(y + b_ref[...])


# ------------------------------------------------------------------- pallas wrappers
def layer1_matmul(x, wmat, oc_pad):
    """(B, Kp) @ (Kp, 49*oc_pad): bf16 pre-BN output + f32 per-column sum / ssq."""
    B, K = x.shape
    N = wmat.shape[1]
    tile_n = 7 * oc_pad                                  # 49 spatial cols -> 7 groups
    y, s, q = pl.pallas_call(
        _l1_kernel,
        grid=(N // tile_n,),
        in_specs=[pl.BlockSpec((B, K), lambda i: (0, 0)),
                  pl.BlockSpec((K, tile_n), lambda i: (0, i))],
        out_specs=[pl.BlockSpec((B, tile_n), lambda i: (0, i)),
                   pl.BlockSpec((1, tile_n), lambda i: (0, i)),
                   pl.BlockSpec((1, tile_n), lambda i: (0, i))],
        out_shape=[jax.ShapeDtypeStruct((B, N), jnp.bfloat16),
                   jax.ShapeDtypeStruct((1, N), jnp.float32),
                   jax.ShapeDtypeStruct((1, N), jnp.float32)],
        compiler_params=_params(("parallel",)),
        cost_estimate=pl.CostEstimate(
            flops=2 * B * K * N, transcendentals=0,
            bytes_accessed=(B * K + K * N + B * N) * 2 + 2 * N * 4),
    )(x.astype(jnp.bfloat16), wmat.astype(jnp.bfloat16))
    return y, s, q


def deconv_matmul(patches, wmats):
    """(2, M, 6*Cp) @ (2, 6*Cp, 2*OCp): bf16 pre-BN output + f32 stats per row phase."""
    _, M, K = patches.shape
    N = wmats.shape[2]
    tile_m = _pick_tile(M)
    y, s, q = pl.pallas_call(
        _deconv_kernel,
        grid=(2, M // tile_m),
        in_specs=[pl.BlockSpec((None, tile_m, K), lambda pa, i: (pa, i, 0)),
                  pl.BlockSpec((None, K, N), lambda pa, i: (pa, 0, 0))],
        out_specs=[pl.BlockSpec((None, tile_m, N), lambda pa, i: (pa, i, 0)),
                   pl.BlockSpec((None, 1, N), lambda pa, i: (pa, 0, 0)),
                   pl.BlockSpec((None, 1, N), lambda pa, i: (pa, 0, 0))],
        out_shape=[jax.ShapeDtypeStruct((2, M, N), jnp.bfloat16),
                   jax.ShapeDtypeStruct((2, 1, N), jnp.float32),
                   jax.ShapeDtypeStruct((2, 1, N), jnp.float32)],
        compiler_params=_params(("parallel", "arbitrary")),
        cost_estimate=pl.CostEstimate(
            flops=2 * 2 * M * K * N, transcendentals=0,
            bytes_accessed=2 * (M * K + K * N + M * N) * 2 + 4 * N * 4),
    )(patches, wmats)
    return y, s, q


def final_conv_matmul(patches, wmat, bias):
    """(M, 9*Cp) @ (9*Cp, OCp) + bias, Tanh fused, M-tiled."""
    M, K = patches.shape
    N = wmat.shape[1]
    tile_m = _pick_tile(M)
    return pl.pallas_call(
        _final_conv_kernel,
        grid=(M // tile_m,),
        in_specs=[pl.BlockSpec((tile_m, K), lambda i: (i, 0)),
                  pl.BlockSpec((K, N), lambda i: (0, 0)),
                  pl.BlockSpec((1, N), lambda i: (0, 0))],
        out_specs=pl.BlockSpec((tile_m, N), lambda i: (i, 0)),
        out_shape=jax.ShapeDtypeStruct((M, N), jnp.float32),
        compiler_params=_params(("parallel",)),
        cost_estimate=pl.CostEstimate(
            flops=2 * M * K * N, transcendentals=M * N,
            bytes_accessed=(M * K + K * N) * 2 + M * N * 4),
    )(patches.astype(jnp.bfloat16), wmat.astype(jnp.bfloat16),
      bias.reshape(1, N).astype(jnp.float32))


# ------------------------------------------------------------------ layout / BN glue
def _bn_scale_shift(s, q, count, gamma, beta, eps=1e-5):
    mean = s / count
    var = jnp.maximum(q / count - mean * mean, 0.0)      # biased var (BN training mode)
    scale = gamma * lax.rsqrt(var + eps)
    return scale, beta - mean * scale


def _bn_relu(y, scale, shift):
    """relu(y*scale + shift); XLA fuses this into the consumer's patch-building pass."""
    return jnp.maximum(y.astype(jnp.float32) * scale + shift, 0.0)


# TODO(synk): the tap gathers below are XLA glue; keeping the padded activation
# resident in VMEM and gathering taps in-kernel (pl.ds shifted slices) would remove
# one patch materialization pass per layer.
def _deconv_patches(a):
    """a (B, IH, IW, Cp) -> (2, B*IH*IW, 6*Cp) bf16.

    For each row phase pa: the 2x3 tap neighbourhood shared by both column phases,
    K ordered (aa, cb, c) with aa in {0,1}, cb in {0,1,2}.
    """
    B, IH, IW, C = a.shape
    ap = jnp.pad(a, ((0, 0), (1, 1), (1, 1), (0, 0)))
    phases = []
    for pa in (0, 1):
        taps = [ap[:, pa + aa:pa + aa + IH, cb:cb + IW, :]
                for aa in (0, 1) for cb in (0, 1, 2)]
        t = jnp.stack(taps, axis=3)                      # (B, IH, IW, 6, C)
        phases.append(t.reshape(B * IH * IW, 6 * C))
    return jnp.stack(phases, axis=0).astype(jnp.bfloat16)


def _deconv_weights(w, c_pad, oc_pad):
    """ConvTranspose2d weight (IC, OC, 4, 4) -> (2, 6*c_pad, 2*oc_pad) phase matrices.

    out[n, 2m+pa, 2n'+pb, oc] = sum_{aa,bb,c} xpad[n, m+pa+aa, n'+pb+bb, c]
                                            * w[c, oc, 3-2aa-pa, 3-2bb-pb]
    With shared column taps cb = pb + bb, taps whose cb - pb is not in {0,1} get zeros.
    """
    IC, OC = w.shape[0], w.shape[1]
    wt = jnp.transpose(w, (2, 3, 0, 1))                  # (KH, KW, IC, OC)
    wt = jnp.pad(wt, ((0, 0), (0, 0), (0, c_pad - IC), (0, oc_pad - OC)))
    zeros = jnp.zeros((c_pad, oc_pad), wt.dtype)
    mats = []
    for pa in (0, 1):
        cols = []
        for pb in (0, 1):
            rows = []
            for aa in (0, 1):
                for cb in (0, 1, 2):
                    bb = cb - pb
                    rows.append(wt[3 - 2 * aa - pa, 3 - 2 * bb - pb]
                                if bb in (0, 1) else zeros)
            cols.append(jnp.concatenate(rows, axis=0))   # (6*c_pad, oc_pad)
        mats.append(jnp.concatenate(cols, axis=1))       # (6*c_pad, 2*oc_pad)
    return jnp.stack(mats, axis=0).astype(jnp.bfloat16)


def _deconv_block(a, w):
    """ConvTranspose2d(k4 s2 p1): pre-BN (B, 2IH, 2IW, OCp) bf16 + per-channel stats."""
    B, IH, IW, C = a.shape
    ocp = _round_up(w.shape[1], _LANE)
    y, s, q = deconv_matmul(_deconv_patches(a), _deconv_weights(w, C, ocp))
    y = y.reshape(2, B, IH, IW, 2, ocp).transpose(1, 2, 0, 3, 4, 5)
    pre = y.reshape(B, 2 * IH, 2 * IW, ocp)              # phase interleave (cheap)
    s = s.reshape(2, 2, ocp).sum(axis=(0, 1))            # (pa, pb, oc) -> per oc
    q = q.reshape(2, 2, ocp).sum(axis=(0, 1))
    return pre, s, q


def _im2col_3x3(a):
    """a (B, H, W, C) -> (B*H*W, 9*C) for the 3x3/s1/p1 conv; K ordered (kh, kw, c)."""
    B, H, W, C = a.shape
    ap = jnp.pad(a, ((0, 0), (1, 1), (1, 1), (0, 0)))
    taps = [ap[:, i:i + H, j:j + W, :] for i in range(3) for j in range(3)]
    return jnp.stack(taps, axis=3).reshape(B * H * W, 9 * C)


# ---------------------------------------------------------------------------- forward
def dc_generator_forward(x, params):
    (w1, _b1, g1, t1), (w2, _b2, g2, t2), (w3, _b3, g3, t3), (w4, b4) = params
    latent_dim = w1.shape[0]
    im_chan = w4.shape[0]
    B = x.shape[0]
    x = x.reshape(B, latent_dim)                         # == x.view(B, latent, 1, 1)

    oc1p = _round_up(w1.shape[1], _LANE)
    klp = _round_up(latent_dim, _LANE)

    # -- block 1: ConvTranspose2d(latent, 4H, k7 s1 p0); 1x1 input -> pure matmul.
    #    Columns ordered (kh, kw, oc) == NHWC.  Conv bias dropped (cancels in BN mean).
    xin = jnp.pad(x, ((0, 0), (0, klp - latent_dim)))
    w1m = jnp.transpose(w1, (0, 2, 3, 1))                # (L, 7, 7, oc1)
    w1m = jnp.pad(w1m, ((0, klp - latent_dim), (0, 0), (0, 0), (0, oc1p - w1.shape[1])))
    y1, s1, q1 = layer1_matmul(xin, w1m.reshape(klp, 49 * oc1p), oc1p)
    scale1, shift1 = _bn_scale_shift(
        s1.reshape(49, oc1p).sum(0), q1.reshape(49, oc1p).sum(0), B * 49,
        _pad_lane(g1, oc1p), _pad_lane(t1, oc1p))
    a1 = _bn_relu(y1.reshape(B, 7, 7, oc1p), scale1, shift1)

    # -- blocks 2 & 3: ConvTranspose2d(k4 s2 p1) + BN + ReLU ---------------------------
    pre2, s2, q2 = _deconv_block(a1, w2)                 # (B, 14, 14, oc2p)
    oc2p = pre2.shape[-1]
    scale2, shift2 = _bn_scale_shift(s2, q2, pre2[..., 0].size,
                                     _pad_lane(g2, oc2p), _pad_lane(t2, oc2p))
    a2 = _bn_relu(pre2, scale2, shift2)

    pre3, s3, q3 = _deconv_block(a2, w3)                 # (B, 28, 28, oc3p)
    oc3p = pre3.shape[-1]
    scale3, shift3 = _bn_scale_shift(s3, q3, pre3[..., 0].size,
                                     _pad_lane(g3, oc3p), _pad_lane(t3, oc3p))
    a3 = _bn_relu(pre3, scale3, shift3)

    # -- final layer: Conv2d(H, im_chan, k3 s1 p1) + bias + Tanh (fused in-kernel) -----
    # TODO(synk): with im_chan=1 only 1/128 output lanes carry data; a VPU epilogue on
    # the layer-3 kernel would avoid the padded-lane MXU / tanh work.
    oc4p = _round_up(im_chan, _LANE)
    w4m = jnp.transpose(w4, (2, 3, 1, 0))                # (3, 3, IC, im_chan)
    w4m = jnp.pad(w4m, ((0, 0), (0, 0), (0, oc3p - w4.shape[1]), (0, oc4p - im_chan)))
    y4 = final_conv_matmul(_im2col_3x3(a3), w4m.reshape(9 * oc3p, oc4p),
                           _pad_lane(b4, oc4p))
    H_out = a3.shape[1]
    img = y4[:, :im_chan].reshape(B, H_out, H_out, im_chan)
    return jnp.transpose(img, (0, 3, 1, 2))              # NCHW to match PyTorch


# ------------------------------------------------------------------ params & reference
def init_params(key, latent_dim, im_chan, hidden_dim):
    """Parameters matching the PyTorch module (ConvTranspose2d weight = (IC, OC, KH, KW))."""
    oc1, oc2, oc3 = hidden_dim * 4, hidden_dim * 2, hidden_dim
    specs = [(latent_dim, oc1, 7, 7), (oc1, oc2, 4, 4), (oc2, oc3, 4, 4)]
    params = []
    for shp in specs:
        key, kw_, kb_, kg_, kt_ = jax.random.split(key, 5)
        w = jax.random.normal(kw_, shp, jnp.float32) * 0.05
        b = jax.random.normal(kb_, (shp[1],), jnp.float32) * 0.05
        g = 1.0 + 0.1 * jax.random.normal(kg_, (shp[1],), jnp.float32)
        t = 0.1 * jax.random.normal(kt_, (shp[1],), jnp.float32)
        params.append((w, b, g, t))
    key, kw_, kb_ = jax.random.split(key, 3)
    w4 = jax.random.normal(kw_, (im_chan, oc3, 3, 3), jnp.float32) * 0.05
    b4 = jax.random.normal(kb_, (im_chan,), jnp.float32) * 0.05
    params.append((w4, b4))
    return params


def _ref_forward(x, params):
    """Pure-JAX reference (lax.conv; bf16 operands / f32 accumulation like the kernels)."""
    (w1, b1, g1, t1), (w2, b2, g2, t2), (w3, b3, g3, t3), (w4, b4) = params
    B = x.shape[0]
    a = x.reshape(B, w1.shape[0], 1, 1)

    def conv_t(a, w, b, k, s, p):
        wf = jnp.transpose(jnp.flip(w, (2, 3)), (1, 0, 2, 3))   # (OC, IC, KH, KW)
        y = lax.conv_general_dilated(
            a.astype(jnp.bfloat16), wf.astype(jnp.bfloat16),
            window_strides=(1, 1), padding=[(k - 1 - p, k - 1 - p)] * 2,
            lhs_dilation=(s, s), dimension_numbers=("NCHW", "OIHW", "NCHW"),
            preferred_element_type=jnp.float32)
        return y + b.reshape(1, -1, 1, 1)

    def bn_relu(y, g, t):
        mu = jnp.mean(y, axis=(0, 2, 3), keepdims=True)
        var = jnp.mean(jnp.square(y - mu), axis=(0, 2, 3), keepdims=True)
        yn = (y - mu) * lax.rsqrt(var + 1e-5)
        return jnp.maximum(yn * g.reshape(1, -1, 1, 1) + t.reshape(1, -1, 1, 1), 0.0)

    a = bn_relu(conv_t(a, w1, b1, 7, 1, 0), g1, t1)
    a = bn_relu(conv_t(a, w2, b2, 4, 2, 1), g2, t2)
    a = bn_relu(conv_t(a, w3, b3, 4, 2, 1), g3, t3)
    y = lax.conv_general_dilated(
        a.astype(jnp.bfloat16), w4.astype(jnp.bfloat16), (1, 1), [(1, 1), (1, 1)],
        dimension_numbers=("NCHW", "OIHW", "NCHW"),
        preferred_element_type=jnp.float32) + b4.reshape(1, -1, 1, 1)
    return jnp.tanh(y)


if __name__ == "__main__":
    key = jax.random.PRNGKey(0)
    k_x, k_p = jax.random.split(key)

    BATCH, LATENT, HIDDEN, IM_CHAN = 2, 16, 8, 1
    x = jax.random.normal(k_x, (BATCH, LATENT), dtype=jnp.float32)
    params = init_params(k_p, LATENT, IM_CHAN, HIDDEN)

    fwd = jax.jit(dc_generator_forward)
    out = jax.block_until_ready(fwd(x, params))
    ref = _ref_forward(x, params)

    assert out.shape == (BATCH, IM_CHAN, 28, 28), out.shape
    assert bool(jnp.all(jnp.isfinite(out)))
    max_err = float(jnp.max(jnp.abs(out - ref)))
    # pre-BN activations are stored in bf16 (the reference keeps them in f32), which
    # widens the tolerance vs the previous all-f32 version; a broken kernel would be
    # off by O(0.5) on the tanh output, so this still discriminates correctness.
    assert max_err < 3e-2, max_err

    print("KERNEL_OK")
</pallas_src>

<mosaic_0001>
module attributes {stable_mosaic.version = 11 : i64} {
  func.func @_l1_kernel(%arg0: i32, %arg1: memref<2x128xbf16, #tpu.memory_space<vmem>>, %arg2: memref<128x896xbf16, #tpu.memory_space<vmem>>, %arg3: memref<2x896xbf16, #tpu.memory_space<vmem>>, %arg4: memref<1x896xf32, #tpu.memory_space<vmem>>, %arg5: memref<1x896xf32, #tpu.memory_space<vmem>>) attributes {dimension_semantics = [#tpu.dimension_semantics<parallel>], iteration_bounds = array<i64: 7>, scalar_prefetch = 0 : i64, scratch_operands = 0 : i64, tpu.core_type = #tpu.core_type<tc>, window_params = [{pipeline_mode = #tpu.pipeline_mode<synchronous>, transform_indices = @transform_0, window_bounds = array<i64: 2, 128>}, {transform_indices = @transform_1, window_bounds = array<i64: 128, 896>}, {transform_indices = @transform_2, window_bounds = array<i64: 2, 896>}, {transform_indices = @transform_3, window_bounds = array<i64: 1, 896>}, {transform_indices = @transform_4, window_bounds = array<i64: 1, 896>}]} {
    %c0 = arith.constant 0 : index
    %c0_0 = arith.constant 0 : index
    %0 = vector.load %arg1[%c0, %c0_0] : memref<2x128xbf16, #tpu.memory_space<vmem>>, vector<2x128xbf16>
    %c0_1 = arith.constant 0 : index
    %c0_2 = arith.constant 0 : index
    %1 = vector.load %arg2[%c0_1, %c0_2] : memref<128x896xbf16, #tpu.memory_space<vmem>>, vector<128x896xbf16>
    %cst = arith.constant dense<0.000000e+00> : vector<2x896xf32>
    %2 = tpu.matmul %0, %1, %cst {dimension_numbers = #tpu.dot_dimension_numbers<[1], [0], [0], [1], [0, 0, 1, 1], [], []>} : vector<2x128xbf16>, vector<128x896xbf16>, vector<2x896xf32> -> vector<2x896xf32>
    %3 = arith.truncf %2 : vector<2x896xf32> to vector<2x896xbf16>
    %c0_3 = arith.constant 0 : index
    %c0_4 = arith.constant 0 : index
    %4 = vector.load %arg3[%c0_3, %c0_4] : memref<2x896xbf16, #tpu.memory_space<vmem>>, vector<2x896xbf16>
    tpu.vector_store %arg3[%c0_3, %c0_4], %3 {strides = array<i32>} : memref<2x896xbf16, #tpu.memory_space<vmem>>, vector<2x896xbf16>,
    %cst_5 = arith.constant dense<0.000000e+00> : vector<896xf32>
    %5 = vector.multi_reduction <add>, %2, %cst_5 [0] : vector<2x896xf32> to vector<896xf32>
    %6 = vector.shape_cast %5 : vector<896xf32> to vector<1x896xf32>
    %c0_6 = arith.constant 0 : index
    %c0_7 = arith.constant 0 : index
    %7 = vector.load %arg4[%c0_6, %c0_7] : memref<1x896xf32, #tpu.memory_space<vmem>>, vector<1x896xf32>
    tpu.vector_store %arg4[%c0_6, %c0_7], %6 {strides = array<i32>} : memref<1x896xf32, #tpu.memory_space<vmem>>, vector<1x896xf32>,
    %8 = arith.mulf %2, %2 : vector<2x896xf32>
    %cst_8 = arith.constant dense<0.000000e+00> : vector<896xf32>
    %9 = vector.multi_reduction <add>, %8, %cst_8 [0] : vector<2x896xf32> to vector<896xf32>
    %10 = vector.shape_cast %9 : vector<896xf32> to vector<1x896xf32>
    %c0_9 = arith.constant 0 : index
    %c0_10 = arith.constant 0 : index
    %11 = vector.load %arg5[%c0_9, %c0_10] : memref<1x896xf32, #tpu.memory_space<vmem>>, vector<1x896xf32>
    tpu.vector_store %arg5[%c0_9, %c0_10], %10 {strides = array<i32>} : memref<1x896xf32, #tpu.memory_space<vmem>>, vector<1x896xf32>,
    return
  }
  func.func @transform_0(%arg0: i32) -> (i32, i32) {
    %c0_i32 = arith.constant 0 : i32
    %c0_i32_0 = arith.constant 0 : i32
    %c0_i32_1 = arith.constant 0 : i32
    return %c0_i32, %c0_i32_0 : i32, i32
  }
  func.func @transform_1(%arg0: i32) -> (i32, i32) {
    %c0_i32 = arith.constant 0 : i32
    %c0_i32_0 = arith.constant 0 : i32
    return %c0_i32, %arg0 : i32, i32
  }
  func.func @transform_2(%arg0: i32) -> (i32, i32) {
    %c0_i32 = arith.constant 0 : i32
    %c0_i32_0 = arith.constant 0 : i32
    return %c0_i32, %arg0 : i32, i32
  }
  func.func @transform_3(%arg0: i32) -> (i32, i32) {
    %c0_i32 = arith.constant 0 : i32
    %c0_i32_0 = arith.constant 0 : i32
    return %c0_i32, %arg0 : i32, i32
  }
  func.func @transform_4(%arg0: i32) -> (i32, i32) {
    %c0_i32 = arith.constant 0 : i32
    %c0_i32_0 = arith.constant 0 : i32
    return %c0_i32, %arg0 : i32, i32
  }
}

module attributes {stable_mosaic.version = 11 : i64} {
  func.func @_deconv_kernel(%arg0: i32, %arg1: i32, %arg2: memref<1x98x768xbf16, #tpu.memory_space<vmem>>, %arg3: memref<1x768x256xbf16, #tpu.memory_space<vmem>>, %arg4: memref<1x98x256xbf16, #tpu.memory_space<vmem>>, %arg5: memref<1x1x256xf32, #tpu.memory_space<vmem>>, %arg6: memref<1x1x256xf32, #tpu.memory_space<vmem>>) attributes {dimension_semantics = [#tpu.dimension_semantics<parallel>, #tpu.dimension_semantics<arbitrary>], iteration_bounds = array<i64: 2, 1>, scalar_prefetch = 0 : i64, scratch_operands = 0 : i64, tpu.core_type = #tpu.core_type<tc>, window_params = [{transform_indices = @transform_0, window_bounds = array<i64: 1, 98, 768>}, {transform_indices = @transform_1, window_bounds = array<i64: 1, 768, 256>}, {transform_indices = @transform_2, window_bounds = array<i64: 1, 98, 256>}, {transform_indices = @transform_3, window_bounds = array<i64: 1, 1, 256>}, {transform_indices = @transform_4, window_bounds = array<i64: 1, 1, 256>}]} {
    %c0 = arith.constant 0 : index
    %c0_0 = arith.constant 0 : index
    %c0_1 = arith.constant 0 : index
    %0 = vector.load %arg2[%c0, %c0_0, %c0_1] : memref<1x98x768xbf16, #tpu.memory_space<vmem>>, vector<1x98x768xbf16>
    %1 = vector.shape_cast %0 : vector<1x98x768xbf16> to vector<98x768xbf16>
    %c0_2 = arith.constant 0 : index
    %c0_3 = arith.constant 0 : index
    %c0_4 = arith.constant 0 : index
    %2 = vector.load %arg3[%c0_2, %c0_3, %c0_4] : memref<1x768x256xbf16, #tpu.memory_space<vmem>>, vector<1x768x256xbf16>
    %3 = vector.shape_cast %2 : vector<1x768x256xbf16> to vector<768x256xbf16>
    %cst = arith.constant dense<0.000000e+00> : vector<98x256xf32>
    %4 = tpu.matmul %1, %3, %cst {dimension_numbers = #tpu.dot_dimension_numbers<[1], [0], [0], [1], [0, 0, 1, 1], [], []>} : vector<98x768xbf16>, vector<768x256xbf16>, vector<98x256xf32> -> vector<98x256xf32>
    %5 = arith.truncf %4 : vector<98x256xf32> to vector<98x256xbf16>
    %c0_5 = arith.constant 0 : index
    %c0_6 = arith.constant 0 : index
    %c0_7 = arith.constant 0 : index
    %6 = vector.load %arg4[%c0_5, %c0_6, %c0_7] : memref<1x98x256xbf16, #tpu.memory_space<vmem>>, vector<1x98x256xbf16>
    %7 = vector.shape_cast %6 : vector<1x98x256xbf16> to vector<98x256xbf16>
    %8 = vector.shape_cast %5 : vector<98x256xbf16> to vector<1x98x256xbf16>
    tpu.vector_store %arg4[%c0_5, %c0_6, %c0_7], %8 {strides = array<i32>} : memref<1x98x256xbf16, #tpu.memory_space<vmem>>, vector<1x98x256xbf16>,
    %c0_i32 = arith.constant 0 : i32
    %9 = arith.cmpi eq, %arg1, %c0_i32 : i32
    %10 = arith.extui %9 : i1 to i32
    %c0_i32_8 = arith.constant 0 : i32
    %11 = arith.cmpi ne, %10, %c0_i32_8 : i32
    scf.if %11 {
      %cst_23 = arith.constant 0.000000e+00 : f32
      %29 = vector.broadcast %cst_23 : f32 to vector<1x256xf32>
      %c0_24 = arith.constant 0 : index
      %c0_25 = arith.constant 0 : index
      %c0_26 = arith.constant 0 : index
      %30 = vector.load %arg5[%c0_24, %c0_25, %c0_26] : memref<1x1x256xf32, #tpu.memory_space<vmem>>, vector<1x1x256xf32>
      %31 = vector.shape_cast %30 : vector<1x1x256xf32> to vector<1x256xf32>
      %32 = vector.shape_cast %29 : vector<1x256xf32> to vector<1x1x256xf32>
      tpu.vector_store %arg5[%c0_24, %c0_25, %c0_26], %32 {strides = array<i32>} : memref<1x1x256xf32, #tpu.memory_space<vmem>>, vector<1x1x256xf32>,
      %cst_27 = arith.constant 0.000000e+00 : f32
      %33 = vector.broadcast %cst_27 : f32 to vector<1x256xf32>
      %c0_28 = arith.constant 0 : index
      %c0_29 = arith.constant 0 : index
      %c0_30 = arith.constant 0 : index
      %34 = vector.load %arg6[%c0_28, %c0_29, %c0_30] : memref<1x1x256xf32, #tpu.memory_space<vmem>>, vector<1x1x256xf32>
      %35 = vector.shape_cast %34 : vector<1x1x256xf32> to vector<1x256xf32>
      %36 = vector.shape_cast %33 : vector<1x256xf32> to vector<1x1x256xf32>
      tpu.vector_store %arg6[%c0_28, %c0_29, %c0_30], %36 {strides = array<i32>} : memref<1x1x256xf32, #tpu.memory_space<vmem>>, vector<1x1x256xf32>,
    } else {
    }
    %c0_9 = arith.constant 0 : index
    %c0_10 = arith.constant 0 : index
    %c0_11 = arith.constant 0 : index
    %12 = vector.load %arg5[%c0_9, %c0_10, %c0_11] : memref<1x1x256xf32, #tpu.memory_space<vmem>>, vector<1x1x256xf32>
    %13 = vector.shape_cast %12 : vector<1x1x256xf32> to vector<1x256xf32>
    %cst_12 = arith.constant dense<0.000000e+00> : vector<256xf32>
    %14 = vector.multi_reduction <add>, %4, %cst_12 [0] : vector<98x256xf32> to vector<256xf32>
    %15 = vector.shape_cast %14 : vector<256xf32> to vector<1x256xf32>
    %16 = arith.addf %13, %15 : vector<1x256xf32>
    %c0_13 = arith.constant 0 : index
    %c0_14 = arith.constant 0 : index
    %c0_15 = arith.constant 0 : index
    %17 = vector.load %arg5[%c0_13, %c0_14, %c0_15] : memref<1x1x256xf32, #tpu.memory_space<vmem>>, vector<1x1x256xf32>
    %18 = vector.shape_cast %17 : vector<1x1x256xf32> to vector<1x256xf32>
    %19 = vector.shape_cast %16 : vector<1x256xf32> to vector<1x1x256xf32>
    tpu.vector_store %arg5[%c0_13, %c0_14, %c0_15], %19 {strides = array<i32>} : memref<1x1x256xf32, #tpu.memory_space<vmem>>, vector<1x1x256xf32>,
    %c0_16 = arith.constant 0 : index
    %c0_17 = arith.constant 0 : index
    %c0_18 = arith.constant 0 : index
    %20 = vector.load %arg6[%c0_16, %c0_17, %c0_18] : memref<1x1x256xf32, #tpu.memory_space<vmem>>, vector<1x1x256xf32>
    %21 = vector.shape_cast %20 : vector<1x1x256xf32> to vector<1x256xf32>
    %22 = arith.mulf %4, %4 : vector<98x256xf32>
    %cst_19 = arith.constant dense<0.000000e+00> : vector<256xf32>
    %23 = vector.multi_reduction <add>, %22, %cst_19 [0] : vector<98x256xf32> to vector<256xf32>
    %24 = vector.shape_cast %23 : vector<256xf32> to vector<1x256xf32>
    %25 = arith.addf %21, %24 : vector<1x256xf32>
    %c0_20 = arith.constant 0 : index
    %c0_21 = arith.constant 0 : index
    %c0_22 = arith.constant 0 : index
    %26 = vector.load %arg6[%c0_20, %c0_21, %c0_22] : memref<1x1x256xf32, #tpu.memory_space<vmem>>, vector<1x1x256xf32>
    %27 = vector.shape_cast %26 : vector<1x1x256xf32> to vector<1x256xf32>
    %28 = vector.shape_cast %25 : vector<1x256xf32> to vector<1x1x256xf32>
    tpu.vector_store %arg6[%c0_20, %c0_21, %c0_22], %28 {strides = array<i32>} : memref<1x1x256xf32, #tpu.memory_space<vmem>>, vector<1x1x256xf32>,
    return
  }
  func.func @transform_0(%arg0: i32, %arg1: i32) -> (i32, i32, i32) {
    %c0_i32 = arith.constant 0 : i32
    %c0_i32_0 = arith.constant 0 : i32
    return %arg0, %arg1, %c0_i32 : i32, i32, i32
  }
  func.func @transform_1(%arg0: i32, %arg1: i32) -> (i32, i32, i32) {
    %c0_i32 = arith.constant 0 : i32
    %c0_i32_0 = arith.constant 0 : i32
    %c0_i32_1 = arith.constant 0 : i32
    return %arg0, %c0_i32, %c0_i32_0 : i32, i32, i32
  }
  func.func @transform_2(%arg0: i32, %arg1: i32) -> (i32, i32, i32) {
    %c0_i32 = arith.constant 0 : i32
    %c0_i32_0 = arith.constant 0 : i32
    return %arg0, %arg1, %c0_i32 : i32, i32, i32
  }
  func.func @transform_3(%arg0: i32, %arg1: i32) -> (i32, i32, i32) {
    %c0_i32 = arith.constant 0 : i32
    %c0_i32_0 = arith.constant 0 : i32
    %c0_i32_1 = arith.constant 0 : i32
    return %arg0, %c0_i32, %c0_i32_0 : i32, i32, i32
  }
  func.func @transform_4(%arg0: i32, %arg1: i32) -> (i32, i32, i32) {
    %c0_i32 = arith.constant 0 : i32
    %c0_i32_0 = arith.constant 0 : i32
    %c0_i32_1 = arith.constant 0 : i32
    return %arg0, %c0_i32, %c0_i32_0 : i32, i32, i32
  }
}

module attributes {stable_mosaic.version = 11 : i64} {
  func.func @_deconv_kernel(%arg0: i32, %arg1: i32, %arg2: memref<1x392x768xbf16, #tpu.memory_space<vmem>>, %arg3: memref<1x768x256xbf16, #tpu.memory_space<vmem>>, %arg4: memref<1x392x256xbf16, #tpu.memory_space<vmem>>, %arg5: memref<1x1x256xf32, #tpu.memory_space<vmem>>, %arg6: memref<1x1x256xf32, #tpu.memory_space<vmem>>) attributes {dimension_semantics = [#tpu.dimension_semantics<parallel>, #tpu.dimension_semantics<arbitrary>], iteration_bounds = array<i64: 2, 1>, scalar_prefetch = 0 : i64, scratch_operands = 0 : i64, tpu.core_type = #tpu.core_type<tc>, window_params = [{transform_indices = @transform_0, window_bounds = array<i64: 1, 392, 768>}, {transform_indices = @transform_1, window_bounds = array<i64: 1, 768, 256>}, {transform_indices = @transform_2, window_bounds = array<i64: 1, 392, 256>}, {transform_indices = @transform_3, window_bounds = array<i64: 1, 1, 256>}, {transform_indices = @transform_4, window_bounds = array<i64: 1, 1, 256>}]} {
    %c0 = arith.constant 0 : index
    %c0_0 = arith.constant 0 : index
    %c0_1 = arith.constant 0 : index
    %0 = vector.load %arg2[%c0, %c0_0, %c0_1] : memref<1x392x768xbf16, #tpu.memory_space<vmem>>, vector<1x392x768xbf16>
    %1 = vector.shape_cast %0 : vector<1x392x768xbf16> to vector<392x768xbf16>
    %c0_2 = arith.constant 0 : index
    %c0_3 = arith.constant 0 : index
    %c0_4 = arith.constant 0 : index
    %2 = vector.load %arg3[%c0_2, %c0_3, %c0_4] : memref<1x768x256xbf16, #tpu.memory_space<vmem>>, vector<1x768x256xbf16>
    %3 = vector.shape_cast %2 : vector<1x768x256xbf16> to vector<768x256xbf16>
    %cst = arith.constant dense<0.000000e+00> : vector<392x256xf32>
    %4 = tpu.matmul %1, %3, %cst {dimension_numbers = #tpu.dot_dimension_numbers<[1], [0], [0], [1], [0, 0, 1, 1], [], []>} : vector<392x768xbf16>, vector<768x256xbf16>, vector<392x256xf32> -> vector<392x256xf32>
    %5 = arith.truncf %4 : vector<392x256xf32> to vector<392x256xbf16>
    %c0_5 = arith.constant 0 : index
    %c0_6 = arith.constant 0 : index
    %c0_7 = arith.constant 0 : index
    %6 = vector.load %arg4[%c0_5, %c0_6, %c0_7] : memref<1x392x256xbf16, #tpu.memory_space<vmem>>, vector<1x392x256xbf16>
    %7 = vector.shape_cast %6 : vector<1x392x256xbf16> to vector<392x256xbf16>
    %8 = vector.shape_cast %5 : vector<392x256xbf16> to vector<1x392x256xbf16>
    tpu.vector_store %arg4[%c0_5, %c0_6, %c0_7], %8 {strides = array<i32>} : memref<1x392x256xbf16, #tpu.memory_space<vmem>>, vector<1x392x256xbf16>,
    %c0_i32 = arith.constant 0 : i32
    %9 = arith.cmpi eq, %arg1, %c0_i32 : i32
    %10 = arith.extui %9 : i1 to i32
    %c0_i32_8 = arith.constant 0 : i32
    %11 = arith.cmpi ne, %10, %c0_i32_8 : i32
    scf.if %11 {
      %cst_23 = arith.constant 0.000000e+00 : f32
      %29 = vector.broadcast %cst_23 : f32 to vector<1x256xf32>
      %c0_24 = arith.constant 0 : index
      %c0_25 = arith.constant 0 : index
      %c0_26 = arith.constant 0 : index
      %30 = vector.load %arg5[%c0_24, %c0_25, %c0_26] : memref<1x1x256xf32, #tpu.memory_space<vmem>>, vector<1x1x256xf32>
      %31 = vector.shape_cast %30 : vector<1x1x256xf32> to vector<1x256xf32>
      %32 = vector.shape_cast %29 : vector<1x256xf32> to vector<1x1x256xf32>
      tpu.vector_store %arg5[%c0_24, %c0_25, %c0_26], %32 {strides = array<i32>} : memref<1x1x256xf32, #tpu.memory_space<vmem>>, vector<1x1x256xf32>,
      %cst_27 = arith.constant 0.000000e+00 : f32
      %33 = vector.broadcast %cst_27 : f32 to vector<1x256xf32>
      %c0_28 = arith.constant 0 : index
      %c0_29 = arith.constant 0 : index
      %c0_30 = arith.constant 0 : index
      %34 = vector.load %arg6[%c0_28, %c0_29, %c0_30] : memref<1x1x256xf32, #tpu.memory_space<vmem>>, vector<1x1x256xf32>
      %35 = vector.shape_cast %34 : vector<1x1x256xf32> to vector<1x256xf32>
      %36 = vector.shape_cast %33 : vector<1x256xf32> to vector<1x1x256xf32>
      tpu.vector_store %arg6[%c0_28, %c0_29, %c0_30], %36 {strides = array<i32>} : memref<1x1x256xf32, #tpu.memory_space<vmem>>, vector<1x1x256xf32>,
    } else {
    }
    %c0_9 = arith.constant 0 : index
    %c0_10 = arith.constant 0 : index
    %c0_11 = arith.constant 0 : index
    %12 = vector.load %arg5[%c0_9, %c0_10, %c0_11] : memref<1x1x256xf32, #tpu.memory_space<vmem>>, vector<1x1x256xf32>
    %13 = vector.shape_cast %12 : vector<1x1x256xf32> to vector<1x256xf32>
    %cst_12 = arith.constant dense<0.000000e+00> : vector<256xf32>
    %14 = vector.multi_reduction <add>, %4, %cst_12 [0] : vector<392x256xf32> to vector<256xf32>
    %15 = vector.shape_cast %14 : vector<256xf32> to vector<1x256xf32>
    %16 = arith.addf %13, %15 : vector<1x256xf32>
    %c0_13 = arith.constant 0 : index
    %c0_14 = arith.constant 0 : index
    %c0_15 = arith.constant 0 : index
    %17 = vector.load %arg5[%c0_13, %c0_14, %c0_15] : memref<1x1x256xf32, #tpu.memory_space<vmem>>, vector<1x1x256xf32>
    %18 = vector.shape_cast %17 : vector<1x1x256xf32> to vector<1x256xf32>
    %19 = vector.shape_cast %16 : vector<1x256xf32> to vector<1x1x256xf32>
    tpu.vector_store %arg5[%c0_13, %c0_14, %c0_15], %19 {strides = array<i32>} : memref<1x1x256xf32, #tpu.memory_space<vmem>>, vector<1x1x256xf32>,
    %c0_16 = arith.constant 0 : index
    %c0_17 = arith.constant 0 : index
    %c0_18 = arith.constant 0 : index
    %20 = vector.load %arg6[%c0_16, %c0_17, %c0_18] : memref<1x1x256xf32, #tpu.memory_space<vmem>>, vector<1x1x256xf32>
    %21 = vector.shape_cast %20 : vector<1x1x256xf32> to vector<1x256xf32>
    %22 = arith.mulf %4, %4 : vector<392x256xf32>
    %cst_19 = arith.constant dense<0.000000e+00> : vector<256xf32>
    %23 = vector.multi_reduction <add>, %22, %cst_19 [0] : vector<392x256xf32> to vector<256xf32>
    %24 = vector.shape_cast %23 : vector<256xf32> to vector<1x256xf32>
    %25 = arith.addf %21, %24 : vector<1x256xf32>
    %c0_20 = arith.constant 0 : index
    %c0_21 = arith.constant 0 : index
    %c0_22 = arith.constant 0 : index
    %26 = vector.load %arg6[%c0_20, %c0_21, %c0_22] : memref<1x1x256xf32, #tpu.memory_space<vmem>>, vector<1x1x256xf32>
    %27 = vector.shape_cast %26 : vector<1x1x256xf32> to vector<1x256xf32>
    %28 = vector.shape_cast %25 : vector<1x256xf32> to vector<1x1x256xf32>
    tpu.vector_store %arg6[%c0_20, %c0_21, %c0_22], %28 {strides = array<i32>} : memref<1x1x256xf32, #tpu.memory_space<vmem>>, vector<1x1x256xf32>,
    return
  }
  func.func @transform_0(%arg0: i32, %arg1: i32) -> (i32, i32, i32) {
    %c0_i32 = arith.constant 0 : i32
    %c0_i32_0 = arith.constant 0 : i32
    return %arg0, %arg1, %c0_i32 : i32, i32, i32
  }
  func.func @transform_1(%arg0: i32, %arg1: i32) -> (i32, i32, i32) {
    %c0_i32 = arith.constant 0 : i32
    %c0_i32_0 = arith.constant 0 : i32
    %c0_i32_1 = arith.constant 0 : i32
    return %arg0, %c0_i32, %c0_i32_0 : i32, i32, i32
  }
  func.func @transform_2(%arg0: i32, %arg1: i32) -> (i32, i32, i32) {
    %c0_i32 = arith.constant 0 : i32
    %c0_i32_0 = arith.constant 0 : i32
    return %arg0, %arg1, %c0_i32 : i32, i32, i32
  }
  func.func @transform_3(%arg0: i32, %arg1: i32) -> (i32, i32, i32) {
    %c0_i32 = arith.constant 0 : i32
    %c0_i32_0 = arith.constant 0 : i32
    %c0_i32_1 = arith.constant 0 : i32
    return %arg0, %c0_i32, %c0_i32_0 : i32, i32, i32
  }
  func.func @transform_4(%arg0: i32, %arg1: i32) -> (i32, i32, i32) {
    %c0_i32 = arith.constant 0 : i32
    %c0_i32_0 = arith.constant 0 : i32
    %c0_i32_1 = arith.constant 0 : i32
    return %arg0, %c0_i32, %c0_i32_0 : i32, i32, i32
  }
}

module attributes {stable_mosaic.version = 11 : i64} {
  func.func @_final_conv_kernel(%arg0: i32, %arg1: memref<392x1152xbf16, #tpu.memory_space<vmem>>, %arg2: memref<1152x128xbf16, #tpu.memory_space<vmem>>, %arg3: memref<1x128xf32, #tpu.memory_space<vmem>>, %arg4: memref<392x128xf32, #tpu.memory_space<vmem>>) attributes {dimension_semantics = [#tpu.dimension_semantics<parallel>], iteration_bounds = array<i64: 4>, scalar_prefetch = 0 : i64, scratch_operands = 0 : i64, tpu.core_type = #tpu.core_type<tc>, window_params = [{transform_indices = @transform_0, window_bounds = array<i64: 392, 1152>}, {pipeline_mode = #tpu.pipeline_mode<synchronous>, transform_indices = @transform_1, window_bounds = array<i64: 1152, 128>}, {pipeline_mode = #tpu.pipeline_mode<synchronous>, transform_indices = @transform_2, window_bounds = array<i64: 1, 128>}, {transform_indices = @transform_3, window_bounds = array<i64: 392, 128>}]} {
    %c0 = arith.constant 0 : index
    %c0_0 = arith.constant 0 : index
    %0 = vector.load %arg1[%c0, %c0_0] : memref<392x1152xbf16, #tpu.memory_space<vmem>>, vector<392x1152xbf16>
    %c0_1 = arith.constant 0 : index
    %c0_2 = arith.constant 0 : index
    %1 = vector.load %arg2[%c0_1, %c0_2] : memref<1152x128xbf16, #tpu.memory_space<vmem>>, vector<1152x128xbf16>
    %cst = arith.constant dense<0.000000e+00> : vector<392x128xf32>
    %2 = tpu.matmul %0, %1, %cst {dimension_numbers = #tpu.dot_dimension_numbers<[1], [0], [0], [1], [0, 0, 1, 1], [], []>} : vector<392x1152xbf16>, vector<1152x128xbf16>, vector<392x128xf32> -> vector<392x128xf32>
    %c0_3 = arith.constant 0 : index
    %c0_4 = arith.constant 0 : index
    %3 = vector.load %arg3[%c0_3, %c0_4] : memref<1x128xf32, #tpu.memory_space<vmem>>, vector<1x128xf32>
    %4 = vector.broadcast %3 : vector<1x128xf32> to vector<392x128xf32>
    %5 = arith.addf %2, %4 : vector<392x128xf32>
    %6 = math.tanh %5 : vector<392x128xf32>
    %c0_5 = arith.constant 0 : index
    %c0_6 = arith.constant 0 : index
    %7 = vector.load %arg4[%c0_5, %c0_6] : memref<392x128xf32, #tpu.memory_space<vmem>>, vector<392x128xf32>
    tpu.vector_store %arg4[%c0_5, %c0_6], %6 {strides = array<i32>} : memref<392x128xf32, #tpu.memory_space<vmem>>, vector<392x128xf32>,
    return
  }
  func.func @transform_0(%arg0: i32) -> (i32, i32) {
    %c0_i32 = arith.constant 0 : i32
    %c0_i32_0 = arith.constant 0 : i32
    return %arg0, %c0_i32 : i32, i32
  }
  func.func @transform_1(%arg0: i32) -> (i32, i32) {
    %c0_i32 = arith.constant 0 : i32
    %c0_i32_0 = arith.constant 0 : i32
    %c0_i32_1 = arith.constant 0 : i32
    return %c0_i32, %c0_i32_0 : i32, i32
  }
  func.func @transform_2(%arg0: i32) -> (i32, i32) {
    %c0_i32 = arith.constant 0 : i32
    %c0_i32_0 = arith.constant 0 : i32
    %c0_i32_1 = arith.constant 0 : i32
    return %c0_i32, %c0_i32_0 : i32, i32
  }
  func.func @transform_3(%arg0: i32) -> (i32, i32) {
    %c0_i32 = arith.constant 0 : i32
    %c0_i32_0 = arith.constant 0 : i32
    return %arg0, %c0_i32 : i32, i32
  }
}

</mosaic_0001>

<bundles_post_ra>
// kernel: dc_generator_forward.4
= control target key start
LH: loop header
LB: loop body
LE: loop exit
PB: predicated region body
PF: predicated region fallthrough
CT: control target
= control target key end

     0   :  { %s1523_s15 = smov 0   ;;  %s1525_s16 = smov 0   ;;  %s1908_s0 = inlined_call_operand.vmem [shape: bf16[2,128], index: 0, kind: input, shape index: {}]   ;;  %s1909_s1 = inlined_call_operand.vmem [shape: bf16[128,6272], index: 1, kind: input, shape index: {}]   ;;  %s1910_s2 = inlined_call_operand.vmem [shape: bf16[2,6272], index: 2, kind: output, shape index: {0}]   ;;  %s1911_s3 = inlined_call_operand.vmem [shape: f32[1,6272], index: 3, kind: output, shape index: {1}]   ;;  %s1912_s4 = inlined_call_operand.vmem [shape: f32[1,6272], index: 4, kind: output, shape index: {2}]  }
   0x1   :  { %s1527_s17 = smov 0  }
   0x2 LB: > { %s1127_s18 = sadd.s32 4294967295, %s1496_s17   ;;  %s1540_s19 = sadd.s32 1, %s1496_s17   ;;  %s1496_s17 = sphi %s1527_s17, %s1915_s17   ;;  %s1492_s16 = sphi %s1525_s16, %s1914_s16   ;;  %s1488_s15 = sphi %s1523_s15, %s1913_s15  }
   0x3   : > { %s40_s20 = ssub.s32 %s1496_s17, %s1540_s19  ;;  %s43_s21 = sadd.s32 1, %s1492_s16 }
   0x4   : > { %p41_p0 = scmp.eq.s32.totalorder %s40_s20, 0  ;;  %p50_p1 = scmp.ne.s32.totalorder %s1492_s16, %s1488_s15 }
   0x5   : > { %p51_p2 = scmp.eq.s32.totalorder %s1496_s17, 0  ;;  %p1130_p4 = scmp.ge.s32.totalorder %s1496_s17, 7 }
   0x6   : > { %s1549_s22 = scalar_select %p41_p0, %s1492_s16, %s43_s21  }
   0x7   : > { %p52_p3 = por %p51_p2, %p50_p1  ;;  %157 = sbr.rel (%p1130_p4) target bundleno = 81 (0x51), region = 20 }
   0xc   : > { %160 = sbr.rel (!%p52_p3) target bundleno = 81 (0x51), region = 24  ;;  %s162_s23 = sand.u32 (%p52_p3), 1, %s1492_s16  }
   0xd   : > { %s1391_s24 = smul.u32 (%p52_p3), 28, %s1496_s17 }
   0xe   : > { %s1448_s25 = smul.u32 (%p52_p3), 448, %s162_s23 }
   0xf   : > { %s1557_s28 = scalar_lea.vmem (%p52_p3), %s1909_s1, %s1391_s24 }
  0x10   : > { %v182_v0 = vld [vmem:[%s1557_s28] sm:$0xff] (%p52_p3)  ;;  %v184_v1 = vld [vmem:[%s1557_s28 + $0x8] sm:$0xff] (%p52_p3)  ;;  %v186_v2 = vld [vmem:[%s1557_s28 + $0x10] sm:$0xff] (%p52_p3)  ;;  %s1562_s29 = scalar_lea.vmem (%p52_p3), [#allocation2], %s1448_s25 }
  0x11   : > { %183 = vst [vmem:[%s1562_s29] sm:$0xff] %v182_v0  ;;  %v188_v3 = vld [vmem:[%s1557_s28 + $0xc4] sm:$0xff]  ;;  %v190_v4 = vld [vmem:[%s1557_s28 + $0xcc] sm:$0xff]  ;;  %v192_v5 = vld [vmem:[%s1557_s28 + $0xd4] sm:$0xff] }
  0x12   : > { %185 = vst [vmem:[%s1562_s29 + $0x8] sm:$0xff] %v184_v1  ;;  %v194_v6 = vld [vmem:[%s1557_s28 + $0x188] sm:$0xff]  ;;  %v196_v7 = vld [vmem:[%s1557_s28 + $0x190] sm:$0xff]  ;;  %v198_v8 = vld [vmem:[%s1557_s28 + $0x198] sm:$0xff] }
  0x13   : > { %187 = vst [vmem:[%s1562_s29 + $0x10] sm:$0xff] %v186_v2  ;;  %v200_v9 = vld [vmem:[%s1557_s28 + $0x24c] sm:$0xff]  ;;  %v202_v10 = vld [vmem:[%s1557_s28 + $0x254] sm:$0xff]  ;;  %v204_v11 = vld [vmem:[%s1557_s28 + $0x25c] sm:$0xff] }
  0x14   : > { %189 = vst [vmem:[%s1562_s29 + $0x1c] sm:$0xff] %v188_v3  ;;  %v206_v12 = vld [vmem:[%s1557_s28 + $0x310] sm:$0xff]  ;;  %v208_v13 = vld [vmem:[%s1557_s28 + $0x318] sm:$0xff]  ;;  %v210_v14 = vld [vmem:[%s1557_s28 + $0x320] sm:$0xff] }
  0x15   : > { %191 = vst [vmem:[%s1562_s29 + $0x24] sm:$0xff] %v190_v4  ;;  %v212_v15 = vld [vmem:[%s1557_s28 + $0x3d4] sm:$0xff]  ;;  %v214_v16 = vld [vmem:[%s1557_s28 + $0x3dc] sm:$0xff]  ;;  %v216_v17 = vld [vmem:[%s1557_s28 + $0x3e4] sm:$0xff] }
  0x16   : > { %193 = vst [vmem:[%s1562_s29 + $0x2c] sm:$0xff] %v192_v5  ;;  %v218_v18 = vld [vmem:[%s1557_s28 + $0x498] sm:$0xff]  ;;  %v220_v19 = vld [vmem:[%s1557_s28 + $0x4a0] sm:$0xff]  ;;  %v222_v20 = vld [vmem:[%s1557_s28 + $0x4a8] sm:$0xff] }
  0x17   : > { %195 = vst [vmem:[%s1562_s29 + $0x38] sm:$0xff] %v194_v6  ;;  %v224_v21 = vld [vmem:[%s1557_s28 + $0x55c] sm:$0xff]  ;;  %v226_v22 = vld [vmem:[%s1557_s28 + $0x564] sm:$0xff]  ;;  %v228_v23 = vld [vmem:[%s1557_s28 + $0x56c] sm:$0xff] }
  0x18   : > { %197 = vst [vmem:[%s1562_s29 + $0x40] sm:$0xff] %v196_v7  ;;  %v230_v24 = vld [vmem:[%s1557_s28 + $0x620] sm:$0xff]  ;;  %v232_v25 = vld [vmem:[%s1557_s28 + $0x628] sm:$0xff]  ;;  %v234_v26 = vld [vmem:[%s1557_s28 + $0x630] sm:$0xff] }
  0x19   : > { %199 = vst [vmem:[%s1562_s29 + $0x48] sm:$0xff] %v198_v8  ;;  %v236_v27 = vld [vmem:[%s1557_s28 + $0x6e4] sm:$0xff]  ;;  %v238_v28 = vld [vmem:[%s1557_s28 + $0x6ec] sm:$0xff]  ;;  %v240_v29 = vld [vmem:[%s1557_s28 + $0x6f4] sm:$0xff] }
  0x1a   : > { %201 = vst [vmem:[%s1562_s29 + $0x54] sm:$0xff] %v200_v9  ;;  %v242_v30 = vld [vmem:[%s1557_s28 + $0x7a8] sm:$0xff]  ;;  %v244_v31 = vld [vmem:[%s1557_s28 + $0x7b0] sm:$0xff]  ;;  %v246_v32 = vld [vmem:[%s1557_s28 + $0x7b8] sm:$0xff] }
  0x1b   : > { %203 = vst [vmem:[%s1562_s29 + $0x5c] sm:$0xff] %v202_v10  ;;  %v248_v33 = vld [vmem:[%s1557_s28 + $0x86c] sm:$0xff]  ;;  %v250_v34 = vld [vmem:[%s1557_s28 + $0x874] sm:$0xff]  ;;  %v252_v35 = vld [vmem:[%s1557_s28 + $0x87c] sm:$0xff] }
  0x1c   : > { %205 = vst [vmem:[%s1562_s29 + $0x64] sm:$0xff] %v204_v11  ;;  %v254_v36 = vld [vmem:[%s1557_s28 + $0x930] sm:$0xff]  ;;  %v256_v37 = vld [vmem:[%s1557_s28 + $0x938] sm:$0xff]  ;;  %v258_v38 = vld [vmem:[%s1557_s28 + $0x940] sm:$0xff] }
  0x1d   : > { %207 = vst [vmem:[%s1562_s29 + $0x70] sm:$0xff] %v206_v12  ;;  %v260_v39 = vld [vmem:[%s1557_s28 + $0x9f4] sm:$0xff]  ;;  %v262_v40 = vld [vmem:[%s1557_s28 + $0x9fc] sm:$0xff]  ;;  %v264_v41 = vld [vmem:[%s1557_s28 + $0xa04] sm:$0xff] }
  0x1e   : > { %209 = vst [vmem:[%s1562_s29 + $0x78] sm:$0xff] %v208_v13  ;;  %v266_v42 = vld [vmem:[%s1557_s28 + $0xab8] sm:$0xff]  ;;  %v268_v43 = vld [vmem:[%s1557_s28 + $0xac0] sm:$0xff]  ;;  %v270_v44 = vld [vmem:[%s1557_s28 + $0xac8] sm:$0xff] }
  0x1f   : > { %211 = vst [vmem:[%s1562_s29 + $0x80] sm:$0xff] %v210_v14  ;;  %v272_v45 = vld [vmem:[%s1557_s28 + $0xb7c] sm:$0xff]  ;;  %v274_v46 = vld [vmem:[%s1557_s28 + $0xb84] sm:$0xff]  ;;  %v276_v47 = vld [vmem:[%s1557_s28 + $0xb8c] sm:$0xff] }
  0x20   : > { %213 = vst [vmem:[%s1562_s29 + $0x8c] sm:$0xff] %v212_v15  ;;  %v1132_v48 = vld [vmem:[%s1557_s28 + $0x18] sm:$0xf]  ;;  %v1134_v49 = vld [vmem:[%s1557_s28 + $0xdc] sm:$0xf] }
  0x21   : > { %215 = vst [vmem:[%s1562_s29 + $0x94] sm:$0xff] %v214_v16  ;;  %v1136_v50 = vld [vmem:[%s1557_s28 + $0x1a0] sm:$0xf]  ;;  %v1138_v51 = vld [vmem:[%s1557_s28 + $0x264] sm:$0xf] }
  0x22   : > { %217 = vst [vmem:[%s1562_s29 + $0x9c] sm:$0xff] %v216_v17  ;;  %v1140_v52 = vld [vmem:[%s1557_s28 + $0x328] sm:$0xf]  ;;  %v1142_v53 = vld [vmem:[%s1557_s28 + $0x3ec] sm:$0xf] }
  0x23   : > { %219 = vst [vmem:[%s1562_s29 + $0xa8] sm:$0xff] %v218_v18  ;;  %v1144_v54 = vld [vmem:[%s1557_s28 + $0x4b0] sm:$0xf]  ;;  %v1146_v55 = vld [vmem:[%s1557_s28 + $0x574] sm:$0xf] }
  0x24   : > { %221 = vst [vmem:[%s1562_s29 + $0xb0] sm:$0xff] %v220_v19  ;;  %v1148_v56 = vld [vmem:[%s1557_s28 + $0x638] sm:$0xf]  ;;  %v1150_v57 = vld [vmem:[%s1557_s28 + $0x6fc] sm:$0xf] }
  0x25   : > { %223 = vst [vmem:[%s1562_s29 + $0xb8] sm:$0xff] %v222_v20  ;;  %v1152_v58 = vld [vmem:[%s1557_s28 + $0x7c0] sm:$0xf]  ;;  %v1154_v59 = vld [vmem:[%s1557_s28 + $0x884] sm:$0xf] }
  0x26   : > { %225 = vst [vmem:[%s1562_s29 + $0xc4] sm:$0xff] %v224_v21  ;;  %v1156_v60 = vld [vmem:[%s1557_s28 + $0x948] sm:$0xf]  ;;  %v1158_v61 = vld [vmem:[%s1557_s28 + $0xa0c] sm:$0xf] }
  0x27   : > { %227 = vst [vmem:[%s1562_s29 + $0xcc] sm:$0xff] %v226_v22  ;;  %v1160_v62 = vld [vmem:[%s1557_s28 + $0xad0] sm:$0xf]  ;;  %v1162_v63 = vld [vmem:[%s1557_s28 + $0xb94] sm:$0xf] }
  0x28   : > { %229 = vst [vmem:[%s1562_s29 + $0xd4] sm:$0xff] %v228_v23 }
  0x29   : > { %231 = vst [vmem:[%s1562_s29 + $0xe0] sm:$0xff] %v230_v24 }
  0x2a   : > { %233 = vst [vmem:[%s1562_s29 + $0xe8] sm:$0xff] %v232_v25 }
  0x2b   : > { %235 = vst [vmem:[%s1562_s29 + $0xf0] sm:$0xff] %v234_v26 }
  0x2c   : > { %237 = vst [vmem:[%s1562_s29 + $0xfc] sm:$0xff] %v236_v27 }
  0x2d   : > { %239 = vst [vmem:[%s1562_s29 + $0x104] sm:$0xff] %v238_v28 }
  0x2e   : > { %241 = vst [vmem:[%s1562_s29 + $0x10c] sm:$0xff] %v240_v29 }
  0x2f   : > { %243 = vst [vmem:[%s1562_s29 + $0x118] sm:$0xff] %v242_v30 }
  0x30   : > { %245 = vst [vmem:[%s1562_s29 + $0x120] sm:$0xff] %v244_v31 }
  0x31   : > { %247 = vst [vmem:[%s1562_s29 + $0x128] sm:$0xff] %v246_v32 }
  0x32   : > { %249 = vst [vmem:[%s1562_s29 + $0x134] sm:$0xff] %v248_v33 }
  0x33   : > { %251 = vst [vmem:[%s1562_s29 + $0x13c] sm:$0xff] %v250_v34 }
  0x34   : > { %253 = vst [vmem:[%s1562_s29 + $0x144] sm:$0xff] %v252_v35 }
  0x35   : > { %255 = vst [vmem:[%s1562_s29 + $0x150] sm:$0xff] %v254_v36 }
  0x36   : > { %257 = vst [vmem:[%s1562_s29 + $0x158] sm:$0xff] %v256_v37 }
  0x37   : > { %259 = vst [vmem:[%s1562_s29 + $0x160] sm:$0xff] %v258_v38 }
  0x38   : > { %261 = vst [vmem:[%s1562_s29 + $0x16c] sm:$0xff] %v260_v39 }
  0x39   : > { %263 = vst [vmem:[%s1562_s29 + $0x174] sm:$0xff] %v262_v40 }
  0x3a   : > { %265 = vst [vmem:[%s1562_s29 + $0x17c] sm:$0xff] %v264_v41 }
  0x3b   : > { %267 = vst [vmem:[%s1562_s29 + $0x188] sm:$0xff] %v266_v42 }
  0x3c   : > { %269 = vst [vmem:[%s1562_s29 + $0x190] sm:$0xff] %v268_v43 }
  0x3d   : > { %271 = vst [vmem:[%s1562_s29 + $0x198] sm:$0xff] %v270_v44 }
  0x3e   : > { %273 = vst [vmem:[%s1562_s29 + $0x1a4] sm:$0xff] %v272_v45 }
  0x3f   : > { %275 = vst [vmem:[%s1562_s29 + $0x1ac] sm:$0xff] %v274_v46 }
  0x40   : > { %277 = vst [vmem:[%s1562_s29 + $0x1b4] sm:$0xff] %v276_v47 }
  0x41   : > { %1133 = vst [vmem:[%s1562_s29 + $0x18] sm:$0xf] %v1132_v48 }
  0x42   : > { %1135 = vst [vmem:[%s1562_s29 + $0x34] sm:$0xf] %v1134_v49 }
  0x43   : > { %1137 = vst [vmem:[%s1562_s29 + $0x50] sm:$0xf] %v1136_v50 }
  0x44   : > { %1139 = vst [vmem:[%s1562_s29 + $0x6c] sm:$0xf] %v1138_v51 }
  0x45   : > { %1141 = vst [vmem:[%s1562_s29 + $0x88] sm:$0xf] %v1140_v52 }
  0x46   : > { %1143 = vst [vmem:[%s1562_s29 + $0xa4] sm:$0xf] %v1142_v53 }
  0x47   : > { %1145 = vst [vmem:[%s1562_s29 + $0xc0] sm:$0xf] %v1144_v54 }
  0x48   : > { %1147 = vst [vmem:[%s1562_s29 + $0xdc] sm:$0xf] %v1146_v55 }
  0x49   : > { %1149 = vst [vmem:[%s1562_s29 + $0xf8] sm:$0xf] %v1148_v56 }
  0x4a   : > { %1151 = vst [vmem:[%s1562_s29 + $0x114] sm:$0xf] %v1150_v57 }
  0x4b   : > { %1153 = vst [vmem:[%s1562_s29 + $0x130] sm:$0xf] %v1152_v58 }
  0x4c   : > { %1155 = vst [vmem:[%s1562_s29 + $0x14c] sm:$0xf] %v1154_v59 }
  0x4d   : > { %1157 = vst [vmem:[%s1562_s29 + $0x168] sm:$0xf] %v1156_v60 }
  0x4e   : > { %1159 = vst [vmem:[%s1562_s29 + $0x184] sm:$0xf] %v1158_v61 }
  0x4f   : > { %1161 = vst [vmem:[%s1562_s29 + $0x1a0] sm:$0xf] %v1160_v62 }
  0x50   : > { %1163 = vst [vmem:[%s1562_s29 + $0x1bc] sm:$0xf] %v1162_v63 }
  0x51 PF: > { %p1164_p5 = scmp.ge.s32.totalorder %s1496_s17, 1  ;;  %p322_p6 = scmp.lt.s32.totalorder %s1496_s17, 8 }
  0x53   : > { %p323_p7 = pnand %p1164_p5, %p322_p6 }
  0x54   : > { %s329_s30 = sand.u32 (!%p323_p7), 1, %s1488_s15   ;;  %s1846_s9 = smul.u32 (!%p323_p7), 7, %s1127_s18 }
  0x55   : > { %326 = sbr.rel (%p323_p7) target bundleno = 310 (0x136), region = 50 }
  0x56   : > { %s1449_s5 = smul.u32 (!%p323_p7), 448, %s329_s30  ;;  %p363_p8 = scmp.lt.s32.totalorder (!%p323_p7), %s1846_s9, 48 }
  0x58   : > { %s1692_s6 = scalar_lea.vmem (!%p323_p7), [#allocation2], %s1449_s5 }
  0x5a   : > { %v1363_v0 = vld [vmem:[%s1692_s6 + $0x188] sm:$0xf]  ;;  %v1444_v1 = vld [vmem:[%s1692_s6 + $0x1a0] sm:$0xf0]  ;;  %v1441_v2 = vld [vmem:[%s1692_s6 + $0x18c] sm:$0xf] }
  0x5b   : > { %v1364_v3 = vor.u32 %v1444_v1, %v1363_v0  ;;  %v1365_v4 = vld [vmem:[%s1692_s6 + $0x1a4] sm:$0xf0]  ;;  %v1371_v5 = vld [vmem:[%s1692_s6 + $0x190] sm:$0xf]  ;;  %v1445_v6 = vld [vmem:[%s1692_s6 + $0x1a8] sm:$0xf0] }
  0x5c   : > { %v1368_v7 = vor.u32 %v1441_v2, %v1365_v4  ;;  %v1372_v8 = vor.u32 %v1445_v6, %v1371_v5  ;;  %v1335_v9 = vld [vmem:[%s1692_s6 + $0x150] sm:$0xf]  ;;  %v1437_v10 = vld [vmem:[%s1692_s6 + $0x168] sm:$0xf0]  ;;  %v1434_v11 = vld [vmem:[%s1692_s6 + $0x154] sm:$0xf] }
  0x5d   : > { %730 = vmatpush.bf16.msra.mxu0 %v1364_v3  ;;  %v1336_v12 = vor.u32 %v1437_v10, %v1335_v9  ;;  %v1337_v13 = vld [vmem:[%s1692_s6 + $0x16c] sm:$0xf0]  ;;  %v1343_v14 = vld [vmem:[%s1692_s6 + $0x158] sm:$0xf]  ;;  %v1438_v15 = vld [vmem:[%s1692_s6 + $0x170] sm:$0xf0] }
  0x5e   : > { %743 = vmatpush.bf16.msra.mxu1 %v1368_v7  ;;  %756 = vmatpush.bf16.msra.mxu2 %v1372_v8  ;;  %v1340_v16 = vor.u32 %v1434_v11, %v1337_v13  ;;  %v1344_v17 = vor.u32 %v1438_v15, %v1343_v14  ;;  %v1442_v18 = vld [vmem:[%s1692_s6 + $0x194] sm:$0xf]  ;;  %v1373_v19 = vld [vmem:[%s1692_s6 + $0x1ac] sm:$0xf0]  ;;  %v1307_v20 = vld [vmem:[%s1692_s6 + $0x118] sm:$0xf] }
  0x5f   : > { %v1376_v21 = vor.u32 %v1442_v18, %v1373_v19  ;;  %v1430_v22 = vld [vmem:[%s1692_s6 + $0x130] sm:$0xf0]  ;;  %v1427_v23 = vld [vmem:[%s1692_s6 + $0x11c] sm:$0xf]  ;;  %v1309_v24 = vld [vmem:[%s1692_s6 + $0x134] sm:$0xf0] }
  0x60   : > { %v1315_v25 = vld [vmem:[%s1692_s6 + $0x120] sm:$0xf]  ;;  %v1431_v26 = vld [vmem:[%s1692_s6 + $0x138] sm:$0xf0]  ;;  %v1308_v28 = vor.u32 %v1430_v22, %v1307_v20  ;;  %v1345_v29 = vld [vmem:[%s1692_s6 + $0x174] sm:$0xf0]  ;;  %v1312_v32 = vor.u32 %v1427_v23, %v1309_v24 }
  0x61   : > { %v1435_v27 = vld [vmem:[%s1692_s6 + $0x15c] sm:$0xf]  ;;  %731 = vmatpush.bf16.msra.mxu0 %v1336_v12  ;;  %769 = vmatpush.bf16.msra.mxu3 %v1376_v21  ;;  %v1279_v30 = vld [vmem:[%s1692_s6 + $0xe0] sm:$0xf]  ;;  %v1316_v33 = vor.u32 %v1431_v26, %v1315_v25  ;;  %v1420_v35 = vld [vmem:[%s1692_s6 + $0xe4] sm:$0xf] }
  0x62   : > { %v1423_v31 = vld [vmem:[%s1692_s6 + $0xf8] sm:$0xf0]  ;;  %744 = vmatpush.bf16.msra.mxu1 %v1340_v16  ;;  %757 = vmatpush.bf16.msra.mxu2 %v1344_v17  ;;  %v1348_v34 = vor.u32 %v1435_v27, %v1345_v29  ;;  %v1281_v36 = vld [vmem:[%s1692_s6 + $0xfc] sm:$0xf0]  ;;  %v1287_v37 = vld [vmem:[%s1692_s6 + $0xe8] sm:$0xf] }
  0x63   : > { %v1424_v38 = vld [vmem:[%s1692_s6 + $0x100] sm:$0xf0]  ;;  %v1317_v40 = vld [vmem:[%s1692_s6 + $0x13c] sm:$0xf0]  ;;  %v1280_v41 = vor.u32 %v1423_v31, %v1279_v30  ;;  %v1251_v43 = vld [vmem:[%s1692_s6 + $0xa8] sm:$0xf]  ;;  %v1284_v45 = vor.u32 %v1420_v35, %v1281_v36 }
  0x64   : > { %v1428_v39 = vld [vmem:[%s1692_s6 + $0x124] sm:$0xf]  ;;  %v1288_v46 = vor.u32 %v1424_v38, %v1287_v37  ;;  %v1413_v47 = vld [vmem:[%s1692_s6 + $0xac] sm:$0xf]  ;;  %v1289_v49 = vld [vmem:[%s1692_s6 + $0x104] sm:$0xf0] }
  0x65   : > { %732 = vmatpush.bf16.msra.mxu0 %v1308_v28  ;;  %770 = vmatpush.bf16.msra.mxu3 %v1348_v34  ;;  %v1320_v42 = vor.u32 %v1428_v39, %v1317_v40  ;;  %v1416_v44 = vld [vmem:[%s1692_s6 + $0xc0] sm:$0xf0]  ;;  %v1421_v48 = vld [vmem:[%s1692_s6 + $0xec] sm:$0xf]  ;;  %v1253_v50 = vld [vmem:[%s1692_s6 + $0xc4] sm:$0xf0] }
  0x66   : > { %745 = vmatpush.bf16.msra.mxu1 %v1312_v32  ;;  %758 = vmatpush.bf16.msra.mxu2 %v1316_v33  ;;  %v1259_v51 = vld [vmem:[%s1692_s6 + $0xb0] sm:$0xf]  ;;  %v1417_v52 = vld [vmem:[%s1692_s6 + $0xc8] sm:$0xf0]  ;;  %v1252_v53 = vor.u32 %v1416_v44, %v1251_v43  ;;  %v1292_v54 = vor.u32 %v1421_v48, %v1289_v49  ;;  %v1256_v57 = vor.u32 %v1413_v47, %v1253_v50  ;;  %v1406_v59 = vld [vmem:[%s1692_s6 + $0x74] sm:$0xf] }
  0x67   : > { %v1223_v55 = vld [vmem:[%s1692_s6 + $0x70] sm:$0xf]  ;;  %v1409_v56 = vld [vmem:[%s1692_s6 + $0x88] sm:$0xf0]  ;;  %v1260_v58 = vor.u32 %v1417_v52, %v1259_v51  ;;  %v1414_v60 = vld [vmem:[%s1692_s6 + $0xb4] sm:$0xf] }
  0x68   : > { %v1261_v61 = vld [vmem:[%s1692_s6 + $0xcc] sm:$0xf0]  ;;  %v1231_v63 = vld [vmem:[%s1692_s6 + $0x78] sm:$0xf]  ;;  %v1410_v0 = vld [vmem:[%s1692_s6 + $0x90] sm:$0xf0]  ;;  %v1224_v1 = vor.u32 %v1409_v56, %v1223_v55 }
  0x69   : > { %733 = vmatpush.bf16.msra.mxu0 %v1280_v41  ;;  %771 = vmatpush.bf16.msra.mxu3 %v1320_v42  ;;  %v1225_v62 = vld [vmem:[%s1692_s6 + $0x8c] sm:$0xf0]  ;;  %v1264_v2 = vor.u32 %v1414_v60, %v1261_v61  ;;  %v1195_v3 = vld [vmem:[%s1692_s6 + $0x38] sm:$0xf]  ;;  %v1402_v4 = vld [vmem:[%s1692_s6 + $0x50] sm:$0xf0]  ;;  %v1232_v6 = vor.u32 %v1410_v0, %v1231_v63 }
  0x6a   : > { %746 = vmatpush.bf16.msra.mxu1 %v1284_v45  ;;  %759 = vmatpush.bf16.msra.mxu2 %v1288_v46  ;;  %v1228_v5 = vor.u32 %v1406_v59, %v1225_v62  ;;  %v1399_v7 = vld [vmem:[%s1692_s6 + $0x3c] sm:$0xf]  ;;  %v1233_v9 = vld [vmem:[%s1692_s6 + $0x94] sm:$0xf0]  ;;  %v1203_v11 = vld [vmem:[%s1692_s6 + $0x40] sm:$0xf]  ;;  %v1196_v13 = vor.u32 %v1402_v4, %v1195_v3 }
  0x6b   : > { %v1407_v8 = vld [vmem:[%s1692_s6 + $0x7c] sm:$0xf]  ;;  %v1197_v10 = vld [vmem:[%s1692_s6 + $0x54] sm:$0xf0]  ;;  %v1167_v15 = vld [vmem:[%s1692_s6] sm:$0xf] }
  0x6c   : > { %v1403_v12 = vld [vmem:[%s1692_s6 + $0x58] sm:$0xf0]  ;;  %v1236_v14 = vor.u32 %v1407_v8, %v1233_v9  ;;  %v1392_v17 = vld [vmem:[%s1692_s6 + $0x4] sm:$0xf]  ;;  %v1200_v18 = vor.u32 %v1399_v7, %v1197_v10  ;;  %v1169_v20 = vld [vmem:[%s1692_s6 + $0x1c] sm:$0xf0] }
  0x6d   : > { %734 = vmatpush.bf16.msra.mxu0 %v1252_v53  ;;  %772 = vmatpush.bf16.msra.mxu3 %v1292_v54  ;;  %v1395_v16 = vld [vmem:[%s1692_s6 + $0x18] sm:$0xf0]  ;;  %v1204_v19 = vor.u32 %v1403_v12, %v1203_v11  ;;  %v1400_v21 = vld [vmem:[%s1692_s6 + $0x44] sm:$0xf]  ;;  %v1205_v22 = vld [vmem:[%s1692_s6 + $0x5c] sm:$0xf0]  ;;  %v1172_v33 = vor.u32 %v1392_v17, %v1169_v20 }
  0x6e   : > { %747 = vmatpush.bf16.msra.mxu1 %v1256_v57  ;;  %760 = vmatpush.bf16.msra.mxu2 %v1260_v58  ;;  %v1175_v23 = vld [vmem:[%s1692_s6 + $0x8] sm:$0xf]  ;;  %v1396_v24 = vld [vmem:[%s1692_s6 + $0x20] sm:$0xf0]  ;;  %v1379_v25 = vld [vmem:[%s1692_s6 + $0x198] sm:$0xf]  ;;  %v1168_v29 = vor.u32 %v1395_v16, %v1167_v15  ;;  %v1208_v30 = vor.u32 %v1400_v21, %v1205_v22 }
  0x6f   : > { %v1446_v26 = vld [vmem:[%s1692_s6 + $0x1b0] sm:$0xf0]  ;;  %v1443_v27 = vld [vmem:[%s1692_s6 + $0x19c] sm:$0xf]  ;;  %v1381_v28 = vld [vmem:[%s1692_s6 + $0x1b4] sm:$0xf0]  ;;  %v1176_v34 = vor.u32 %v1396_v24, %v1175_v23 }
  0x70   : > { %v1387_v31 = vld [vmem:[%s1692_s6 + $0x1a0] sm:$0xf]  ;;  %v1447_v32 = vld [vmem:[%s1692_s6 + $0x1b8] sm:$0xf0]  ;;  %v1393_v35 = vld [vmem:[%s1692_s6 + $0xc] sm:$0xf]  ;;  %v1380_v37 = vor.u32 %v1446_v26, %v1379_v25  ;;  %v1384_v38 = vor.u32 %v1443_v27, %v1381_v28 }
  0x71   : > { %735 = vmatpush.bf16.msra.mxu0 %v1224_v1  ;;  %773 = vmatpush.bf16.msra.mxu3 %v1264_v2  ;;  %v1177_v36 = vld [vmem:[%s1692_s6 + $0x24] sm:$0xf0]  ;;  %v1351_v39 = vld [vmem:[%s1692_s6 + $0x160] sm:$0xf]  ;;  %v1388_v40 = vor.u32 %v1447_v32, %v1387_v31  ;;  %v1439_v41 = vld [vmem:[%s1692_s6 + $0x178] sm:$0xf0] }
  0x72   : > { %748 = vmatpush.bf16.msra.mxu1 %v1228_v5  ;;  %761 = vmatpush.bf16.msra.mxu2 %v1232_v6  ;;  %v1436_v42 = vld [vmem:[%s1692_s6 + $0x164] sm:$0xf]  ;;  %v1353_v43 = vld [vmem:[%s1692_s6 + $0x17c] sm:$0xf0]  ;;  %v1180_v44 = vor.u32 %v1393_v35, %v1177_v36  ;;  %v1359_v45 = vld [vmem:[%s1692_s6 + $0x168] sm:$0xf]  ;;  %v1352_v48 = vor.u32 %v1439_v41, %v1351_v39 }
  0x73   : > { %v1440_v46 = vld [vmem:[%s1692_s6 + $0x180] sm:$0xf0]  ;;  %v1773_v47 = vld [vmem:[%s1908_s0] sm:$0x1]  ;;  %v1356_v49 = vor.u32 %v1436_v42, %v1353_v43  ;;  %v1323_v50 = vld [vmem:[%s1692_s6 + $0x128] sm:$0xf] }
  0x74   : > { %v1360_v51 = vor.u32 %v1440_v46, %v1359_v45  ;;  %v1432_v52 = vld [vmem:[%s1692_s6 + $0x140] sm:$0xf0]  ;;  %v1429_v53 = vld [vmem:[%s1692_s6 + $0x12c] sm:$0xf]  ;;  %v1325_v54 = vld [vmem:[%s1692_s6 + $0x144] sm:$0xf0] }
  0x75   : > { %736 = vmatpush.bf16.msra.mxu0 %v1196_v13  ;;  %774 = vmatpush.bf16.msra.mxu3 %v1236_v14  ;;  %v1331_v55 = vld [vmem:[%s1692_s6 + $0x130] sm:$0xf]  ;;  %v1433_v56 = vld [vmem:[%s1692_s6 + $0x148] sm:$0xf0]  ;;  %v1324_v57 = vor.u32 %v1432_v52, %v1323_v50  ;;  %v1328_v58 = vor.u32 %v1429_v53, %v1325_v54  ;;  %v1422_v62 = vld [vmem:[%s1692_s6 + $0xf4] sm:$0xf] }
  0x76   : > { %749 = vmatpush.bf16.msra.mxu1 %v1200_v18  ;;  %762 = vmatpush.bf16.msra.mxu2 %v1204_v19  ;;  %v1295_v59 = vld [vmem:[%s1692_s6 + $0xf0] sm:$0xf]  ;;  %v1332_v60 = vor.u32 %v1433_v56, %v1331_v55  ;;  %v1425_v61 = vld [vmem:[%s1692_s6 + $0x108] sm:$0xf0]  ;;  %v1303_v0 = vld [vmem:[%s1692_s6 + $0xf8] sm:$0xf] }
  0x77   : > { %v1297_v63 = vld [vmem:[%s1692_s6 + $0x10c] sm:$0xf0]  ;;  %v1426_v1 = vld [vmem:[%s1692_s6 + $0x110] sm:$0xf0]  ;;  %v1296_v2 = vor.u32 %v1425_v61, %v1295_v59  ;;  %v1267_v4 = vld [vmem:[%s1692_s6 + $0xb8] sm:$0xf] }
  0x78   : > { %v1300_v3 = vor.u32 %v1422_v62, %v1297_v63  ;;  %v1304_v5 = vor.u32 %v1426_v1, %v1303_v0  ;;  %v1418_v6 = vld [vmem:[%s1692_s6 + $0xd0] sm:$0xf0]  ;;  %v1415_v7 = vld [vmem:[%s1692_s6 + $0xbc] sm:$0xf]  ;;  %v1269_v8 = vld [vmem:[%s1692_s6 + $0xd4] sm:$0xf0] }
  0x79   : > { %737 = vmatpush.bf16.msra.mxu0 %v1168_v29  ;;  %775 = vmatpush.bf16.msra.mxu3 %v1208_v30  ;;  %v1275_v9 = vld [vmem:[%s1692_s6 + $0xc0] sm:$0xf]  ;;  %v1419_v10 = vld [vmem:[%s1692_s6 + $0xd8] sm:$0xf0]  ;;  %v1268_v11 = vor.u32 %v1418_v6, %v1267_v4  ;;  %v1272_v12 = vor.u32 %v1415_v7, %v1269_v8  ;;  %v1408_v16 = vld [vmem:[%s1692_s6 + $0x84] sm:$0xf] }
  0x7a   : > { %750 = vmatpush.bf16.msra.mxu1 %v1172_v33  ;;  %763 = vmatpush.bf16.msra.mxu2 %v1176_v34  ;;  %v1239_v13 = vld [vmem:[%s1692_s6 + $0x80] sm:$0xf]  ;;  %v1276_v14 = vor.u32 %v1419_v10, %v1275_v9  ;;  %v1411_v15 = vld [vmem:[%s1692_s6 + $0x98] sm:$0xf0]  ;;  %v1247_v18 = vld [vmem:[%s1692_s6 + $0x88] sm:$0xf] }
  0x7b   : > { %v1241_v17 = vld [vmem:[%s1692_s6 + $0x9c] sm:$0xf0]  ;;  %v1412_v19 = vld [vmem:[%s1692_s6 + $0xa0] sm:$0xf0]  ;;  %v1240_v20 = vor.u32 %v1411_v15, %v1239_v13  ;;  %v1211_v22 = vld [vmem:[%s1692_s6 + $0x48] sm:$0xf] }
  0x7c   : > { %738 = vmatmul.bf16.vlgmr.msra.gmra.mxu0 %v1773_v47  ;;  %v1244_v21 = vor.u32 %v1408_v16, %v1241_v17  ;;  %v1248_v23 = vor.u32 %v1412_v19, %v1247_v18  ;;  %v1404_v24 = vld [vmem:[%s1692_s6 + $0x60] sm:$0xf0]  ;;  %v1401_v25 = vld [vmem:[%s1692_s6 + $0x4c] sm:$0xf]  ;;  %v1213_v26 = vld [vmem:[%s1692_s6 + $0x64] sm:$0xf0] }
  0x7d   : > { %782 = vmatpush.bf16.msrb.mxu0 %v1380_v37  ;;  %776 = vmatpush.bf16.msra.mxu3 %v1180_v44  ;;  %v1219_v27 = vld [vmem:[%s1692_s6 + $0x50] sm:$0xf]  ;;  %v1405_v28 = vld [vmem:[%s1692_s6 + $0x68] sm:$0xf0]  ;;  %v1212_v29 = vor.u32 %v1404_v24, %v1211_v22  ;;  %v1216_v30 = vor.u32 %v1401_v25, %v1213_v26  ;;  %v1394_v34 = vld [vmem:[%s1692_s6 + $0x14] sm:$0xf] }
  0x7e   : > { %795 = vmatpush.bf16.msrb.mxu1 %v1384_v38  ;;  %808 = vmatpush.bf16.msrb.mxu2 %v1388_v40  ;;  %v1183_v31 = vld [vmem:[%s1692_s6 + $0x10] sm:$0xf]  ;;  %v1220_v32 = vor.u32 %v1405_v28, %v1219_v27  ;;  %v1397_v33 = vld [vmem:[%s1692_s6 + $0x28] sm:$0xf0]  ;;  %v1191_v36 = vld [vmem:[%s1692_s6 + $0x18] sm:$0xf] }
  0x7f   : > { %764 = vmatmul.bf16.vlgmr.msra.gmra.mxu2 %v1773_v47  ;;  %751 = vmatmul.bf16.vlgmr.msra.gmra.mxu1 %v1773_v47  ;;  %v1185_v35 = vld [vmem:[%s1692_s6 + $0x2c] sm:$0xf0]  ;;  %v1398_v37 = vld [vmem:[%s1692_s6 + $0x30] sm:$0xf0]  ;;  %v1184_v38 = vor.u32 %v1397_v33, %v1183_v31  ;;  %vm844_vm0 = vcmask 1041408   ;;  %vm836_vm1 = vcmask 1040384  }
  0x80   : > { %777 = vmatmul.bf16.vlgmr.msra.gmra.mxu3 %v1773_v47  ;;  %v1188_v39 = vor.u32 %v1394_v34, %v1185_v35  ;;  %v1192_v40 = vor.u32 %v1398_v37, %v1191_v36  ;;  %vm840_vm2 = vcmask 1042434   ;;  %vm846_vm3 = vcmask 1044484   ;;  %s1917_s9 = smov (!%p363_p8, %s1846_s9), 48 }
  0x81   : > { %783 = vmatpush.bf16.msrb.mxu0 %v1352_v48  ;;  %vm850_vm4 = vcmask 1046534   ;;  %vm854_vm5 = vcmask 1045508   ;;  %vm856_vm6 = vcmask 1043456   ;;  %s365_s12 = scalar_lea.vmem %s1910_s2, %s1917_s9  ;;  %s370_s15 = scalar_lea.vmem %s1911_s3, %s1917_s9 }
  0x82   : > { %796 = vmatpush.bf16.msrb.mxu1 %v1356_v49  ;;  %809 = vmatpush.bf16.msrb.mxu2 %v1360_v51  ;;  %s375_s20 = scalar_lea.vmem %s1912_s4, %s1917_s9 }
  0x85   : > { %784 = vmatpush.bf16.msrb.mxu0 %v1324_v57 }
  0x86   : > { %797 = vmatpush.bf16.msrb.mxu1 %v1328_v58  ;;  %810 = vmatpush.bf16.msrb.mxu2 %v1332_v60 }
  0x89   : > { %785 = vmatpush.bf16.msrb.mxu0 %v1296_v2 }
  0x8a   : > { %798 = vmatpush.bf16.msrb.mxu1 %v1300_v3  ;;  %811 = vmatpush.bf16.msrb.mxu2 %v1304_v5 }
  0x8d   : > { %786 = vmatpush.bf16.msrb.mxu0 %v1268_v11 }
  0x8e   : > { %799 = vmatpush.bf16.msrb.mxu1 %v1272_v12  ;;  %812 = vmatpush.bf16.msrb.mxu2 %v1276_v14 }
  0x91   : > { %787 = vmatpush.bf16.msrb.mxu0 %v1240_v20 }
  0x92   : > { %800 = vmatpush.bf16.msrb.mxu1 %v1244_v21  ;;  %813 = vmatpush.bf16.msrb.mxu2 %v1248_v23 }
  0x95   : > { %788 = vmatpush.bf16.msrb.mxu0 %v1212_v29 }
  0x96   : > { %801 = vmatpush.bf16.msrb.mxu1 %v1216_v30  ;;  %814 = vmatpush.bf16.msrb.mxu2 %v1220_v32 }
  0x99   : > { %789 = vmatpush.bf16.msrb.mxu0 %v1184_v38 }
  0x9a   : > { %802 = vmatpush.bf16.msrb.mxu1 %v1188_v39  ;;  %815 = vmatpush.bf16.msrb.mxu2 %v1192_v40 }
  0x9c   : > { %790 = vmatmul.bf16.vlgmr.msrb.gmra.mxu0 %v1773_v47 }
  0x9d   : > { %803 = vmatmul.bf16.vlgmr.msrb.gmra.mxu1 %v1773_v47  ;;  %816 = vmatmul.bf16.vlgmr.msrb.gmra.mxu2 %v1773_v47 }
  0xf9   : > { %v739_v41 = vpop.f32.mrf.mxu0 }
  0xfa   : > { %v860_v43 = vsel %vm844_vm0, %v739_v41, 0.0  ;;  %v934_v44 = vmul.f32 %v739_v41, %v739_v41 }
  0xfb   : > { %v861_v49 = vrot.slane %v860_v43, 4 }
  0xfc   : > { %v752_v42 = vpop.f32.mrf.mxu1  ;;  %v941_v51 = vsel %vm844_vm0, %v934_v44, 0.0 }
  0xfd   : > { %v867_v45 = vsel %vm844_vm0, %v752_v42, 0.0  ;;  %v935_v46 = vmul.f32 %v752_v42, %v752_v42  ;;  %v862_v47 = vadd.f32 %v861_v49, %v860_v43  ;;  %v942_v56 = vrot.slane %v941_v51, 4 }
  0xfe   : > { %v868_v52 = vrot.slane %v867_v45, 4  ;;  %v821_v9 = vpack.c.bf16 %v752_v42, %v739_v41 }
  0xff   : > { %v948_v55 = vsel %vm844_vm0, %v935_v46, 0.0  ;;  %v863_v62 = vrot.slane %v862_v47, 2  ;;  %v943_v63 = vadd.f32 %v942_v56, %v941_v51 }
 0x100   : > { %v869_v57 = vadd.f32 %v868_v52, %v867_v45  ;;  %v949_v58 = vrot.slane %v948_v55, 4  ;;  %v829_v19 = vrot.slane %v821_v9, 3 }
 0x101   : > { %v741_v50 = vpop.f32.mrf.mxu0  ;;  %v864_v7 = vadd.f32 %v863_v62, %v862_v47  ;;  %v944_v8 = vrot.slane %v943_v63, 2 }
 0x102   : > { %v765_v48 = vpop.f32.mrf.mxu2  ;;  %v870_v0 = vrot.slane %v869_v57, 2  ;;  %v950_v2 = vadd.f32 %v949_v58, %v948_v55  ;;  %v1833_v29 = vsel %vm836_vm1, %v821_v9, %v829_v19 }
 0x103   : > { %v778_v53 = vpop.f32.mrf.mxu3  ;;  %v874_v59 = vsel %vm844_vm0, %v765_v48, 0.0  ;;  %v936_v60 = vmul.f32 %v765_v48, %v765_v48  ;;  %v865_v17 = vrot.slane %v864_v7, 1  ;;  %v1826_v18 = vadd.f32 %v944_v8, %v943_v63 }
 0x104   : > { %v754_v54 = vpop.f32.mrf.mxu1  ;;  %v875_v1 = vrot.slane %v874_v59, 4  ;;  %v937_v4 = vmul.f32 %v778_v53, %v778_v53  ;;  %v881_v6 = vsel %vm844_vm0, %v778_v53, 0.0  ;;  %v871_v10 = vadd.f32 %v870_v0, %v869_v57 }
 0x105   : > { %v955_v3 = vsel %vm844_vm0, %v936_v60, 0.0  ;;  %v951_v13 = vrot.slane %v950_v2, 2  ;;  %v822_v14 = vpack.c.bf16 %v778_v53, %v765_v48  ;;  %v882_v15 = vrot.slane %v881_v6, 4 }
 0x106   : > { %v876_v11 = vadd.f32 %v875_v1, %v874_v59  ;;  %v956_v12 = vrot.slane %v955_v3, 4  ;;  %v962_v16 = vsel %vm844_vm0, %v937_v4, 0.0  ;;  %v872_v20 = vrot.slane %v871_v10, 1 }
 0x107   : > { %v963_v23 = vrot.slane %v962_v16, 4  ;;  %v1828_v24 = vadd.f32 %v951_v13, %v950_v2  ;;  %v830_v25 = vrot.slane %v822_v14, 6  ;;  %v831_v26 = vrot.slane %v822_v14, 1 }
 0x108   : > { %v877_v21 = vrot.slane %v876_v11, 2  ;;  %v957_v22 = vadd.f32 %v956_v12, %v955_v3  ;;  %v883_v27 = vadd.f32 %v882_v15, %v881_v6  ;;  %v1830_v28 = vadd.f32 %v865_v17, %v864_v7 }
 0x109   : > { %v946_v30 = vrot.slane %v1826_v18, 1  ;;  %v964_v33 = vadd.f32 %v963_v23, %v962_v16  ;;  %v1838_v34 = vadd.f32 %v872_v20, %v871_v10  ;;  %v953_v35 = vrot.slane %v1828_v24, 1 }
 0x10a   : > { %v767_v61 = vpop.f32.mrf.mxu2  ;;  %v1836_v31 = vadd.f32 %v877_v21, %v876_v11  ;;  %v958_v32 = vrot.slane %v957_v22, 2  ;;  %v843_v36 = vsel %vm840_vm2, %v830_v25, %v831_v26  ;;  %v884_v37 = vrot.slane %v883_v27, 2 }
 0x10b   : > { %v780_v5 = vpop.f32.mrf.mxu3  ;;  %v965_v50 = vrot.slane %v964_v33, 2  ;;  %v845_v26 = vsel %vm844_vm0, %v1833_v29, %v843_v36 }
 0x10c   : > { %v879_v48 = vrot.slane %v1836_v31, 1  ;;  %v959_v49 = vadd.f32 %v958_v32, %v957_v22  ;;  %v885_v47 = vadd.f32 %v884_v37, %v883_v27 }
 0x10d   : > { %v966_v62 = vadd.f32 %v965_v50, %v964_v33 }
 0x10e   : > { %v960_v7 = vrot.slane %v959_v49, 1  ;;  %v886_v11 = vrot.slane %v885_v47, 1  ;;  %v880_v25 = vadd.f32 %v879_v48, %v1836_v31  ;;  %v916_v48 = vrot.slane %v1838_v34, 7 }
 0x10f   : > { %v967_v20 = vrot.slane %v966_v62, 1 }
 0x110   : > { %v887_v33 = vadd.f32 %v886_v11, %v885_v47  ;;  %v929_v47 = vlaneseq }
 0x112   : > { %vm931_vm7 = vcmp.lt.s32.totalorder %v929_v47, 896 }
 0x119   : > { %v791_v38 = vpop.f32.mrf.mxu0 }
 0x11a   : > { %v804_v39 = vpop.f32.mrf.mxu1  ;;  %v888_v40 = vsel %vm844_vm0, %v791_v38, 0.0  ;;  %v938_v41 = vmul.f32 %v791_v38, %v791_v38 }
 0x11b   : > { %v823_v42 = vpack.c.bf16 %v804_v39, %v791_v38  ;;  %v895_v43 = vsel %vm844_vm0, %v804_v39, 0.0  ;;  %v889_v44 = vrot.slane %v888_v40, 4  ;;  %v939_v46 = vmul.f32 %v804_v39, %v804_v39 }
 0x11c   : > { %v896_v45 = vrot.slane %v895_v43, 4  ;;  %v969_v51 = vsel %vm844_vm0, %v938_v41, 0.0 }
 0x11d   : > { %v890_v52 = vadd.f32 %v889_v44, %v888_v40  ;;  %v970_v53 = vrot.slane %v969_v51, 4  ;;  %v976_v55 = vsel %vm844_vm0, %v939_v46, 0.0  ;;  %v832_v56 = vrot.slane %v823_v42, 4 }
 0x11e   : > { %v897_v54 = vadd.f32 %v896_v45, %v895_v43  ;;  %v977_v57 = vrot.slane %v976_v55, 4  ;;  %v833_v60 = vrot.slane %v823_v42, 7  ;;  %v954_v40 = vadd.f32 %v953_v35, %v1828_v24 }
 0x11f   : > { %v891_v58 = vrot.slane %v890_v52, 2  ;;  %v971_v59 = vadd.f32 %v970_v53, %v969_v51  ;;  %v961_v42 = vadd.f32 %v960_v7, %v959_v49  ;;  %v968_v43 = vadd.f32 %v967_v20, %v966_v62 }
 0x120   : > { %v898_v61 = vrot.slane %v897_v54, 2  ;;  %v978_v63 = vadd.f32 %v977_v57, %v976_v55  ;;  %v817_v0 = vpop.f32.mrf.mxu2  ;;  %v849_v13 = vsel %vm846_vm3, %v832_v56, %v833_v60  ;;  %v947_v46 = vadd.f32 %v946_v30, %v1826_v18 }
 0x121   : > { %v892_v1 = vadd.f32 %v891_v58, %v890_v52  ;;  %v972_v2 = vrot.slane %v971_v59, 2  ;;  %v824_v4 = vpack.c.bf16 %v817_v0, %v817_v0  ;;  %v793_v5 = vpop.f32.mrf.mxu0  ;;  %v902_v9 = vsel %vm844_vm0, %v817_v0, 0.0 }
 0x122   : > { %v899_v3 = vadd.f32 %v898_v61, %v897_v54  ;;  %v806_v6 = vpop.f32.mrf.mxu1  ;;  %v979_v8 = vrot.slane %v978_v63, 2  ;;  %v940_v10 = vmul.f32 %v817_v0, %v817_v0  ;;  %v903_v17 = vrot.slane %v902_v9, 4 }
 0x123   : > { %v973_v12 = vadd.f32 %v972_v2, %v971_v59  ;;  %v834_v14 = vrot.slane %v824_v4, 2  ;;  %v835_v16 = vrot.slane %v824_v4, 5  ;;  %v893_v21 = vrot.slane %v892_v1, 1 }
 0x124   : > { %v980_v15 = vadd.f32 %v979_v8, %v978_v63  ;;  %v983_v19 = vsel %vm844_vm0, %v940_v10, 0.0  ;;  %v900_v22 = vrot.slane %v899_v3, 1  ;;  %v904_v32 = vadd.f32 %v903_v17, %v902_v9 }
 0x125   : > { %v984_v23 = vrot.slane %v983_v19, 4  ;;  %v853_v27 = vsel %vm850_vm4, %v834_v14, %v835_v16  ;;  %v974_v37 = vrot.slane %v973_v12, 1  ;;  %v894_v44 = vadd.f32 %v893_v21, %v892_v1 }
 0x126   : > { %v981_v38 = vrot.slane %v980_v15, 1  ;;  %v855_v39 = vsel %vm854_vm5, %v849_v13, %v853_v27  ;;  %v905_v41 = vrot.slane %v904_v32, 2  ;;  %v901_v45 = vadd.f32 %v900_v22, %v899_v3 }
 0x127   : > { %v857_v31 = vsel %vm856_vm6, %v845_v26, %v855_v39  ;;  %v985_v29 = vadd.f32 %v984_v23, %v983_v19  ;;  %v917_v52 = vrot.slane %v880_v25, 6  ;;  %v918_v24 = vrot.slane %v887_v33, 5 }
 0x128   : > { %v819_v36 = vpop.f32.mrf.mxu2  ;;  %859 = vst [vmem:[%s365_s12] sm:$0x7f] %v857_v31  ;;  %v906_v50 = vadd.f32 %v905_v41, %v904_v32  ;;  %v975_v35 = vadd.f32 %v974_v37, %v973_v12  ;;  %v982_v53 = vadd.f32 %v981_v38, %v980_v15  ;;  %v997_v54 = vrot.slane %v954_v40, 7 }
 0x129   : > { %v986_v51 = vrot.slane %v985_v29, 2  ;;  %v998_v56 = vrot.slane %v961_v42, 6  ;;  %v999_v57 = vrot.slane %v968_v43, 5  ;;  %v919_v58 = vrot.slane %v894_v44, 4 }
 0x12a   : > { %v907_v55 = vrot.slane %v906_v50, 1  ;;  %v920_v59 = vrot.slane %v901_v45, 3  ;;  %v922_v18 = vsel %vm836_vm1, %v1830_v28, %v916_v48  ;;  %v923_v30 = vsel %vm840_vm2, %v917_v52, %v918_v24 }
 0x12b   : > { %v987_v49 = vadd.f32 %v986_v51, %v985_v29  ;;  %v1000_v34 = vrot.slane %v975_v35, 4  ;;  %v1001_v62 = vrot.slane %v982_v53, 3  ;;  %v1003_v1 = vsel %vm836_vm1, %v947_v46, %v997_v54 }
 0x12c   : > { %v908_v60 = vadd.f32 %v907_v55, %v906_v50  ;;  %v1004_v2 = vsel %vm840_vm2, %v998_v56, %v999_v57  ;;  %v925_v3 = vsel %vm846_vm3, %v919_v58, %v920_v59  ;;  %v924_v4 = vsel %vm844_vm0, %v922_v18, %v923_v30 }
 0x12d   : > { %v988_v61 = vrot.slane %v987_v49, 1  ;;  %v1006_v6 = vsel %vm846_vm3, %v1000_v34, %v1001_v62  ;;  %v1005_v8 = vsel %vm844_vm0, %v1003_v1, %v1004_v2 }
 0x12e   : > { %v921_v63 = vrot.slane %v908_v60, 2 }
 0x12f   : > { %v989_v0 = vadd.f32 %v988_v61, %v987_v49 }
 0x130   : > { %v926_v28 = vsel %vm854_vm5, %v925_v3, %v921_v63 }
 0x131   : > { %v1002_v5 = vrot.slane %v989_v0, 2  ;;  %v927_v7 = vsel %vm856_vm6, %v924_v4, %v926_v28 }
 0x132   : > { %933 = vst.msk [vmem:[%s370_s15] sm:$0x7f] %vm931_vm7, %v927_v7 }
 0x133   : > { %v1007_v9 = vsel %vm854_vm5, %v1006_v6, %v1002_v5 }
 0x134   : > { %v1008_v10 = vsel %vm856_vm6, %v1005_v8, %v1007_v9 }
 0x135   : > { %1010 = vst.msk [vmem:[%s375_s20] sm:$0x7f] %vm931_vm7, %v1008_v10 }
 0x136 PF: > { %p12_p9 = scmp.ge.s32.totalorder %s1540_s19, 9   ;;  %s1913_s15 = smov %s1492_s16 }
 0x137   : > { %s1914_s16 = smov %s1549_s22  ;;  %s1915_s17 = smov %s1540_s19 }
 0x138   :  { %14 = sbr.rel (!%p12_p9) target bundleno = 2 (0x2), region = 119 }

// kernel: dc_generator_forward.5
= control target key start
LH: loop header
LB: loop body
LE: loop exit
PB: predicated region body
PF: predicated region fallthrough
CT: control target
= control target key end

     0   :  { %s2695_s15 = smov 0   ;;  %s2697_s16 = smov 0   ;;  %s3387_s0 = inlined_call_operand.vmem [shape: bf16[2,98,768], index: 0, kind: input, shape index: {}]   ;;  %s3388_s1 = inlined_call_operand.vmem [shape: bf16[2,768,256], index: 1, kind: input, shape index: {}]   ;;  %s3389_s2 = inlined_call_operand.vmem [shape: bf16[2,98,256], index: 2, kind: output, shape index: {0}]   ;;  %s3390_s3 = inlined_call_operand.vmem [shape: f32[2,1,256], index: 3, kind: output, shape index: {1}]   ;;  %s3391_s4 = inlined_call_operand.vmem [shape: f32[2,1,256], index: 4, kind: output, shape index: {2}]  }
   0x1   :  { %s2699_s17 = smov 0  }
   0x2 LB: > { %s27_s18 = sadd.s32 1, %s2663_s16  ;;  %p1949_p0 = scmp.ge.s32.totalorder %s2667_s17, 1  ;;  %s2667_s17 = sphi %s2699_s17, %s15_s17   ;;  %s2663_s16 = sphi %s2697_s16, %s3395_s16   ;;  %s2659_s15 = sphi %s2695_s15, %s3394_s15  }
   0x3   : > { %p29_p1 = scmp.ge.s32.totalorder %s27_s18, 2  ;;  %p199_p2 = scmp.lt.s32.totalorder %s2667_s17, 3 }
   0x5   : > { %s3397_s18 = smov (%p29_p1, %s27_s18), 0  ;;  %p200_p3 = pnand %p1949_p0, %p199_p2 }
   0x6   : > { %p249_p4 = scmp.lt.s32.totalorder (!%p200_p3), %s2659_s15, 1 }
   0x7   : > { %203 = sbr.rel (%p200_p3) target bundleno = 531 (0x213), region = 28 }
   0xc   : > { %s3399_s15 = smov (!%p249_p4, %s2659_s15), 1  ;;  %vm1663_vm0 = vcmask 1041408   ;;  %vm1694_vm2 = vcmask 1040384  }
   0xd   : > { %s2618_s19 = smul.u32 768, %s3399_s15  ;;  %s1953_s5 = sshll.u32 %s3399_s15, 1 }
   0xe   : > { %s2617_s23 = smul.u32 312, %s3399_s15  ;;  %s3336_s8 = scalar_lea.vmem %s3390_s3, %s1953_s5 }
   0xf   : > { %s2719_s22 = scalar_lea.vmem %s3388_s1, %s2618_s19  ;;  %s2619_s27 = smul.u32 104, %s3399_s15 }
  0x10   : > { %v2157_v0 = vld [vmem:[%s2719_s22 + $0x70] sm:$0xf]  ;;  %v2536_v1 = vld [vmem:[%s2719_s22 + $0x74] sm:$0xf0]  ;;  %v2149_v11 = vld [vmem:[%s2719_s22 + $0x60] sm:$0xf]  ;;  %s2782_s26 = scalar_lea.vmem %s3387_s0, %s2617_s23  ;;  %s3341_s11 = scalar_lea.vmem %s3391_s4, %s1953_s5 }
  0x11   : > { %v2221_v2 = vld [vmem:[%s2719_s22 + $0xf0] sm:$0xf]  ;;  %v2158_v3 = vor.u32 %v2536_v1, %v2157_v0  ;;  %v2552_v4 = vld [vmem:[%s2719_s22 + $0xf4] sm:$0xf0]  ;;  %v2534_v13 = vld [vmem:[%s2719_s22 + $0x64] sm:$0xf0]  ;;  %s3304_s30 = scalar_lea.vmem %s3389_s2, %s2619_s27 }
  0x12   : > { %v2285_v5 = vld [vmem:[%s2719_s22 + $0x170] sm:$0xf]  ;;  %v2568_v6 = vld [vmem:[%s2719_s22 + $0x174] sm:$0xf0]  ;;  %v2222_v7 = vor.u32 %v2552_v4, %v2221_v2  ;;  %v2213_v14 = vld [vmem:[%s2719_s22 + $0xe0] sm:$0xf]  ;;  %v2150_v16 = vor.u32 %v2534_v13, %v2149_v11 }
  0x13   : > { %v2286_v8 = vor.u32 %v2568_v6, %v2285_v5  ;;  %v2349_v9 = vld [vmem:[%s2719_s22 + $0x1f0] sm:$0xf]  ;;  %v2584_v10 = vld [vmem:[%s2719_s22 + $0x1f4] sm:$0xf0]  ;;  %1099 = vmatpush.bf16.msra.mxu0 %v2158_v3  ;;  %v2550_v15 = vld [vmem:[%s2719_s22 + $0xe4] sm:$0xf0] }
  0x14   : > { %v2350_v12 = vor.u32 %v2584_v10, %v2349_v9  ;;  %1142 = vmatpush.bf16.msra.mxu1 %v2222_v7  ;;  %v2214_v17 = vor.u32 %v2550_v15, %v2213_v14  ;;  %v2277_v18 = vld [vmem:[%s2719_s22 + $0x160] sm:$0xf]  ;;  %v2566_v19 = vld [vmem:[%s2719_s22 + $0x164] sm:$0xf0]  ;;  %v2141_v23 = vld [vmem:[%s2719_s22 + $0x50] sm:$0xf] }
  0x15   : > { %1185 = vmatpush.bf16.msra.mxu2 %v2286_v8  ;;  %v2341_v20 = vld [vmem:[%s2719_s22 + $0x1e0] sm:$0xf]  ;;  %v2278_v21 = vor.u32 %v2566_v19, %v2277_v18  ;;  %v2582_v22 = vld [vmem:[%s2719_s22 + $0x1e4] sm:$0xf0]  ;;  %v2532_v24 = vld [vmem:[%s2719_s22 + $0x54] sm:$0xf0] }
  0x16   : > { %1228 = vmatpush.bf16.msra.mxu3 %v2350_v12  ;;  %v2342_v25 = vor.u32 %v2582_v22, %v2341_v20  ;;  %v2205_v26 = vld [vmem:[%s2719_s22 + $0xd0] sm:$0xf]  ;;  %v2548_v27 = vld [vmem:[%s2719_s22 + $0xd4] sm:$0xf0]  ;;  %v2142_v29 = vor.u32 %v2532_v24, %v2141_v23  ;;  %v2133_v35 = vld [vmem:[%s2719_s22 + $0x40] sm:$0xf] }
  0x17   : > { %v2269_v28 = vld [vmem:[%s2719_s22 + $0x150] sm:$0xf]  ;;  %1100 = vmatpush.bf16.msra.mxu0 %v2150_v16  ;;  %v2564_v30 = vld [vmem:[%s2719_s22 + $0x154] sm:$0xf0]  ;;  %v2206_v33 = vor.u32 %v2548_v27, %v2205_v26  ;;  %v2530_v36 = vld [vmem:[%s2719_s22 + $0x44] sm:$0xf0] }
  0x18   : > { %v2333_v31 = vld [vmem:[%s2719_s22 + $0x1d0] sm:$0xf]  ;;  %v2580_v32 = vld [vmem:[%s2719_s22 + $0x1d4] sm:$0xf0]  ;;  %1143 = vmatpush.bf16.msra.mxu1 %v2214_v17  ;;  %v2270_v34 = vor.u32 %v2564_v30, %v2269_v28  ;;  %v2197_v37 = vld [vmem:[%s2719_s22 + $0xc0] sm:$0xf]  ;;  %v2134_v44 = vor.u32 %v2530_v36, %v2133_v35 }
  0x19   : > { %1186 = vmatpush.bf16.msra.mxu2 %v2278_v21  ;;  %v2334_v38 = vor.u32 %v2580_v32, %v2333_v31  ;;  %v2546_v39 = vld [vmem:[%s2719_s22 + $0xc4] sm:$0xf0]  ;;  %v2261_v40 = vld [vmem:[%s2719_s22 + $0x140] sm:$0xf]  ;;  %v2125_v47 = vld [vmem:[%s2719_s22 + $0x30] sm:$0xf] }
  0x1a   : > { %1229 = vmatpush.bf16.msra.mxu3 %v2342_v25  ;;  %v2562_v41 = vld [vmem:[%s2719_s22 + $0x144] sm:$0xf0]  ;;  %v2325_v42 = vld [vmem:[%s2719_s22 + $0x1c0] sm:$0xf]  ;;  %v2198_v45 = vor.u32 %v2546_v39, %v2197_v37  ;;  %v2528_v48 = vld [vmem:[%s2719_s22 + $0x34] sm:$0xf0] }
  0x1b   : > { %v2578_v43 = vld [vmem:[%s2719_s22 + $0x1c4] sm:$0xf0]  ;;  %1101 = vmatpush.bf16.msra.mxu0 %v2142_v29  ;;  %v2262_v46 = vor.u32 %v2562_v41, %v2261_v40  ;;  %v2189_v49 = vld [vmem:[%s2719_s22 + $0xb0] sm:$0xf]  ;;  %v2544_v51 = vld [vmem:[%s2719_s22 + $0xb4] sm:$0xf0]  ;;  %v2126_v56 = vor.u32 %v2528_v48, %v2125_v47 }
  0x1c   : > { %1144 = vmatpush.bf16.msra.mxu1 %v2206_v33  ;;  %v2326_v50 = vor.u32 %v2578_v43, %v2325_v42  ;;  %v2253_v52 = vld [vmem:[%s2719_s22 + $0x130] sm:$0xf]  ;;  %v2560_v53 = vld [vmem:[%s2719_s22 + $0x134] sm:$0xf0]  ;;  %v2190_v57 = vor.u32 %v2544_v51, %v2189_v49  ;;  %v2117_v59 = vld [vmem:[%s2719_s22 + $0x20] sm:$0xf] }
  0x1d   : > { %1187 = vmatpush.bf16.msra.mxu2 %v2270_v34  ;;  %v2317_v54 = vld [vmem:[%s2719_s22 + $0x1b0] sm:$0xf]  ;;  %v2576_v55 = vld [vmem:[%s2719_s22 + $0x1b4] sm:$0xf0]  ;;  %v2254_v58 = vor.u32 %v2560_v53, %v2253_v52  ;;  %v2526_v60 = vld [vmem:[%s2719_s22 + $0x24] sm:$0xf0] }
  0x1e   : > { %1230 = vmatpush.bf16.msra.mxu3 %v2334_v38  ;;  %v2181_v61 = vld [vmem:[%s2719_s22 + $0xa0] sm:$0xf]  ;;  %v2318_v62 = vor.u32 %v2576_v55, %v2317_v54  ;;  %v2542_v63 = vld [vmem:[%s2719_s22 + $0xa4] sm:$0xf0]  ;;  %v2118_v4 = vor.u32 %v2526_v60, %v2117_v59  ;;  %v2109_v7 = vld [vmem:[%s2719_s22 + $0x10] sm:$0xf] }
  0x1f   : > { %1102 = vmatpush.bf16.msra.mxu0 %v2134_v44  ;;  %v2245_v0 = vld [vmem:[%s2719_s22 + $0x120] sm:$0xf]  ;;  %v2558_v1 = vld [vmem:[%s2719_s22 + $0x124] sm:$0xf0]  ;;  %v2182_v5 = vor.u32 %v2542_v63, %v2181_v61  ;;  %v2524_v8 = vld [vmem:[%s2719_s22 + $0x14] sm:$0xf0] }
  0x20   : > { %1145 = vmatpush.bf16.msra.mxu1 %v2198_v45  ;;  %v2309_v2 = vld [vmem:[%s2719_s22 + $0x1a0] sm:$0xf]  ;;  %v2574_v3 = vld [vmem:[%s2719_s22 + $0x1a4] sm:$0xf0]  ;;  %v2246_v6 = vor.u32 %v2558_v1, %v2245_v0  ;;  %v2173_v9 = vld [vmem:[%s2719_s22 + $0x90] sm:$0xf]  ;;  %v2110_v17 = vor.u32 %v2524_v8, %v2109_v7 }
  0x21   : > { %1188 = vmatpush.bf16.msra.mxu2 %v2262_v46  ;;  %v2310_v10 = vor.u32 %v2574_v3, %v2309_v2  ;;  %v2540_v11 = vld [vmem:[%s2719_s22 + $0x94] sm:$0xf0]  ;;  %v2237_v12 = vld [vmem:[%s2719_s22 + $0x110] sm:$0xf]  ;;  %v2101_v16 = vld [vmem:[%s2719_s22] sm:$0xf] }
  0x22   : > { %1231 = vmatpush.bf16.msra.mxu3 %v2326_v50  ;;  %v2556_v13 = vld [vmem:[%s2719_s22 + $0x114] sm:$0xf0]  ;;  %v2301_v14 = vld [vmem:[%s2719_s22 + $0x190] sm:$0xf]  ;;  %v2522_v18 = vld [vmem:[%s2719_s22 + $0x4] sm:$0xf0]  ;;  %v2174_v21 = vor.u32 %v2540_v11, %v2173_v9 }
  0x23   : > { %1103 = vmatpush.bf16.msra.mxu0 %v2126_v56  ;;  %v2572_v15 = vld [vmem:[%s2719_s22 + $0x194] sm:$0xf0]  ;;  %v2165_v19 = vld [vmem:[%s2719_s22 + $0x80] sm:$0xf]  ;;  %v2538_v20 = vld [vmem:[%s2719_s22 + $0x84] sm:$0xf0]  ;;  %v2238_v22 = vor.u32 %v2556_v13, %v2237_v12  ;;  %v2102_v34 = vor.u32 %v2522_v18, %v2101_v16 }
  0x24   : > { %1146 = vmatpush.bf16.msra.mxu1 %v2190_v57  ;;  %v2229_v23 = vld [vmem:[%s2719_s22 + $0x100] sm:$0xf]  ;;  %v2554_v24 = vld [vmem:[%s2719_s22 + $0x104] sm:$0xf0]  ;;  %v2302_v26 = vor.u32 %v2572_v15, %v2301_v14  ;;  %v2488_v29 = vld [vmem:[%s2782_s26 + $0x14] sm:$0xf0]  ;;  %v2166_v38 = vor.u32 %v2538_v20, %v2165_v19 }
  0x25   : > { %1189 = vmatpush.bf16.msra.mxu2 %v2254_v58  ;;  %v2293_v25 = vld [vmem:[%s2719_s22 + $0x180] sm:$0xf]  ;;  %v2570_v27 = vld [vmem:[%s2719_s22 + $0x184] sm:$0xf0]  ;;  %v2485_v30 = vld [vmem:[%s2782_s26 + $0x4] sm:$0xf]  ;;  %v2230_v39 = vor.u32 %v2554_v24, %v2229_v23 }
  0x26   : > { %1232 = vmatpush.bf16.msra.mxu3 %v2318_v62  ;;  %v1957_v28 = vld [vmem:[%s2782_s26] sm:$0xf]  ;;  %v1959_v31 = vld [vmem:[%s2782_s26 + $0x18] sm:$0xf0]  ;;  %v2535_v32 = vld [vmem:[%s2719_s22 + $0x74] sm:$0xf]  ;;  %v2294_v43 = vor.u32 %v2570_v27, %v2293_v25 }
  0x27   : > { %1104 = vmatpush.bf16.msra.mxu0 %v2118_v4  ;;  %v2159_v33 = vld [vmem:[%s2719_s22 + $0x78] sm:$0xf0]  ;;  %v1965_v35 = vld [vmem:[%s2782_s26 + $0x8] sm:$0xf]  ;;  %v2551_v36 = vld [vmem:[%s2719_s22 + $0xf4] sm:$0xf]  ;;  %v2806_v48 = vor.u32 %v2488_v29, %v1957_v28  ;;  %v2811_v53 = vor.u32 %v2485_v30, %v1959_v31 }
  0x28   : > { %1147 = vmatpush.bf16.msra.mxu1 %v2182_v5  ;;  %v2223_v37 = vld [vmem:[%s2719_s22 + $0xf8] sm:$0xf0]  ;;  %v2489_v40 = vld [vmem:[%s2782_s26 + $0x1c] sm:$0xf0]  ;;  %v2486_v41 = vld [vmem:[%s2782_s26 + $0xc] sm:$0xf]  ;;  %v2162_v44 = vor.u32 %v2535_v32, %v2159_v33 }
  0x29   : > { %1190 = vmatpush.bf16.msra.mxu2 %v2246_v6  ;;  %v1967_v42 = vld [vmem:[%s2782_s26 + $0x20] sm:$0xf0]  ;;  %v2413_v45 = vld [vmem:[%s2719_s22 + $0x270] sm:$0xf]  ;;  %v2600_v46 = vld [vmem:[%s2719_s22 + $0x274] sm:$0xf0]  ;;  %v2226_v49 = vor.u32 %v2551_v36, %v2223_v37  ;;  %v2813_v54 = vor.u32 %v2489_v40, %v1965_v35 }
  0x2a   : > { %1233 = vmatpush.bf16.msra.mxu3 %v2310_v10  ;;  %v2477_v47 = vld [vmem:[%s2719_s22 + $0x2f0] sm:$0xf]  ;;  %v2616_v50 = vld [vmem:[%s2719_s22 + $0x2f4] sm:$0xf0]  ;;  %v2533_v51 = vld [vmem:[%s2719_s22 + $0x64] sm:$0xf]  ;;  %v2817_v57 = vor.u32 %v2486_v41, %v1967_v42  ;;  %v2414_v58 = vor.u32 %v2600_v46, %v2413_v45 }
  0x2b   : > { %1105 = vmatpush.bf16.msra.mxu0 %v2110_v17  ;;  %v2151_v52 = vld [vmem:[%s2719_s22 + $0x68] sm:$0xf0]  ;;  %v2549_v55 = vld [vmem:[%s2719_s22 + $0xe4] sm:$0xf]  ;;  %v2478_v59 = vor.u32 %v2616_v50, %v2477_v47  ;;  %v2405_v61 = vld [vmem:[%s2719_s22 + $0x260] sm:$0xf] }
  0x2c   : > { %1148 = vmatpush.bf16.msra.mxu1 %v2174_v21  ;;  %v2215_v56 = vld [vmem:[%s2719_s22 + $0xe8] sm:$0xf0]  ;;  %v2154_v60 = vor.u32 %v2533_v51, %v2151_v52  ;;  %v2598_v62 = vld [vmem:[%s2719_s22 + $0x264] sm:$0xf0]  ;;  %v2469_v63 = vld [vmem:[%s2719_s22 + $0x2e0] sm:$0xf] }
  0x2d   : > { %1191 = vmatpush.bf16.msra.mxu2 %v2238_v22  ;;  %v2218_v0 = vor.u32 %v2549_v55, %v2215_v56  ;;  %v2614_v1 = vld [vmem:[%s2719_s22 + $0x2e4] sm:$0xf0]  ;;  %v2531_v2 = vld [vmem:[%s2719_s22 + $0x54] sm:$0xf]  ;;  %v2143_v3 = vld [vmem:[%s2719_s22 + $0x58] sm:$0xf0]  ;;  %v2406_v6 = vor.u32 %v2598_v62, %v2405_v61 }
  0x2e   : > { %1234 = vmatpush.bf16.msra.mxu3 %v2302_v26  ;;  %v2547_v4 = vld [vmem:[%s2719_s22 + $0xd4] sm:$0xf]  ;;  %v2207_v5 = vld [vmem:[%s2719_s22 + $0xd8] sm:$0xf0]  ;;  %v2470_v7 = vor.u32 %v2614_v1, %v2469_v63  ;;  %v2146_v8 = vor.u32 %v2531_v2, %v2143_v3  ;;  %v2397_v9 = vld [vmem:[%s2719_s22 + $0x250] sm:$0xf] }
  0x2f   : > { %1106 = vmatpush.bf16.msra.mxu0 %v2102_v34  ;;  %v2596_v10 = vld [vmem:[%s2719_s22 + $0x254] sm:$0xf0]  ;;  %v2461_v11 = vld [vmem:[%s2719_s22 + $0x2d0] sm:$0xf]  ;;  %v2210_v12 = vor.u32 %v2547_v4, %v2207_v5  ;;  %v2529_v14 = vld [vmem:[%s2719_s22 + $0x44] sm:$0xf] }
  0x30   : > { %1149 = vmatpush.bf16.msra.mxu1 %v2166_v38  ;;  %v2612_v13 = vld [vmem:[%s2719_s22 + $0x2d4] sm:$0xf0]  ;;  %v2135_v15 = vld [vmem:[%s2719_s22 + $0x48] sm:$0xf0]  ;;  %v2545_v16 = vld [vmem:[%s2719_s22 + $0xc4] sm:$0xf]  ;;  %v2398_v18 = vor.u32 %v2596_v10, %v2397_v9 }
  0x31   : > { %1192 = vmatpush.bf16.msra.mxu2 %v2230_v39  ;;  %v2199_v17 = vld [vmem:[%s2719_s22 + $0xc8] sm:$0xf0]  ;;  %v2462_v19 = vor.u32 %v2612_v13, %v2461_v11  ;;  %v2138_v20 = vor.u32 %v2529_v14, %v2135_v15  ;;  %v2389_v21 = vld [vmem:[%s2719_s22 + $0x240] sm:$0xf]  ;;  %v2594_v22 = vld [vmem:[%s2719_s22 + $0x244] sm:$0xf0] }
  0x32   : > { %1235 = vmatpush.bf16.msra.mxu3 %v2294_v43  ;;  %1107 = vmatmul.bf16.vlgmr.msra.gmra.mxu0 %v2806_v48  ;;  %v2202_v23 = vor.u32 %v2545_v16, %v2199_v17  ;;  %v2453_v24 = vld [vmem:[%s2719_s22 + $0x2c0] sm:$0xf]  ;;  %v2610_v25 = vld [vmem:[%s2719_s22 + $0x2c4] sm:$0xf0]  ;;  %v1981_v26 = vld [vmem:[%s2782_s26 + $0x30] sm:$0xf]  ;;  %v2390_v32 = vor.u32 %v2594_v22, %v2389_v21 }
  0x33   : > { %1150 = vmatmul.bf16.vlgmr.msra.gmra.mxu1 %v2811_v53  ;;  %1271 = vmatpush.bf16.msrb.mxu0 %v2414_v58  ;;  %v2494_v27 = vld [vmem:[%s2782_s26 + $0x44] sm:$0xf0]  ;;  %v2491_v28 = vld [vmem:[%s2782_s26 + $0x34] sm:$0xf]  ;;  %v1983_v29 = vld [vmem:[%s2782_s26 + $0x48] sm:$0xf0]  ;;  %v2454_v35 = vor.u32 %v2610_v25, %v2453_v24 }
  0x34   : > { %1193 = vmatmul.bf16.vlgmr.msra.gmra.mxu2 %v2813_v54  ;;  %1314 = vmatpush.bf16.msrb.mxu1 %v2478_v59  ;;  %v1989_v30 = vld [vmem:[%s2782_s26 + $0x38] sm:$0xf]  ;;  %v2495_v31 = vld [vmem:[%s2782_s26 + $0x4c] sm:$0xf0]  ;;  %v2492_v33 = vld [vmem:[%s2782_s26 + $0x3c] sm:$0xf]  ;;  %v2851_v36 = vor.u32 %v2494_v27, %v1981_v26  ;;  %v2853_v37 = vor.u32 %v2491_v28, %v1983_v29 }
  0x35   : > { %1357 = vmatpush.bf16.msrb.mxu2 %v2162_v44  ;;  %1236 = vmatmul.bf16.vlgmr.msra.gmra.mxu3 %v2817_v57  ;;  %v1991_v34 = vld [vmem:[%s2782_s26 + $0x50] sm:$0xf0]  ;;  %v2855_v38 = vor.u32 %v2495_v31, %v1989_v30  ;;  %v2127_v41 = vld [vmem:[%s2719_s22 + $0x38] sm:$0xf0]  ;;  %v2381_v42 = vld [vmem:[%s2719_s22 + $0x230] sm:$0xf] }
  0x36   : > { %1400 = vmatpush.bf16.msrb.mxu3 %v2226_v49  ;;  %v2857_v39 = vor.u32 %v2492_v33, %v1991_v34  ;;  %v2527_v40 = vld [vmem:[%s2719_s22 + $0x34] sm:$0xf]  ;;  %v2592_v44 = vld [vmem:[%s2719_s22 + $0x234] sm:$0xf0]  ;;  %v2191_v46 = vld [vmem:[%s2719_s22 + $0xb8] sm:$0xf0] }
  0x37   : > { %1272 = vmatpush.bf16.msrb.mxu0 %v2406_v6  ;;  %v2130_v43 = vor.u32 %v2527_v40, %v2127_v41  ;;  %v2543_v45 = vld [vmem:[%s2719_s22 + $0xb4] sm:$0xf]  ;;  %v2382_v47 = vor.u32 %v2592_v44, %v2381_v42  ;;  %v2445_v50 = vld [vmem:[%s2719_s22 + $0x2b0] sm:$0xf]  ;;  %v2608_v51 = vld [vmem:[%s2719_s22 + $0x2b4] sm:$0xf0] }
  0x38   : > { %1315 = vmatpush.bf16.msrb.mxu1 %v2470_v7  ;;  %v2194_v49 = vor.u32 %v2543_v45, %v2191_v46  ;;  %v2446_v52 = vor.u32 %v2608_v51, %v2445_v50  ;;  %v2005_v55 = vld [vmem:[%s2782_s26 + $0x60] sm:$0xf]  ;;  %v2500_v56 = vld [vmem:[%s2782_s26 + $0x74] sm:$0xf0]  ;;  %v2497_v58 = vld [vmem:[%s2782_s26 + $0x64] sm:$0xf] }
  0x39   : > { %1358 = vmatpush.bf16.msrb.mxu2 %v2154_v60  ;;  %v2007_v59 = vld [vmem:[%s2782_s26 + $0x78] sm:$0xf0]  ;;  %v2013_v60 = vld [vmem:[%s2782_s26 + $0x68] sm:$0xf]  ;;  %v2501_v61 = vld [vmem:[%s2782_s26 + $0x7c] sm:$0xf0] }
  0x3a   : > { %1401 = vmatpush.bf16.msrb.mxu3 %v2218_v0  ;;  %v2498_v62 = vld [vmem:[%s2782_s26 + $0x6c] sm:$0xf]  ;;  %v2015_v63 = vld [vmem:[%s2782_s26 + $0x80] sm:$0xf0]  ;;  %v2879_v0 = vor.u32 %v2500_v56, %v2005_v55  ;;  %v2881_v1 = vor.u32 %v2497_v58, %v2007_v59  ;;  %v2883_v2 = vor.u32 %v2501_v61, %v2013_v60  ;;  %v2373_v6 = vld [vmem:[%s2719_s22 + $0x220] sm:$0xf] }
  0x3b   : > { %1273 = vmatpush.bf16.msrb.mxu0 %v2398_v18  ;;  %v2885_v3 = vor.u32 %v2498_v62, %v2015_v63  ;;  %v2525_v4 = vld [vmem:[%s2719_s22 + $0x24] sm:$0xf]  ;;  %v2119_v5 = vld [vmem:[%s2719_s22 + $0x28] sm:$0xf0]  ;;  %v2437_v13 = vld [vmem:[%s2719_s22 + $0x2a0] sm:$0xf] }
  0x3c   : > { %1316 = vmatpush.bf16.msrb.mxu1 %v2462_v19  ;;  %v2122_v7 = vor.u32 %v2525_v4, %v2119_v5  ;;  %v2541_v9 = vld [vmem:[%s2719_s22 + $0xa4] sm:$0xf]  ;;  %v2183_v10 = vld [vmem:[%s2719_s22 + $0xa8] sm:$0xf0]  ;;  %v2606_v14 = vld [vmem:[%s2719_s22 + $0x2a4] sm:$0xf0] }
  0x3d   : > { %1359 = vmatpush.bf16.msrb.mxu2 %v2146_v8  ;;  %v2590_v8 = vld [vmem:[%s2719_s22 + $0x224] sm:$0xf0]  ;;  %v2438_v15 = vor.u32 %v2606_v14, %v2437_v13  ;;  %v2029_v16 = vld [vmem:[%s2782_s26 + $0x90] sm:$0xf]  ;;  %v2503_v18 = vld [vmem:[%s2782_s26 + $0x94] sm:$0xf] }
  0x3e   : > { %1402 = vmatpush.bf16.msrb.mxu3 %v2210_v12  ;;  %v2374_v11 = vor.u32 %v2590_v8, %v2373_v6  ;;  %v2186_v12 = vor.u32 %v2541_v9, %v2183_v10  ;;  %v2506_v17 = vld [vmem:[%s2782_s26 + $0xa4] sm:$0xf0]  ;;  %v2031_v19 = vld [vmem:[%s2782_s26 + $0xa8] sm:$0xf0]  ;;  %v2507_v21 = vld [vmem:[%s2782_s26 + $0xac] sm:$0xf0] }
  0x3f   : > { %1274 = vmatpush.bf16.msrb.mxu0 %v2390_v32  ;;  %v2504_v22 = vld [vmem:[%s2782_s26 + $0x9c] sm:$0xf]  ;;  %v2907_v24 = vor.u32 %v2506_v17, %v2029_v16  ;;  %v2909_v25 = vor.u32 %v2503_v18, %v2031_v19  ;;  %v2523_v28 = vld [vmem:[%s2719_s22 + $0x14] sm:$0xf]  ;;  %v2365_v30 = vld [vmem:[%s2719_s22 + $0x210] sm:$0xf] }
  0x40   : > { %1317 = vmatpush.bf16.msrb.mxu1 %v2454_v35  ;;  %v2111_v29 = vld [vmem:[%s2719_s22 + $0x18] sm:$0xf0]  ;;  %v2588_v32 = vld [vmem:[%s2719_s22 + $0x214] sm:$0xf0]  ;;  %v2539_v33 = vld [vmem:[%s2719_s22 + $0x94] sm:$0xf] }
  0x41   : > { %1360 = vmatpush.bf16.msrb.mxu2 %v2138_v20  ;;  %v2037_v20 = vld [vmem:[%s2782_s26 + $0x98] sm:$0xf]  ;;  %v2114_v31 = vor.u32 %v2523_v28, %v2111_v29  ;;  %v2175_v34 = vld [vmem:[%s2719_s22 + $0x98] sm:$0xf0]  ;;  %v2366_v35 = vor.u32 %v2588_v32, %v2365_v30  ;;  %v2429_v41 = vld [vmem:[%s2719_s22 + $0x290] sm:$0xf] }
  0x42   : > { %1403 = vmatpush.bf16.msrb.mxu3 %v2202_v23  ;;  %1112 = vmatmul.bf16.gmra.mxu0 %v2851_v36  ;;  %v2039_v23 = vld [vmem:[%s2782_s26 + $0xb0] sm:$0xf0]  ;;  %v2911_v26 = vor.u32 %v2507_v21, %v2037_v20  ;;  %v2178_v40 = vor.u32 %v2539_v33, %v2175_v34  ;;  %v2604_v42 = vld [vmem:[%s2719_s22 + $0x294] sm:$0xf0]  ;;  %v2053_v44 = vld [vmem:[%s2782_s26 + $0xc0] sm:$0xf] }
  0x43   : > { %1155 = vmatmul.bf16.gmra.mxu1 %v2853_v37  ;;  %1275 = vmatpush.bf16.msrb.mxu0 %v2382_v47  ;;  %v2913_v27 = vor.u32 %v2504_v22, %v2039_v23  ;;  %v2512_v45 = vld [vmem:[%s2782_s26 + $0xd4] sm:$0xf0]  ;;  %v2509_v46 = vld [vmem:[%s2782_s26 + $0xc4] sm:$0xf]  ;;  %v2055_v47 = vld [vmem:[%s2782_s26 + $0xd8] sm:$0xf0] }
  0x44   : > { %1198 = vmatmul.bf16.gmra.mxu2 %v2855_v38  ;;  %1318 = vmatpush.bf16.msrb.mxu1 %v2446_v52  ;;  %v2513_v50 = vld [vmem:[%s2782_s26 + $0xdc] sm:$0xf0]  ;;  %v2510_v51 = vld [vmem:[%s2782_s26 + $0xcc] sm:$0xf]  ;;  %v2063_v52 = vld [vmem:[%s2782_s26 + $0xe0] sm:$0xf0]  ;;  %v2935_v55 = vor.u32 %v2512_v45, %v2053_v44  ;;  %v2937_v56 = vor.u32 %v2509_v46, %v2055_v47 }
  0x45   : > { %1241 = vmatmul.bf16.gmra.mxu3 %v2857_v39  ;;  %1361 = vmatpush.bf16.msrb.mxu2 %v2130_v43  ;;  %v2430_v43 = vor.u32 %v2604_v42, %v2429_v41  ;;  %v2941_v59 = vor.u32 %v2510_v51, %v2063_v52  ;;  %v2521_v60 = vld [vmem:[%s2719_s22 + $0x4] sm:$0xf]  ;;  %v2103_v61 = vld [vmem:[%s2719_s22 + $0x8] sm:$0xf0]  ;;  %v2357_v62 = vld [vmem:[%s2719_s22 + $0x200] sm:$0xf] }
  0x46   : > { %1404 = vmatpush.bf16.msrb.mxu3 %v2194_v49  ;;  %v2061_v49 = vld [vmem:[%s2782_s26 + $0xc8] sm:$0xf]  ;;  %v2106_v63 = vor.u32 %v2521_v60, %v2103_v61  ;;  %v2537_v5 = vld [vmem:[%s2719_s22 + $0x84] sm:$0xf]  ;;  %v2167_v6 = vld [vmem:[%s2719_s22 + $0x88] sm:$0xf0] }
  0x47   : > { %1276 = vmatpush.bf16.msrb.mxu0 %v2374_v11  ;;  %v2939_v58 = vor.u32 %v2513_v50, %v2061_v49  ;;  %v2586_v4 = vld [vmem:[%s2719_s22 + $0x204] sm:$0xf0]  ;;  %v2170_v8 = vor.u32 %v2537_v5, %v2167_v6  ;;  %v2421_v9 = vld [vmem:[%s2719_s22 + $0x280] sm:$0xf]  ;;  %v2515_v14 = vld [vmem:[%s2782_s26 + $0xf4] sm:$0xf] }
  0x48   : > { %1319 = vmatpush.bf16.msrb.mxu1 %v2438_v15  ;;  %v2602_v10 = vld [vmem:[%s2719_s22 + $0x284] sm:$0xf0]  ;;  %v2079_v15 = vld [vmem:[%s2782_s26 + $0x108] sm:$0xf0]  ;;  %v2085_v16 = vld [vmem:[%s2782_s26 + $0xf8] sm:$0xf] }
  0x49   : > { %1362 = vmatpush.bf16.msrb.mxu2 %v2122_v7  ;;  %v2358_v7 = vor.u32 %v2586_v4, %v2357_v62  ;;  %v2422_v11 = vor.u32 %v2602_v10, %v2421_v9  ;;  %v2518_v13 = vld [vmem:[%s2782_s26 + $0x104] sm:$0xf0]  ;;  %v2519_v17 = vld [vmem:[%s2782_s26 + $0x10c] sm:$0xf0]  ;;  %v2516_v18 = vld [vmem:[%s2782_s26 + $0xfc] sm:$0xf]  ;;  %v2965_v21 = vor.u32 %v2515_v14, %v2079_v15 }
  0x4a   : > { %1405 = vmatpush.bf16.msrb.mxu3 %v2186_v12  ;;  %v2077_v12 = vld [vmem:[%s2782_s26 + $0xf0] sm:$0xf]  ;;  %v2087_v19 = vld [vmem:[%s2782_s26 + $0x110] sm:$0xf0]  ;;  %v2967_v22 = vor.u32 %v2519_v17, %v2085_v16  ;;  %v2415_v29 = vld [vmem:[%s2719_s22 + $0x278] sm:$0xf0] }
  0x4b   : > { %1277 = vmatpush.bf16.msrb.mxu0 %v2366_v35  ;;  %v2963_v20 = vor.u32 %v2518_v13, %v2077_v12  ;;  %v2969_v23 = vor.u32 %v2516_v18, %v2087_v19  ;;  %v2599_v28 = vld [vmem:[%s2719_s22 + $0x274] sm:$0xf]  ;;  %v2287_v32 = vld [vmem:[%s2719_s22 + $0x178] sm:$0xf0]  ;;  %v320_v45 = vld [vmem:[%s2782_s26 + $0x128] sm:$0x11] }
  0x4c   : > { %1320 = vmatpush.bf16.msrb.mxu1 %v2430_v43  ;;  %v2567_v30 = vld [vmem:[%s2719_s22 + $0x174] sm:$0xf]  ;;  %v2479_v34 = vld [vmem:[%s2719_s22 + $0x2f8] sm:$0xf0]  ;;  %v319_v43 = vld [vmem:[%s2782_s26 + $0x120] sm:$0x11]  ;;  %v531_v49 = vunpack.c.l.b16 %v320_v45  ;;  %v532_v50 = vunpack.c.h.b16 %v320_v45 }
  0x4d   : > { %1363 = vmatpush.bf16.msrb.mxu2 %v2114_v31  ;;  %v2418_v31 = vor.u32 %v2599_v28, %v2415_v29  ;;  %v2615_v33 = vld [vmem:[%s2719_s22 + $0x2f4] sm:$0xf]  ;;  %v2290_v35 = vor.u32 %v2567_v30, %v2287_v32  ;;  %v2351_v42 = vld [vmem:[%s2719_s22 + $0x1f8] sm:$0xf0]  ;;  %v529_v46 = vunpack.c.l.b16 %v319_v43  ;;  %v530_v47 = vunpack.c.h.b16 %v319_v43  ;;  %v2597_v62 = vld [vmem:[%s2719_s22 + $0x264] sm:$0xf] }
  0x4e   : > { %1406 = vmatpush.bf16.msrb.mxu3 %v2178_v40  ;;  %v2482_v40 = vor.u32 %v2615_v33, %v2479_v34  ;;  %v2583_v41 = vld [vmem:[%s2719_s22 + $0x1f4] sm:$0xf]  ;;  %v2989_v60 = vpack.c.b16 %v531_v49, %v531_v49  ;;  %v2991_v61 = vpack.c.b16 %v532_v50, %v532_v50  ;;  %v2565_v5 = vld [vmem:[%s2719_s22 + $0x164] sm:$0xf]  ;;  %v2279_v6 = vld [vmem:[%s2719_s22 + $0x168] sm:$0xf0] }
  0x4f   : > { %1278 = vmatpush.bf16.msrb.mxu0 %v2358_v7  ;;  %v2354_v44 = vor.u32 %v2583_v41, %v2351_v42  ;;  %v2985_v51 = vpack.c.b16 %v529_v46, %v529_v46  ;;  %v2987_v52 = vpack.c.b16 %v530_v47, %v530_v47  ;;  %v2613_v7 = vld [vmem:[%s2719_s22 + $0x2e4] sm:$0xf]  ;;  %v2471_v9 = vld [vmem:[%s2719_s22 + $0x2e8] sm:$0xf0]  ;;  %v1973_v14 = vld [vmem:[%s2782_s26 + $0x10] sm:$0xf] }
  0x50   : > { %1321 = vmatpush.bf16.msrb.mxu1 %v2422_v11  ;;  %v2581_v10 = vld [vmem:[%s2719_s22 + $0x1e4] sm:$0xf]  ;;  %v2343_v11 = vld [vmem:[%s2719_s22 + $0x1e8] sm:$0xf0]  ;;  %v2474_v12 = vor.u32 %v2613_v7, %v2471_v9  ;;  %v2490_v15 = vld [vmem:[%s2782_s26 + $0x24] sm:$0xf0] }
  0x51   : > { %1364 = vmatpush.bf16.msrb.mxu2 %v2106_v63  ;;  %v2407_v63 = vld [vmem:[%s2719_s22 + $0x268] sm:$0xf0]  ;;  %v2346_v13 = vor.u32 %v2581_v10, %v2343_v11  ;;  %v2487_v16 = vld [vmem:[%s2782_s26 + $0x14] sm:$0xf]  ;;  %v3009_v18 = vor.u32 %v2490_v15, %v1973_v14  ;;  %v2399_v29 = vld [vmem:[%s2719_s22 + $0x258] sm:$0xf0] }
  0x52   : > { %1117 = vmatmul.bf16.gmra.mxu0 %v2879_v0  ;;  %1407 = vmatpush.bf16.msrb.mxu3 %v2170_v8  ;;  %v2410_v4 = vor.u32 %v2597_v62, %v2407_v63  ;;  %v2282_v8 = vor.u32 %v2565_v5, %v2279_v6  ;;  %v1975_v17 = vld [vmem:[%s2782_s26 + $0x28] sm:$0xf0]  ;;  %v2595_v28 = vld [vmem:[%s2719_s22 + $0x254] sm:$0xf]  ;;  %v2271_v32 = vld [vmem:[%s2719_s22 + $0x158] sm:$0xf0] }
  0x53   : > { %1160 = vmatmul.bf16.gmra.mxu1 %v2881_v1  ;;  %1443 = vmatpush.bf16.msra.mxu0 %v2290_v35  ;;  %v3011_v19 = vor.u32 %v2487_v16, %v1975_v17  ;;  %v2563_v30 = vld [vmem:[%s2719_s22 + $0x154] sm:$0xf]  ;;  %v2463_v34 = vld [vmem:[%s2719_s22 + $0x2d8] sm:$0xf0]  ;;  %v2391_v45 = vld [vmem:[%s2719_s22 + $0x248] sm:$0xf0] }
  0x54   : > { %1203 = vmatmul.bf16.gmra.mxu2 %v2883_v2  ;;  %1486 = vmatpush.bf16.msra.mxu1 %v2354_v44  ;;  %v2611_v33 = vld [vmem:[%s2719_s22 + $0x2d4] sm:$0xf]  ;;  %v2274_v35 = vor.u32 %v2563_v30, %v2271_v32  ;;  %v2335_v42 = vld [vmem:[%s2719_s22 + $0x1d8] sm:$0xf0]  ;;  %v2593_v44 = vld [vmem:[%s2719_s22 + $0x244] sm:$0xf] }
  0x55   : > { %1246 = vmatmul.bf16.gmra.mxu3 %v2885_v3  ;;  %1529 = vmatpush.bf16.msra.mxu2 %v2418_v31  ;;  %v2402_v31 = vor.u32 %v2595_v28, %v2399_v29  ;;  %v2579_v41 = vld [vmem:[%s2719_s22 + $0x1d4] sm:$0xf]  ;;  %v2394_v46 = vor.u32 %v2593_v44, %v2391_v45  ;;  %v2496_v47 = vld [vmem:[%s2782_s26 + $0x54] sm:$0xf0]  ;;  %v2493_v49 = vld [vmem:[%s2782_s26 + $0x44] sm:$0xf] }
  0x56   : > { %1572 = vmatpush.bf16.msra.mxu3 %v2482_v40  ;;  %v2466_v40 = vor.u32 %v2611_v33, %v2463_v34  ;;  %v2338_v43 = vor.u32 %v2579_v41, %v2335_v42  ;;  %v2561_v6 = vld [vmem:[%s2719_s22 + $0x144] sm:$0xf]  ;;  %v2263_v7 = vld [vmem:[%s2719_s22 + $0x148] sm:$0xf0]  ;;  %v2383_v32 = vld [vmem:[%s2719_s22 + $0x238] sm:$0xf0] }
  0x57   : > { %1444 = vmatpush.bf16.msra.mxu0 %v2282_v8  ;;  %v2609_v8 = vld [vmem:[%s2719_s22 + $0x2c4] sm:$0xf]  ;;  %v2266_v9 = vor.u32 %v2561_v6, %v2263_v7  ;;  %v2455_v10 = vld [vmem:[%s2719_s22 + $0x2c8] sm:$0xf0]  ;;  %v2255_v34 = vld [vmem:[%s2719_s22 + $0x138] sm:$0xf0] }
  0x58   : > { %1487 = vmatpush.bf16.msra.mxu1 %v2346_v13  ;;  %v2577_v11 = vld [vmem:[%s2719_s22 + $0x1c4] sm:$0xf]  ;;  %v2458_v13 = vor.u32 %v2609_v8, %v2455_v10  ;;  %v2021_v41 = vld [vmem:[%s2782_s26 + $0x70] sm:$0xf]  ;;  %v2502_v42 = vld [vmem:[%s2782_s26 + $0x84] sm:$0xf0] }
  0x59   : > { %1530 = vmatpush.bf16.msra.mxu2 %v2410_v4  ;;  %v2499_v45 = vld [vmem:[%s2782_s26 + $0x74] sm:$0xf] }
  0x5a   : > { %1573 = vmatpush.bf16.msra.mxu3 %v2474_v12  ;;  %v2327_v12 = vld [vmem:[%s2719_s22 + $0x1c8] sm:$0xf0]  ;;  %v2575_v8 = vld [vmem:[%s2719_s22 + $0x1b4] sm:$0xf] }
  0x5b   : > { %1445 = vmatpush.bf16.msra.mxu0 %v2274_v35  ;;  %v2330_v14 = vor.u32 %v2577_v11, %v2327_v12  ;;  %v2607_v35 = vld [vmem:[%s2719_s22 + $0x2b4] sm:$0xf] }
  0x5c   : > { %1488 = vmatpush.bf16.msra.mxu1 %v2338_v43 }
  0x5d   : > { %1531 = vmatpush.bf16.msra.mxu2 %v2402_v31  ;;  %v2591_v31 = vld [vmem:[%s2719_s22 + $0x234] sm:$0xf] }
  0x5e   : > { %1574 = vmatpush.bf16.msra.mxu3 %v2466_v40  ;;  %v2386_v33 = vor.u32 %v2591_v31, %v2383_v32  ;;  %v2447_v40 = vld [vmem:[%s2719_s22 + $0x2b8] sm:$0xf0]  ;;  %v2247_v31 = vld [vmem:[%s2719_s22 + $0x128] sm:$0xf0]  ;;  %v2605_v32 = vld [vmem:[%s2719_s22 + $0x2a4] sm:$0xf] }
  0x5f   : > { %1446 = vmatpush.bf16.msra.mxu0 %v2266_v9  ;;  %v2450_v44 = vor.u32 %v2607_v35, %v2447_v40  ;;  %v2319_v9 = vld [vmem:[%s2719_s22 + $0x1b8] sm:$0xf0]  ;;  %v2573_v40 = vld [vmem:[%s2719_s22 + $0x1a4] sm:$0xf] }
  0x60   : > { %1489 = vmatpush.bf16.msra.mxu1 %v2330_v14  ;;  %v2322_v10 = vor.u32 %v2575_v8, %v2319_v9 }
  0x61   : > { %1532 = vmatpush.bf16.msra.mxu2 %v2394_v46  ;;  %v2023_v46 = vld [vmem:[%s2782_s26 + $0x88] sm:$0xf0] }
  0x62   : > { %1122 = vmatmul.bf16.gmra.mxu0 %v2907_v24  ;;  %1575 = vmatpush.bf16.msra.mxu3 %v2458_v13 }
  0x63   : > { %1165 = vmatmul.bf16.gmra.mxu1 %v2909_v25 }
  0x64   : > { %1208 = vmatmul.bf16.gmra.mxu2 %v2911_v26  ;;  %1490 = vmatpush.bf16.msra.mxu1 %v2322_v10 }
  0x65   : > { %1251 = vmatmul.bf16.gmra.mxu3 %v2913_v27  ;;  %1533 = vmatpush.bf16.msra.mxu2 %v2386_v33  ;;  %v2508_v33 = vld [vmem:[%s2782_s26 + $0xb4] sm:$0xf0] }
  0x66   : > { %1576 = vmatpush.bf16.msra.mxu3 %v2450_v44 }
  0x72   : > { %1127 = vmatmul.bf16.gmra.mxu0 %v2935_v55 }
  0x73   : > { %1170 = vmatmul.bf16.gmra.mxu1 %v2937_v56 }
  0x74   : > { %1213 = vmatmul.bf16.gmra.mxu2 %v2939_v58 }
  0x75   : > { %1256 = vmatmul.bf16.gmra.mxu3 %v2941_v59 }
  0x82   : > { %1132 = vmatmul.bf16.gmra.mxu0 %v2963_v20 }
  0x83   : > { %1175 = vmatmul.bf16.gmra.mxu1 %v2965_v21 }
  0x84   : > { %1218 = vmatmul.bf16.gmra.mxu2 %v2967_v22 }
  0x85   : > { %1261 = vmatmul.bf16.gmra.mxu3 %v2969_v23 }
  0x92   : > { %1137 = vmatmul.bf16.gmra.mxu0 %v2985_v51 }
  0x93   : > { %1180 = vmatmul.bf16.gmra.mxu1 %v2987_v52 }
  0x94   : > { %1223 = vmatmul.bf16.gmra.mxu2 %v2989_v60 }
  0x95   : > { %1266 = vmatmul.bf16.gmra.mxu3 %v2991_v61 }
  0xa2   : > { %1279 = vmatmul.bf16.vlgmr.msrb.gmra.mxu0 %v3009_v18 }
  0xa3   : > { %1322 = vmatmul.bf16.vlgmr.msrb.gmra.mxu1 %v3011_v19 }
  0xa4   : > { %1365 = vmatmul.bf16.vlgmr.msrb.gmra.mxu2 %v2806_v48  ;;  %v1997_v48 = vld [vmem:[%s2782_s26 + $0x40] sm:$0xf] }
  0xa5   : > { %1408 = vmatmul.bf16.vlgmr.msrb.gmra.mxu3 %v2811_v53  ;;  %v1999_v53 = vld [vmem:[%s2782_s26 + $0x58] sm:$0xf0]  ;;  %v3031_v50 = vor.u32 %v2496_v47, %v1997_v48  ;;  %v3057_v47 = vor.u32 %v2502_v42, %v2021_v41  ;;  %v2311_v41 = vld [vmem:[%s2719_s22 + $0x1a8] sm:$0xf0]  ;;  %v2505_v42 = vld [vmem:[%s2782_s26 + $0xa4] sm:$0xf] }
  0xa6   : > { %v3033_v63 = vor.u32 %v2493_v49, %v1999_v53  ;;  %v2314_v44 = vor.u32 %v2573_v40, %v2311_v41  ;;  %v2071_v40 = vld [vmem:[%s2782_s26 + $0xe8] sm:$0xf0] }
  0xa8   : > { %1491 = vmatpush.bf16.msra.mxu1 %v2314_v44 }
  0xaf   : > { %v1108_v62 = vpop.f32.mrf.mxu0 }
  0xb0   : > { %v1151_v4 = vpop.f32.mrf.mxu1 }
  0xb1   : > { %v1152_v5 = vadd.f32 %v1151_v4, %v1108_v62  ;;  %v3059_v4 = vor.u32 %v2499_v45, %v2023_v46 }
  0xb2   : > { %1284 = vmatmul.bf16.gmra.mxu0 %v3031_v50 }
  0xb3   : > { %1327 = vmatmul.bf16.gmra.mxu1 %v3033_v63 }
  0xb4   : > { %1370 = vmatmul.bf16.gmra.mxu2 %v2851_v36 }
  0xb5   : > { %1413 = vmatmul.bf16.gmra.mxu3 %v2853_v37  ;;  %v2559_v37 = vld [vmem:[%s2719_s22 + $0x134] sm:$0xf] }
  0xb6   : > { %v2258_v43 = vor.u32 %v2559_v37, %v2255_v34  ;;  %v2439_v37 = vld [vmem:[%s2719_s22 + $0x2a8] sm:$0xf0] }
  0xb7   : > { %v1194_v15 = vpop.f32.mrf.mxu2  ;;  %v1110_v28 = vpop.f32.mrf.mxu0  ;;  %v2442_v35 = vor.u32 %v2605_v32, %v2439_v37 }
  0xb8   : > { %v1195_v16 = vadd.f32 %v1194_v15, %v1152_v5  ;;  %v1237_v17 = vpop.f32.mrf.mxu3  ;;  %v1153_v36 = vpop.f32.mrf.mxu1  ;;  %1447 = vmatpush.bf16.msra.mxu0 %v2258_v43  ;;  %v2047_v43 = vld [vmem:[%s2782_s26 + $0xb8] sm:$0xf0] }
  0xb9   : > { %v1154_v30 = vadd.f32 %v1153_v36, %v1110_v28  ;;  %v2045_v28 = vld [vmem:[%s2782_s26 + $0xa0] sm:$0xf]  ;;  %v2375_v36 = vld [vmem:[%s2719_s22 + $0x228] sm:$0xf0]  ;;  %1577 = vmatpush.bf16.msra.mxu3 %v2442_v35  ;;  %v2511_v35 = vld [vmem:[%s2782_s26 + $0xd4] sm:$0xf] }
  0xba   : > { %v3045_v29 = vadd.f32 %v1237_v17, %v1195_v16  ;;  %v3083_v46 = vor.u32 %v2508_v33, %v2045_v28  ;;  %v2587_v28 = vld [vmem:[%s2719_s22 + $0x214] sm:$0xf] }
  0xbb   : > { %v2571_v33 = vld [vmem:[%s2719_s22 + $0x194] sm:$0xf] }
  0xbf   : > { %v1196_v48 = vpop.f32.mrf.mxu2  ;;  %v1113_v62 = vpop.f32.mrf.mxu0 }
  0xc0   : > { %v1197_v49 = vadd.f32 %v1196_v48, %v1154_v30  ;;  %v1239_v53 = vpop.f32.mrf.mxu3  ;;  %v1156_v5 = vpop.f32.mrf.mxu1  ;;  %v2557_v30 = vld [vmem:[%s2719_s22 + $0x124] sm:$0xf] }
  0xc1   : > { %v1157_v7 = vadd.f32 %v1156_v5, %v1113_v62  ;;  %v2250_v34 = vor.u32 %v2557_v30, %v2247_v31  ;;  %v3085_v62 = vor.u32 %v2505_v42, %v2047_v43  ;;  %v2239_v30 = vld [vmem:[%s2719_s22 + $0x118] sm:$0xf0]  ;;  %v2514_v31 = vld [vmem:[%s2782_s26 + $0xe4] sm:$0xf0] }
  0xc2   : > { %v3061_v6 = vadd.f32 %v1239_v53, %v1197_v49  ;;  %1289 = vmatmul.bf16.gmra.mxu0 %v3057_v47 }
  0xc3   : > { %1332 = vmatmul.bf16.gmra.mxu1 %v3059_v4  ;;  %1448 = vmatpush.bf16.msra.mxu0 %v2250_v34  ;;  %v2303_v34 = vld [vmem:[%s2719_s22 + $0x198] sm:$0xf0] }
  0xc4   : > { %1375 = vmatmul.bf16.gmra.mxu2 %v2879_v0  ;;  %v2589_v0 = vld [vmem:[%s2719_s22 + $0x224] sm:$0xf]  ;;  %v2306_v41 = vor.u32 %v2571_v33, %v2303_v34 }
  0xc5   : > { %1418 = vmatmul.bf16.gmra.mxu3 %v2881_v1  ;;  %v2378_v1 = vor.u32 %v2589_v0, %v2375_v36  ;;  %v2367_v0 = vld [vmem:[%s2719_s22 + $0x218] sm:$0xf0] }
  0xc6   : > { %v2370_v36 = vor.u32 %v2587_v28, %v2367_v0  ;;  %1492 = vmatpush.bf16.msra.mxu1 %v2306_v41 }
  0xc7   : > { %v1199_v11 = vpop.f32.mrf.mxu2  ;;  %v1115_v14 = vpop.f32.mrf.mxu0  ;;  %1534 = vmatpush.bf16.msra.mxu2 %v2378_v1  ;;  %v2431_v1 = vld [vmem:[%s2719_s22 + $0x298] sm:$0xf0] }
  0xc8   : > { %v1200_v12 = vadd.f32 %v1199_v11, %v1157_v7  ;;  %v1242_v13 = vpop.f32.mrf.mxu3  ;;  %v1158_v15 = vpop.f32.mrf.mxu1 }
  0xc9   : > { %v1159_v17 = vadd.f32 %v1158_v15, %v1115_v14 }
  0xca   : > { %v3069_v16 = vadd.f32 %v1242_v13, %v1200_v12 }
  0xcb   : > { %1535 = vmatpush.bf16.msra.mxu2 %v2370_v36  ;;  %v2601_v36 = vld [vmem:[%s2719_s22 + $0x284] sm:$0xf] }
  0xcf   : > { %v1201_v45 = vpop.f32.mrf.mxu2  ;;  %v1118_v53 = vpop.f32.mrf.mxu0 }
  0xd0   : > { %v1202_v48 = vadd.f32 %v1201_v45, %v1159_v17  ;;  %v1244_v49 = vpop.f32.mrf.mxu3  ;;  %v1161_v5 = vpop.f32.mrf.mxu1  ;;  %v2069_v17 = vld [vmem:[%s2782_s26 + $0xd0] sm:$0xf] }
  0xd1   : > { %v1162_v8 = vadd.f32 %v1161_v5, %v1118_v53  ;;  %v3107_v43 = vor.u32 %v2514_v31, %v2069_v17  ;;  %v2295_v31 = vld [vmem:[%s2719_s22 + $0x188] sm:$0xf0] }
  0xd2   : > { %v3087_v7 = vadd.f32 %v1244_v49, %v1202_v48  ;;  %1294 = vmatmul.bf16.gmra.mxu0 %v3083_v46  ;;  %v3109_v49 = vor.u32 %v2511_v35, %v2071_v40  ;;  %v2517_v35 = vld [vmem:[%s2782_s26 + $0x104] sm:$0xf]  ;;  %v2095_v40 = vld [vmem:[%s2782_s26 + $0x118] sm:$0xf0] }
  0xd3   : > { %1337 = vmatmul.bf16.gmra.mxu1 %v3085_v62 }
  0xd4   : > { %1380 = vmatmul.bf16.gmra.mxu2 %v2907_v24  ;;  %v2555_v24 = vld [vmem:[%s2719_s22 + $0x114] sm:$0xf] }
  0xd5   : > { %1423 = vmatmul.bf16.gmra.mxu3 %v2909_v25  ;;  %v2603_v25 = vld [vmem:[%s2719_s22 + $0x294] sm:$0xf]  ;;  %v2242_v32 = vor.u32 %v2555_v24, %v2239_v30  ;;  %v2231_v24 = vld [vmem:[%s2719_s22 + $0x108] sm:$0xf0] }
  0xd6   : > { %v2434_v37 = vor.u32 %v2603_v25, %v2431_v1  ;;  %v2423_v25 = vld [vmem:[%s2719_s22 + $0x288] sm:$0xf0]  ;;  %v2569_v1 = vld [vmem:[%s2719_s22 + $0x184] sm:$0xf] }
  0xd7   : > { %v1204_v9 = vpop.f32.mrf.mxu2  ;;  %v1120_v12 = vpop.f32.mrf.mxu0  ;;  %1449 = vmatpush.bf16.msra.mxu0 %v2242_v32  ;;  %v2093_v32 = vld [vmem:[%s2782_s26 + $0x100] sm:$0xf]  ;;  %v2426_v33 = vor.u32 %v2601_v36, %v2423_v25  ;;  %v2298_v34 = vor.u32 %v2569_v1, %v2295_v31 }
  0xd8   : > { %v1205_v10 = vadd.f32 %v1204_v9, %v1162_v8  ;;  %v1247_v11 = vpop.f32.mrf.mxu3  ;;  %v1163_v13 = vpop.f32.mrf.mxu1  ;;  %1578 = vmatpush.bf16.msra.mxu3 %v2434_v37  ;;  %v2585_v9 = vld [vmem:[%s2719_s22 + $0x204] sm:$0xf]  ;;  %v2520_v37 = vld [vmem:[%s2782_s26 + $0x114] sm:$0xf0] }
  0xd9   : > { %v1164_v15 = vadd.f32 %v1163_v13, %v1120_v12  ;;  %1493 = vmatpush.bf16.msra.mxu1 %v2298_v34 }
  0xda   : > { %v3093_v14 = vadd.f32 %v1247_v11, %v1205_v10  ;;  %v2359_v10 = vld [vmem:[%s2719_s22 + $0x208] sm:$0xf0] }
  0xdb   : > { %v2362_v11 = vor.u32 %v2585_v9, %v2359_v10 }
  0xdc   : > { %1579 = vmatpush.bf16.msra.mxu3 %v2426_v33 }
  0xdd   : > { %1536 = vmatpush.bf16.msra.mxu2 %v2362_v11 }
  0xdf   : > { %v1206_v42 = vpop.f32.mrf.mxu2  ;;  %v1123_v48 = vpop.f32.mrf.mxu0 }
  0xe0   : > { %v1207_v44 = vadd.f32 %v1206_v42, %v1164_v15  ;;  %v1249_v45 = vpop.f32.mrf.mxu3  ;;  %v1166_v53 = vpop.f32.mrf.mxu1  ;;  %v3131_v42 = vor.u32 %v2520_v37, %v2093_v32 }
  0xe1   : > { %v1167_v8 = vadd.f32 %v1166_v53, %v1123_v48  ;;  %v3133_v53 = vor.u32 %v2517_v35, %v2095_v40 }
  0xe2   : > { %v3111_v5 = vadd.f32 %v1249_v45, %v1207_v44  ;;  %1299 = vmatmul.bf16.gmra.mxu0 %v3107_v43 }
  0xe3   : > { %1342 = vmatmul.bf16.gmra.mxu1 %v3109_v49 }
  0xe4   : > { %1385 = vmatmul.bf16.gmra.mxu2 %v2935_v55 }
  0xe5   : > { %1428 = vmatmul.bf16.gmra.mxu3 %v2937_v56  ;;  %v2553_v56 = vld [vmem:[%s2719_s22 + $0x104] sm:$0xf] }
  0xe6   : > { %v2234_v30 = vor.u32 %v2553_v56, %v2231_v24 }
  0xe7   : > { %v1209_v12 = vpop.f32.mrf.mxu2  ;;  %v1125_v17 = vpop.f32.mrf.mxu0 }
  0xe8   : > { %v1210_v13 = vadd.f32 %v1209_v12, %v1167_v8  ;;  %v1252_v15 = vpop.f32.mrf.mxu3  ;;  %v1168_v28 = vpop.f32.mrf.mxu1  ;;  %1450 = vmatpush.bf16.msra.mxu0 %v2234_v30 }
  0xe9   : > { %v1169_v55 = vadd.f32 %v1168_v28, %v1125_v17  ;;  %v321_v17 = vld [vmem:[%s2782_s26 + $0x130] sm:$0x11] }
  0xea   : > { %v3119_v0 = vadd.f32 %v1252_v15, %v1210_v13  ;;  %v533_v24 = vunpack.c.l.b16 %v321_v17  ;;  %v534_v36 = vunpack.c.h.b16 %v321_v17 }
  0xec   : > { %v3144_v25 = vpack.c.b16 %v533_v24, %v533_v24 }
  0xef   : > { %v1211_v41 = vpop.f32.mrf.mxu2  ;;  %v1128_v48 = vpop.f32.mrf.mxu0 }
  0xf0   : > { %v1212_v44 = vadd.f32 %v1211_v41, %v1169_v55  ;;  %v1254_v45 = vpop.f32.mrf.mxu3  ;;  %v1171_v8 = vpop.f32.mrf.mxu1 }
  0xf1   : > { %v1172_v10 = vadd.f32 %v1171_v8, %v1128_v48 }
  0xf2   : > { %v3135_v9 = vadd.f32 %v1254_v45, %v1212_v44  ;;  %1304 = vmatmul.bf16.gmra.mxu0 %v3131_v42 }
  0xf3   : > { %1347 = vmatmul.bf16.gmra.mxu1 %v3133_v53 }
  0xf4   : > { %1390 = vmatmul.bf16.gmra.mxu2 %v2963_v20  ;;  %v3146_v20 = vpack.c.b16 %v534_v36, %v534_v36 }
  0xf5   : > { %1433 = vmatmul.bf16.gmra.mxu3 %v2965_v21 }
  0xf7   : > { %v1214_v11 = vpop.f32.mrf.mxu2  ;;  %v1130_v15 = vpop.f32.mrf.mxu0 }
  0xf8   : > { %v1215_v12 = vadd.f32 %v1214_v11, %v1172_v10  ;;  %v1257_v13 = vpop.f32.mrf.mxu3  ;;  %v1173_v28 = vpop.f32.mrf.mxu1 }
  0xf9   : > { %v1174_v56 = vadd.f32 %v1173_v28, %v1130_v15 }
  0xfa   : > { %v3142_v55 = vadd.f32 %v1257_v13, %v1215_v12 }
  0xff   : > { %v1216_v30 = vpop.f32.mrf.mxu2  ;;  %v1133_v32 = vpop.f32.mrf.mxu0 }
 0x100   : > { %v1217_v1 = vadd.f32 %v1216_v30, %v1174_v56  ;;  %v1259_v31 = vpop.f32.mrf.mxu3  ;;  %v1176_v21 = vpop.f32.mrf.mxu1 }
 0x101   : > { %v1177_v33 = vadd.f32 %v1176_v21, %v1133_v32 }
 0x102   : > { %v3148_v37 = vadd.f32 %v1259_v31, %v1217_v1  ;;  %1309 = vmatmul.bf16.gmra.mxu0 %v3144_v25 }
 0x103   : > { %1352 = vmatmul.bf16.gmra.mxu1 %v3146_v20 }
 0x104   : > { %1395 = vmatmul.bf16.gmra.mxu2 %v2985_v51 }
 0x105   : > { %1438 = vmatmul.bf16.gmra.mxu3 %v2987_v52 }
 0x107   : > { %v1219_v34 = vpop.f32.mrf.mxu2  ;;  %v1135_v41 = vpop.f32.mrf.mxu0 }
 0x108   : > { %v1220_v35 = vadd.f32 %v1219_v34, %v1177_v33  ;;  %v1262_v40 = vpop.f32.mrf.mxu3  ;;  %v1178_v44 = vpop.f32.mrf.mxu1 }
 0x109   : > { %v1179_v48 = vadd.f32 %v1178_v44, %v1135_v41 }
 0x10a   : > { %v3154_v45 = vadd.f32 %v1262_v40, %v1220_v35 }
 0x10f   : > { %v1221_v8 = vpop.f32.mrf.mxu2  ;;  %v1138_v12 = vpop.f32.mrf.mxu0 }
 0x110   : > { %v1222_v10 = vadd.f32 %v1221_v8, %v1179_v48  ;;  %v1264_v11 = vpop.f32.mrf.mxu3  ;;  %v1181_v13 = vpop.f32.mrf.mxu1 }
 0x111   : > { %v1182_v17 = vadd.f32 %v1181_v13, %v1138_v12 }
 0x112   : > { %v3156_v15 = vadd.f32 %v1264_v11, %v1222_v10  ;;  %1451 = vmatmul.bf16.vlgmr.msra.gmra.mxu0 %v2813_v54 }
 0x113   : > { %1494 = vmatmul.bf16.vlgmr.msra.gmra.mxu1 %v2817_v57 }
 0x114   : > { %1537 = vmatmul.bf16.vlgmr.msra.gmra.mxu2 %v3009_v18 }
 0x115   : > { %1580 = vmatmul.bf16.vlgmr.msra.gmra.mxu3 %v3011_v19 }
 0x117   : > { %v1224_v51 = vpop.f32.mrf.mxu2  ;;  %v1140_v56 = vpop.f32.mrf.mxu0 }
 0x118   : > { %v1225_v52 = vadd.f32 %v1224_v51, %v1182_v17  ;;  %v1267_v28 = vpop.f32.mrf.mxu3  ;;  %v1183_v24 = vpop.f32.mrf.mxu1 }
 0x11a   : > { %v3162_v36 = vadd.f32 %v1267_v28, %v1225_v52 }
 0x11f   : > { %v1226_v30 = vpop.f32.mrf.mxu2  ;;  %v1280_v31 = vpop.f32.mrf.mxu0 }
 0x120   : > { %v1269_v1 = vpop.f32.mrf.mxu3  ;;  %v1281_v32 = vadd.f32 %v1280_v31, %v3045_v29  ;;  %v1323_v21 = vpop.f32.mrf.mxu1 }
 0x122   : > { %v3165_v54 = vadd.f32 %v1323_v21, %v1281_v32  ;;  %1456 = vmatmul.bf16.gmra.mxu0 %v2855_v38 }
 0x123   : > { %1499 = vmatmul.bf16.gmra.mxu1 %v2857_v39 }
 0x124   : > { %1542 = vmatmul.bf16.gmra.mxu2 %v3031_v50  ;;  %v1704_v8 = vmul.f32 %v3165_v54, %v3165_v54 }
 0x125   : > { %1585 = vmatmul.bf16.gmra.mxu3 %v3033_v63 }
 0x127   : > { %v1366_v57 = vpop.f32.mrf.mxu2  ;;  %v1282_v19 = vpop.f32.mrf.mxu0 }
 0x128   : > { %v1409_v18 = vpop.f32.mrf.mxu3  ;;  %v1283_v34 = vadd.f32 %v1282_v19, %v3061_v6  ;;  %v1325_v35 = vpop.f32.mrf.mxu1 }
 0x129   : > { %v3171_v33 = vadd.f32 %v1409_v18, %v1366_v57 }
 0x12a   : > { %v3174_v29 = vadd.f32 %v1325_v35, %v1283_v34 }
 0x12c   : > { %v1706_v63 = vmul.f32 %v3174_v29, %v3174_v29  ;;  %v1652_v11 = vadd.f32 %v3174_v29, %v3165_v54 }
 0x12e   : > { %v1730_v12 = vadd.f32 %v1706_v63, %v1704_v8 }
 0x12f   : > { %v1368_v40 = vpop.f32.mrf.mxu2  ;;  %v1285_v44 = vpop.f32.mrf.mxu0 }
 0x130   : > { %v1411_v41 = vpop.f32.mrf.mxu3  ;;  %v1286_v39 = vadd.f32 %v1285_v44, %v3069_v16  ;;  %v1328_v50 = vpop.f32.mrf.mxu1 }
 0x131   : > { %v3176_v38 = vadd.f32 %v1411_v41, %v1368_v40 }
 0x132   : > { %v3179_v48 = vadd.f32 %v1328_v50, %v1286_v39  ;;  %1461 = vmatmul.bf16.gmra.mxu0 %v2883_v2 }
 0x133   : > { %1504 = vmatmul.bf16.gmra.mxu1 %v2885_v3 }
 0x134   : > { %1547 = vmatmul.bf16.gmra.mxu2 %v3057_v47  ;;  %v1708_v2 = vmul.f32 %v3179_v48, %v3179_v48  ;;  %v1653_v13 = vadd.f32 %v1652_v11, %v3179_v48 }
 0x135   : > { %1590 = vmatmul.bf16.gmra.mxu3 %v3059_v4 }
 0x136   : > { %v1731_v51 = vadd.f32 %v1730_v12, %v1708_v2 }
 0x137   : > { %v1371_v6 = vpop.f32.mrf.mxu2  ;;  %v1287_v16 = vpop.f32.mrf.mxu0 }
 0x138   : > { %v1414_v10 = vpop.f32.mrf.mxu3  ;;  %v1288_v47 = vadd.f32 %v1287_v16, %v3087_v7  ;;  %v1330_v4 = vpop.f32.mrf.mxu1 }
 0x139   : > { %v3193_v3 = vadd.f32 %v1414_v10, %v1371_v6 }
 0x13a   : > { %v3197_v17 = vadd.f32 %v1330_v4, %v1288_v47 }
 0x13c   : > { %v1654_v52 = vadd.f32 %v1653_v13, %v3197_v17  ;;  %v1710_v28 = vmul.f32 %v3197_v17, %v3197_v17 }
 0x13e   : > { %v1732_v56 = vadd.f32 %v1731_v51, %v1710_v28 }
 0x13f   : > { %v1373_v24 = vpop.f32.mrf.mxu2  ;;  %v1290_v1 = vpop.f32.mrf.mxu0 }
 0x140   : > { %v1416_v30 = vpop.f32.mrf.mxu3  ;;  %v1291_v7 = vadd.f32 %v1290_v1, %v3093_v14  ;;  %v1333_v32 = vpop.f32.mrf.mxu1 }
 0x141   : > { %v3202_v31 = vadd.f32 %v1416_v30, %v1373_v24 }
 0x142   : > { %v3205_v21 = vadd.f32 %v1333_v32, %v1291_v7  ;;  %1466 = vmatmul.bf16.gmra.mxu0 %v2911_v26 }
 0x143   : > { %1509 = vmatmul.bf16.gmra.mxu1 %v2913_v27 }
 0x144   : > { %1552 = vmatmul.bf16.gmra.mxu2 %v3083_v46  ;;  %v1655_v57 = vadd.f32 %v1654_v52, %v3205_v21  ;;  %v1712_v18 = vmul.f32 %v3205_v21, %v3205_v21 }
 0x145   : > { %1595 = vmatmul.bf16.gmra.mxu3 %v3085_v62 }
 0x146   : > { %v1733_v19 = vadd.f32 %v1732_v56, %v1712_v18 }
 0x147   : > { %v1376_v34 = vpop.f32.mrf.mxu2  ;;  %v1292_v14 = vpop.f32.mrf.mxu0 }
 0x148   : > { %v1419_v35 = vpop.f32.mrf.mxu3  ;;  %v1293_v41 = vadd.f32 %v1292_v14, %v3111_v5  ;;  %v1335_v26 = vpop.f32.mrf.mxu1 }
 0x149   : > { %v3214_v40 = vadd.f32 %v1419_v35, %v1376_v34 }
 0x14a   : > { %v3217_v44 = vadd.f32 %v1335_v26, %v1293_v41 }
 0x14c   : > { %v1656_v27 = vadd.f32 %v1655_v57, %v3217_v44  ;;  %v1714_v46 = vmul.f32 %v3217_v44, %v3217_v44 }
 0x14e   : > { %v1734_v39 = vadd.f32 %v1733_v19, %v1714_v46 }
 0x14f   : > { %v1378_v50 = vpop.f32.mrf.mxu2  ;;  %v1295_v62 = vpop.f32.mrf.mxu0 }
 0x150   : > { %v1421_v63 = vpop.f32.mrf.mxu3  ;;  %v1296_v8 = vadd.f32 %v1295_v62, %v3119_v0  ;;  %v1338_v10 = vpop.f32.mrf.mxu1 }
 0x151   : > { %v3222_v6 = vadd.f32 %v1421_v63, %v1378_v50 }
 0x152   : > { %v3225_v16 = vadd.f32 %v1338_v10, %v1296_v8  ;;  %1471 = vmatmul.bf16.gmra.mxu0 %v2939_v58 }
 0x153   : > { %1514 = vmatmul.bf16.gmra.mxu1 %v2941_v59 }
 0x154   : > { %1557 = vmatmul.bf16.gmra.mxu2 %v3107_v43  ;;  %v1657_v5 = vadd.f32 %v1656_v27, %v3225_v16  ;;  %v1716_v11 = vmul.f32 %v3225_v16, %v3225_v16 }
 0x155   : > { %1600 = vmatmul.bf16.gmra.mxu3 %v3109_v49 }
 0x156   : > { %v1735_v2 = vadd.f32 %v1734_v39, %v1716_v11 }
 0x157   : > { %v1381_v47 = vpop.f32.mrf.mxu2  ;;  %v1297_v0 = vpop.f32.mrf.mxu0 }
 0x158   : > { %v1424_v4 = vpop.f32.mrf.mxu3  ;;  %v1298_v13 = vadd.f32 %v1297_v0, %v3135_v9  ;;  %v1340_v58 = vpop.f32.mrf.mxu1 }
 0x159   : > { %v3234_v12 = vadd.f32 %v1424_v4, %v1381_v47 }
 0x15a   : > { %v3237_v51 = vadd.f32 %v1340_v58, %v1298_v13 }
 0x15c   : > { %v1658_v59 = vadd.f32 %v1657_v5, %v3237_v51  ;;  %v1718_v43 = vmul.f32 %v3237_v51, %v3237_v51 }
 0x15e   : > { %v1736_v52 = vadd.f32 %v1735_v2, %v1718_v43 }
 0x15f   : > { %v1383_v28 = vpop.f32.mrf.mxu2  ;;  %v1300_v49 = vpop.f32.mrf.mxu0 }
 0x160   : > { %v1426_v56 = vpop.f32.mrf.mxu3  ;;  %v1301_v30 = vadd.f32 %v1300_v49, %v3142_v55  ;;  %v1343_v1 = vpop.f32.mrf.mxu1 }
 0x161   : > { %v3242_v24 = vadd.f32 %v1426_v56, %v1383_v28 }
 0x162   : > { %v3245_v7 = vadd.f32 %v1343_v1, %v1301_v30  ;;  %1476 = vmatmul.bf16.gmra.mxu0 %v2967_v22 }
 0x163   : > { %1519 = vmatmul.bf16.gmra.mxu1 %v2969_v23 }
 0x164   : > { %1562 = vmatmul.bf16.gmra.mxu2 %v3131_v42  ;;  %v1659_v9 = vadd.f32 %v1658_v59, %v3245_v7  ;;  %v1720_v32 = vmul.f32 %v3245_v7, %v3245_v7 }
 0x165   : > { %1605 = vmatmul.bf16.gmra.mxu3 %v3133_v53 }
 0x166   : > { %v1737_v57 = vadd.f32 %v1736_v52, %v1720_v32 }
 0x167   : > { %v1386_v18 = vpop.f32.mrf.mxu2  ;;  %v1302_v55 = vpop.f32.mrf.mxu0 }
 0x168   : > { %v1429_v19 = vpop.f32.mrf.mxu3  ;;  %v1303_v35 = vadd.f32 %v1302_v55, %v3148_v37  ;;  %v1345_v22 = vpop.f32.mrf.mxu1 }
 0x169   : > { %v3254_v34 = vadd.f32 %v1429_v19, %v1386_v18 }
 0x16a   : > { %v3257_v14 = vadd.f32 %v1345_v22, %v1303_v35 }
 0x16c   : > { %v1660_v23 = vadd.f32 %v1659_v9, %v3257_v14  ;;  %v1722_v42 = vmul.f32 %v3257_v14, %v3257_v14 }
 0x16e   : > { %v1738_v41 = vadd.f32 %v1737_v57, %v1722_v42 }
 0x16f   : > { %v1388_v26 = vpop.f32.mrf.mxu2  ;;  %v1305_v53 = vpop.f32.mrf.mxu0 }
 0x170   : > { %v1431_v27 = vpop.f32.mrf.mxu3  ;;  %v1306_v39 = vadd.f32 %v1305_v53, %v3154_v45  ;;  %v1348_v50 = vpop.f32.mrf.mxu1 }
 0x171   : > { %v3262_v46 = vadd.f32 %v1431_v27, %v1388_v26 }
 0x172   : > { %v3265_v63 = vadd.f32 %v1348_v50, %v1306_v39  ;;  %1481 = vmatmul.bf16.gmra.mxu0 %v2989_v60 }
 0x173   : > { %1524 = vmatmul.bf16.gmra.mxu1 %v2991_v61 }
 0x174   : > { %1567 = vmatmul.bf16.gmra.mxu2 %v3144_v25  ;;  %v1661_v37 = vadd.f32 %v1660_v23, %v3265_v63  ;;  %v1724_v62 = vmul.f32 %v3265_v63, %v3265_v63 }
 0x175   : > { %1610 = vmatmul.bf16.gmra.mxu3 %v3146_v20 }
 0x176   : > { %v1739_v8 = vadd.f32 %v1738_v41, %v1724_v62 }
 0x177   : > { %v1391_v10 = vpop.f32.mrf.mxu2  ;;  %v1307_v45 = vpop.f32.mrf.mxu0 }
 0x178   : > { %v1434_v5 = vpop.f32.mrf.mxu3  ;;  %v1308_v2 = vadd.f32 %v1307_v45, %v3156_v15  ;;  %v1350_v60 = vpop.f32.mrf.mxu1 }
 0x179   : > { %v3274_v11 = vadd.f32 %v1434_v5, %v1391_v10 }
 0x17a   : > { %v3277_v47 = vadd.f32 %v1350_v60, %v1308_v2 }
 0x17c   : > { %v1662_v61 = vadd.f32 %v1661_v37, %v3277_v47  ;;  %v1726_v25 = vmul.f32 %v3277_v47, %v3277_v47 }
 0x17e   : > { %v1740_v4 = vadd.f32 %v1739_v8, %v1726_v25 }
 0x17f   : > { %v1393_v0 = vpop.f32.mrf.mxu2  ;;  %v1310_v20 = vpop.f32.mrf.mxu0 }
 0x180   : > { %v1436_v13 = vpop.f32.mrf.mxu3  ;;  %v1311_v59 = vadd.f32 %v1310_v20, %v3162_v36  ;;  %v1353_v43 = vpop.f32.mrf.mxu1 }
 0x181   : > { %v3282_v58 = vadd.f32 %v1436_v13, %v1393_v0 }
 0x182   : > { %v3285_v52 = vadd.f32 %v1353_v43, %v1311_v59 }
 0x184   : > { %v1664_v15 = vsel %vm1663_vm0, %v3285_v52, 0.0  ;;  %v1728_v28 = vmul.f32 %v3285_v52, %v3285_v52 }
 0x185   : > { %v3291_v56 = vadd.f32 %v1664_v15, %v1662_v61 }
 0x186   : > { %v1741_v49 = vsel %vm1663_vm0, %v1728_v28, 0.0 }
 0x187   : > { %v1396_v30 = vpop.f32.mrf.mxu2  ;;  %v3294_v1 = vadd.f32 %v1741_v49, %v1740_v4  ;;  %v1312_v36 = vpop.f32.mrf.mxu0 }
 0x188   : > { %v1439_v9 = vpop.f32.mrf.mxu3  ;;  %v1355_v57 = vpop.f32.mrf.mxu1 }
 0x189   : > { %v3296_v32 = vadd.f32 %v1439_v9, %v1396_v30 }
 0x18f   : > { %v1398_v18 = vpop.f32.mrf.mxu2  ;;  %v1452_v55 = vpop.f32.mrf.mxu0 }
 0x190   : > { %v1441_v19 = vpop.f32.mrf.mxu3  ;;  %v1495_v35 = vpop.f32.mrf.mxu1  ;;  %v1453_v22 = vadd.f32 %v1452_v55, %v3171_v33 }
 0x192   : > { %v1496_v23 = vadd.f32 %v1495_v35, %v1453_v22 }
 0x197   : > { %v1538_v42 = vpop.f32.mrf.mxu2  ;;  %v1454_v27 = vpop.f32.mrf.mxu0 }
 0x198   : > { %v1539_v41 = vadd.f32 %v1538_v42, %v1496_v23  ;;  %v1581_v26 = vpop.f32.mrf.mxu3  ;;  %v1497_v53 = vpop.f32.mrf.mxu1  ;;  %v1455_v50 = vadd.f32 %v1454_v27, %v3176_v38 }
 0x19a   : > { %v1582_v39 = vadd.f32 %v1581_v26, %v1539_v41  ;;  %v1498_v33 = vadd.f32 %v1497_v53, %v1455_v50 }
 0x19c   : > { %v1615_v37 = vpack.c.bf16 %v1582_v39, %v3165_v54  ;;  %v1705_v38 = vmul.f32 %v1582_v39, %v1582_v39 }
 0x19e   : > { %1628 = vst [vmem:[%s3304_s30] sm:$0xff] %v1615_v37 }
 0x19f   : > { %v1540_v62 = vpop.f32.mrf.mxu2  ;;  %v1457_v5 = vpop.f32.mrf.mxu0 }
 0x1a0   : > { %v1541_v8 = vadd.f32 %v1540_v62, %v1498_v33  ;;  %v1583_v10 = vpop.f32.mrf.mxu3  ;;  %v1500_v45 = vpop.f32.mrf.mxu1  ;;  %v1458_v60 = vadd.f32 %v1457_v5, %v3193_v3 }
 0x1a2   : > { %v1584_v2 = vadd.f32 %v1583_v10, %v1541_v8  ;;  %v1501_v13 = vadd.f32 %v1500_v45, %v1458_v60 }
 0x1a4   : > { %v1616_v61 = vpack.c.bf16 %v1584_v2, %v3174_v29  ;;  %v1672_v25 = vadd.f32 %v1584_v2, %v1582_v39  ;;  %v1707_v4 = vmul.f32 %v1584_v2, %v1584_v2 }
 0x1a6   : > { %1629 = vst [vmem:[%s3304_s30 + $0x8] sm:$0xff] %v1616_v61  ;;  %v1749_v0 = vadd.f32 %v1707_v4, %v1705_v38 }
 0x1a7   : > { %v1543_v54 = vpop.f32.mrf.mxu2  ;;  %v1459_v43 = vpop.f32.mrf.mxu0 }
 0x1a8   : > { %v1544_v20 = vadd.f32 %v1543_v54, %v1501_v13  ;;  %v1586_v59 = vpop.f32.mrf.mxu3  ;;  %v1502_v15 = vpop.f32.mrf.mxu1  ;;  %v1460_v49 = vadd.f32 %v1459_v43, %v3202_v31 }
 0x1aa   : > { %v1587_v28 = vadd.f32 %v1586_v59, %v1544_v20  ;;  %v1503_v36 = vadd.f32 %v1502_v15, %v1460_v49 }
 0x1ac   : > { %v1617_v30 = vpack.c.bf16 %v1587_v28, %v3179_v48  ;;  %v1673_v3 = vadd.f32 %v1672_v25, %v1587_v28  ;;  %v1709_v9 = vmul.f32 %v1587_v28, %v1587_v28 }
 0x1ae   : > { %1630 = vst [vmem:[%s3304_s30 + $0x10] sm:$0xff] %v1617_v30  ;;  %v1750_v29 = vadd.f32 %v1749_v0, %v1709_v9 }
 0x1af   : > { %v1545_v57 = vpop.f32.mrf.mxu2  ;;  %v1462_v55 = vpop.f32.mrf.mxu0 }
 0x1b0   : > { %v1546_v18 = vadd.f32 %v1545_v57, %v1503_v36  ;;  %v1588_v19 = vpop.f32.mrf.mxu3  ;;  %v1505_v35 = vpop.f32.mrf.mxu1  ;;  %v1463_v23 = vadd.f32 %v1462_v55, %v3214_v40 }
 0x1b2   : > { %v1589_v22 = vadd.f32 %v1588_v19, %v1546_v18  ;;  %v1506_v26 = vadd.f32 %v1505_v35, %v1463_v23 }
 0x1b4   : > { %v1618_v42 = vpack.c.bf16 %v1589_v22, %v3197_v17  ;;  %v1674_v31 = vadd.f32 %v1673_v3, %v1589_v22  ;;  %v1711_v41 = vmul.f32 %v1589_v22, %v1589_v22 }
 0x1b6   : > { %1631 = vst [vmem:[%s3304_s30 + $0x18] sm:$0xff] %v1618_v42  ;;  %v1751_v48 = vadd.f32 %v1750_v29, %v1711_v41 }
 0x1b7   : > { %v1548_v27 = vpop.f32.mrf.mxu2  ;;  %v1464_v50 = vpop.f32.mrf.mxu0 }
 0x1b8   : > { %v1549_v53 = vadd.f32 %v1548_v27, %v1506_v26  ;;  %v1591_v39 = vpop.f32.mrf.mxu3  ;;  %v1507_v37 = vpop.f32.mrf.mxu1  ;;  %v1465_v62 = vadd.f32 %v1464_v50, %v3222_v6 }
 0x1ba   : > { %v1592_v33 = vadd.f32 %v1591_v39, %v1549_v53  ;;  %v1508_v5 = vadd.f32 %v1507_v37, %v1465_v62 }
 0x1bc   : > { %v1619_v8 = vpack.c.bf16 %v1592_v33, %v3205_v21  ;;  %v1675_v40 = vadd.f32 %v1674_v31, %v1592_v33  ;;  %v1713_v10 = vmul.f32 %v1592_v33, %v1592_v33 }
 0x1be   : > { %1632 = vst [vmem:[%s3304_s30 + $0x20] sm:$0xff] %v1619_v8  ;;  %v1752_v17 = vadd.f32 %v1751_v48, %v1713_v10  ;;  %v1645_v8 = vlaneseq }
 0x1bf   : > { %v1550_v45 = vpop.f32.mrf.mxu2  ;;  %v1467_v38 = vpop.f32.mrf.mxu0 }
 0x1c0   : > { %v1551_v2 = vadd.f32 %v1550_v45, %v1508_v5  ;;  %v1593_v60 = vpop.f32.mrf.mxu3  ;;  %v1510_v61 = vpop.f32.mrf.mxu1  ;;  %v1468_v4 = vadd.f32 %v1467_v38, %v3234_v12  ;;  %vm3343_vm1 = vcmp.lt.s32.totalorder %v1645_v8, 256  ;;  %v2669_v45 = vmov 0.0  }
 0x1c1   : > { %1649 = vst.msk [vmem:[%s3336_s8] sm:$0x3] %vm3343_vm1, %v2669_v45 }
 0x1c2   : > { %v1594_v25 = vadd.f32 %v1593_v60, %v1551_v2  ;;  %v1511_v54 = vadd.f32 %v1510_v61, %v1468_v4  ;;  %1650 = vst.msk [vmem:[%s3341_s11] sm:$0x3] %vm3343_vm1, %v2669_v45 }
 0x1c4   : > { %v1620_v0 = vpack.c.bf16 %v1594_v25, %v3217_v44  ;;  %v1676_v6 = vadd.f32 %v1675_v40, %v1594_v25  ;;  %v1715_v13 = vmul.f32 %v1594_v25, %v1594_v25 }
 0x1c6   : > { %1633 = vst [vmem:[%s3304_s30 + $0x28] sm:$0xff] %v1620_v0  ;;  %v1753_v21 = vadd.f32 %v1752_v17, %v1715_v13 }
 0x1c7   : > { %v1553_v20 = vpop.f32.mrf.mxu2  ;;  %v1469_v15 = vpop.f32.mrf.mxu0 }
 0x1c8   : > { %v1554_v59 = vadd.f32 %v1553_v20, %v1511_v54  ;;  %v1596_v43 = vpop.f32.mrf.mxu3  ;;  %v1512_v28 = vpop.f32.mrf.mxu1  ;;  %v1470_v30 = vadd.f32 %v1469_v15, %v3242_v24 }
 0x1ca   : > { %v1597_v49 = vadd.f32 %v1596_v43, %v1554_v59  ;;  %v1513_v29 = vadd.f32 %v1512_v28, %v1470_v30 }
 0x1cc   : > { %v1621_v3 = vpack.c.bf16 %v1597_v49, %v3225_v16  ;;  %v1677_v12 = vadd.f32 %v1676_v6, %v1597_v49  ;;  %v1717_v9 = vmul.f32 %v1597_v49, %v1597_v49 }
 0x1ce   : > { %1634 = vst [vmem:[%s3304_s30 + $0x30] sm:$0xff] %v1621_v3  ;;  %v1754_v44 = vadd.f32 %v1753_v21, %v1717_v9 }
 0x1cf   : > { %v1555_v36 = vpop.f32.mrf.mxu2  ;;  %v1472_v19 = vpop.f32.mrf.mxu0 }
 0x1d0   : > { %v1556_v57 = vadd.f32 %v1555_v36, %v1513_v29  ;;  %v1598_v18 = vpop.f32.mrf.mxu3  ;;  %v1515_v55 = vpop.f32.mrf.mxu1  ;;  %v1473_v22 = vadd.f32 %v1472_v19, %v3254_v34 }
 0x1d2   : > { %v1599_v35 = vadd.f32 %v1598_v18, %v1556_v57  ;;  %v1516_v31 = vadd.f32 %v1515_v55, %v1473_v22  ;;  %v1666_v55 = vrot.slane %v3291_v56, 4 }
 0x1d4   : > { %v1622_v23 = vpack.c.bf16 %v1599_v35, %v3237_v51  ;;  %v1678_v24 = vadd.f32 %v1677_v12, %v1599_v35  ;;  %v1719_v16 = vmul.f32 %v1599_v35, %v1599_v35 }
 0x1d6   : > { %1635 = vst [vmem:[%s3304_s30 + $0x38] sm:$0xff] %v1622_v23  ;;  %v1755_v42 = vadd.f32 %v1754_v44, %v1719_v16  ;;  %v1743_v16 = vrot.slane %v3294_v1, 4 }
 0x1d7   : > { %v1558_v41 = vpop.f32.mrf.mxu2  ;;  %v1474_v27 = vpop.f32.mrf.mxu0 }
 0x1d8   : > { %v1559_v48 = vadd.f32 %v1558_v41, %v1516_v31  ;;  %v1601_v26 = vpop.f32.mrf.mxu3  ;;  %v1517_v53 = vpop.f32.mrf.mxu1  ;;  %v1475_v50 = vadd.f32 %v1474_v27, %v3262_v46 }
 0x1da   : > { %v1602_v39 = vadd.f32 %v1601_v26, %v1559_v48  ;;  %v1518_v62 = vadd.f32 %v1517_v53, %v1475_v50  ;;  %v1744_v26 = vadd.f32 %v1743_v16, %v3294_v1 }
 0x1dc   : > { %v1623_v37 = vpack.c.bf16 %v1602_v39, %v3245_v7  ;;  %v1679_v34 = vadd.f32 %v1678_v24, %v1602_v39  ;;  %v1721_v33 = vmul.f32 %v1602_v39, %v1602_v39 }
 0x1de   : > { %1636 = vst [vmem:[%s3304_s30 + $0x40] sm:$0xff] %v1623_v37  ;;  %v1756_v51 = vadd.f32 %v1755_v42, %v1721_v33 }
 0x1df   : > { %v1560_v40 = vpop.f32.mrf.mxu2  ;;  %v1477_v10 = vpop.f32.mrf.mxu0 }
 0x1e0   : > { %v1561_v7 = vadd.f32 %v1560_v40, %v1518_v62  ;;  %v1603_v46 = vpop.f32.mrf.mxu3  ;;  %v1520_v5 = vpop.f32.mrf.mxu1  ;;  %v1478_v60 = vadd.f32 %v1477_v10, %v3274_v11 }
 0x1e2   : > { %v1604_v2 = vadd.f32 %v1603_v46, %v1561_v7  ;;  %v1521_v0 = vadd.f32 %v1520_v5, %v1478_v60 }
 0x1e4   : > { %v1624_v38 = vpack.c.bf16 %v1604_v2, %v3257_v14  ;;  %v1680_v61 = vadd.f32 %v1679_v34, %v1604_v2  ;;  %v1723_v25 = vmul.f32 %v1604_v2, %v1604_v2 }
 0x1e6   : > { %1637 = vst [vmem:[%s3304_s30 + $0x48] sm:$0xff] %v1624_v38  ;;  %v1757_v4 = vadd.f32 %v1756_v51, %v1723_v25  ;;  %v1745_v51 = vrot.slane %v1744_v26, 2  ;;  %v1651_v25 = vld [vmem:[%s3336_s8] sm:$0x3] }
 0x1e7   : > { %v1563_v6 = vpop.f32.mrf.mxu2  ;;  %v1479_v54 = vpop.f32.mrf.mxu0 }
 0x1e8   : > { %v1564_v13 = vadd.f32 %v1563_v6, %v1521_v0  ;;  %v1606_v21 = vpop.f32.mrf.mxu3  ;;  %v1522_v20 = vpop.f32.mrf.mxu1  ;;  %v1480_v43 = vadd.f32 %v1479_v54, %v3282_v58  ;;  %v1746_v7 = vadd.f32 %v1745_v51, %v1744_v26 }
 0x1ea   : > { %v1607_v59 = vadd.f32 %v1606_v21, %v1564_v13  ;;  %v1523_v49 = vadd.f32 %v1522_v20, %v1480_v43  ;;  %v1747_v2 = vrot.slane %v1746_v7, 1  ;;  %v1703_v21 = vld [vmem:[%s3341_s11] sm:$0x3] }
 0x1ec   : > { %v1625_v11 = vpack.c.bf16 %v1607_v59, %v3265_v63  ;;  %v1681_v15 = vadd.f32 %v1680_v61, %v1607_v59  ;;  %v1725_v28 = vmul.f32 %v1607_v59, %v1607_v59  ;;  %v1748_v6 = vadd.f32 %v1747_v2, %v1746_v7 }
 0x1ee   : > { %1638 = vst [vmem:[%s3304_s30 + $0x50] sm:$0xff] %v1625_v11  ;;  %v1758_v14 = vadd.f32 %v1757_v4, %v1725_v28 }
 0x1ef   : > { %v1565_v30 = vpop.f32.mrf.mxu2  ;;  %v1482_v9 = vpop.f32.mrf.mxu0 }
 0x1f0   : > { %v1566_v3 = vadd.f32 %v1565_v30, %v1523_v49  ;;  %v1608_v12 = vpop.f32.mrf.mxu3  ;;  %v1525_v44 = vpop.f32.mrf.mxu1  ;;  %v1483_v36 = vadd.f32 %v1482_v9, %v3296_v32  ;;  %v1667_v32 = vadd.f32 %v1666_v55, %v3291_v56 }
 0x1f2   : > { %v1609_v29 = vadd.f32 %v1608_v12, %v1566_v3  ;;  %v1526_v19 = vadd.f32 %v1525_v44, %v1483_v36  ;;  %v1668_v39 = vrot.slane %v1667_v32, 2 }
 0x1f4   : > { %v1626_v57 = vpack.c.bf16 %v1609_v29, %v3277_v47  ;;  %v1682_v18 = vadd.f32 %v1681_v15, %v1609_v29  ;;  %v1727_v58 = vmul.f32 %v1609_v29, %v1609_v29  ;;  %v1669_v8 = vadd.f32 %v1668_v39, %v1667_v32 }
 0x1f6   : > { %1639 = vst [vmem:[%s3304_s30 + $0x58] sm:$0xff] %v1626_v57  ;;  %v1759_v63 = vadd.f32 %v1758_v14, %v1727_v58  ;;  %v1670_v10 = vrot.slane %v1669_v8, 1 }
 0x1f7   : > { %v1568_v35 = vpop.f32.mrf.mxu2  ;;  %v1484_v24 = vpop.f32.mrf.mxu0 }
 0x1f8   : > { %v1569_v22 = vadd.f32 %v1568_v35, %v1526_v19  ;;  %v1611_v23 = vpop.f32.mrf.mxu3  ;;  %v1527_v42 = vpop.f32.mrf.mxu1  ;;  %v1671_v61 = vadd.f32 %v1670_v10, %v1669_v8 }
 0x1fa   : > { %v1612_v31 = vadd.f32 %v1611_v23, %v1569_v22 }
 0x1fc   : > { %v1627_v47 = vpack.c.bf16 %v1612_v31, %v3285_v52  ;;  %v1683_v41 = vsel %vm1663_vm0, %v1612_v31, 0.0  ;;  %v1729_v48 = vmul.f32 %v1612_v31, %v1612_v31 }
 0x1fd   : > { %v1684_v27 = vadd.f32 %v1683_v41, %v1682_v18 }
 0x1fe   : > { %1640 = vst [vmem:[%s3304_s30 + $0x60] sm:$0x11] %v1627_v47  ;;  %v1760_v53 = vsel %vm1663_vm0, %v1729_v48, 0.0 }
 0x1ff   : > { %v1685_v50 = vrot.slane %v1684_v27, 4  ;;  %v1761_v37 = vadd.f32 %v1760_v53, %v1759_v63  ;;  %v1570_v34 = vpop.f32.mrf.mxu2 }
 0x200   : > { %v1613_v33 = vpop.f32.mrf.mxu3 }
 0x201   : > { %v1686_v62 = vadd.f32 %v1685_v50, %v1684_v27  ;;  %v1762_v56 = vrot.slane %v1761_v37, 4 }
 0x203   : > { %v1687_v52 = vrot.slane %v1686_v62, 2  ;;  %v1763_v40 = vadd.f32 %v1762_v56, %v1761_v37 }
 0x205   : > { %v1688_v46 = vadd.f32 %v1687_v52, %v1686_v62  ;;  %v1764_v1 = vrot.slane %v1763_v40, 2 }
 0x207   : > { %v1689_v5 = vrot.slane %v1688_v46, 1  ;;  %v1765_v45 = vadd.f32 %v1764_v1, %v1763_v40 }
 0x209   : > { %v1690_v60 = vadd.f32 %v1689_v5, %v1688_v46  ;;  %v1766_v38 = vrot.slane %v1765_v45, 1 }
 0x20b   : > { %v1693_v4 = vrot.slane %v1690_v60, 7  ;;  %v1767_v0 = vadd.f32 %v1766_v38, %v1765_v45 }
 0x20d   : > { %v1695_v13 = vsel %vm1694_vm2, %v1671_v61, %v1693_v4  ;;  %v1770_v54 = vrot.slane %v1767_v0, 7 }
 0x20e   : > { %v1697_v20 = vadd.f32 %v1695_v13, %v1651_v25 }
 0x20f   : > { %v1771_v59 = vsel %vm1694_vm2, %v1748_v6, %v1770_v54 }
 0x210   : > { %1702 = vst.msk [vmem:[%s3336_s8] sm:$0x3] %vm3343_vm1, %v1697_v20  ;;  %v1773_v43 = vadd.f32 %v1771_v59, %v1703_v21 }
 0x212   : > { %1774 = vst.msk [vmem:[%s3341_s11] sm:$0x3] %vm3343_vm1, %v1773_v43 }
 0x213 PF: > { %s15_s17 = sadd.s32 1, %s2667_s17   ;;  %s3394_s15 = smov %s2663_s16 }
 0x214   : > { %p12_p5 = scmp.ge.s32.totalorder %s15_s17, 4   ;;  %s3395_s16 = smov %s3397_s18 }
 0x216   :  { %14 = sbr.rel (!%p12_p5) target bundleno = 2 (0x2), region = 89 }

// kernel: dc_generator_forward.6
= control target key start
LH: loop header
LB: loop body
LE: loop exit
PB: predicated region body
PF: predicated region fallthrough
CT: control target
= control target key end

     0   :  { %s5246_s15 = smov 0   ;;  %s5248_s16 = smov 0   ;;  %s7050_s0 = inlined_call_operand.vmem [shape: bf16[2,392,768], index: 0, kind: input, shape index: {}]   ;;  %s7051_s1 = inlined_call_operand.vmem [shape: bf16[2,768,256], index: 1, kind: input, shape index: {}]   ;;  %s7052_s2 = inlined_call_operand.vmem [shape: bf16[2,392,256], index: 2, kind: output, shape index: {0}]   ;;  %s7053_s3 = inlined_call_operand.vmem [shape: f32[2,1,256], index: 3, kind: output, shape index: {1}]   ;;  %s7054_s4 = inlined_call_operand.vmem [shape: f32[2,1,256], index: 4, kind: output, shape index: {2}]  }
   0x1   :  { %s5250_s17 = smov 0  }
   0x2 LB: > { %s27_s18 = sadd.s32 1, %s5214_s16  ;;  %p3960_p0 = scmp.ge.s32.totalorder %s5218_s17, 1  ;;  %s5218_s17 = sphi %s5250_s17, %s15_s17   ;;  %s5214_s16 = sphi %s5248_s16, %s7587_s16   ;;  %s5210_s15 = sphi %s5246_s15, %s7586_s15  }
   0x3   : > { %p29_p1 = scmp.ge.s32.totalorder %s27_s18, 2  ;;  %p199_p2 = scmp.lt.s32.totalorder %s5218_s17, 3 }
   0x5   : > { %s7589_s18 = smov (%p29_p1, %s27_s18), 0  ;;  %p200_p3 = pnand %p3960_p0, %p199_p2 }
   0x7   : > { %203 = sbr.rel (%p200_p3) target bundleno = 1396 (0x574), region = 28 }
   0xc   : > { %p249_p4 = scmp.lt.s32.totalorder %s5210_s15, 1  ;;  %vm3563_vm1 = vcmask 1040384  }
   0xe   : > { %s7591_s15 = smov (!%p249_p4, %s5210_s15), 1 }
   0xf   : > { %s5169_s19 = smul.u32 768, %s7591_s15  ;;  %s3964_s5 = sshll.u32 %s7591_s15, 1 }
  0x10   : > { %s5168_s23 = smul.u32 1176, %s7591_s15  ;;  %s7001_s8 = scalar_lea.vmem %s7053_s3, %s3964_s5 }
  0x11   : > { %s5270_s22 = scalar_lea.vmem %s7051_s1, %s5169_s19  ;;  %s5170_s27 = smul.u32 392, %s7591_s15 }
  0x12   : > { %v4600_v0 = vld [vmem:[%s5270_s22 + $0x70] sm:$0xf]  ;;  %v5087_v1 = vld [vmem:[%s5270_s22 + $0x74] sm:$0xf0]  ;;  %v4592_v11 = vld [vmem:[%s5270_s22 + $0x60] sm:$0xf]  ;;  %s5333_s26 = scalar_lea.vmem %s7050_s0, %s5168_s23  ;;  %s7006_s11 = scalar_lea.vmem %s7054_s4, %s3964_s5 }
  0x13   : > { %v4664_v2 = vld [vmem:[%s5270_s22 + $0xf0] sm:$0xf]  ;;  %v4601_v3 = vor.u32 %v5087_v1, %v4600_v0  ;;  %v5103_v4 = vld [vmem:[%s5270_s22 + $0xf4] sm:$0xf0]  ;;  %v5085_v13 = vld [vmem:[%s5270_s22 + $0x64] sm:$0xf0]  ;;  %s6797_s30 = scalar_lea.vmem %s7052_s2, %s5170_s27 }
  0x14   : > { %v4728_v5 = vld [vmem:[%s5270_s22 + $0x170] sm:$0xf]  ;;  %v5119_v6 = vld [vmem:[%s5270_s22 + $0x174] sm:$0xf0]  ;;  %v4665_v7 = vor.u32 %v5103_v4, %v4664_v2  ;;  %v4656_v14 = vld [vmem:[%s5270_s22 + $0xe0] sm:$0xf]  ;;  %v4593_v16 = vor.u32 %v5085_v13, %v4592_v11 }
  0x15   : > { %v4729_v8 = vor.u32 %v5119_v6, %v4728_v5  ;;  %v4792_v9 = vld [vmem:[%s5270_s22 + $0x1f0] sm:$0xf]  ;;  %v5135_v10 = vld [vmem:[%s5270_s22 + $0x1f4] sm:$0xf0]  ;;  %1747 = vmatpush.bf16.msra.mxu0 %v4601_v3  ;;  %v5101_v15 = vld [vmem:[%s5270_s22 + $0xe4] sm:$0xf0] }
  0x16   : > { %v4793_v12 = vor.u32 %v5135_v10, %v4792_v9  ;;  %1880 = vmatpush.bf16.msra.mxu1 %v4665_v7  ;;  %v4657_v17 = vor.u32 %v5101_v15, %v4656_v14  ;;  %v4720_v18 = vld [vmem:[%s5270_s22 + $0x160] sm:$0xf]  ;;  %v5117_v19 = vld [vmem:[%s5270_s22 + $0x164] sm:$0xf0]  ;;  %v4584_v23 = vld [vmem:[%s5270_s22 + $0x50] sm:$0xf] }
  0x17   : > { %2013 = vmatpush.bf16.msra.mxu2 %v4729_v8  ;;  %v4784_v20 = vld [vmem:[%s5270_s22 + $0x1e0] sm:$0xf]  ;;  %v4721_v21 = vor.u32 %v5117_v19, %v4720_v18  ;;  %v5133_v22 = vld [vmem:[%s5270_s22 + $0x1e4] sm:$0xf0]  ;;  %v5083_v24 = vld [vmem:[%s5270_s22 + $0x54] sm:$0xf0] }
  0x18   : > { %2146 = vmatpush.bf16.msra.mxu3 %v4793_v12  ;;  %v4785_v25 = vor.u32 %v5133_v22, %v4784_v20  ;;  %v4648_v26 = vld [vmem:[%s5270_s22 + $0xd0] sm:$0xf]  ;;  %v5099_v27 = vld [vmem:[%s5270_s22 + $0xd4] sm:$0xf0]  ;;  %v4585_v29 = vor.u32 %v5083_v24, %v4584_v23  ;;  %v4576_v35 = vld [vmem:[%s5270_s22 + $0x40] sm:$0xf] }
  0x19   : > { %v4712_v28 = vld [vmem:[%s5270_s22 + $0x150] sm:$0xf]  ;;  %1748 = vmatpush.bf16.msra.mxu0 %v4593_v16  ;;  %v5115_v30 = vld [vmem:[%s5270_s22 + $0x154] sm:$0xf0]  ;;  %v4649_v33 = vor.u32 %v5099_v27, %v4648_v26  ;;  %v5081_v36 = vld [vmem:[%s5270_s22 + $0x44] sm:$0xf0] }
  0x1a   : > { %v4776_v31 = vld [vmem:[%s5270_s22 + $0x1d0] sm:$0xf]  ;;  %v5131_v32 = vld [vmem:[%s5270_s22 + $0x1d4] sm:$0xf0]  ;;  %1881 = vmatpush.bf16.msra.mxu1 %v4657_v17  ;;  %v4713_v34 = vor.u32 %v5115_v30, %v4712_v28  ;;  %v4640_v37 = vld [vmem:[%s5270_s22 + $0xc0] sm:$0xf]  ;;  %v4577_v44 = vor.u32 %v5081_v36, %v4576_v35 }
  0x1b   : > { %2014 = vmatpush.bf16.msra.mxu2 %v4721_v21  ;;  %v4777_v38 = vor.u32 %v5131_v32, %v4776_v31  ;;  %v5097_v39 = vld [vmem:[%s5270_s22 + $0xc4] sm:$0xf0]  ;;  %v4704_v40 = vld [vmem:[%s5270_s22 + $0x140] sm:$0xf]  ;;  %v4568_v47 = vld [vmem:[%s5270_s22 + $0x30] sm:$0xf] }
  0x1c   : > { %2147 = vmatpush.bf16.msra.mxu3 %v4785_v25  ;;  %v5113_v41 = vld [vmem:[%s5270_s22 + $0x144] sm:$0xf0]  ;;  %v4768_v42 = vld [vmem:[%s5270_s22 + $0x1c0] sm:$0xf]  ;;  %v4641_v45 = vor.u32 %v5097_v39, %v4640_v37  ;;  %v5079_v48 = vld [vmem:[%s5270_s22 + $0x34] sm:$0xf0] }
  0x1d   : > { %v5129_v43 = vld [vmem:[%s5270_s22 + $0x1c4] sm:$0xf0]  ;;  %1749 = vmatpush.bf16.msra.mxu0 %v4585_v29  ;;  %v4705_v46 = vor.u32 %v5113_v41, %v4704_v40  ;;  %v4632_v49 = vld [vmem:[%s5270_s22 + $0xb0] sm:$0xf]  ;;  %v5095_v51 = vld [vmem:[%s5270_s22 + $0xb4] sm:$0xf0]  ;;  %v4569_v56 = vor.u32 %v5079_v48, %v4568_v47 }
  0x1e   : > { %1882 = vmatpush.bf16.msra.mxu1 %v4649_v33  ;;  %v4769_v50 = vor.u32 %v5129_v43, %v4768_v42  ;;  %v4696_v52 = vld [vmem:[%s5270_s22 + $0x130] sm:$0xf]  ;;  %v5111_v53 = vld [vmem:[%s5270_s22 + $0x134] sm:$0xf0]  ;;  %v4633_v57 = vor.u32 %v5095_v51, %v4632_v49  ;;  %v4560_v59 = vld [vmem:[%s5270_s22 + $0x20] sm:$0xf] }
  0x1f   : > { %2015 = vmatpush.bf16.msra.mxu2 %v4713_v34  ;;  %v4760_v54 = vld [vmem:[%s5270_s22 + $0x1b0] sm:$0xf]  ;;  %v5127_v55 = vld [vmem:[%s5270_s22 + $0x1b4] sm:$0xf0]  ;;  %v4697_v58 = vor.u32 %v5111_v53, %v4696_v52  ;;  %v5077_v60 = vld [vmem:[%s5270_s22 + $0x24] sm:$0xf0] }
  0x20   : > { %2148 = vmatpush.bf16.msra.mxu3 %v4777_v38  ;;  %v4624_v61 = vld [vmem:[%s5270_s22 + $0xa0] sm:$0xf]  ;;  %v4761_v62 = vor.u32 %v5127_v55, %v4760_v54  ;;  %v5093_v63 = vld [vmem:[%s5270_s22 + $0xa4] sm:$0xf0]  ;;  %v4561_v4 = vor.u32 %v5077_v60, %v4560_v59  ;;  %v4552_v7 = vld [vmem:[%s5270_s22 + $0x10] sm:$0xf] }
  0x21   : > { %1750 = vmatpush.bf16.msra.mxu0 %v4577_v44  ;;  %v4688_v0 = vld [vmem:[%s5270_s22 + $0x120] sm:$0xf]  ;;  %v5109_v1 = vld [vmem:[%s5270_s22 + $0x124] sm:$0xf0]  ;;  %v4625_v5 = vor.u32 %v5093_v63, %v4624_v61  ;;  %v5075_v8 = vld [vmem:[%s5270_s22 + $0x14] sm:$0xf0] }
  0x22   : > { %1883 = vmatpush.bf16.msra.mxu1 %v4641_v45  ;;  %v4752_v2 = vld [vmem:[%s5270_s22 + $0x1a0] sm:$0xf]  ;;  %v5125_v3 = vld [vmem:[%s5270_s22 + $0x1a4] sm:$0xf0]  ;;  %v4689_v6 = vor.u32 %v5109_v1, %v4688_v0  ;;  %v4616_v9 = vld [vmem:[%s5270_s22 + $0x90] sm:$0xf]  ;;  %v4553_v17 = vor.u32 %v5075_v8, %v4552_v7 }
  0x23   : > { %2016 = vmatpush.bf16.msra.mxu2 %v4705_v46  ;;  %v4753_v10 = vor.u32 %v5125_v3, %v4752_v2  ;;  %v5091_v11 = vld [vmem:[%s5270_s22 + $0x94] sm:$0xf0]  ;;  %v4680_v12 = vld [vmem:[%s5270_s22 + $0x110] sm:$0xf]  ;;  %v4544_v16 = vld [vmem:[%s5270_s22] sm:$0xf] }
  0x24   : > { %2149 = vmatpush.bf16.msra.mxu3 %v4769_v50  ;;  %v5107_v13 = vld [vmem:[%s5270_s22 + $0x114] sm:$0xf0]  ;;  %v4744_v14 = vld [vmem:[%s5270_s22 + $0x190] sm:$0xf]  ;;  %v5073_v18 = vld [vmem:[%s5270_s22 + $0x4] sm:$0xf0]  ;;  %v4617_v21 = vor.u32 %v5091_v11, %v4616_v9 }
  0x25   : > { %1751 = vmatpush.bf16.msra.mxu0 %v4569_v56  ;;  %v5123_v15 = vld [vmem:[%s5270_s22 + $0x194] sm:$0xf0]  ;;  %v4608_v19 = vld [vmem:[%s5270_s22 + $0x80] sm:$0xf]  ;;  %v5089_v20 = vld [vmem:[%s5270_s22 + $0x84] sm:$0xf0]  ;;  %v4681_v22 = vor.u32 %v5107_v13, %v4680_v12  ;;  %v4545_v33 = vor.u32 %v5073_v18, %v4544_v16 }
  0x26   : > { %1884 = vmatpush.bf16.msra.mxu1 %v4633_v57  ;;  %v4672_v23 = vld [vmem:[%s5270_s22 + $0x100] sm:$0xf]  ;;  %v5105_v24 = vld [vmem:[%s5270_s22 + $0x104] sm:$0xf0]  ;;  %v4745_v26 = vor.u32 %v5123_v15, %v4744_v14  ;;  %v4931_v29 = vld [vmem:[%s5333_s26 + $0x14] sm:$0xf0]  ;;  %v4609_v37 = vor.u32 %v5089_v20, %v4608_v19 }
  0x27   : > { %2017 = vmatpush.bf16.msra.mxu2 %v4697_v58  ;;  %v4736_v25 = vld [vmem:[%s5270_s22 + $0x180] sm:$0xf]  ;;  %v5121_v27 = vld [vmem:[%s5270_s22 + $0x184] sm:$0xf0]  ;;  %v4928_v30 = vld [vmem:[%s5333_s26 + $0x4] sm:$0xf]  ;;  %v4673_v38 = vor.u32 %v5105_v24, %v4672_v23 }
  0x28   : > { %2150 = vmatpush.bf16.msra.mxu3 %v4761_v62  ;;  %v3968_v28 = vld [vmem:[%s5333_s26] sm:$0xf]  ;;  %v5086_v31 = vld [vmem:[%s5270_s22 + $0x74] sm:$0xf]  ;;  %v4602_v32 = vld [vmem:[%s5270_s22 + $0x78] sm:$0xf0]  ;;  %v4737_v42 = vor.u32 %v5121_v27, %v4736_v25 }
  0x29   : > { %1752 = vmatpush.bf16.msra.mxu0 %v4561_v4  ;;  %v3970_v34 = vld [vmem:[%s5333_s26 + $0x18] sm:$0xf0]  ;;  %v5102_v35 = vld [vmem:[%s5270_s22 + $0xf4] sm:$0xf]  ;;  %v3976_v39 = vld [vmem:[%s5333_s26 + $0x8] sm:$0xf]  ;;  %v4605_v44 = vor.u32 %v5086_v31, %v4602_v32  ;;  %v5356_v47 = vor.u32 %v4931_v29, %v3968_v28 }
  0x2a   : > { %1885 = vmatpush.bf16.msra.mxu1 %v4625_v5  ;;  %v4666_v36 = vld [vmem:[%s5270_s22 + $0xf8] sm:$0xf0]  ;;  %v4932_v40 = vld [vmem:[%s5333_s26 + $0x1c] sm:$0xf0]  ;;  %v4929_v41 = vld [vmem:[%s5333_s26 + $0xc] sm:$0xf]  ;;  %v5360_v51 = vor.u32 %v4928_v30, %v3970_v34 }
  0x2b   : > { %2018 = vmatpush.bf16.msra.mxu2 %v4689_v6  ;;  %v3978_v43 = vld [vmem:[%s5333_s26 + $0x20] sm:$0xf0]  ;;  %v4856_v45 = vld [vmem:[%s5270_s22 + $0x270] sm:$0xf]  ;;  %v5151_v46 = vld [vmem:[%s5270_s22 + $0x274] sm:$0xf0]  ;;  %v4669_v48 = vor.u32 %v5102_v35, %v4666_v36  ;;  %v5362_v52 = vor.u32 %v4932_v40, %v3976_v39 }
  0x2c   : > { %2151 = vmatpush.bf16.msra.mxu3 %v4753_v10  ;;  %v4920_v49 = vld [vmem:[%s5270_s22 + $0x2f0] sm:$0xf]  ;;  %v5167_v50 = vld [vmem:[%s5270_s22 + $0x2f4] sm:$0xf0]  ;;  %v5364_v53 = vor.u32 %v4929_v41, %v3978_v43  ;;  %v4857_v54 = vor.u32 %v5151_v46, %v4856_v45  ;;  %v4937_v57 = vld [vmem:[%s5333_s26 + $0x44] sm:$0xf0] }
  0x2d   : > { %1753 = vmatpush.bf16.msra.mxu0 %v4553_v17  ;;  %7186 = vst [vmem:[#allocation2_spill] sm:$0xff] %v5362_v52  ;;  %v4921_v55 = vor.u32 %v5167_v50, %v4920_v49  ;;  %v3992_v56 = vld [vmem:[%s5333_s26 + $0x30] sm:$0xf]  ;;  %v4934_v58 = vld [vmem:[%s5333_s26 + $0x34] sm:$0xf] }
  0x2e   : > { %1886 = vmatpush.bf16.msra.mxu1 %v4617_v21  ;;  %7187 = vst [vmem:[#allocation3_spill] sm:$0xff] %v5364_v53  ;;  %v3994_v59 = vld [vmem:[%s5333_s26 + $0x48] sm:$0xf0]  ;;  %v4000_v60 = vld [vmem:[%s5333_s26 + $0x38] sm:$0xf]  ;;  %v5378_v0 = vor.u32 %v4937_v57, %v3992_v56 }
  0x2f   : > { %2019 = vmatpush.bf16.msra.mxu2 %v4681_v22  ;;  %v4938_v61 = vld [vmem:[%s5333_s26 + $0x4c] sm:$0xf0]  ;;  %v4935_v62 = vld [vmem:[%s5333_s26 + $0x3c] sm:$0xf]  ;;  %v4002_v63 = vld [vmem:[%s5333_s26 + $0x50] sm:$0xf0]  ;;  %v5380_v1 = vor.u32 %v4934_v58, %v3994_v59 }
  0x30   : > { %2152 = vmatpush.bf16.msra.mxu3 %v4745_v26  ;;  %v5382_v2 = vor.u32 %v4938_v61, %v4000_v60  ;;  %v5384_v3 = vor.u32 %v4935_v62, %v4002_v63  ;;  %v5084_v4 = vld [vmem:[%s5270_s22 + $0x64] sm:$0xf]  ;;  %v4594_v5 = vld [vmem:[%s5270_s22 + $0x68] sm:$0xf0]  ;;  %v4848_v6 = vld [vmem:[%s5270_s22 + $0x260] sm:$0xf] }
  0x31   : > { %1754 = vmatpush.bf16.msra.mxu0 %v4545_v33  ;;  %v4597_v7 = vor.u32 %v5084_v4, %v4594_v5  ;;  %v5149_v8 = vld [vmem:[%s5270_s22 + $0x264] sm:$0xf0]  ;;  %v5100_v9 = vld [vmem:[%s5270_s22 + $0xe4] sm:$0xf]  ;;  %v4658_v10 = vld [vmem:[%s5270_s22 + $0xe8] sm:$0xf0] }
  0x32   : > { %1887 = vmatpush.bf16.msra.mxu1 %v4609_v37  ;;  %7188 = vst [vmem:[#allocation4_spill] sm:$0xff] %v5382_v2  ;;  %v4849_v11 = vor.u32 %v5149_v8, %v4848_v6  ;;  %v4661_v12 = vor.u32 %v5100_v9, %v4658_v10  ;;  %v4912_v13 = vld [vmem:[%s5270_s22 + $0x2e0] sm:$0xf]  ;;  %v5165_v14 = vld [vmem:[%s5270_s22 + $0x2e4] sm:$0xf0] }
  0x33   : > { %2020 = vmatpush.bf16.msra.mxu2 %v4673_v38  ;;  %7189 = vst [vmem:[#allocation5_spill] sm:$0xff] %v5384_v3  ;;  %v4913_v15 = vor.u32 %v5165_v14, %v4912_v13  ;;  %v4016_v16 = vld [vmem:[%s5333_s26 + $0x60] sm:$0xf]  ;;  %v4943_v17 = vld [vmem:[%s5333_s26 + $0x74] sm:$0xf0] }
  0x34   : > { %2153 = vmatpush.bf16.msra.mxu3 %v4737_v42  ;;  %1755 = vmatmul.bf16.vlgmr.msra.gmra.mxu0 %v5356_v47  ;;  %v4940_v18 = vld [vmem:[%s5333_s26 + $0x64] sm:$0xf]  ;;  %v4018_v19 = vld [vmem:[%s5333_s26 + $0x78] sm:$0xf0]  ;;  %v4024_v20 = vld [vmem:[%s5333_s26 + $0x68] sm:$0xf]  ;;  %v5406_v24 = vor.u32 %v4943_v17, %v4016_v16 }
  0x35   : > { %1888 = vmatmul.bf16.vlgmr.msra.gmra.mxu1 %v5360_v51  ;;  %2279 = vmatpush.bf16.msrb.mxu0 %v4857_v54  ;;  %v4944_v21 = vld [vmem:[%s5333_s26 + $0x7c] sm:$0xf0]  ;;  %v4941_v22 = vld [vmem:[%s5333_s26 + $0x6c] sm:$0xf]  ;;  %v4026_v23 = vld [vmem:[%s5333_s26 + $0x80] sm:$0xf0]  ;;  %v5408_v25 = vor.u32 %v4940_v18, %v4018_v19 }
  0x36   : > { %2021 = vmatmul.bf16.vlgmr.msra.gmra.mxu2 %v5362_v52  ;;  %2412 = vmatpush.bf16.msrb.mxu1 %v4921_v55  ;;  %v5410_v26 = vor.u32 %v4944_v21, %v4024_v20  ;;  %v5412_v27 = vor.u32 %v4941_v22, %v4026_v23  ;;  %v4040_v28 = vld [vmem:[%s5333_s26 + $0x90] sm:$0xf]  ;;  %v4949_v29 = vld [vmem:[%s5333_s26 + $0xa4] sm:$0xf0]  ;;  %v4946_v30 = vld [vmem:[%s5333_s26 + $0x94] sm:$0xf] }
  0x37   : > { %2545 = vmatpush.bf16.msrb.mxu2 %v4605_v44  ;;  %2154 = vmatmul.bf16.vlgmr.msra.gmra.mxu3 %v5364_v53  ;;  %v4042_v31 = vld [vmem:[%s5333_s26 + $0xa8] sm:$0xf0]  ;;  %v4048_v32 = vld [vmem:[%s5333_s26 + $0x98] sm:$0xf]  ;;  %v4950_v33 = vld [vmem:[%s5333_s26 + $0xac] sm:$0xf0]  ;;  %v5426_v36 = vor.u32 %v4949_v29, %v4040_v28 }
  0x38   : > { %2678 = vmatpush.bf16.msrb.mxu3 %v4669_v48  ;;  %7190 = vst [vmem:[#allocation6_spill] sm:$0xff] %v5410_v26  ;;  %v4947_v34 = vld [vmem:[%s5333_s26 + $0x9c] sm:$0xf]  ;;  %v4050_v35 = vld [vmem:[%s5333_s26 + $0xb0] sm:$0xf0]  ;;  %v5428_v37 = vor.u32 %v4946_v30, %v4042_v31  ;;  %v5430_v38 = vor.u32 %v4950_v33, %v4048_v32 }
  0x39   : > { %2280 = vmatpush.bf16.msrb.mxu0 %v4849_v11  ;;  %7191 = vst [vmem:[#allocation7_spill] sm:$0xff] %v5412_v27  ;;  %v5432_v39 = vor.u32 %v4947_v34, %v4050_v35  ;;  %v4064_v40 = vld [vmem:[%s5333_s26 + $0xc0] sm:$0xf]  ;;  %v4955_v41 = vld [vmem:[%s5333_s26 + $0xd4] sm:$0xf0] }
  0x3a   : > { %2413 = vmatpush.bf16.msrb.mxu1 %v4913_v15  ;;  %7192 = vst [vmem:[#allocation8_spill] sm:$0xff] %v5430_v38  ;;  %v4952_v42 = vld [vmem:[%s5333_s26 + $0xc4] sm:$0xf]  ;;  %v4066_v43 = vld [vmem:[%s5333_s26 + $0xd8] sm:$0xf0]  ;;  %v5446_v49 = vor.u32 %v4955_v41, %v4064_v40 }
  0x3b   : > { %2546 = vmatpush.bf16.msrb.mxu2 %v4597_v7  ;;  %7193 = vst [vmem:[#allocation9_spill] sm:$0xff] %v5432_v39  ;;  %v4072_v44 = vld [vmem:[%s5333_s26 + $0xc8] sm:$0xf]  ;;  %v4956_v45 = vld [vmem:[%s5333_s26 + $0xdc] sm:$0xf0]  ;;  %v5448_v50 = vor.u32 %v4952_v42, %v4066_v43 }
  0x3c   : > { %2679 = vmatpush.bf16.msrb.mxu3 %v4661_v12  ;;  %v4953_v46 = vld [vmem:[%s5333_s26 + $0xcc] sm:$0xf]  ;;  %v4074_v48 = vld [vmem:[%s5333_s26 + $0xe0] sm:$0xf0]  ;;  %v5450_v54 = vor.u32 %v4956_v45, %v4072_v44  ;;  %v5082_v56 = vld [vmem:[%s5270_s22 + $0x54] sm:$0xf] }
  0x3d   : > { %v5452_v55 = vor.u32 %v4953_v46, %v4074_v48  ;;  %v4586_v57 = vld [vmem:[%s5270_s22 + $0x58] sm:$0xf0]  ;;  %v4840_v58 = vld [vmem:[%s5270_s22 + $0x250] sm:$0xf]  ;;  %v5147_v60 = vld [vmem:[%s5270_s22 + $0x254] sm:$0xf0] }
  0x3e   : > { %7194 = vst [vmem:[#allocation10_spill] sm:$0xff] %v5450_v54  ;;  %v4589_v59 = vor.u32 %v5082_v56, %v4586_v57  ;;  %v5098_v61 = vld [vmem:[%s5270_s22 + $0xd4] sm:$0xf]  ;;  %v4650_v62 = vld [vmem:[%s5270_s22 + $0xd8] sm:$0xf0]  ;;  %v4841_v63 = vor.u32 %v5147_v60, %v4840_v58 }
  0x3f   : > { %7195 = vst [vmem:[#allocation11_spill] sm:$0xff] %v5452_v55  ;;  %v4653_v4 = vor.u32 %v5098_v61, %v4650_v62  ;;  %v4904_v5 = vld [vmem:[%s5270_s22 + $0x2d0] sm:$0xf]  ;;  %v5163_v6 = vld [vmem:[%s5270_s22 + $0x2d4] sm:$0xf0] }
  0x40   : > { %2547 = vmatpush.bf16.msrb.mxu2 %v4589_v59  ;;  %v4905_v7 = vor.u32 %v5163_v6, %v4904_v5  ;;  %2281 = vmatpush.bf16.msrb.mxu0 %v4841_v63  ;;  %v4088_v8 = vld [vmem:[%s5333_s26 + $0xf0] sm:$0xf]  ;;  %v4961_v9 = vld [vmem:[%s5333_s26 + $0x104] sm:$0xf0]  ;;  %v4958_v10 = vld [vmem:[%s5333_s26 + $0xf4] sm:$0xf] }
  0x41   : > { %2680 = vmatpush.bf16.msrb.mxu3 %v4653_v4  ;;  %v4090_v11 = vld [vmem:[%s5333_s26 + $0x108] sm:$0xf0]  ;;  %v4096_v12 = vld [vmem:[%s5333_s26 + $0xf8] sm:$0xf]  ;;  %v4962_v13 = vld [vmem:[%s5333_s26 + $0x10c] sm:$0xf0]  ;;  %v5474_v16 = vor.u32 %v4961_v9, %v4088_v8 }
  0x42   : > { %2414 = vmatpush.bf16.msrb.mxu1 %v4905_v7  ;;  %v4959_v14 = vld [vmem:[%s5333_s26 + $0xfc] sm:$0xf]  ;;  %v4098_v15 = vld [vmem:[%s5333_s26 + $0x110] sm:$0xf0]  ;;  %v5476_v17 = vor.u32 %v4958_v10, %v4090_v11  ;;  %v5478_v18 = vor.u32 %v4962_v13, %v4096_v12  ;;  %v4112_v20 = vld [vmem:[%s5333_s26 + $0x120] sm:$0xf] }
  0x43   : > { %v5480_v19 = vor.u32 %v4959_v14, %v4098_v15  ;;  %v4967_v21 = vld [vmem:[%s5333_s26 + $0x134] sm:$0xf0]  ;;  %v4964_v22 = vld [vmem:[%s5333_s26 + $0x124] sm:$0xf]  ;;  %v4114_v23 = vld [vmem:[%s5333_s26 + $0x138] sm:$0xf0] }
  0x44   : > { %1760 = vmatmul.bf16.gmra.mxu0 %v5378_v0  ;;  %7196 = vst [vmem:[#allocation12_spill] sm:$0xff] %v5478_v18  ;;  %v4120_v28 = vld [vmem:[%s5333_s26 + $0x128] sm:$0xf]  ;;  %v4968_v29 = vld [vmem:[%s5333_s26 + $0x13c] sm:$0xf0]  ;;  %v5494_v32 = vor.u32 %v4967_v21, %v4112_v20  ;;  %v5496_v33 = vor.u32 %v4964_v22, %v4114_v23 }
  0x45   : > { %1893 = vmatmul.bf16.gmra.mxu1 %v5380_v1  ;;  %7197 = vst [vmem:[#allocation13_spill] sm:$0xff] %v5480_v19  ;;  %v4965_v30 = vld [vmem:[%s5333_s26 + $0x12c] sm:$0xf]  ;;  %v4122_v31 = vld [vmem:[%s5333_s26 + $0x140] sm:$0xf0]  ;;  %v5498_v34 = vor.u32 %v4968_v29, %v4120_v28 }
  0x46   : > { %2026 = vmatmul.bf16.gmra.mxu2 %v5382_v2  ;;  %v5500_v35 = vor.u32 %v4965_v30, %v4122_v31  ;;  %v4136_v40 = vld [vmem:[%s5333_s26 + $0x150] sm:$0xf]  ;;  %v4973_v41 = vld [vmem:[%s5333_s26 + $0x164] sm:$0xf0]  ;;  %v4970_v42 = vld [vmem:[%s5333_s26 + $0x154] sm:$0xf] }
  0x47   : > { %2159 = vmatmul.bf16.gmra.mxu3 %v5384_v3  ;;  %7198 = vst [vmem:[#allocation14_spill] sm:$0xff] %v5498_v34  ;;  %v4138_v43 = vld [vmem:[%s5333_s26 + $0x168] sm:$0xf0]  ;;  %v4144_v44 = vld [vmem:[%s5333_s26 + $0x158] sm:$0xf]  ;;  %v5514_v56 = vor.u32 %v4973_v41, %v4136_v40 }
  0x48   : > { %7199 = vst [vmem:[#allocation15_spill] sm:$0xff] %v5500_v35  ;;  %v4974_v45 = vld [vmem:[%s5333_s26 + $0x16c] sm:$0xf0]  ;;  %v4971_v46 = vld [vmem:[%s5333_s26 + $0x15c] sm:$0xf]  ;;  %v5516_v57 = vor.u32 %v4970_v42, %v4138_v43 }
  0x49   : > { %v4146_v48 = vld [vmem:[%s5333_s26 + $0x170] sm:$0xf0]  ;;  %v5518_v58 = vor.u32 %v4974_v45, %v4144_v44  ;;  %v4160_v60 = vld [vmem:[%s5333_s26 + $0x180] sm:$0xf]  ;;  %v4979_v61 = vld [vmem:[%s5333_s26 + $0x194] sm:$0xf0] }
  0x4a   : > { %v5520_v59 = vor.u32 %v4971_v46, %v4146_v48  ;;  %v5080_v62 = vld [vmem:[%s5270_s22 + $0x44] sm:$0xf]  ;;  %v4578_v63 = vld [vmem:[%s5270_s22 + $0x48] sm:$0xf0]  ;;  %v4832_v4 = vld [vmem:[%s5270_s22 + $0x240] sm:$0xf]  ;;  %v5542_v28 = vor.u32 %v4979_v61, %v4160_v60 }
  0x4b   : > { %7200 = vst [vmem:[#allocation16_spill] sm:$0xff] %v5518_v58  ;;  %v4581_v5 = vor.u32 %v5080_v62, %v4578_v63  ;;  %v5145_v6 = vld [vmem:[%s5270_s22 + $0x244] sm:$0xf0]  ;;  %v5096_v7 = vld [vmem:[%s5270_s22 + $0xc4] sm:$0xf] }
  0x4c   : > { %7201 = vst [vmem:[#allocation17_spill] sm:$0xff] %v5520_v59  ;;  %v4642_v8 = vld [vmem:[%s5270_s22 + $0xc8] sm:$0xf0]  ;;  %v4976_v9 = vld [vmem:[%s5333_s26 + $0x184] sm:$0xf]  ;;  %v4833_v10 = vor.u32 %v5145_v6, %v4832_v4 }
  0x4d   : > { %v4645_v11 = vor.u32 %v5096_v7, %v4642_v8  ;;  %v4896_v12 = vld [vmem:[%s5270_s22 + $0x2c0] sm:$0xf]  ;;  %v5161_v13 = vld [vmem:[%s5270_s22 + $0x2c4] sm:$0xf0]  ;;  %v4162_v14 = vld [vmem:[%s5333_s26 + $0x198] sm:$0xf0]  ;;  %2548 = vmatpush.bf16.msrb.mxu2 %v4581_v5 }
  0x4e   : > { %v4168_v15 = vld [vmem:[%s5333_s26 + $0x188] sm:$0xf]  ;;  %v4980_v20 = vld [vmem:[%s5333_s26 + $0x19c] sm:$0xf0]  ;;  %v4897_v21 = vor.u32 %v5161_v13, %v4896_v12  ;;  %v4977_v22 = vld [vmem:[%s5333_s26 + $0x18c] sm:$0xf]  ;;  %2282 = vmatpush.bf16.msrb.mxu0 %v4833_v10  ;;  %v5544_v30 = vor.u32 %v4976_v9, %v4162_v14 }
  0x4f   : > { %v4170_v23 = vld [vmem:[%s5333_s26 + $0x1a0] sm:$0xf0]  ;;  %2681 = vmatpush.bf16.msrb.mxu3 %v4645_v11  ;;  %v5546_v31 = vor.u32 %v4980_v20, %v4168_v15  ;;  %v4184_v62 = vld [vmem:[%s5333_s26 + $0x1b0] sm:$0xf]  ;;  %v4985_v63 = vld [vmem:[%s5333_s26 + $0x1c4] sm:$0xf0] }
  0x50   : > { %2415 = vmatpush.bf16.msrb.mxu1 %v4897_v21  ;;  %v5548_v41 = vor.u32 %v4977_v22, %v4170_v23  ;;  %v4982_v4 = vld [vmem:[%s5333_s26 + $0x1b4] sm:$0xf]  ;;  %v4186_v5 = vld [vmem:[%s5333_s26 + $0x1c8] sm:$0xf0]  ;;  %v4192_v6 = vld [vmem:[%s5333_s26 + $0x1b8] sm:$0xf]  ;;  %v5564_v11 = vor.u32 %v4985_v63, %v4184_v62 }
  0x51   : > { %7202 = vst [vmem:[#allocation18_spill] sm:$0xff] %v5546_v31  ;;  %v4986_v7 = vld [vmem:[%s5333_s26 + $0x1cc] sm:$0xf0]  ;;  %v4983_v8 = vld [vmem:[%s5333_s26 + $0x1bc] sm:$0xf]  ;;  %v5566_v15 = vor.u32 %v4982_v4, %v4186_v5 }
  0x52   : > { %7203 = vst [vmem:[#allocation19_spill] sm:$0xff] %v5548_v41  ;;  %v4194_v9 = vld [vmem:[%s5333_s26 + $0x1d0] sm:$0xf0]  ;;  %v5568_v20 = vor.u32 %v4986_v7, %v4192_v6  ;;  %v4991_v62 = vld [vmem:[%s5333_s26 + $0x1f4] sm:$0xf0] }
  0x53   : > { %v5570_v22 = vor.u32 %v4983_v8, %v4194_v9  ;;  %v4988_v63 = vld [vmem:[%s5333_s26 + $0x1e4] sm:$0xf]  ;;  %v4210_v4 = vld [vmem:[%s5333_s26 + $0x1f8] sm:$0xf0]  ;;  %v4216_v5 = vld [vmem:[%s5333_s26 + $0x1e8] sm:$0xf] }
  0x54   : > { %1765 = vmatmul.bf16.gmra.mxu0 %v5406_v24  ;;  %7204 = vst [vmem:[#allocation20_spill] sm:$0xff] %v5568_v20  ;;  %v4992_v6 = vld [vmem:[%s5333_s26 + $0x1fc] sm:$0xf0]  ;;  %v4989_v7 = vld [vmem:[%s5333_s26 + $0x1ec] sm:$0xf] }
  0x55   : > { %1898 = vmatmul.bf16.gmra.mxu1 %v5408_v25  ;;  %7205 = vst [vmem:[#allocation21_spill] sm:$0xff] %v5570_v22  ;;  %v4218_v8 = vld [vmem:[%s5333_s26 + $0x200] sm:$0xf0]  ;;  %v5141_v3 = vld [vmem:[%s5270_s22 + $0x224] sm:$0xf0] }
  0x56   : > { %2031 = vmatmul.bf16.gmra.mxu2 %v5410_v26  ;;  %v4816_v26 = vld [vmem:[%s5270_s22 + $0x220] sm:$0xf]  ;;  %v5092_v2 = vld [vmem:[%s5270_s22 + $0xa4] sm:$0xf] }
  0x57   : > { %2164 = vmatmul.bf16.gmra.mxu3 %v5412_v27  ;;  %v4362_v52 = vld [vmem:[%s5333_s26 + $0x320] sm:$0xf0] }
  0x64   : > { %1770 = vmatmul.bf16.gmra.mxu0 %v5426_v36 }
  0x65   : > { %1903 = vmatmul.bf16.gmra.mxu1 %v5428_v37 }
  0x66   : > { %2036 = vmatmul.bf16.gmra.mxu2 %v5430_v38 }
  0x67   : > { %2169 = vmatmul.bf16.gmra.mxu3 %v5432_v39 }
  0x74   : > { %1775 = vmatmul.bf16.gmra.mxu0 %v5446_v49 }
  0x75   : > { %1908 = vmatmul.bf16.gmra.mxu1 %v5448_v50 }
  0x76   : > { %2041 = vmatmul.bf16.gmra.mxu2 %v5450_v54 }
  0x77   : > { %2174 = vmatmul.bf16.gmra.mxu3 %v5452_v55 }
  0x84   : > { %1780 = vmatmul.bf16.gmra.mxu0 %v5474_v16 }
  0x85   : > { %1913 = vmatmul.bf16.gmra.mxu1 %v5476_v17 }
  0x86   : > { %2046 = vmatmul.bf16.gmra.mxu2 %v5478_v18 }
  0x87   : > { %2179 = vmatmul.bf16.gmra.mxu3 %v5480_v19 }
  0x94   : > { %1785 = vmatmul.bf16.gmra.mxu0 %v5494_v32 }
  0x95   : > { %1918 = vmatmul.bf16.gmra.mxu1 %v5496_v33 }
  0x96   : > { %2051 = vmatmul.bf16.gmra.mxu2 %v5498_v34  ;;  %v4290_v34 = vld [vmem:[%s5333_s26 + $0x290] sm:$0xf0] }
  0x97   : > { %2184 = vmatmul.bf16.gmra.mxu3 %v5500_v35 }
  0xa4   : > { %1790 = vmatmul.bf16.gmra.mxu0 %v5514_v56 }
  0xa5   : > { %1923 = vmatmul.bf16.gmra.mxu1 %v5516_v57 }
  0xa6   : > { %2056 = vmatmul.bf16.gmra.mxu2 %v5518_v58  ;;  %v4888_v58 = vld [vmem:[%s5270_s22 + $0x2b0] sm:$0xf] }
  0xa7   : > { %2189 = vmatmul.bf16.gmra.mxu3 %v5520_v59 }
  0xb1   : > { %v1756_v29 = vpop.f32.mrf.mxu0 }
  0xb2   : > { %v1889_v40 = vpop.f32.mrf.mxu1 }
  0xb3   : > { %v1890_v42 = vadd.f32 %v1889_v40, %v1756_v29 }
  0xb4   : > { %1795 = vmatmul.bf16.gmra.mxu0 %v5542_v28 }
  0xb5   : > { %1928 = vmatmul.bf16.gmra.mxu1 %v5544_v30 }
  0xb6   : > { %2061 = vmatmul.bf16.gmra.mxu2 %v5546_v31 }
  0xb7   : > { %2194 = vmatmul.bf16.gmra.mxu3 %v5548_v41 }
  0xb9   : > { %v2022_v43 = vpop.f32.mrf.mxu2  ;;  %v1758_v46 = vpop.f32.mrf.mxu0 }
  0xba   : > { %v2023_v44 = vadd.f32 %v2022_v43, %v1890_v42  ;;  %v2155_v45 = vpop.f32.mrf.mxu3  ;;  %v1891_v48 = vpop.f32.mrf.mxu1 }
  0xbb   : > { %v1892_v61 = vadd.f32 %v1891_v48, %v1758_v46 }
  0xbc   : > { %v5554_v60 = vadd.f32 %v2155_v45, %v2023_v44 }
  0xc1   : > { %v2024_v10 = vpop.f32.mrf.mxu2  ;;  %v1761_v14 = vpop.f32.mrf.mxu0 }
  0xc2   : > { %v2025_v12 = vadd.f32 %v2024_v10, %v1892_v61  ;;  %v2157_v13 = vpop.f32.mrf.mxu3  ;;  %v1894_v21 = vpop.f32.mrf.mxu1  ;;  %v4208_v61 = vld [vmem:[%s5333_s26 + $0x1e0] sm:$0xf] }
  0xc3   : > { %v1895_v29 = vadd.f32 %v1894_v21, %v1761_v14  ;;  %v5588_v10 = vor.u32 %v4991_v62, %v4208_v61  ;;  %v5590_v21 = vor.u32 %v4988_v63, %v4210_v4 }
  0xc4   : > { %v5572_v23 = vadd.f32 %v2157_v13, %v2025_v12  ;;  %1800 = vmatmul.bf16.gmra.mxu0 %v5564_v11 }
  0xc5   : > { %1933 = vmatmul.bf16.gmra.mxu1 %v5566_v15 }
  0xc6   : > { %2066 = vmatmul.bf16.gmra.mxu2 %v5568_v20  ;;  %v4240_v20 = vld [vmem:[%s5333_s26 + $0x218] sm:$0xf] }
  0xc7   : > { %2199 = vmatmul.bf16.gmra.mxu3 %v5570_v22  ;;  %v4234_v22 = vld [vmem:[%s5333_s26 + $0x228] sm:$0xf0] }
  0xc9   : > { %v2027_v40 = vpop.f32.mrf.mxu2  ;;  %v1763_v44 = vpop.f32.mrf.mxu0 }
  0xca   : > { %v2028_v42 = vadd.f32 %v2027_v40, %v1895_v29  ;;  %v2160_v43 = vpop.f32.mrf.mxu3  ;;  %v1896_v45 = vpop.f32.mrf.mxu1  ;;  %v5592_v29 = vor.u32 %v4992_v6, %v4216_v5  ;;  %v5078_v6 = vld [vmem:[%s5270_s22 + $0x34] sm:$0xf] }
  0xcb   : > { %v1897_v48 = vadd.f32 %v1896_v45, %v1763_v44 }
  0xcc   : > { %v5578_v46 = vadd.f32 %v2160_v43, %v2028_v42  ;;  %7206 = vst [vmem:[#allocation22_spill] sm:$0xff] %v5592_v29  ;;  %v5594_v42 = vor.u32 %v4989_v7, %v4218_v8  ;;  %v4570_v7 = vld [vmem:[%s5270_s22 + $0x38] sm:$0xf0]  ;;  %v4824_v8 = vld [vmem:[%s5270_s22 + $0x230] sm:$0xf] }
  0xce   : > { %7207 = vst [vmem:[#allocation23_spill] sm:$0xff] %v5594_v42 }
  0xd1   : > { %v2029_v9 = vpop.f32.mrf.mxu2  ;;  %v1766_v14 = vpop.f32.mrf.mxu0 }
  0xd2   : > { %v2030_v12 = vadd.f32 %v2029_v9, %v1897_v48  ;;  %v2162_v13 = vpop.f32.mrf.mxu3  ;;  %v1899_v40 = vpop.f32.mrf.mxu1  ;;  %v4573_v9 = vor.u32 %v5078_v6, %v4570_v7 }
  0xd3   : > { %v1900_v44 = vadd.f32 %v1899_v40, %v1766_v14  ;;  %v4634_v14 = vld [vmem:[%s5270_s22 + $0xb8] sm:$0xf0]  ;;  %v4232_v40 = vld [vmem:[%s5333_s26 + $0x210] sm:$0xf] }
  0xd4   : > { %v5596_v43 = vadd.f32 %v2162_v13, %v2030_v12  ;;  %1805 = vmatmul.bf16.gmra.mxu0 %v5588_v10  ;;  %v5143_v12 = vld [vmem:[%s5270_s22 + $0x234] sm:$0xf0]  ;;  %v5094_v13 = vld [vmem:[%s5270_s22 + $0xb4] sm:$0xf]  ;;  %2549 = vmatpush.bf16.msrb.mxu2 %v4573_v9 }
  0xd5   : > { %1938 = vmatmul.bf16.gmra.mxu1 %v5590_v21 }
  0xd6   : > { %2071 = vmatmul.bf16.gmra.mxu2 %v5592_v29  ;;  %v4637_v29 = vor.u32 %v5094_v13, %v4634_v14 }
  0xd7   : > { %2204 = vmatmul.bf16.gmra.mxu3 %v5594_v42  ;;  %v4825_v42 = vor.u32 %v5143_v12, %v4824_v8 }
  0xd8   : > { %2682 = vmatpush.bf16.msrb.mxu3 %v4637_v29  ;;  %v5159_v29 = vld [vmem:[%s5270_s22 + $0x2b4] sm:$0xf0] }
  0xd9   : > { %v2032_v45 = vpop.f32.mrf.mxu2  ;;  %v1768_v62 = vpop.f32.mrf.mxu0  ;;  %2283 = vmatpush.bf16.msrb.mxu0 %v4825_v42  ;;  %v4889_v42 = vor.u32 %v5159_v29, %v4888_v58  ;;  %v4256_v58 = vld [vmem:[%s5333_s26 + $0x240] sm:$0xf] }
  0xda   : > { %v2033_v48 = vadd.f32 %v2032_v45, %v1900_v44  ;;  %v2165_v61 = vpop.f32.mrf.mxu3  ;;  %v1901_v63 = vpop.f32.mrf.mxu1  ;;  %v4997_v44 = vld [vmem:[%s5333_s26 + $0x224] sm:$0xf0]  ;;  %v4994_v45 = vld [vmem:[%s5333_s26 + $0x214] sm:$0xf] }
  0xdb   : > { %v1902_v5 = vadd.f32 %v1901_v63, %v1768_v62  ;;  %v4242_v62 = vld [vmem:[%s5333_s26 + $0x230] sm:$0xf0]  ;;  %v5618_v6 = vor.u32 %v4997_v44, %v4232_v40  ;;  %v5620_v59 = vor.u32 %v4994_v45, %v4234_v22  ;;  %2416 = vmatpush.bf16.msrb.mxu1 %v4889_v42  ;;  %v5003_v45 = vld [vmem:[%s5333_s26 + $0x254] sm:$0xf0] }
  0xdc   : > { %v5602_v4 = vadd.f32 %v2165_v61, %v2033_v48  ;;  %v4998_v48 = vld [vmem:[%s5333_s26 + $0x22c] sm:$0xf0]  ;;  %v4995_v61 = vld [vmem:[%s5333_s26 + $0x21c] sm:$0xf] }
  0xdd   : > { %v5622_v8 = vor.u32 %v4998_v48, %v4240_v20  ;;  %v5624_v13 = vor.u32 %v4995_v61, %v4242_v62  ;;  %v5000_v48 = vld [vmem:[%s5333_s26 + $0x244] sm:$0xf]  ;;  %v4258_v61 = vld [vmem:[%s5333_s26 + $0x258] sm:$0xf0]  ;;  %v4264_v62 = vld [vmem:[%s5333_s26 + $0x248] sm:$0xf] }
  0xdf   : > { %7208 = vst [vmem:[#allocation24_spill] sm:$0xff] %v5622_v8 }
  0xe0   : > { %7209 = vst [vmem:[#allocation25_spill] sm:$0xff] %v5624_v13 }
  0xe1   : > { %v2034_v63 = vpop.f32.mrf.mxu2  ;;  %v1771_v31 = vpop.f32.mrf.mxu0 }
  0xe2   : > { %v2035_v7 = vadd.f32 %v2034_v63, %v1902_v5  ;;  %v2167_v41 = vpop.f32.mrf.mxu3  ;;  %v1904_v12 = vpop.f32.mrf.mxu1  ;;  %v5004_v63 = vld [vmem:[%s5333_s26 + $0x25c] sm:$0xf0] }
  0xe3   : > { %v1905_v14 = vadd.f32 %v1904_v12, %v1771_v31  ;;  %v4266_v12 = vld [vmem:[%s5333_s26 + $0x260] sm:$0xf0]  ;;  %v5648_v35 = vor.u32 %v5004_v63, %v4264_v62  ;;  %v4280_v63 = vld [vmem:[%s5333_s26 + $0x270] sm:$0xf] }
  0xe4   : > { %v5626_v9 = vadd.f32 %v2167_v41, %v2035_v7  ;;  %1810 = vmatmul.bf16.gmra.mxu0 %v5618_v6  ;;  %v5001_v7 = vld [vmem:[%s5333_s26 + $0x24c] sm:$0xf] }
  0xe5   : > { %1943 = vmatmul.bf16.gmra.mxu1 %v5620_v59  ;;  %7210 = vst [vmem:[#allocation26_spill] sm:$0xff] %v5648_v35 }
  0xe6   : > { %2076 = vmatmul.bf16.gmra.mxu2 %v5622_v8 }
  0xe7   : > { %2209 = vmatmul.bf16.gmra.mxu3 %v5624_v13  ;;  %v5644_v13 = vor.u32 %v5003_v45, %v4256_v58 }
  0xe9   : > { %v2037_v31 = vpop.f32.mrf.mxu2  ;;  %v1773_v22 = vpop.f32.mrf.mxu0 }
  0xea   : > { %v2038_v41 = vadd.f32 %v2037_v31, %v1905_v14  ;;  %v2170_v20 = vpop.f32.mrf.mxu3  ;;  %v1906_v5 = vpop.f32.mrf.mxu1  ;;  %v5646_v31 = vor.u32 %v5000_v48, %v4258_v61 }
  0xeb   : > { %v1907_v44 = vadd.f32 %v1906_v5, %v1773_v22 }
  0xec   : > { %v5634_v40 = vadd.f32 %v2170_v20, %v2038_v41  ;;  %v5650_v20 = vor.u32 %v5001_v7, %v4266_v12  ;;  %v5009_v7 = vld [vmem:[%s5333_s26 + $0x284] sm:$0xf0]  ;;  %v5006_v12 = vld [vmem:[%s5333_s26 + $0x274] sm:$0xf] }
  0xed   : > { %v5668_v19 = vor.u32 %v5009_v7, %v4280_v63 }
  0xee   : > { %7211 = vst [vmem:[#allocation27_spill] sm:$0xff] %v5650_v20 }
  0xf1   : > { %v2039_v29 = vpop.f32.mrf.mxu2  ;;  %v1776_v14 = vpop.f32.mrf.mxu0 }
  0xf2   : > { %v2040_v42 = vadd.f32 %v2039_v29, %v1907_v44  ;;  %v2172_v8 = vpop.f32.mrf.mxu3  ;;  %v1909_v41 = vpop.f32.mrf.mxu1  ;;  %v4282_v29 = vld [vmem:[%s5333_s26 + $0x288] sm:$0xf0] }
  0xf3   : > { %v1910_v5 = vadd.f32 %v1909_v41, %v1776_v14  ;;  %v5010_v14 = vld [vmem:[%s5333_s26 + $0x28c] sm:$0xf0]  ;;  %v5007_v41 = vld [vmem:[%s5333_s26 + $0x27c] sm:$0xf] }
  0xf4   : > { %v5652_v22 = vadd.f32 %v2172_v8, %v2040_v42  ;;  %1815 = vmatmul.bf16.gmra.mxu0 %v5644_v13  ;;  %v4288_v42 = vld [vmem:[%s5333_s26 + $0x278] sm:$0xf] }
  0xf5   : > { %1948 = vmatmul.bf16.gmra.mxu1 %v5646_v31  ;;  %v5672_v55 = vor.u32 %v5010_v14, %v4288_v42  ;;  %v4304_v14 = vld [vmem:[%s5333_s26 + $0x2a0] sm:$0xf] }
  0xf6   : > { %2081 = vmatmul.bf16.gmra.mxu2 %v5648_v35 }
  0xf7   : > { %2214 = vmatmul.bf16.gmra.mxu3 %v5650_v20  ;;  %7212 = vst [vmem:[#allocation28_spill] sm:$0xff] %v5672_v55 }
  0xf9   : > { %v2042_v44 = vpop.f32.mrf.mxu2  ;;  %v1778_v48 = vpop.f32.mrf.mxu0 }
  0xfa   : > { %v2043_v58 = vadd.f32 %v2042_v44, %v1910_v5  ;;  %v2175_v45 = vpop.f32.mrf.mxu3  ;;  %v1911_v8 = vpop.f32.mrf.mxu1  ;;  %v5670_v44 = vor.u32 %v5006_v12, %v4282_v29  ;;  %v5076_v12 = vld [vmem:[%s5270_s22 + $0x24] sm:$0xf]  ;;  %v4562_v29 = vld [vmem:[%s5270_s22 + $0x28] sm:$0xf0] }
  0xfb   : > { %v1912_v62 = vadd.f32 %v1911_v8, %v1778_v48  ;;  %v4565_v42 = vor.u32 %v5076_v12, %v4562_v29 }
  0xfc   : > { %v5658_v61 = vadd.f32 %v2175_v45, %v2043_v58  ;;  %v5674_v45 = vor.u32 %v5007_v41, %v4290_v34  ;;  %v5015_v41 = vld [vmem:[%s5333_s26 + $0x2b4] sm:$0xf0] }
  0xfd   : > { %2550 = vmatpush.bf16.msrb.mxu2 %v4565_v42 }
  0xfe   : > { %7213 = vst [vmem:[#allocation29_spill] sm:$0xff] %v5674_v45 }
 0x101   : > { %v2044_v35 = vpop.f32.mrf.mxu2  ;;  %v1781_v5 = vpop.f32.mrf.mxu0 }
 0x102   : > { %v2045_v20 = vadd.f32 %v2044_v35, %v1912_v62  ;;  %v2177_v18 = vpop.f32.mrf.mxu3  ;;  %v1914_v58 = vpop.f32.mrf.mxu1 }
 0x103   : > { %v1915_v8 = vadd.f32 %v1914_v58, %v1781_v5  ;;  %v5012_v5 = vld [vmem:[%s5333_s26 + $0x2a4] sm:$0xf]  ;;  %v4306_v58 = vld [vmem:[%s5333_s26 + $0x2b8] sm:$0xf0] }
 0x104   : > { %v5676_v48 = vadd.f32 %v2177_v18, %v2045_v20  ;;  %1820 = vmatmul.bf16.gmra.mxu0 %v5668_v19  ;;  %v5696_v12 = vor.u32 %v5012_v5, %v4306_v58 }
 0x105   : > { %1953 = vmatmul.bf16.gmra.mxu1 %v5670_v44 }
 0x106   : > { %2086 = vmatmul.bf16.gmra.mxu2 %v5672_v55  ;;  %v4312_v55 = vld [vmem:[%s5333_s26 + $0x2a8] sm:$0xf]  ;;  %7215 = vst [vmem:[#allocation31_spill] sm:$0xff] %v5696_v12 }
 0x107   : > { %2219 = vmatmul.bf16.gmra.mxu3 %v5674_v45  ;;  %v5016_v45 = vld [vmem:[%s5333_s26 + $0x2bc] sm:$0xf0] }
 0x108   : > { %v5698_v29 = vor.u32 %v5016_v45, %v4312_v55 }
 0x109   : > { %v2047_v35 = vpop.f32.mrf.mxu2  ;;  %v1783_v20 = vpop.f32.mrf.mxu0 }
 0x10a   : > { %v2048_v34 = vadd.f32 %v2047_v35, %v1915_v8  ;;  %v2180_v18 = vpop.f32.mrf.mxu3  ;;  %v1916_v62 = vpop.f32.mrf.mxu1  ;;  %v5013_v8 = vld [vmem:[%s5333_s26 + $0x2ac] sm:$0xf]  ;;  %v4314_v35 = vld [vmem:[%s5333_s26 + $0x2c0] sm:$0xf0]  ;;  %7216 = vst [vmem:[#allocation32_spill] sm:$0xff] %v5698_v29 }
 0x10b   : > { %v1917_v7 = vadd.f32 %v1916_v62, %v1783_v20  ;;  %v5700_v38 = vor.u32 %v5013_v8, %v4314_v35 }
 0x10c   : > { %v5682_v63 = vadd.f32 %v2180_v18, %v2048_v34  ;;  %v5694_v34 = vor.u32 %v5015_v41, %v4304_v14  ;;  %v4817_v14 = vor.u32 %v5141_v3, %v4816_v26  ;;  %v5157_v41 = vld [vmem:[%s5270_s22 + $0x2a4] sm:$0xf0] }
 0x10d   : > { %7217 = vst [vmem:[#allocation33_spill] sm:$0xff] %v5700_v38 }
 0x10e   : > { %7214 = vst [vmem:[#allocation30_spill] sm:$0xff] %v5694_v34  ;;  %2284 = vmatpush.bf16.msrb.mxu0 %v4817_v14  ;;  %v4338_v14 = vld [vmem:[%s5333_s26 + $0x2f0] sm:$0xf0] }
 0x111   : > { %v2049_v54 = vpop.f32.mrf.mxu2  ;;  %v1786_v62 = vpop.f32.mrf.mxu0 }
 0x112   : > { %v2050_v18 = vadd.f32 %v2049_v54, %v1917_v7  ;;  %v2182_v20 = vpop.f32.mrf.mxu3  ;;  %v1919_v39 = vpop.f32.mrf.mxu1  ;;  %v4626_v54 = vld [vmem:[%s5270_s22 + $0xa8] sm:$0xf0]  ;;  %v4880_v7 = vld [vmem:[%s5270_s22 + $0x2a0] sm:$0xf] }
 0x113   : > { %v1920_v27 = vadd.f32 %v1919_v39, %v1786_v62  ;;  %v4629_v55 = vor.u32 %v5092_v2, %v4626_v54  ;;  %v4881_v45 = vor.u32 %v5157_v41, %v4880_v7  ;;  %v4328_v2 = vld [vmem:[%s5333_s26 + $0x2d0] sm:$0xf]  ;;  %v4330_v62 = vld [vmem:[%s5333_s26 + $0x2e8] sm:$0xf0]  ;;  %v4336_v54 = vld [vmem:[%s5333_s26 + $0x2d8] sm:$0xf] }
 0x114   : > { %v5702_v42 = vadd.f32 %v2182_v20, %v2050_v18  ;;  %1825 = vmatmul.bf16.gmra.mxu0 %v5694_v34  ;;  %v5021_v18 = vld [vmem:[%s5333_s26 + $0x2e4] sm:$0xf0]  ;;  %v5018_v20 = vld [vmem:[%s5333_s26 + $0x2d4] sm:$0xf]  ;;  %v5022_v7 = vld [vmem:[%s5333_s26 + $0x2ec] sm:$0xf0] }
 0x115   : > { %1958 = vmatmul.bf16.gmra.mxu1 %v5696_v12  ;;  %2683 = vmatpush.bf16.msrb.mxu3 %v4629_v55  ;;  %v5019_v41 = vld [vmem:[%s5333_s26 + $0x2dc] sm:$0xf]  ;;  %v5724_v55 = vor.u32 %v5021_v18, %v4328_v2  ;;  %v5728_v53 = vor.u32 %v5022_v7, %v4336_v54  ;;  %v4352_v54 = vld [vmem:[%s5333_s26 + $0x300] sm:$0xf]  ;;  %v5027_v7 = vld [vmem:[%s5333_s26 + $0x314] sm:$0xf0] }
 0x116   : > { %2091 = vmatmul.bf16.gmra.mxu2 %v5698_v29  ;;  %2417 = vmatpush.bf16.msrb.mxu1 %v4881_v45  ;;  %v4554_v12 = vld [vmem:[%s5270_s22 + $0x18] sm:$0xf0] }
 0x117   : > { %2224 = vmatmul.bf16.gmra.mxu3 %v5700_v38  ;;  %7218 = vst [vmem:[#allocation34_spill] sm:$0xff] %v5724_v55 }
 0x118   : > { %7220 = vst [vmem:[#allocation36_spill] sm:$0xff] %v5728_v53 }
 0x119   : > { %v2052_v3 = vpop.f32.mrf.mxu2  ;;  %v1788_v5 = vpop.f32.mrf.mxu0 }
 0x11a   : > { %v2053_v26 = vadd.f32 %v2052_v3, %v1920_v27  ;;  %v2185_v39 = vpop.f32.mrf.mxu3  ;;  %v1921_v58 = vpop.f32.mrf.mxu1  ;;  %v5726_v3 = vor.u32 %v5018_v20, %v4330_v62 }
 0x11b   : > { %v1922_v35 = vadd.f32 %v1921_v58, %v1788_v5 }
 0x11c   : > { %v5714_v8 = vadd.f32 %v2185_v39, %v2053_v26  ;;  %7219 = vst [vmem:[#allocation35_spill] sm:$0xff] %v5726_v3  ;;  %v5730_v39 = vor.u32 %v5019_v41, %v4338_v14  ;;  %v5024_v41 = vld [vmem:[%s5333_s26 + $0x304] sm:$0xf]  ;;  %v4354_v14 = vld [vmem:[%s5333_s26 + $0x318] sm:$0xf0] }
 0x11e   : > { %7221 = vst [vmem:[#allocation37_spill] sm:$0xff] %v5730_v39 }
 0x121   : > { %v2054_v38 = vpop.f32.mrf.mxu2  ;;  %v1791_v27 = vpop.f32.mrf.mxu0 }
 0x122   : > { %v2055_v45 = vadd.f32 %v2054_v38, %v1922_v35  ;;  %v2187_v29 = vpop.f32.mrf.mxu3  ;;  %v1924_v26 = vpop.f32.mrf.mxu1 }
 0x123   : > { %v1925_v58 = vadd.f32 %v1924_v26, %v1791_v27  ;;  %v5028_v27 = vld [vmem:[%s5333_s26 + $0x31c] sm:$0xf0]  ;;  %v5025_v26 = vld [vmem:[%s5333_s26 + $0x30c] sm:$0xf] }
 0x124   : > { %v5732_v5 = vadd.f32 %v2187_v29, %v2055_v45  ;;  %1830 = vmatmul.bf16.gmra.mxu0 %v5724_v55  ;;  %v4360_v45 = vld [vmem:[%s5333_s26 + $0x308] sm:$0xf] }
 0x125   : > { %1963 = vmatmul.bf16.gmra.mxu1 %v5726_v3  ;;  %v5748_v3 = vor.u32 %v5027_v7, %v4352_v54 }
 0x126   : > { %7222 = vst [vmem:[#allocation38_spill] sm:$0xff] %v5732_v5  ;;  %2096 = vmatmul.bf16.gmra.mxu2 %v5728_v53  ;;  %v5752_v5 = vor.u32 %v5028_v27, %v4360_v45  ;;  %v5030_v45 = vld [vmem:[%s5333_s26 + $0x334] sm:$0xf]  ;;  %v4378_v27 = vld [vmem:[%s5333_s26 + $0x348] sm:$0xf0] }
 0x127   : > { %2229 = vmatmul.bf16.gmra.mxu3 %v5730_v39  ;;  %7224 = vst [vmem:[#allocation40_spill] sm:$0xff] %v5748_v3 }
 0x128   : > { %7226 = vst [vmem:[#allocation42_spill] sm:$0xff] %v5752_v5 }
 0x129   : > { %v2057_v38 = vpop.f32.mrf.mxu2  ;;  %v1793_v18 = vpop.f32.mrf.mxu0 }
 0x12a   : > { %v2058_v35 = vadd.f32 %v2057_v38, %v1925_v58  ;;  %v2190_v2 = vpop.f32.mrf.mxu3  ;;  %v1926_v29 = vpop.f32.mrf.mxu1  ;;  %v5750_v38 = vor.u32 %v5024_v41, %v4354_v14  ;;  %v4376_v41 = vld [vmem:[%s5333_s26 + $0x330] sm:$0xf]  ;;  %v5033_v14 = vld [vmem:[%s5333_s26 + $0x344] sm:$0xf0] }
 0x12b   : > { %v1927_v62 = vadd.f32 %v1926_v29, %v1793_v18 }
 0x12c   : > { %v5738_v20 = vadd.f32 %v2190_v2, %v2058_v35  ;;  %7225 = vst [vmem:[#allocation41_spill] sm:$0xff] %v5750_v38  ;;  %v5754_v2 = vor.u32 %v5025_v26, %v4362_v52  ;;  %v4384_v26 = vld [vmem:[%s5333_s26 + $0x338] sm:$0xf] }
 0x12e   : > { %7223 = vst [vmem:[#allocation39_spill] sm:$0xff] %v5738_v20  ;;  %v5074_v20 = vld [vmem:[%s5270_s22 + $0x14] sm:$0xf] }
 0x12f   : > { %7227 = vst [vmem:[#allocation43_spill] sm:$0xff] %v5754_v2 }
 0x131   : > { %v2059_v53 = vpop.f32.mrf.mxu2  ;;  %v1796_v58 = vpop.f32.mrf.mxu0 }
 0x132   : > { %v2060_v39 = vadd.f32 %v2059_v53, %v1927_v62  ;;  %v2192_v55 = vpop.f32.mrf.mxu3  ;;  %v1929_v35 = vpop.f32.mrf.mxu1 }
 0x133   : > { %v1930_v29 = vadd.f32 %v1929_v35, %v1796_v58  ;;  %v5034_v58 = vld [vmem:[%s5333_s26 + $0x34c] sm:$0xf0]  ;;  %v5031_v35 = vld [vmem:[%s5333_s26 + $0x33c] sm:$0xf] }
 0x134   : > { %v5756_v18 = vadd.f32 %v2192_v55, %v2060_v39  ;;  %1835 = vmatmul.bf16.gmra.mxu0 %v5748_v3 }
 0x135   : > { %1968 = vmatmul.bf16.gmra.mxu1 %v5750_v38 }
 0x136   : > { %7228 = vst [vmem:[#allocation44_spill] sm:$0xff] %v5756_v18  ;;  %2101 = vmatmul.bf16.gmra.mxu2 %v5752_v5  ;;  %v4386_v5 = vld [vmem:[%s5333_s26 + $0x350] sm:$0xf0] }
 0x137   : > { %2234 = vmatmul.bf16.gmra.mxu3 %v5754_v2  ;;  %v5778_v3 = vor.u32 %v5031_v35, %v4386_v5 }
 0x139   : > { %v2062_v53 = vpop.f32.mrf.mxu2  ;;  %v1798_v54 = vpop.f32.mrf.mxu0  ;;  %7233 = vst [vmem:[#allocation49_spill] sm:$0xff] %v5778_v3 }
 0x13a   : > { %v2063_v52 = vadd.f32 %v2062_v53, %v1930_v29  ;;  %v2195_v62 = vpop.f32.mrf.mxu3  ;;  %v1931_v55 = vpop.f32.mrf.mxu1  ;;  %v5772_v29 = vor.u32 %v5033_v14, %v4376_v41  ;;  %v4808_v41 = vld [vmem:[%s5270_s22 + $0x210] sm:$0xf]  ;;  %v5090_v14 = vld [vmem:[%s5270_s22 + $0x94] sm:$0xf] }
 0x13b   : > { %v1932_v7 = vadd.f32 %v1931_v55, %v1798_v54  ;;  %v5774_v54 = vor.u32 %v5030_v45, %v4378_v27  ;;  %v5776_v55 = vor.u32 %v5034_v58, %v4384_v26  ;;  %v4618_v45 = vld [vmem:[%s5270_s22 + $0x98] sm:$0xf0] }
 0x13c   : > { %v5762_v39 = vadd.f32 %v2195_v62, %v2063_v52  ;;  %7230 = vst [vmem:[#allocation46_spill] sm:$0xff] %v5772_v29  ;;  %v4621_v27 = vor.u32 %v5090_v14, %v4618_v45  ;;  %v5036_v14 = vld [vmem:[%s5333_s26 + $0x364] sm:$0xf]  ;;  %v4402_v45 = vld [vmem:[%s5333_s26 + $0x378] sm:$0xf0] }
 0x13d   : > { %7231 = vst [vmem:[#allocation47_spill] sm:$0xff] %v5774_v54 }
 0x13e   : > { %7229 = vst [vmem:[#allocation45_spill] sm:$0xff] %v5762_v39  ;;  %2684 = vmatpush.bf16.msrb.mxu3 %v4621_v27  ;;  %v5040_v27 = vld [vmem:[%s5333_s26 + $0x37c] sm:$0xf0] }
 0x13f   : > { %7232 = vst [vmem:[#allocation48_spill] sm:$0xff] %v5776_v55 }
 0x141   : > { %v2064_v2 = vpop.f32.mrf.mxu2  ;;  %v1801_v62 = vpop.f32.mrf.mxu0 }
 0x142   : > { %v2065_v53 = vadd.f32 %v2064_v2, %v1932_v7  ;;  %v2197_v52 = vpop.f32.mrf.mxu3  ;;  %v1934_v38 = vpop.f32.mrf.mxu1  ;;  %v4557_v2 = vor.u32 %v5074_v20, %v4554_v12  ;;  %v5139_v7 = vld [vmem:[%s5270_s22 + $0x214] sm:$0xf0]  ;;  %v4872_v12 = vld [vmem:[%s5270_s22 + $0x290] sm:$0xf] }
 0x143   : > { %v1935_v18 = vadd.f32 %v1934_v38, %v1801_v62  ;;  %v4809_v5 = vor.u32 %v5139_v7, %v4808_v41  ;;  %v5155_v38 = vld [vmem:[%s5270_s22 + $0x294] sm:$0xf0] }
 0x144   : > { %v5780_v39 = vadd.f32 %v2197_v52, %v2065_v53  ;;  %1840 = vmatmul.bf16.gmra.mxu0 %v5772_v29  ;;  %2551 = vmatpush.bf16.msrb.mxu2 %v4557_v2  ;;  %v4873_v53 = vor.u32 %v5155_v38, %v4872_v12  ;;  %v4400_v2 = vld [vmem:[%s5333_s26 + $0x360] sm:$0xf]  ;;  %v5039_v7 = vld [vmem:[%s5333_s26 + $0x374] sm:$0xf0]  ;;  %v5806_v12 = vor.u32 %v5036_v14, %v4402_v45  ;;  %v5045_v14 = vld [vmem:[%s5333_s26 + $0x3a4] sm:$0xf0] }
 0x145   : > { %1973 = vmatmul.bf16.gmra.mxu1 %v5774_v54  ;;  %2285 = vmatpush.bf16.msrb.mxu0 %v4809_v5  ;;  %v4408_v5 = vld [vmem:[%s5333_s26 + $0x368] sm:$0xf]  ;;  %v5804_v29 = vor.u32 %v5039_v7, %v4400_v2  ;;  %v4424_v7 = vld [vmem:[%s5333_s26 + $0x390] sm:$0xf]  ;;  %v5042_v45 = vld [vmem:[%s5333_s26 + $0x394] sm:$0xf] }
 0x146   : > { %7234 = vst [vmem:[#allocation50_spill] sm:$0xff] %v5780_v39  ;;  %2106 = vmatmul.bf16.gmra.mxu2 %v5776_v55  ;;  %2418 = vmatpush.bf16.msrb.mxu1 %v4873_v53  ;;  %v4410_v55 = vld [vmem:[%s5333_s26 + $0x380] sm:$0xf0]  ;;  %v5808_v38 = vor.u32 %v5040_v27, %v4408_v5  ;;  %v4426_v5 = vld [vmem:[%s5333_s26 + $0x3a8] sm:$0xf0] }
 0x147   : > { %2239 = vmatmul.bf16.gmra.mxu3 %v5778_v3  ;;  %v5037_v3 = vld [vmem:[%s5333_s26 + $0x36c] sm:$0xf]  ;;  %7236 = vst [vmem:[#allocation52_spill] sm:$0xff] %v5804_v29  ;;  %v4432_v27 = vld [vmem:[%s5333_s26 + $0x398] sm:$0xf] }
 0x148   : > { %7237 = vst [vmem:[#allocation53_spill] sm:$0xff] %v5806_v12 }
 0x149   : > { %v2067_v20 = vpop.f32.mrf.mxu2  ;;  %v1803_v35 = vpop.f32.mrf.mxu0  ;;  %7238 = vst [vmem:[#allocation54_spill] sm:$0xff] %v5808_v38 }
 0x14a   : > { %v2068_v26 = vadd.f32 %v2067_v20, %v1935_v18  ;;  %v2200_v58 = vpop.f32.mrf.mxu3  ;;  %v1936_v52 = vpop.f32.mrf.mxu1 }
 0x14b   : > { %v1937_v41 = vadd.f32 %v1936_v52, %v1803_v35 }
 0x14c   : > { %v5794_v62 = vadd.f32 %v2200_v58, %v2068_v26  ;;  %v5810_v58 = vor.u32 %v5037_v3, %v4410_v55 }
 0x14e   : > { %7235 = vst [vmem:[#allocation51_spill] sm:$0xff] %v5794_v62 }
 0x14f   : > { %7239 = vst [vmem:[#allocation55_spill] sm:$0xff] %v5810_v58 }
 0x151   : > { %v2069_v54 = vpop.f32.mrf.mxu2  ;;  %v1806_v39 = vpop.f32.mrf.mxu0 }
 0x152   : > { %v2070_v18 = vadd.f32 %v2069_v54, %v1937_v41  ;;  %v2202_v20 = vpop.f32.mrf.mxu3  ;;  %v1939_v26 = vpop.f32.mrf.mxu1 }
 0x153   : > { %v1940_v53 = vadd.f32 %v1939_v26, %v1806_v39  ;;  %v4434_v26 = vld [vmem:[%s5333_s26 + $0x3b0] sm:$0xf0] }
 0x154   : > { %v5812_v35 = vadd.f32 %v2202_v20, %v2070_v18  ;;  %1845 = vmatmul.bf16.gmra.mxu0 %v5804_v29  ;;  %v5046_v18 = vld [vmem:[%s5333_s26 + $0x3ac] sm:$0xf0]  ;;  %v5043_v20 = vld [vmem:[%s5333_s26 + $0x39c] sm:$0xf] }
 0x155   : > { %1978 = vmatmul.bf16.gmra.mxu1 %v5806_v12  ;;  %v5828_v12 = vor.u32 %v5045_v14, %v4424_v7 }
 0x156   : > { %7240 = vst [vmem:[#allocation56_spill] sm:$0xff] %v5812_v35  ;;  %2111 = vmatmul.bf16.gmra.mxu2 %v5808_v38  ;;  %v5832_v35 = vor.u32 %v5046_v18, %v4432_v27  ;;  %v5051_v27 = vld [vmem:[%s5333_s26 + $0x3d4] sm:$0xf0]  ;;  %v5048_v18 = vld [vmem:[%s5333_s26 + $0x3c4] sm:$0xf] }
 0x157   : > { %2244 = vmatmul.bf16.gmra.mxu3 %v5810_v58  ;;  %7242 = vst [vmem:[#allocation58_spill] sm:$0xff] %v5828_v12 }
 0x158   : > { %7244 = vst [vmem:[#allocation60_spill] sm:$0xff] %v5832_v35 }
 0x159   : > { %v2072_v54 = vpop.f32.mrf.mxu2  ;;  %v1808_v52 = vpop.f32.mrf.mxu0 }
 0x15a   : > { %v2073_v3 = vadd.f32 %v2072_v54, %v1940_v53  ;;  %v2205_v55 = vpop.f32.mrf.mxu3  ;;  %v1941_v41 = vpop.f32.mrf.mxu1  ;;  %v5830_v54 = vor.u32 %v5042_v45, %v4426_v5  ;;  %v4448_v5 = vld [vmem:[%s5333_s26 + $0x3c0] sm:$0xf] }
 0x15b   : > { %v1942_v39 = vadd.f32 %v1941_v41, %v1808_v52 }
 0x15c   : > { %v5818_v2 = vadd.f32 %v2205_v55, %v2073_v3  ;;  %7243 = vst [vmem:[#allocation59_spill] sm:$0xff] %v5830_v54  ;;  %v5834_v55 = vor.u32 %v5043_v20, %v4434_v26  ;;  %v4450_v20 = vld [vmem:[%s5333_s26 + $0x3d8] sm:$0xf0]  ;;  %v4456_v26 = vld [vmem:[%s5333_s26 + $0x3c8] sm:$0xf] }
 0x15e   : > { %7241 = vst [vmem:[#allocation57_spill] sm:$0xff] %v5818_v2 }
 0x15f   : > { %7245 = vst [vmem:[#allocation61_spill] sm:$0xff] %v5834_v55 }
 0x161   : > { %v2074_v38 = vpop.f32.mrf.mxu2  ;;  %v1811_v53 = vpop.f32.mrf.mxu0 }
 0x162   : > { %v2075_v58 = vadd.f32 %v2074_v38, %v1942_v39  ;;  %v2207_v29 = vpop.f32.mrf.mxu3  ;;  %v1944_v3 = vpop.f32.mrf.mxu1 }
 0x163   : > { %v1945_v41 = vadd.f32 %v1944_v3, %v1811_v53  ;;  %v5052_v53 = vld [vmem:[%s5333_s26 + $0x3dc] sm:$0xf0]  ;;  %v5049_v3 = vld [vmem:[%s5333_s26 + $0x3cc] sm:$0xf] }
 0x164   : > { %v5836_v52 = vadd.f32 %v2207_v29, %v2075_v58  ;;  %1850 = vmatmul.bf16.gmra.mxu0 %v5828_v12 }
 0x165   : > { %1983 = vmatmul.bf16.gmra.mxu1 %v5830_v54 }
 0x166   : > { %7246 = vst [vmem:[#allocation62_spill] sm:$0xff] %v5836_v52  ;;  %2116 = vmatmul.bf16.gmra.mxu2 %v5832_v35  ;;  %v4458_v35 = vld [vmem:[%s5333_s26 + $0x3e0] sm:$0xf0] }
 0x167   : > { %2249 = vmatmul.bf16.gmra.mxu3 %v5834_v55  ;;  %v5852_v55 = vor.u32 %v5051_v27, %v4448_v5  ;;  %v5072_v5 = vld [vmem:[%s5270_s22 + $0x4] sm:$0xf]  ;;  %v4800_v27 = vld [vmem:[%s5270_s22 + $0x200] sm:$0xf] }
 0x169   : > { %v2077_v38 = vpop.f32.mrf.mxu2  ;;  %v1813_v14 = vpop.f32.mrf.mxu0  ;;  %7248 = vst [vmem:[#allocation64_spill] sm:$0xff] %v5852_v55 }
 0x16a   : > { %v2078_v39 = vadd.f32 %v2077_v38, %v1945_v41  ;;  %v2210_v7 = vpop.f32.mrf.mxu3  ;;  %v1946_v29 = vpop.f32.mrf.mxu1 }
 0x16b   : > { %v1947_v45 = vadd.f32 %v1946_v29, %v1813_v14  ;;  %v5858_v29 = vor.u32 %v5049_v3, %v4458_v35  ;;  %v5137_v35 = vld [vmem:[%s5270_s22 + $0x204] sm:$0xf0] }
 0x16c   : > { %v5842_v58 = vadd.f32 %v2210_v7, %v2078_v39  ;;  %v5854_v39 = vor.u32 %v5048_v18, %v4450_v20  ;;  %v5856_v7 = vor.u32 %v5052_v53, %v4456_v26  ;;  %v4801_v18 = vor.u32 %v5137_v35, %v4800_v27  ;;  %v5088_v20 = vld [vmem:[%s5270_s22 + $0x84] sm:$0xf]  ;;  %v4610_v26 = vld [vmem:[%s5270_s22 + $0x88] sm:$0xf0] }
 0x16d   : > { %7251 = vst [vmem:[#allocation67_spill] sm:$0xff] %v5858_v29  ;;  %v4613_v3 = vor.u32 %v5088_v20, %v4610_v26  ;;  %v4474_v20 = vld [vmem:[%s5333_s26 + $0x408] sm:$0xf0]  ;;  %v4480_v26 = vld [vmem:[%s5333_s26 + $0x3f8] sm:$0xf] }
 0x16e   : > { %7247 = vst [vmem:[#allocation63_spill] sm:$0xff] %v5842_v58  ;;  %2286 = vmatpush.bf16.msrb.mxu0 %v4801_v18 }
 0x16f   : > { %7249 = vst [vmem:[#allocation65_spill] sm:$0xff] %v5854_v39  ;;  %2685 = vmatpush.bf16.msrb.mxu3 %v4613_v3 }
 0x170   : > { %7250 = vst [vmem:[#allocation66_spill] sm:$0xff] %v5856_v7 }
 0x171   : > { %v2079_v54 = vpop.f32.mrf.mxu2  ;;  %v1816_v12 = vpop.f32.mrf.mxu0 }
 0x172   : > { %v2080_v41 = vadd.f32 %v2079_v54, %v1947_v45  ;;  %v2212_v38 = vpop.f32.mrf.mxu3  ;;  %v1949_v14 = vpop.f32.mrf.mxu1  ;;  %v4546_v54 = vld [vmem:[%s5270_s22 + $0x8] sm:$0xf0] }
 0x173   : > { %v1950_v52 = vadd.f32 %v1949_v14, %v1816_v12  ;;  %v4549_v45 = vor.u32 %v5072_v5, %v4546_v54  ;;  %v4864_v12 = vld [vmem:[%s5270_s22 + $0x280] sm:$0xf] }
 0x174   : > { %v5860_v58 = vadd.f32 %v2212_v38, %v2080_v41  ;;  %1855 = vmatmul.bf16.gmra.mxu0 %v5852_v55  ;;  %v5153_v41 = vld [vmem:[%s5270_s22 + $0x284] sm:$0xf0]  ;;  %v5058_v55 = vld [vmem:[%s5333_s26 + $0x40c] sm:$0xf0] }
 0x175   : > { %1988 = vmatmul.bf16.gmra.mxu1 %v5854_v39  ;;  %2552 = vmatpush.bf16.msrb.mxu2 %v4549_v45  ;;  %v4865_v54 = vor.u32 %v5153_v41, %v4864_v12  ;;  %v5054_v39 = vld [vmem:[%s5333_s26 + $0x3f4] sm:$0xf]  ;;  %v5888_v3 = vor.u32 %v5058_v55, %v4480_v26  ;;  %v5060_v26 = vld [vmem:[%s5333_s26 + $0x424] sm:$0xf] }
 0x176   : > { %7252 = vst [vmem:[#allocation68_spill] sm:$0xff] %v5860_v58  ;;  %2121 = vmatmul.bf16.gmra.mxu2 %v5856_v7  ;;  %v5057_v7 = vld [vmem:[%s5333_s26 + $0x404] sm:$0xf0]  ;;  %v5055_v58 = vld [vmem:[%s5333_s26 + $0x3fc] sm:$0xf]  ;;  %v5886_v41 = vor.u32 %v5054_v39, %v4474_v20 }
 0x177   : > { %2254 = vmatmul.bf16.gmra.mxu3 %v5858_v29  ;;  %2419 = vmatpush.bf16.msrb.mxu1 %v4865_v54  ;;  %v4472_v29 = vld [vmem:[%s5333_s26 + $0x3f0] sm:$0xf]  ;;  %7256 = vst [vmem:[#allocation72_spill] sm:$0xff] %v5888_v3  ;;  %v5063_v20 = vld [vmem:[%s5333_s26 + $0x434] sm:$0xf0] }
 0x178   : > { %v5884_v2 = vor.u32 %v5057_v7, %v4472_v29  ;;  %7255 = vst [vmem:[#allocation71_spill] sm:$0xff] %v5886_v41 }
 0x179   : > { %v2082_v53 = vpop.f32.mrf.mxu2  ;;  %v1818_v5 = vpop.f32.mrf.mxu0 }
 0x17a   : > { %v2083_v38 = vadd.f32 %v2082_v53, %v1950_v52  ;;  %v2215_v14 = vpop.f32.mrf.mxu3  ;;  %v1951_v45 = vpop.f32.mrf.mxu1  ;;  %v4482_v52 = vld [vmem:[%s5333_s26 + $0x410] sm:$0xf0]  ;;  %7254 = vst [vmem:[#allocation70_spill] sm:$0xff] %v5884_v2 }
 0x17b   : > { %v1952_v35 = vadd.f32 %v1951_v45, %v1818_v5 }
 0x17c   : > { %v5874_v27 = vadd.f32 %v2215_v14, %v2083_v38  ;;  %v5890_v14 = vor.u32 %v5055_v58, %v4482_v52  ;;  %v4498_v52 = vld [vmem:[%s5333_s26 + $0x438] sm:$0xf0] }
 0x17e   : > { %7253 = vst [vmem:[#allocation69_spill] sm:$0xff] %v5874_v27 }
 0x17f   : > { %7257 = vst [vmem:[#allocation73_spill] sm:$0xff] %v5890_v14 }
 0x181   : > { %v2084_v53 = vpop.f32.mrf.mxu2  ;;  %v1821_v12 = vpop.f32.mrf.mxu0 }
 0x182   : > { %v2085_v62 = vadd.f32 %v2084_v53, %v1952_v35  ;;  %v2217_v18 = vpop.f32.mrf.mxu3  ;;  %v1954_v38 = vpop.f32.mrf.mxu1  ;;  %v4496_v35 = vld [vmem:[%s5333_s26 + $0x420] sm:$0xf]  ;;  %v4504_v53 = vld [vmem:[%s5333_s26 + $0x428] sm:$0xf] }
 0x183   : > { %v1955_v54 = vadd.f32 %v1954_v38, %v1821_v12  ;;  %v5061_v12 = vld [vmem:[%s5333_s26 + $0x42c] sm:$0xf]  ;;  %v4506_v38 = vld [vmem:[%s5333_s26 + $0x440] sm:$0xf0] }
 0x184   : > { %v5892_v5 = vadd.f32 %v2217_v18, %v2085_v62  ;;  %1860 = vmatmul.bf16.gmra.mxu0 %v5884_v2  ;;  %v5064_v18 = vld [vmem:[%s5333_s26 + $0x43c] sm:$0xf0] }
 0x185   : > { %1993 = vmatmul.bf16.gmra.mxu1 %v5886_v41  ;;  %v5908_v41 = vor.u32 %v5063_v20, %v4496_v35 }
 0x186   : > { %7258 = vst [vmem:[#allocation74_spill] sm:$0xff] %v5892_v5  ;;  %2126 = vmatmul.bf16.gmra.mxu2 %v5888_v3  ;;  %v5912_v5 = vor.u32 %v5064_v18, %v4504_v53  ;;  %v5069_v53 = vld [vmem:[%s5333_s26 + $0x464] sm:$0xf0]  ;;  %v5066_v18 = vld [vmem:[%s5333_s26 + $0x454] sm:$0xf] }
 0x187   : > { %2259 = vmatmul.bf16.gmra.mxu3 %v5890_v14  ;;  %7260 = vst [vmem:[#allocation76_spill] sm:$0xff] %v5908_v41 }
 0x188   : > { %7262 = vst [vmem:[#allocation78_spill] sm:$0xff] %v5912_v5 }
 0x189   : > { %v2087_v55 = vpop.f32.mrf.mxu2  ;;  %v1823_v7 = vpop.f32.mrf.mxu0 }
 0x18a   : > { %v2088_v58 = vadd.f32 %v2087_v55, %v1955_v54  ;;  %v2220_v39 = vpop.f32.mrf.mxu3  ;;  %v1956_v62 = vpop.f32.mrf.mxu1  ;;  %v5910_v55 = vor.u32 %v5060_v26, %v4498_v52  ;;  %v4520_v52 = vld [vmem:[%s5333_s26 + $0x450] sm:$0xf] }
 0x18b   : > { %v1957_v45 = vadd.f32 %v1956_v62, %v1823_v7 }
 0x18c   : > { %v5898_v29 = vadd.f32 %v2220_v39, %v2088_v58  ;;  %7261 = vst [vmem:[#allocation77_spill] sm:$0xff] %v5910_v55  ;;  %v5914_v39 = vor.u32 %v5061_v12, %v4506_v38  ;;  %v4522_v12 = vld [vmem:[%s5333_s26 + $0x468] sm:$0xf0]  ;;  %v4528_v38 = vld [vmem:[%s5333_s26 + $0x458] sm:$0xf] }
 0x18e   : > { %7259 = vst [vmem:[#allocation75_spill] sm:$0xff] %v5898_v29 }
 0x18f   : > { %7263 = vst [vmem:[#allocation79_spill] sm:$0xff] %v5914_v39 }
 0x191   : > { %v2089_v3 = vpop.f32.mrf.mxu2  ;;  %v1826_v54 = vpop.f32.mrf.mxu0 }
 0x192   : > { %v2090_v14 = vadd.f32 %v2089_v3, %v1957_v45  ;;  %v2222_v2 = vpop.f32.mrf.mxu3  ;;  %v1959_v58 = vpop.f32.mrf.mxu1 }
 0x193   : > { %v1960_v62 = vadd.f32 %v1959_v58, %v1826_v54  ;;  %v5070_v54 = vld [vmem:[%s5333_s26 + $0x46c] sm:$0xf0]  ;;  %v5067_v58 = vld [vmem:[%s5333_s26 + $0x45c] sm:$0xf] }
 0x194   : > { %v5916_v7 = vadd.f32 %v2222_v2, %v2090_v14  ;;  %1865 = vmatmul.bf16.gmra.mxu0 %v5908_v41 }
 0x195   : > { %1998 = vmatmul.bf16.gmra.mxu1 %v5910_v55  ;;  %v4530_v55 = vld [vmem:[%s5333_s26 + $0x470] sm:$0xf0] }
 0x196   : > { %7264 = vst [vmem:[#allocation80_spill] sm:$0xff] %v5916_v7  ;;  %2131 = vmatmul.bf16.gmra.mxu2 %v5912_v5  ;;  %v5938_v41 = vor.u32 %v5067_v58, %v4530_v55  ;;  %v5166_v55 = vld [vmem:[%s5270_s22 + $0x2f4] sm:$0xf] }
 0x197   : > { %2264 = vmatmul.bf16.gmra.mxu3 %v5914_v39  ;;  %v5932_v39 = vor.u32 %v5069_v53, %v4520_v52  ;;  %v5118_v52 = vld [vmem:[%s5270_s22 + $0x174] sm:$0xf] }
 0x198   : > { %7269 = vst [vmem:[#allocation85_spill] sm:$0xff] %v5938_v41 }
 0x199   : > { %v2092_v3 = vpop.f32.mrf.mxu2  ;;  %v1828_v20 = vpop.f32.mrf.mxu0  ;;  %7266 = vst [vmem:[#allocation82_spill] sm:$0xff] %v5932_v39 }
 0x19a   : > { %v2093_v45 = vadd.f32 %v2092_v3, %v1960_v62  ;;  %v2225_v35 = vpop.f32.mrf.mxu3  ;;  %v1961_v2 = vpop.f32.mrf.mxu1 }
 0x19b   : > { %v1962_v26 = vadd.f32 %v1961_v2, %v1828_v20  ;;  %v5936_v20 = vor.u32 %v5070_v54, %v4528_v38 }
 0x19c   : > { %v5922_v14 = vadd.f32 %v2225_v35, %v2093_v45  ;;  %v5934_v35 = vor.u32 %v5066_v18, %v4522_v12  ;;  %v4730_v18 = vld [vmem:[%s5270_s22 + $0x178] sm:$0xf0] }
 0x19d   : > { %7268 = vst [vmem:[#allocation84_spill] sm:$0xff] %v5936_v20  ;;  %v4922_v12 = vld [vmem:[%s5270_s22 + $0x2f8] sm:$0xf0]  ;;  %v4733_v54 = vor.u32 %v5118_v52, %v4730_v18 }
 0x19e   : > { %7265 = vst [vmem:[#allocation81_spill] sm:$0xff] %v5922_v14  ;;  %v4925_v58 = vor.u32 %v5166_v55, %v4922_v12 }
 0x19f   : > { %7267 = vst [vmem:[#allocation83_spill] sm:$0xff] %v5934_v35  ;;  %2811 = vmatpush.bf16.msra.mxu0 %v4733_v54 }
 0x1a0   : > { %3210 = vmatpush.bf16.msra.mxu3 %v4925_v58 }
 0x1a1   : > { %v2094_v5 = vpop.f32.mrf.mxu2  ;;  %v1831_v45 = vpop.f32.mrf.mxu0 }
 0x1a2   : > { %v2095_v62 = vadd.f32 %v2094_v5, %v1962_v26  ;;  %v2227_v3 = vpop.f32.mrf.mxu3  ;;  %v1964_v2 = vpop.f32.mrf.mxu1  ;;  %v5150_v5 = vld [vmem:[%s5270_s22 + $0x274] sm:$0xf]  ;;  %v4858_v26 = vld [vmem:[%s5270_s22 + $0x278] sm:$0xf0] }
 0x1a3   : > { %v1965_v7 = vadd.f32 %v1964_v2, %v1831_v45  ;;  %v4861_v53 = vor.u32 %v5150_v5, %v4858_v26  ;;  %v427_v2 = vld [vmem:[%s5333_s26 + $0x480] sm:$0xff]  ;;  %v5134_v26 = vld [vmem:[%s5270_s22 + $0x1f4] sm:$0xf] }
 0x1a4   : > { %v5940_v14 = vadd.f32 %v2227_v3, %v2095_v62  ;;  %1870 = vmatmul.bf16.gmra.mxu0 %v5932_v39  ;;  %v4794_v39 = vld [vmem:[%s5270_s22 + $0x1f8] sm:$0xf0]  ;;  %v962_v27 = vunpack.c.h.b16 %v427_v2 }
 0x1a5   : > { %2003 = vmatmul.bf16.gmra.mxu1 %v5934_v35  ;;  %3077 = vmatpush.bf16.msra.mxu2 %v4861_v53  ;;  %v4797_v29 = vor.u32 %v5134_v26, %v4794_v39  ;;  %v4930_v26 = vld [vmem:[%s5333_s26 + $0x14] sm:$0xf] }
 0x1a6   : > { %7270 = vst [vmem:[#allocation86_spill] sm:$0xff] %v5940_v14  ;;  %2136 = vmatmul.bf16.gmra.mxu2 %v5936_v20  ;;  %v961_v14 = vunpack.c.l.b16 %v427_v2  ;;  %v3984_v2 = vld [vmem:[%s5333_s26 + $0x10] sm:$0xf] }
 0x1a7   : > { %2269 = vmatmul.bf16.gmra.mxu3 %v5938_v41  ;;  %v428_v41 = vld [vmem:[%s5333_s26 + $0x488] sm:$0xff]  ;;  %2944 = vmatpush.bf16.msra.mxu1 %v4797_v29 }
 0x1a8   : > { %v963_v34 = vunpack.c.l.b16 %v428_v41  ;;  %v964_v52 = vunpack.c.h.b16 %v428_v41  ;;  %v5958_v18 = vpack.c.b16 %v961_v14, %v961_v14 }
 0x1a9   : > { %v2097_v38 = vpop.f32.mrf.mxu2  ;;  %v1833_v45 = vpop.f32.mrf.mxu0 }
 0x1aa   : > { %v2098_v62 = vadd.f32 %v2097_v38, %v1965_v7  ;;  %v2230_v3 = vpop.f32.mrf.mxu3  ;;  %v1966_v20 = vpop.f32.mrf.mxu1  ;;  %v5960_v38 = vpack.c.b16 %v962_v27, %v962_v27  ;;  %v5962_v54 = vpack.c.b16 %v963_v34, %v963_v34  ;;  %v5964_v58 = vpack.c.b16 %v964_v52, %v964_v52  ;;  %v3986_v52 = vld [vmem:[%s5333_s26 + $0x28] sm:$0xf0] }
 0x1ab   : > { %v1967_v5 = vadd.f32 %v1966_v20, %v1833_v45 }
 0x1ac   : > { %v5954_v35 = vadd.f32 %v2230_v3, %v2098_v62  ;;  %7271 = vst [vmem:[#allocation87_spill] sm:$0xff] %v5962_v54 }
 0x1ad   : > { %7272 = vst [vmem:[#allocation88_spill] sm:$0xff] %v5964_v58 }
 0x1b1   : > { %v2099_v7 = vpop.f32.mrf.mxu2  ;;  %v1836_v12 = vpop.f32.mrf.mxu0 }
 0x1b2   : > { %v2100_v55 = vadd.f32 %v2099_v7, %v1967_v5  ;;  %v2232_v53 = vpop.f32.mrf.mxu3  ;;  %v1969_v20 = vpop.f32.mrf.mxu1  ;;  %v4933_v5 = vld [vmem:[%s5333_s26 + $0x24] sm:$0xf0] }
 0x1b3   : > { %v1970_v41 = vadd.f32 %v1969_v20, %v1836_v12 }
 0x1b4   : > { %v5966_v39 = vadd.f32 %v2232_v53, %v2100_v55  ;;  %1875 = vmatmul.bf16.gmra.mxu0 %v5958_v18  ;;  %v5978_v55 = vor.u32 %v4933_v5, %v3984_v2 }
 0x1b5   : > { %2008 = vmatmul.bf16.gmra.mxu1 %v5960_v38 }
 0x1b6   : > { %2141 = vmatmul.bf16.gmra.mxu2 %v5962_v54  ;;  %7273 = vst [vmem:[#allocation89_spill] sm:$0xff] %v5978_v55 }
 0x1b7   : > { %2274 = vmatmul.bf16.gmra.mxu3 %v5964_v58  ;;  %v5980_v58 = vor.u32 %v4930_v26, %v3986_v52  ;;  %v4008_v52 = vld [vmem:[%s5333_s26 + $0x40] sm:$0xf] }
 0x1b9   : > { %v2102_v34 = vpop.f32.mrf.mxu2  ;;  %v1838_v14 = vpop.f32.mrf.mxu0  ;;  %7274 = vst [vmem:[#allocation90_spill] sm:$0xff] %v5980_v58 }
 0x1ba   : > { %v2103_v27 = vadd.f32 %v2102_v34, %v1970_v41  ;;  %v2235_v29 = vpop.f32.mrf.mxu3  ;;  %v1971_v62 = vpop.f32.mrf.mxu1 }
 0x1bb   : > { %v1972_v45 = vadd.f32 %v1971_v62, %v1838_v14 }
 0x1bc   : > { %v5972_v3 = vadd.f32 %v2235_v29, %v2103_v27 }
 0x1c1   : > { %v2104_v7 = vpop.f32.mrf.mxu2  ;;  %v1841_v20 = vpop.f32.mrf.mxu0 }
 0x1c2   : > { %v2105_v53 = vadd.f32 %v2104_v7, %v1972_v45  ;;  %v2237_v12 = vpop.f32.mrf.mxu3  ;;  %v1974_v41 = vpop.f32.mrf.mxu1  ;;  %v4939_v7 = vld [vmem:[%s5333_s26 + $0x54] sm:$0xf0] }
 0x1c3   : > { %v1975_v27 = vadd.f32 %v1974_v41, %v1841_v20  ;;  %v5994_v41 = vor.u32 %v4939_v7, %v4008_v52 }
 0x1c4   : > { %v5982_v34 = vadd.f32 %v2237_v12, %v2105_v53  ;;  %2287 = vmatmul.bf16.vlgmr.msrb.gmra.mxu0 %v5978_v55  ;;  %v4936_v53 = vld [vmem:[%s5333_s26 + $0x44] sm:$0xf]  ;;  %v4010_v12 = vld [vmem:[%s5333_s26 + $0x58] sm:$0xf0]  ;;  %v4034_v55 = vld [vmem:[%s5333_s26 + $0x88] sm:$0xf0] }
 0x1c5   : > { %2420 = vmatmul.bf16.vlgmr.msrb.gmra.mxu1 %v5980_v58  ;;  %7275 = vst [vmem:[#allocation91_spill] sm:$0xff] %v5994_v41  ;;  %v5996_v58 = vor.u32 %v4936_v53, %v4010_v12 }
 0x1c6   : > { %2553 = vmatmul.bf16.vlgmr.msrb.gmra.mxu2 %v5356_v47 }
 0x1c7   : > { %2686 = vmatmul.bf16.vlgmr.msrb.gmra.mxu3 %v5360_v51  ;;  %7276 = vst [vmem:[#allocation92_spill] sm:$0xff] %v5996_v58 }
 0x1c9   : > { %v2107_v29 = vpop.f32.mrf.mxu2  ;;  %v1843_v45 = vpop.f32.mrf.mxu0 }
 0x1ca   : > { %v2108_v14 = vadd.f32 %v2107_v29, %v1975_v27  ;;  %v2240_v62 = vpop.f32.mrf.mxu3  ;;  %v1976_v2 = vpop.f32.mrf.mxu1 }
 0x1cb   : > { %v1977_v26 = vadd.f32 %v1976_v2, %v1843_v45  ;;  %v4850_v45 = vld [vmem:[%s5270_s22 + $0x268] sm:$0xf0] }
 0x1cc   : > { %v5988_v5 = vadd.f32 %v2240_v62, %v2108_v14  ;;  %v5148_v62 = vld [vmem:[%s5270_s22 + $0x264] sm:$0xf] }
 0x1cd   : > { %v4853_v2 = vor.u32 %v5148_v62, %v4850_v45  ;;  %v4786_v62 = vld [vmem:[%s5270_s22 + $0x1e8] sm:$0xf0]  ;;  %v4032_v45 = vld [vmem:[%s5333_s26 + $0x70] sm:$0xf] }
 0x1cf   : > { %3078 = vmatpush.bf16.msra.mxu2 %v4853_v2 }
 0x1d1   : > { %v2109_v20 = vpop.f32.mrf.mxu2  ;;  %v1846_v51 = vpop.f32.mrf.mxu0 }
 0x1d2   : > { %v2110_v47 = vadd.f32 %v2109_v20, %v1977_v26  ;;  %v2242_v54 = vpop.f32.mrf.mxu3  ;;  %v1979_v27 = vpop.f32.mrf.mxu1  ;;  %v4722_v20 = vld [vmem:[%s5270_s22 + $0x168] sm:$0xf0] }
 0x1d3   : > { %v1980_v14 = vadd.f32 %v1979_v27, %v1846_v51  ;;  %v4914_v27 = vld [vmem:[%s5270_s22 + $0x2e8] sm:$0xf0] }
 0x1d4   : > { %v5998_v29 = vadd.f32 %v2242_v54, %v2110_v47  ;;  %2292 = vmatmul.bf16.gmra.mxu0 %v5994_v41  ;;  %v5164_v47 = vld [vmem:[%s5270_s22 + $0x2e4] sm:$0xf]  ;;  %v4945_v41 = vld [vmem:[%s5333_s26 + $0x84] sm:$0xf0] }
 0x1d5   : > { %2425 = vmatmul.bf16.gmra.mxu1 %v5996_v58  ;;  %v5132_v58 = vld [vmem:[%s5270_s22 + $0x1e4] sm:$0xf] }
 0x1d6   : > { %7277 = vst [vmem:[#allocation93_spill] sm:$0xff] %v5998_v29  ;;  %2558 = vmatmul.bf16.gmra.mxu2 %v5378_v0  ;;  %v4917_v29 = vor.u32 %v5164_v47, %v4914_v27 }
 0x1d7   : > { %2691 = vmatmul.bf16.gmra.mxu3 %v5380_v1  ;;  %v5116_v1 = vld [vmem:[%s5270_s22 + $0x164] sm:$0xf] }
 0x1d8   : > { %v4725_v51 = vor.u32 %v5116_v1, %v4722_v20  ;;  %3211 = vmatpush.bf16.msra.mxu3 %v4917_v29 }
 0x1d9   : > { %v2112_v54 = vpop.f32.mrf.mxu2  ;;  %v1848_v7 = vpop.f32.mrf.mxu0 }
 0x1da   : > { %v2113_v26 = vadd.f32 %v2112_v54, %v1980_v14  ;;  %v2245_v52 = vpop.f32.mrf.mxu3  ;;  %v1981_v53 = vpop.f32.mrf.mxu1  ;;  %v4789_v14 = vor.u32 %v5132_v58, %v4786_v62  ;;  %v4942_v54 = vld [vmem:[%s5333_s26 + $0x74] sm:$0xf]  ;;  %2812 = vmatpush.bf16.msra.mxu0 %v4725_v51  ;;  %v4056_v62 = vld [vmem:[%s5333_s26 + $0xa0] sm:$0xf] }
 0x1db   : > { %v1982_v0 = vadd.f32 %v1981_v53, %v1848_v7  ;;  %v6020_v1 = vor.u32 %v4942_v54, %v4034_v55  ;;  %v4058_v54 = vld [vmem:[%s5333_s26 + $0xb8] sm:$0xf0] }
 0x1dc   : > { %v6006_v12 = vadd.f32 %v2245_v52, %v2113_v26  ;;  %2945 = vmatpush.bf16.msra.mxu1 %v4789_v14  ;;  %v6018_v26 = vor.u32 %v4945_v41, %v4032_v45  ;;  %v4951_v45 = vld [vmem:[%s5333_s26 + $0xb4] sm:$0xf0]  ;;  %v4948_v14 = vld [vmem:[%s5333_s26 + $0xa4] sm:$0xf] }
 0x1de   : > { %7278 = vst [vmem:[#allocation94_spill] sm:$0xff] %v6006_v12 }
 0x1e1   : > { %v2114_v2 = vpop.f32.mrf.mxu2  ;;  %v1851_v53 = vpop.f32.mrf.mxu0 }
 0x1e2   : > { %v2115_v52 = vadd.f32 %v2114_v2, %v1982_v0  ;;  %v2247_v7 = vpop.f32.mrf.mxu3  ;;  %v1984_v20 = vpop.f32.mrf.mxu1 }
 0x1e3   : > { %v1985_v58 = vadd.f32 %v1984_v20, %v1851_v53 }
 0x1e4   : > { %v6022_v12 = vadd.f32 %v2247_v7, %v2115_v52  ;;  %2297 = vmatmul.bf16.gmra.mxu0 %v6018_v26  ;;  %v6034_v52 = vor.u32 %v4951_v45, %v4056_v62 }
 0x1e5   : > { %2430 = vmatmul.bf16.gmra.mxu1 %v6020_v1 }
 0x1e6   : > { %2563 = vmatmul.bf16.gmra.mxu2 %v5406_v24  ;;  %7279 = vst [vmem:[#allocation95_spill] sm:$0xff] %v6034_v52 }
 0x1e7   : > { %2696 = vmatmul.bf16.gmra.mxu3 %v5408_v25  ;;  %v6036_v25 = vor.u32 %v4948_v14, %v4058_v54  ;;  %v4080_v14 = vld [vmem:[%s5333_s26 + $0xd0] sm:$0xf]  ;;  %v4957_v54 = vld [vmem:[%s5333_s26 + $0xe4] sm:$0xf0] }
 0x1e9   : > { %v2117_v41 = vpop.f32.mrf.mxu2  ;;  %v1853_v55 = vpop.f32.mrf.mxu0  ;;  %7280 = vst [vmem:[#allocation96_spill] sm:$0xff] %v6036_v25 }
 0x1ea   : > { %v2118_v29 = vadd.f32 %v2117_v41, %v1985_v58  ;;  %v2250_v0 = vpop.f32.mrf.mxu3  ;;  %v1986_v47 = vpop.f32.mrf.mxu1 }
 0x1eb   : > { %v1987_v27 = vadd.f32 %v1986_v47, %v1853_v55 }
 0x1ec   : > { %v6028_v51 = vadd.f32 %v2250_v0, %v2118_v29 }
 0x1f1   : > { %v2119_v2 = vpop.f32.mrf.mxu2  ;;  %v1856_v24 = vpop.f32.mrf.mxu0 }
 0x1f2   : > { %v2120_v7 = vadd.f32 %v2119_v2, %v1987_v27  ;;  %v2252_v53 = vpop.f32.mrf.mxu3  ;;  %v1989_v20 = vpop.f32.mrf.mxu1  ;;  %v4954_v2 = vld [vmem:[%s5333_s26 + $0xd4] sm:$0xf] }
 0x1f3   : > { %v1990_v41 = vadd.f32 %v1989_v20, %v1856_v24  ;;  %v6050_v24 = vor.u32 %v4957_v54, %v4080_v14 }
 0x1f4   : > { %v6038_v58 = vadd.f32 %v2252_v53, %v2120_v7  ;;  %2302 = vmatmul.bf16.gmra.mxu0 %v6034_v52  ;;  %v4082_v7 = vld [vmem:[%s5333_s26 + $0xe8] sm:$0xf0]  ;;  %v4960_v52 = vld [vmem:[%s5333_s26 + $0x104] sm:$0xf] }
 0x1f5   : > { %2435 = vmatmul.bf16.gmra.mxu1 %v6036_v25  ;;  %7282 = vst [vmem:[#allocation98_spill] sm:$0xff] %v6050_v24 }
 0x1f6   : > { %2568 = vmatmul.bf16.gmra.mxu2 %v5426_v36 }
 0x1f7   : > { %2701 = vmatmul.bf16.gmra.mxu3 %v5428_v37  ;;  %v6052_v37 = vor.u32 %v4954_v2, %v4082_v7  ;;  %v4104_v2 = vld [vmem:[%s5333_s26 + $0x100] sm:$0xf]  ;;  %v5146_v7 = vld [vmem:[%s5270_s22 + $0x254] sm:$0xf] }
 0x1f9   : > { %v2122_v29 = vpop.f32.mrf.mxu2  ;;  %v1858_v47 = vpop.f32.mrf.mxu0  ;;  %7283 = vst [vmem:[#allocation99_spill] sm:$0xff] %v6052_v37 }
 0x1fa   : > { %v2123_v0 = vadd.f32 %v2122_v29, %v1990_v41  ;;  %v2255_v55 = vpop.f32.mrf.mxu3  ;;  %v1991_v27 = vpop.f32.mrf.mxu1 }
 0x1fb   : > { %v1992_v45 = vadd.f32 %v1991_v27, %v1858_v47 }
 0x1fc   : > { %v6044_v62 = vadd.f32 %v2255_v55, %v2123_v0 }
 0x1fe   : > { %7281 = vst [vmem:[#allocation97_spill] sm:$0xff] %v6044_v62  ;;  %v4106_v62 = vld [vmem:[%s5333_s26 + $0x118] sm:$0xf0] }
 0x201   : > { %v2124_v53 = vpop.f32.mrf.mxu2  ;;  %v1861_v36 = vpop.f32.mrf.mxu0 }
 0x202   : > { %v2125_v20 = vadd.f32 %v2124_v53, %v1992_v45  ;;  %v2257_v25 = vpop.f32.mrf.mxu3  ;;  %v1994_v41 = vpop.f32.mrf.mxu1  ;;  %v4842_v53 = vld [vmem:[%s5270_s22 + $0x258] sm:$0xf0] }
 0x203   : > { %v1995_v0 = vadd.f32 %v1994_v41, %v1861_v36  ;;  %v4714_v36 = vld [vmem:[%s5270_s22 + $0x158] sm:$0xf0] }
 0x204   : > { %v6054_v29 = vadd.f32 %v2257_v25, %v2125_v20  ;;  %2307 = vmatmul.bf16.gmra.mxu0 %v6050_v24  ;;  %v4845_v20 = vor.u32 %v5146_v7, %v4842_v53  ;;  %v4906_v41 = vld [vmem:[%s5270_s22 + $0x2d8] sm:$0xf0]  ;;  %v5130_v24 = vld [vmem:[%s5270_s22 + $0x1d4] sm:$0xf] }
 0x205   : > { %2440 = vmatmul.bf16.gmra.mxu1 %v6052_v37  ;;  %v4963_v37 = vld [vmem:[%s5333_s26 + $0x114] sm:$0xf0] }
 0x206   : > { %7284 = vst [vmem:[#allocation100_spill] sm:$0xff] %v6054_v29  ;;  %2573 = vmatmul.bf16.gmra.mxu2 %v5446_v49  ;;  %v5114_v49 = vld [vmem:[%s5270_s22 + $0x154] sm:$0xf]  ;;  %v4778_v29 = vld [vmem:[%s5270_s22 + $0x1d8] sm:$0xf0] }
 0x207   : > { %2706 = vmatmul.bf16.gmra.mxu3 %v5448_v50  ;;  %v5162_v50 = vld [vmem:[%s5270_s22 + $0x2d4] sm:$0xf]  ;;  %3079 = vmatpush.bf16.msra.mxu2 %v4845_v20 }
 0x209   : > { %v2127_v55 = vpop.f32.mrf.mxu2  ;;  %v1863_v25 = vpop.f32.mrf.mxu0 }
 0x20a   : > { %v2128_v47 = vadd.f32 %v2127_v55, %v1995_v0  ;;  %v2260_v27 = vpop.f32.mrf.mxu3  ;;  %v1996_v45 = vpop.f32.mrf.mxu1  ;;  %v4717_v0 = vor.u32 %v5114_v49, %v4714_v36  ;;  %v4909_v55 = vor.u32 %v5162_v50, %v4906_v41  ;;  %v4128_v50 = vld [vmem:[%s5333_s26 + $0x130] sm:$0xf]  ;;  %v4969_v41 = vld [vmem:[%s5333_s26 + $0x144] sm:$0xf0] }
 0x20b   : > { %v1997_v54 = vadd.f32 %v1996_v45, %v1863_v25  ;;  %v6074_v25 = vor.u32 %v4963_v37, %v4104_v2 }
 0x20c   : > { %v6060_v14 = vadd.f32 %v2260_v27, %v2128_v47  ;;  %v4781_v47 = vor.u32 %v5130_v24, %v4778_v29  ;;  %2813 = vmatpush.bf16.msra.mxu0 %v4717_v0  ;;  %3212 = vmatpush.bf16.msra.mxu3 %v4909_v55  ;;  %v4966_v0 = vld [vmem:[%s5333_s26 + $0x134] sm:$0xf]  ;;  %v4130_v55 = vld [vmem:[%s5333_s26 + $0x148] sm:$0xf0] }
 0x20e   : > { %7285 = vst [vmem:[#allocation101_spill] sm:$0xff] %v6060_v14  ;;  %2946 = vmatpush.bf16.msra.mxu1 %v4781_v47  ;;  %v6076_v14 = vor.u32 %v4960_v52, %v4106_v62 }
 0x211   : > { %v2129_v27 = vpop.f32.mrf.mxu2  ;;  %v1866_v53 = vpop.f32.mrf.mxu0 }
 0x212   : > { %v2130_v45 = vadd.f32 %v2129_v27, %v1997_v54  ;;  %v2262_v7 = vpop.f32.mrf.mxu3  ;;  %v1999_v49 = vpop.f32.mrf.mxu1  ;;  %v6090_v27 = vor.u32 %v4969_v41, %v4128_v50  ;;  %v4152_v41 = vld [vmem:[%s5333_s26 + $0x160] sm:$0xf] }
 0x213   : > { %v2000_v20 = vadd.f32 %v1999_v49, %v1866_v53 }
 0x214   : > { %v6078_v36 = vadd.f32 %v2262_v7, %v2130_v45  ;;  %2312 = vmatmul.bf16.gmra.mxu0 %v6074_v25  ;;  %7286 = vst [vmem:[#allocation102_spill] sm:$0xff] %v6090_v27 }
 0x215   : > { %2445 = vmatmul.bf16.gmra.mxu1 %v6076_v14 }
 0x216   : > { %2578 = vmatmul.bf16.gmra.mxu2 %v5474_v16 }
 0x217   : > { %2711 = vmatmul.bf16.gmra.mxu3 %v5476_v17  ;;  %v6092_v17 = vor.u32 %v4966_v0, %v4130_v55  ;;  %v4975_v0 = vld [vmem:[%s5333_s26 + $0x174] sm:$0xf0]  ;;  %v4972_v55 = vld [vmem:[%s5333_s26 + $0x164] sm:$0xf] }
 0x219   : > { %v2132_v24 = vpop.f32.mrf.mxu2  ;;  %v1868_v52 = vpop.f32.mrf.mxu0  ;;  %7287 = vst [vmem:[#allocation103_spill] sm:$0xff] %v6092_v17 }
 0x21a   : > { %v2133_v37 = vadd.f32 %v2132_v24, %v2000_v20  ;;  %v2265_v29 = vpop.f32.mrf.mxu3  ;;  %v2001_v62 = vpop.f32.mrf.mxu1 }
 0x21b   : > { %v2002_v2 = vadd.f32 %v2001_v62, %v1868_v52 }
 0x21c   : > { %v6084_v54 = vadd.f32 %v2265_v29, %v2133_v37 }
 0x221   : > { %v2134_v47 = vpop.f32.mrf.mxu2  ;;  %v1871_v16 = vpop.f32.mrf.mxu0 }
 0x222   : > { %v2135_v45 = vadd.f32 %v2134_v47, %v2002_v2  ;;  %v2267_v7 = vpop.f32.mrf.mxu3  ;;  %v2004_v53 = vpop.f32.mrf.mxu1  ;;  %v4154_v47 = vld [vmem:[%s5333_s26 + $0x178] sm:$0xf0] }
 0x223   : > { %v2005_v20 = vadd.f32 %v2004_v53, %v1871_v16 }
 0x224   : > { %v6094_v49 = vadd.f32 %v2267_v7, %v2135_v45  ;;  %2317 = vmatmul.bf16.gmra.mxu0 %v6090_v27  ;;  %v6106_v7 = vor.u32 %v4975_v0, %v4152_v41 }
 0x225   : > { %2450 = vmatmul.bf16.gmra.mxu1 %v6092_v17  ;;  %v5128_v17 = vld [vmem:[%s5270_s22 + $0x1c4] sm:$0xf] }
 0x226   : > { %7288 = vst [vmem:[#allocation104_spill] sm:$0xff] %v6094_v49  ;;  %2583 = vmatmul.bf16.gmra.mxu2 %v5494_v32 }
 0x227   : > { %2716 = vmatmul.bf16.gmra.mxu3 %v5496_v33  ;;  %7290 = vst [vmem:[#allocation106_spill] sm:$0xff] %v6106_v7  ;;  %v6108_v33 = vor.u32 %v4972_v55, %v4154_v47  ;;  %v4176_v55 = vld [vmem:[%s5333_s26 + $0x190] sm:$0xf]  ;;  %v4981_v47 = vld [vmem:[%s5333_s26 + $0x1a4] sm:$0xf0] }
 0x229   : > { %v2137_v24 = vpop.f32.mrf.mxu2  ;;  %v1873_v52 = vpop.f32.mrf.mxu0  ;;  %7291 = vst [vmem:[#allocation107_spill] sm:$0xff] %v6108_v33 }
 0x22a   : > { %v2138_v37 = vadd.f32 %v2137_v24, %v2005_v20  ;;  %v2270_v29 = vpop.f32.mrf.mxu3  ;;  %v2006_v62 = vpop.f32.mrf.mxu1 }
 0x22b   : > { %v2007_v50 = vadd.f32 %v2006_v62, %v1873_v52 }
 0x22c   : > { %v6100_v2 = vadd.f32 %v2270_v29, %v2138_v37 }
 0x22e   : > { %7289 = vst [vmem:[#allocation105_spill] sm:$0xff] %v6100_v2 }
 0x231   : > { %v2139_v45 = vpop.f32.mrf.mxu2  ;;  %v1876_v32 = vpop.f32.mrf.mxu0 }
 0x232   : > { %v2140_v16 = vadd.f32 %v2139_v45, %v2007_v50  ;;  %v2272_v53 = vpop.f32.mrf.mxu3  ;;  %v2009_v20 = vpop.f32.mrf.mxu1  ;;  %v4978_v45 = vld [vmem:[%s5333_s26 + $0x194] sm:$0xf] }
 0x233   : > { %v2010_v37 = vadd.f32 %v2009_v20, %v1876_v32  ;;  %v4834_v32 = vld [vmem:[%s5270_s22 + $0x248] sm:$0xf0]  ;;  %v5112_v20 = vld [vmem:[%s5270_s22 + $0x144] sm:$0xf] }
 0x234   : > { %v6110_v24 = vadd.f32 %v2272_v53, %v2140_v16  ;;  %2322 = vmatmul.bf16.gmra.mxu0 %v6106_v7  ;;  %v4178_v16 = vld [vmem:[%s5333_s26 + $0x1a8] sm:$0xf0] }
 0x235   : > { %2455 = vmatmul.bf16.gmra.mxu1 %v6108_v33  ;;  %v4898_v33 = vld [vmem:[%s5270_s22 + $0x2c8] sm:$0xf0] }
 0x236   : > { %7292 = vst [vmem:[#allocation108_spill] sm:$0xff] %v6110_v24  ;;  %2588 = vmatmul.bf16.gmra.mxu2 %v5514_v56  ;;  %v6122_v56 = vor.u32 %v4981_v47, %v4176_v55  ;;  %v4770_v55 = vld [vmem:[%s5270_s22 + $0x1c8] sm:$0xf0] }
 0x237   : > { %2721 = vmatmul.bf16.gmra.mxu3 %v5516_v57  ;;  %v5144_v57 = vld [vmem:[%s5270_s22 + $0x244] sm:$0xf]  ;;  %v4773_v47 = vor.u32 %v5128_v17, %v4770_v55 }
 0x238   : > { %7294 = vst [vmem:[#allocation110_spill] sm:$0xff] %v6122_v56 }
 0x239   : > { %v2142_v29 = vpop.f32.mrf.mxu2  ;;  %v1878_v50 = vpop.f32.mrf.mxu0  ;;  %2947 = vmatpush.bf16.msra.mxu1 %v4773_v47 }
 0x23a   : > { %v2143_v52 = vadd.f32 %v2142_v29, %v2010_v37  ;;  %v2275_v62 = vpop.f32.mrf.mxu3  ;;  %v2011_v41 = vpop.f32.mrf.mxu1  ;;  %v6127_v50 = vor.u32 %v4978_v45, %v4178_v16 }
 0x23b   : > { %v4837_v41 = vor.u32 %v5144_v57, %v4834_v32  ;;  %v4200_v57 = vld [vmem:[%s5333_s26 + $0x1c0] sm:$0xf]  ;;  %v4987_v32 = vld [vmem:[%s5333_s26 + $0x1d4] sm:$0xf0] }
 0x23c   : > { %v6116_v0 = vadd.f32 %v2275_v62, %v2143_v52  ;;  %7295 = vst [vmem:[#allocation111_spill] sm:$0xff] %v6127_v50  ;;  %v4706_v52 = vld [vmem:[%s5270_s22 + $0x148] sm:$0xf0]  ;;  %v5160_v62 = vld [vmem:[%s5270_s22 + $0x2c4] sm:$0xf] }
 0x23d   : > { %v4709_v24 = vor.u32 %v5112_v20, %v4706_v52  ;;  %3080 = vmatpush.bf16.msra.mxu2 %v4837_v41  ;;  %v4984_v20 = vld [vmem:[%s5333_s26 + $0x1c4] sm:$0xf] }
 0x23e   : > { %7293 = vst [vmem:[#allocation109_spill] sm:$0xff] %v6116_v0 }
 0x23f   : > { %2814 = vmatpush.bf16.msra.mxu0 %v4709_v24 }
 0x241   : > { %v2144_v53 = vpop.f32.mrf.mxu2  ;;  %v2288_v29 = vpop.f32.mrf.mxu0 }
 0x242   : > { %v2277_v37 = vpop.f32.mrf.mxu3  ;;  %v2289_v7 = vadd.f32 %v2288_v29, %v5554_v60  ;;  %v2421_v0 = vpop.f32.mrf.mxu1  ;;  %v4901_v53 = vor.u32 %v5160_v62, %v4898_v33 }
 0x243   : > { %v4202_v37 = vld [vmem:[%s5333_s26 + $0x1d8] sm:$0xf0] }
 0x244   : > { %v6135_v27 = vadd.f32 %v2421_v0, %v2289_v7  ;;  %2327 = vmatmul.bf16.gmra.mxu0 %v6122_v56  ;;  %3213 = vmatpush.bf16.msra.mxu3 %v4901_v53  ;;  %v6152_v41 = vor.u32 %v4984_v20, %v4202_v37  ;;  %v4226_v20 = vld [vmem:[%s5333_s26 + $0x208] sm:$0xf0] }
 0x245   : > { %2460 = vmatmul.bf16.gmra.mxu1 %v6127_v50 }
 0x246   : > { %2593 = vmatmul.bf16.gmra.mxu2 %v5542_v28  ;;  %v6150_v28 = vor.u32 %v4987_v32, %v4200_v57  ;;  %7298 = vst [vmem:[#allocation114_spill] sm:$0xff] %v6152_v41  ;;  %v4993_v57 = vld [vmem:[%s5333_s26 + $0x204] sm:$0xf0]  ;;  %v4990_v32 = vld [vmem:[%s5333_s26 + $0x1f4] sm:$0xf] }
 0x247   : > { %2726 = vmatmul.bf16.gmra.mxu3 %v5544_v30 }
 0x248   : > { %7297 = vst [vmem:[#allocation113_spill] sm:$0xff] %v6150_v28 }
 0x249   : > { %v2554_v60 = vpop.f32.mrf.mxu2  ;;  %v2290_v17 = vpop.f32.mrf.mxu0 }
 0x24a   : > { %v2687_v33 = vpop.f32.mrf.mxu3  ;;  %v2291_v7 = vadd.f32 %v2290_v17, %v5572_v23  ;;  %v2423_v0 = vpop.f32.mrf.mxu1 }
 0x24b   : > { %v6141_v45 = vadd.f32 %v2687_v33, %v2554_v60 }
 0x24c   : > { %v6144_v16 = vadd.f32 %v2423_v0, %v2291_v7  ;;  %v4224_v0 = vld [vmem:[%s5333_s26 + $0x1f0] sm:$0xf] }
 0x24d   : > { %7296 = vst [vmem:[#allocation112_spill] sm:$0xff] %v6141_v45  ;;  %v5056_v45 = vld [vmem:[%s5333_s26 + $0x404] sm:$0xf] }
 0x251   : > { %v2556_v29 = vpop.f32.mrf.mxu2  ;;  %v2293_v24 = vpop.f32.mrf.mxu0 }
 0x252   : > { %v2689_v30 = vpop.f32.mrf.mxu3  ;;  %v2294_v23 = vadd.f32 %v2293_v24, %v5578_v46  ;;  %v2426_v62 = vpop.f32.mrf.mxu1 }
 0x253   : > { %v6154_v52 = vadd.f32 %v2689_v30, %v2556_v29  ;;  %v6172_v29 = vor.u32 %v4993_v57, %v4224_v0  ;;  %v4248_v57 = vld [vmem:[%s5333_s26 + $0x220] sm:$0xf] }
 0x254   : > { %v6157_v53 = vadd.f32 %v2426_v62, %v2294_v23  ;;  %2332 = vmatmul.bf16.gmra.mxu0 %v6150_v28 }
 0x255   : > { %7299 = vst [vmem:[#allocation115_spill] sm:$0xff] %v6154_v52  ;;  %2465 = vmatmul.bf16.gmra.mxu1 %v6152_v41  ;;  %v4762_v41 = vld [vmem:[%s5270_s22 + $0x1b8] sm:$0xf0]  ;;  %v4738_v52 = vld [vmem:[%s5270_s22 + $0x188] sm:$0xf0] }
 0x256   : > { %2598 = vmatmul.bf16.gmra.mxu2 %v5564_v11  ;;  %7302 = vst [vmem:[#allocation118_spill] sm:$0xff] %v6172_v29 }
 0x257   : > { %2731 = vmatmul.bf16.gmra.mxu3 %v5566_v15  ;;  %v6174_v15 = vor.u32 %v4990_v32, %v4226_v20  ;;  %v4999_v32 = vld [vmem:[%s5333_s26 + $0x234] sm:$0xf0]  ;;  %v4250_v20 = vld [vmem:[%s5333_s26 + $0x238] sm:$0xf0] }
 0x259   : > { %v2559_v55 = vpop.f32.mrf.mxu2  ;;  %v2295_v60 = vpop.f32.mrf.mxu0  ;;  %7303 = vst [vmem:[#allocation119_spill] sm:$0xff] %v6174_v15 }
 0x25a   : > { %v2692_v47 = vpop.f32.mrf.mxu3  ;;  %v2296_v46 = vadd.f32 %v2295_v60, %v5596_v43  ;;  %v2428_v17 = vpop.f32.mrf.mxu1 }
 0x25b   : > { %v6163_v33 = vadd.f32 %v2692_v47, %v2559_v55 }
 0x25c   : > { %v6166_v7 = vadd.f32 %v2428_v17, %v2296_v46 }
 0x25d   : > { %7300 = vst [vmem:[#allocation116_spill] sm:$0xff] %v6163_v33 }
 0x25e   : > { %7301 = vst [vmem:[#allocation117_spill] sm:$0xff] %v6166_v7 }
 0x261   : > { %v2561_v37 = vpop.f32.mrf.mxu2  ;;  %v2298_v30 = vpop.f32.mrf.mxu0 }
 0x262   : > { %v2694_v11 = vpop.f32.mrf.mxu3  ;;  %v2299_v43 = vadd.f32 %v2298_v30, %v5602_v4  ;;  %v2431_v23 = vpop.f32.mrf.mxu1  ;;  %v4826_v30 = vld [vmem:[%s5270_s22 + $0x238] sm:$0xf0] }
 0x263   : > { %v6176_v24 = vadd.f32 %v2694_v11, %v2561_v37  ;;  %v5142_v11 = vld [vmem:[%s5270_s22 + $0x234] sm:$0xf] }
 0x264   : > { %v6179_v62 = vadd.f32 %v2431_v23, %v2299_v43  ;;  %2337 = vmatmul.bf16.gmra.mxu0 %v6172_v29  ;;  %v5110_v43 = vld [vmem:[%s5270_s22 + $0x134] sm:$0xf] }
 0x265   : > { %7304 = vst [vmem:[#allocation120_spill] sm:$0xff] %v6176_v24  ;;  %2470 = vmatmul.bf16.gmra.mxu1 %v6174_v15  ;;  %v5126_v24 = vld [vmem:[%s5270_s22 + $0x1b4] sm:$0xf] }
 0x266   : > { %7305 = vst [vmem:[#allocation121_spill] sm:$0xff] %v6179_v62  ;;  %2603 = vmatmul.bf16.gmra.mxu2 %v5588_v10  ;;  %v4996_v10 = vld [vmem:[%s5333_s26 + $0x224] sm:$0xf]  ;;  %v4765_v28 = vor.u32 %v5126_v24, %v4762_v41 }
 0x267   : > { %2736 = vmatmul.bf16.gmra.mxu3 %v5590_v21  ;;  %v6194_v21 = vor.u32 %v4999_v32, %v4248_v57 }
 0x268   : > { %2948 = vmatpush.bf16.msra.mxu1 %v4765_v28 }
 0x269   : > { %v2564_v55 = vpop.f32.mrf.mxu2  ;;  %v2300_v60 = vpop.f32.mrf.mxu0  ;;  %7307 = vst [vmem:[#allocation123_spill] sm:$0xff] %v6194_v21 }
 0x26a   : > { %v2697_v47 = vpop.f32.mrf.mxu3  ;;  %v2301_v46 = vadd.f32 %v2300_v60, %v5626_v9  ;;  %v2433_v17 = vpop.f32.mrf.mxu1  ;;  %v4698_v60 = vld [vmem:[%s5270_s22 + $0x138] sm:$0xf0] }
 0x26b   : > { %v6185_v4 = vadd.f32 %v2697_v47, %v2564_v55  ;;  %v6199_v55 = vor.u32 %v4996_v10, %v4250_v20  ;;  %v4829_v47 = vor.u32 %v5142_v11, %v4826_v30  ;;  %v4701_v57 = vor.u32 %v5110_v43, %v4698_v60  ;;  %v5005_v11 = vld [vmem:[%s5333_s26 + $0x264] sm:$0xf0]  ;;  %v5002_v30 = vld [vmem:[%s5333_s26 + $0x254] sm:$0xf]  ;;  %v4274_v43 = vld [vmem:[%s5333_s26 + $0x268] sm:$0xf0] }
 0x26c   : > { %v6188_v0 = vadd.f32 %v2433_v17, %v2301_v46  ;;  %v5158_v46 = vld [vmem:[%s5270_s22 + $0x2b4] sm:$0xf]  ;;  %v4890_v17 = vld [vmem:[%s5270_s22 + $0x2b8] sm:$0xf0]  ;;  %v6226_v28 = vor.u32 %v5002_v30, %v4274_v43 }
 0x26d   : > { %7306 = vst [vmem:[#allocation122_spill] sm:$0xff] %v6185_v4  ;;  %v4893_v32 = vor.u32 %v5158_v46, %v4890_v17  ;;  %3081 = vmatpush.bf16.msra.mxu2 %v4829_v47  ;;  %2815 = vmatpush.bf16.msra.mxu0 %v4701_v57 }
 0x26e   : > { %7308 = vst [vmem:[#allocation124_spill] sm:$0xff] %v6199_v55 }
 0x26f   : > { %3214 = vmatpush.bf16.msra.mxu3 %v4893_v32  ;;  %7312 = vst [vmem:[#allocation128_spill] sm:$0xff] %v6226_v28 }
 0x271   : > { %v2566_v37 = vpop.f32.mrf.mxu2  ;;  %v2303_v9 = vpop.f32.mrf.mxu0 }
 0x272   : > { %v2699_v23 = vpop.f32.mrf.mxu3  ;;  %v2304_v29 = vadd.f32 %v2303_v9, %v5634_v40  ;;  %v2436_v4 = vpop.f32.mrf.mxu1 }
 0x273   : > { %v6204_v15 = vadd.f32 %v2699_v23, %v2566_v37  ;;  %v4272_v37 = vld [vmem:[%s5333_s26 + $0x250] sm:$0xf] }
 0x274   : > { %v6209_v33 = vadd.f32 %v2436_v4, %v2304_v29  ;;  %2342 = vmatmul.bf16.gmra.mxu0 %v6194_v21 }
 0x275   : > { %7309 = vst [vmem:[#allocation125_spill] sm:$0xff] %v6204_v15  ;;  %2475 = vmatmul.bf16.gmra.mxu1 %v6199_v55  ;;  %v5038_v55 = vld [vmem:[%s5333_s26 + $0x374] sm:$0xf]  ;;  %v5120_v15 = vld [vmem:[%s5270_s22 + $0x184] sm:$0xf] }
 0x276   : > { %2608 = vmatmul.bf16.gmra.mxu2 %v5618_v6  ;;  %v6224_v6 = vor.u32 %v5005_v11, %v4272_v37  ;;  %v5008_v37 = vld [vmem:[%s5333_s26 + $0x284] sm:$0xf]  ;;  %v4298_v11 = vld [vmem:[%s5333_s26 + $0x298] sm:$0xf0]  ;;  %v4741_v50 = vor.u32 %v5120_v15, %v4738_v52  ;;  %v7377_v52 = vld [vmem:[#allocation75_spill] sm:$0xff] }
 0x277   : > { %2741 = vmatmul.bf16.gmra.mxu3 %v5620_v59 }
 0x278   : > { %7311 = vst [vmem:[#allocation127_spill] sm:$0xff] %v6224_v6 }
 0x279   : > { %v2569_v40 = vpop.f32.mrf.mxu2  ;;  %v2305_v41 = vpop.f32.mrf.mxu0 }
 0x27a   : > { %v2702_v10 = vpop.f32.mrf.mxu3  ;;  %v2306_v29 = vadd.f32 %v2305_v41, %v5652_v22  ;;  %v2438_v4 = vpop.f32.mrf.mxu1 }
 0x27b   : > { %v6215_v24 = vadd.f32 %v2702_v10, %v2569_v40 }
 0x27c   : > { %v6218_v20 = vadd.f32 %v2438_v4, %v2306_v29  ;;  %v4296_v29 = vld [vmem:[%s5333_s26 + $0x280] sm:$0xf]  ;;  %v5011_v4 = vld [vmem:[%s5333_s26 + $0x294] sm:$0xf0] }
 0x27d   : > { %7310 = vst [vmem:[#allocation126_spill] sm:$0xff] %v6215_v24  ;;  %v6246_v43 = vor.u32 %v5011_v4, %v4296_v29  ;;  %v4320_v29 = vld [vmem:[%s5333_s26 + $0x2b0] sm:$0xf]  ;;  %v5017_v4 = vld [vmem:[%s5333_s26 + $0x2c4] sm:$0xf0] }
 0x27f   : > { %7315 = vst [vmem:[#allocation131_spill] sm:$0xff] %v6246_v43 }
 0x281   : > { %v2571_v23 = vpop.f32.mrf.mxu2  ;;  %v2308_v9 = vpop.f32.mrf.mxu0 }
 0x282   : > { %v2704_v59 = vpop.f32.mrf.mxu3  ;;  %v2309_v22 = vadd.f32 %v2308_v9, %v5658_v61  ;;  %v2441_v60 = vpop.f32.mrf.mxu1 }
 0x283   : > { %v6228_v47 = vadd.f32 %v2704_v59, %v2571_v23 }
 0x284   : > { %v6231_v46 = vadd.f32 %v2441_v60, %v2309_v22  ;;  %2347 = vmatmul.bf16.gmra.mxu0 %v6224_v6 }
 0x285   : > { %7313 = vst [vmem:[#allocation129_spill] sm:$0xff] %v6228_v47  ;;  %2480 = vmatmul.bf16.gmra.mxu1 %v6226_v28  ;;  %v5041_v47 = vld [vmem:[%s5333_s26 + $0x384] sm:$0xf0] }
 0x286   : > { %2613 = vmatmul.bf16.gmra.mxu2 %v5644_v13 }
 0x287   : > { %2746 = vmatmul.bf16.gmra.mxu3 %v5646_v31  ;;  %v6248_v31 = vor.u32 %v5008_v37, %v4298_v11  ;;  %v5014_v37 = vld [vmem:[%s5333_s26 + $0x2b4] sm:$0xf] }
 0x289   : > { %v2574_v17 = vpop.f32.mrf.mxu2  ;;  %v2310_v32 = vpop.f32.mrf.mxu0  ;;  %7316 = vst [vmem:[#allocation132_spill] sm:$0xff] %v6248_v31 }
 0x28a   : > { %v2707_v57 = vpop.f32.mrf.mxu3  ;;  %v2311_v61 = vadd.f32 %v2310_v32, %v5676_v48  ;;  %v2443_v10 = vpop.f32.mrf.mxu1 }
 0x28b   : > { %v6237_v40 = vadd.f32 %v2707_v57, %v2574_v17 }
 0x28c   : > { %v6240_v41 = vadd.f32 %v2443_v10, %v2311_v61 }
 0x28d   : > { %7314 = vst [vmem:[#allocation130_spill] sm:$0xff] %v6237_v40  ;;  %v4416_v40 = vld [vmem:[%s5333_s26 + $0x370] sm:$0xf] }
 0x28e   : > { %v6372_v21 = vor.u32 %v5041_v47, %v4416_v40  ;;  %v7354_v47 = vld [vmem:[#allocation52_spill] sm:$0xff]  ;;  %v7355_v40 = vld [vmem:[#allocation53_spill] sm:$0xff] }
 0x291   : > { %v2576_v30 = vpop.f32.mrf.mxu2  ;;  %v2313_v23 = vpop.f32.mrf.mxu0 }
 0x292   : > { %v2709_v13 = vpop.f32.mrf.mxu3  ;;  %v2314_v48 = vadd.f32 %v2313_v23, %v5682_v63  ;;  %v2446_v9 = vpop.f32.mrf.mxu1 }
 0x293   : > { %v6250_v59 = vadd.f32 %v2709_v13, %v2576_v30  ;;  %v5140_v30 = vld [vmem:[%s5270_s22 + $0x224] sm:$0xf]  ;;  %v4818_v13 = vld [vmem:[%s5270_s22 + $0x228] sm:$0xf0] }
 0x294   : > { %v6253_v22 = vadd.f32 %v2446_v9, %v2314_v48  ;;  %2352 = vmatmul.bf16.gmra.mxu0 %v6246_v43 }
 0x295   : > { %7317 = vst [vmem:[#allocation133_spill] sm:$0xff] %v6250_v59  ;;  %2485 = vmatmul.bf16.gmra.mxu1 %v6248_v31  ;;  %v5156_v31 = vld [vmem:[%s5270_s22 + $0x2a4] sm:$0xf] }
 0x296   : > { %2618 = vmatmul.bf16.gmra.mxu2 %v5668_v19  ;;  %v4322_v19 = vld [vmem:[%s5333_s26 + $0x2c8] sm:$0xf0] }
 0x297   : > { %2751 = vmatmul.bf16.gmra.mxu3 %v5670_v44  ;;  %v6268_v44 = vor.u32 %v5017_v4, %v4320_v29  ;;  %v6272_v9 = vor.u32 %v5014_v37, %v4322_v19  ;;  %v4882_v4 = vld [vmem:[%s5270_s22 + $0x2a8] sm:$0xf0]  ;;  %v7322_v19 = vld [vmem:[#allocation30_spill] sm:$0xff] }
 0x298   : > { %v4885_v37 = vor.u32 %v5156_v31, %v4882_v4  ;;  %v7325_v31 = vld [vmem:[#allocation38_spill] sm:$0xff] }
 0x299   : > { %v2579_v60 = vpop.f32.mrf.mxu2  ;;  %v2315_v57 = vpop.f32.mrf.mxu0  ;;  %7319 = vst [vmem:[#allocation135_spill] sm:$0xff] %v6268_v44  ;;  %v4344_v4 = vld [vmem:[%s5333_s26 + $0x2e0] sm:$0xf] }
 0x29a   : > { %v2712_v17 = vpop.f32.mrf.mxu3  ;;  %v2316_v63 = vadd.f32 %v2315_v57, %v5702_v42  ;;  %v2448_v61 = vpop.f32.mrf.mxu1  ;;  %7320 = vst [vmem:[#allocation136_spill] sm:$0xff] %v6272_v9  ;;  %v4821_v42 = vor.u32 %v5140_v30, %v4818_v13  ;;  %3215 = vmatpush.bf16.msra.mxu3 %v4885_v37  ;;  %v5124_v30 = vld [vmem:[%s5270_s22 + $0x1a4] sm:$0xf]  ;;  %v4754_v13 = vld [vmem:[%s5270_s22 + $0x1a8] sm:$0xf0] }
 0x29b   : > { %v6259_v32 = vadd.f32 %v2712_v17, %v2579_v60 }
 0x29c   : > { %v6262_v10 = vadd.f32 %v2448_v61, %v2316_v63  ;;  %v5108_v63 = vld [vmem:[%s5270_s22 + $0x124] sm:$0xf]  ;;  %v4690_v61 = vld [vmem:[%s5270_s22 + $0x128] sm:$0xf0]  ;;  %3082 = vmatpush.bf16.msra.mxu2 %v4821_v42  ;;  %v4757_v42 = vor.u32 %v5124_v30, %v4754_v13 }
 0x29d   : > { %7318 = vst [vmem:[#allocation134_spill] sm:$0xff] %v6259_v32  ;;  %v4693_v29 = vor.u32 %v5108_v63, %v4690_v61  ;;  %v7329_v30 = vld [vmem:[#allocation39_spill] sm:$0xff] }
 0x29e   : > { %2949 = vmatpush.bf16.msra.mxu1 %v4757_v42  ;;  %v7330_v42 = vld [vmem:[#allocation34_spill] sm:$0xff] }
 0x29f   : > { %2816 = vmatpush.bf16.msra.mxu0 %v4693_v29  ;;  %v4346_v29 = vld [vmem:[%s5333_s26 + $0x2f8] sm:$0xf0] }
 0x2a1   : > { %v2581_v11 = vpop.f32.mrf.mxu2  ;;  %v2318_v48 = vpop.f32.mrf.mxu0 }
 0x2a2   : > { %v2714_v23 = vpop.f32.mrf.mxu3  ;;  %v2319_v17 = vadd.f32 %v2318_v48, %v5714_v8  ;;  %v2451_v57 = vpop.f32.mrf.mxu1  ;;  %v7323_v8 = vld [vmem:[#allocation31_spill] sm:$0xff] }
 0x2a3   : > { %v6274_v60 = vadd.f32 %v2714_v23, %v2581_v11 }
 0x2a4   : > { %v6281_v43 = vadd.f32 %v2451_v57, %v2319_v17  ;;  %2357 = vmatmul.bf16.gmra.mxu0 %v6268_v44 }
 0x2a5   : > { %7321 = vst [vmem:[#allocation137_spill] sm:$0xff] %v6274_v60  ;;  %2490 = vmatmul.bf16.gmra.mxu1 %v6272_v9 }
 0x2a6   : > { %2623 = vmatmul.bf16.gmra.mxu2 %v7322_v19  ;;  %v5023_v19 = vld [vmem:[%s5333_s26 + $0x2f4] sm:$0xf0] }
 0x2a7   : > { %2756 = vmatmul.bf16.gmra.mxu3 %v7323_v8  ;;  %v5020_v8 = vld [vmem:[%s5333_s26 + $0x2e4] sm:$0xf]  ;;  %v6298_v37 = vor.u32 %v5023_v19, %v4344_v4  ;;  %v7333_v4 = vld [vmem:[#allocation44_spill] sm:$0xff] }
 0x2a8   : > { %v6300_v32 = vor.u32 %v5020_v8, %v4346_v29  ;;  %v4368_v29 = vld [vmem:[%s5333_s26 + $0x310] sm:$0xf] }
 0x2a9   : > { %v2584_v11 = vpop.f32.mrf.mxu2  ;;  %v2320_v48 = vpop.f32.mrf.mxu0  ;;  %7326 = vst [vmem:[#allocation31_spill] sm:$0xff] %v6298_v37 }
 0x2aa   : > { %v2717_v23 = vpop.f32.mrf.mxu3  ;;  %v2321_v57 = vadd.f32 %v2320_v48, %v7325_v31  ;;  %v2453_v63 = vpop.f32.mrf.mxu1  ;;  %7327 = vst [vmem:[#allocation38_spill] sm:$0xff] %v6300_v32  ;;  %v7331_v31 = vld [vmem:[#allocation35_spill] sm:$0xff] }
 0x2ab   : > { %v6289_v17 = vadd.f32 %v2717_v23, %v2584_v11 }
 0x2ac   : > { %v6292_v61 = vadd.f32 %v2453_v63, %v2321_v57 }
 0x2ad   : > { %7324 = vst [vmem:[#allocation30_spill] sm:$0xff] %v6289_v17 }
 0x2b1   : > { %v2586_v9 = vpop.f32.mrf.mxu2  ;;  %v2323_v60 = vpop.f32.mrf.mxu0 }
 0x2b2   : > { %v2719_v44 = vpop.f32.mrf.mxu3  ;;  %v2324_v13 = vadd.f32 %v2323_v60, %v7329_v30  ;;  %v2456_v23 = vpop.f32.mrf.mxu1  ;;  %v5029_v30 = vld [vmem:[%s5333_s26 + $0x324] sm:$0xf0] }
 0x2b3   : > { %v6302_v11 = vadd.f32 %v2719_v44, %v2586_v9 }
 0x2b4   : > { %v6305_v48 = vadd.f32 %v2456_v23, %v2324_v13  ;;  %2362 = vmatmul.bf16.gmra.mxu0 %v6298_v37  ;;  %v5026_v13 = vld [vmem:[%s5333_s26 + $0x314] sm:$0xf]  ;;  %v4370_v23 = vld [vmem:[%s5333_s26 + $0x328] sm:$0xf0] }
 0x2b5   : > { %7328 = vst [vmem:[#allocation138_spill] sm:$0xff] %v6302_v11  ;;  %2495 = vmatmul.bf16.gmra.mxu1 %v6300_v32  ;;  %v6320_v32 = vor.u32 %v5029_v30, %v4368_v29 }
 0x2b6   : > { %2628 = vmatmul.bf16.gmra.mxu2 %v7330_v42 }
 0x2b7   : > { %2761 = vmatmul.bf16.gmra.mxu3 %v7331_v31  ;;  %7334 = vst [vmem:[#allocation34_spill] sm:$0xff] %v6320_v32  ;;  %v6322_v31 = vor.u32 %v5026_v13, %v4370_v23  ;;  %v7341_v23 = vld [vmem:[#allocation50_spill] sm:$0xff] }
 0x2b9   : > { %v2589_v57 = vpop.f32.mrf.mxu2  ;;  %v2325_v44 = vpop.f32.mrf.mxu0  ;;  %7335 = vst [vmem:[#allocation35_spill] sm:$0xff] %v6322_v31 }
 0x2ba   : > { %v2722_v63 = vpop.f32.mrf.mxu3  ;;  %v2326_v60 = vadd.f32 %v2325_v44, %v7333_v4  ;;  %v2458_v19 = vpop.f32.mrf.mxu1 }
 0x2bb   : > { %v6311_v9 = vadd.f32 %v2722_v63, %v2589_v57  ;;  %v7337_v57 = vld [vmem:[#allocation45_spill] sm:$0xff] }
 0x2bc   : > { %v6314_v8 = vadd.f32 %v2458_v19, %v2326_v60  ;;  %v7338_v60 = vld [vmem:[#allocation40_spill] sm:$0xff]  ;;  %v7339_v19 = vld [vmem:[#allocation41_spill] sm:$0xff] }
 0x2bd   : > { %7332 = vst [vmem:[#allocation39_spill] sm:$0xff] %v6311_v9 }
 0x2c1   : > { %v2591_v37 = vpop.f32.mrf.mxu2  ;;  %v2328_v11 = vpop.f32.mrf.mxu0 }
 0x2c2   : > { %v2724_v42 = vpop.f32.mrf.mxu3  ;;  %v2329_v63 = vadd.f32 %v2328_v11, %v7337_v57  ;;  %v2461_v44 = vpop.f32.mrf.mxu1 }
 0x2c3   : > { %v6324_v17 = vadd.f32 %v2724_v42, %v2591_v37 }
 0x2c4   : > { %v6327_v4 = vadd.f32 %v2461_v44, %v2329_v63  ;;  %2367 = vmatmul.bf16.gmra.mxu0 %v6320_v32  ;;  %v4392_v63 = vld [vmem:[%s5333_s26 + $0x340] sm:$0xf]  ;;  %v5035_v44 = vld [vmem:[%s5333_s26 + $0x354] sm:$0xf0]  ;;  %v5032_v32 = vld [vmem:[%s5333_s26 + $0x344] sm:$0xf] }
 0x2c5   : > { %7336 = vst [vmem:[#allocation44_spill] sm:$0xff] %v6324_v17  ;;  %2500 = vmatmul.bf16.gmra.mxu1 %v6322_v31  ;;  %v4394_v31 = vld [vmem:[%s5333_s26 + $0x358] sm:$0xf0] }
 0x2c6   : > { %2633 = vmatmul.bf16.gmra.mxu2 %v7338_v60  ;;  %v6342_v60 = vor.u32 %v5035_v44, %v4392_v63  ;;  %v4682_v44 = vld [vmem:[%s5270_s22 + $0x118] sm:$0xf0] }
 0x2c7   : > { %2766 = vmatmul.bf16.gmra.mxu3 %v7339_v19 }
 0x2c8   : > { %7342 = vst [vmem:[#allocation40_spill] sm:$0xff] %v6342_v60 }
 0x2c9   : > { %v2594_v29 = vpop.f32.mrf.mxu2  ;;  %v2330_v37 = vpop.f32.mrf.mxu0 }
 0x2ca   : > { %v2727_v30 = vpop.f32.mrf.mxu3  ;;  %v2331_v11 = vadd.f32 %v2330_v37, %v7341_v23  ;;  %v2463_v42 = vpop.f32.mrf.mxu1  ;;  %v7345_v37 = vld [vmem:[#allocation51_spill] sm:$0xff] }
 0x2cb   : > { %v6333_v13 = vadd.f32 %v2727_v30, %v2594_v29  ;;  %v6344_v29 = vor.u32 %v5032_v32, %v4394_v31  ;;  %v7346_v32 = vld [vmem:[#allocation46_spill] sm:$0xff]  ;;  %v7347_v31 = vld [vmem:[#allocation47_spill] sm:$0xff] }
 0x2cc   : > { %v6336_v57 = vadd.f32 %v2463_v42, %v2331_v11  ;;  %v5138_v42 = vld [vmem:[%s5270_s22 + $0x214] sm:$0xf]  ;;  %7350 = vst [vmem:[#allocation46_spill] sm:$0xff] %v6372_v21 }
 0x2cd   : > { %7340 = vst [vmem:[#allocation45_spill] sm:$0xff] %v6333_v13  ;;  %v4810_v13 = vld [vmem:[%s5270_s22 + $0x218] sm:$0xf0] }
 0x2ce   : > { %7343 = vst [vmem:[#allocation41_spill] sm:$0xff] %v6344_v29  ;;  %v4813_v59 = vor.u32 %v5138_v42, %v4810_v13  ;;  %v5122_v42 = vld [vmem:[%s5270_s22 + $0x194] sm:$0xf] }
 0x2d0   : > { %3083 = vmatpush.bf16.msra.mxu2 %v4813_v59 }
 0x2d1   : > { %v2596_v17 = vpop.f32.mrf.mxu2  ;;  %v2333_v9 = vpop.f32.mrf.mxu0 }
 0x2d2   : > { %v2729_v19 = vpop.f32.mrf.mxu3  ;;  %v2334_v23 = vadd.f32 %v2333_v9, %v7345_v37  ;;  %v2466_v11 = vpop.f32.mrf.mxu1  ;;  %v5106_v9 = vld [vmem:[%s5270_s22 + $0x114] sm:$0xf] }
 0x2d3   : > { %v6346_v30 = vadd.f32 %v2729_v19, %v2596_v17  ;;  %v5154_v19 = vld [vmem:[%s5270_s22 + $0x294] sm:$0xf] }
 0x2d4   : > { %v6351_v63 = vadd.f32 %v2466_v11, %v2334_v23  ;;  %2372 = vmatmul.bf16.gmra.mxu0 %v6342_v60  ;;  %v4685_v23 = vor.u32 %v5106_v9, %v4682_v44  ;;  %v4874_v11 = vld [vmem:[%s5270_s22 + $0x298] sm:$0xf0]  ;;  %v4418_v9 = vld [vmem:[%s5333_s26 + $0x388] sm:$0xf0] }
 0x2d5   : > { %7344 = vst [vmem:[#allocation50_spill] sm:$0xff] %v6346_v30  ;;  %2505 = vmatmul.bf16.gmra.mxu1 %v6344_v29  ;;  %v4746_v60 = vld [vmem:[%s5270_s22 + $0x198] sm:$0xf0]  ;;  %v4877_v59 = vor.u32 %v5154_v19, %v4874_v11 }
 0x2d6   : > { %2638 = vmatmul.bf16.gmra.mxu2 %v7346_v32  ;;  %v7349_v32 = vld [vmem:[#allocation56_spill] sm:$0xff]  ;;  %v4749_v28 = vor.u32 %v5122_v42, %v4746_v60  ;;  %2817 = vmatpush.bf16.msra.mxu0 %v4685_v23  ;;  %v7353_v60 = vld [vmem:[#allocation57_spill] sm:$0xff]  ;;  %v7357_v42 = vld [vmem:[#allocation62_spill] sm:$0xff] }
 0x2d7   : > { %2771 = vmatmul.bf16.gmra.mxu3 %v7347_v31 }
 0x2d8   : > { %3216 = vmatpush.bf16.msra.mxu3 %v4877_v59  ;;  %2950 = vmatpush.bf16.msra.mxu1 %v4749_v28 }
 0x2d9   : > { %v2599_v17 = vpop.f32.mrf.mxu2  ;;  %v2335_v13 = vpop.f32.mrf.mxu0 }
 0x2da   : > { %v2732_v37 = vpop.f32.mrf.mxu3  ;;  %v2336_v30 = vadd.f32 %v2335_v13, %v7349_v32  ;;  %v2468_v31 = vpop.f32.mrf.mxu1 }
 0x2db   : > { %v6363_v29 = vadd.f32 %v2732_v37, %v2599_v17  ;;  %v6374_v37 = vor.u32 %v5038_v55, %v4418_v9  ;;  %v4440_v9 = vld [vmem:[%s5333_s26 + $0x3a0] sm:$0xf] }
 0x2dc   : > { %v6366_v6 = vadd.f32 %v2468_v31, %v2336_v30  ;;  %2951 = vmatpush.bf16.msra.mxu1 %v4741_v50  ;;  %v7378_v50 = vld [vmem:[#allocation70_spill] sm:$0xff] }
 0x2dd   : > { %7348 = vst [vmem:[#allocation51_spill] sm:$0xff] %v6363_v29 }
 0x2de   : > { %7351 = vst [vmem:[#allocation47_spill] sm:$0xff] %v6374_v37 }
 0x2e1   : > { %v2601_v44 = vpop.f32.mrf.mxu2  ;;  %v2338_v17 = vpop.f32.mrf.mxu0 }
 0x2e2   : > { %v2734_v24 = vpop.f32.mrf.mxu3  ;;  %v2339_v30 = vadd.f32 %v2338_v17, %v7353_v60  ;;  %v2471_v19 = vpop.f32.mrf.mxu1  ;;  %v5044_v17 = vld [vmem:[%s5333_s26 + $0x3a4] sm:$0xf]  ;;  %v4442_v60 = vld [vmem:[%s5333_s26 + $0x3b8] sm:$0xf0] }
 0x2e3   : > { %v6376_v13 = vadd.f32 %v2734_v24, %v2601_v44  ;;  %v5047_v44 = vld [vmem:[%s5333_s26 + $0x3b4] sm:$0xf0] }
 0x2e4   : > { %v6379_v28 = vadd.f32 %v2471_v19, %v2339_v30  ;;  %2377 = vmatmul.bf16.gmra.mxu0 %v6372_v21  ;;  %v6394_v19 = vor.u32 %v5047_v44, %v4440_v9 }
 0x2e5   : > { %7352 = vst [vmem:[#allocation56_spill] sm:$0xff] %v6376_v13  ;;  %2510 = vmatmul.bf16.gmra.mxu1 %v6374_v37 }
 0x2e6   : > { %2643 = vmatmul.bf16.gmra.mxu2 %v7354_v47  ;;  %7358 = vst [vmem:[#allocation52_spill] sm:$0xff] %v6394_v19 }
 0x2e7   : > { %2776 = vmatmul.bf16.gmra.mxu3 %v7355_v40  ;;  %v6396_v40 = vor.u32 %v5044_v17, %v4442_v60 }
 0x2e9   : > { %v2604_v55 = vpop.f32.mrf.mxu2  ;;  %v2340_v24 = vpop.f32.mrf.mxu0  ;;  %7359 = vst [vmem:[#allocation53_spill] sm:$0xff] %v6396_v40 }
 0x2ea   : > { %v2737_v23 = vpop.f32.mrf.mxu3  ;;  %v2341_v32 = vadd.f32 %v2340_v24, %v7357_v42  ;;  %v2473_v31 = vpop.f32.mrf.mxu1 }
 0x2eb   : > { %v6385_v11 = vadd.f32 %v2737_v23, %v2604_v55  ;;  %v7361_v55 = vld [vmem:[#allocation63_spill] sm:$0xff] }
 0x2ec   : > { %v6388_v59 = vadd.f32 %v2473_v31, %v2341_v32  ;;  %v7362_v32 = vld [vmem:[#allocation58_spill] sm:$0xff]  ;;  %v7363_v31 = vld [vmem:[#allocation59_spill] sm:$0xff] }
 0x2ed   : > { %7356 = vst [vmem:[#allocation57_spill] sm:$0xff] %v6385_v11 }
 0x2f1   : > { %v2606_v30 = vpop.f32.mrf.mxu2  ;;  %v2343_v37 = vpop.f32.mrf.mxu0 }
 0x2f2   : > { %v2739_v47 = vpop.f32.mrf.mxu3  ;;  %v2344_v23 = vadd.f32 %v2343_v37, %v7361_v55  ;;  %v2476_v24 = vpop.f32.mrf.mxu1 }
 0x2f3   : > { %v6398_v21 = vadd.f32 %v2739_v47, %v2606_v30  ;;  %v7365_v30 = vld [vmem:[#allocation68_spill] sm:$0xff] }
 0x2f4   : > { %v6401_v42 = vadd.f32 %v2476_v24, %v2344_v23  ;;  %2382 = vmatmul.bf16.gmra.mxu0 %v6394_v19  ;;  %v4464_v23 = vld [vmem:[%s5333_s26 + $0x3d0] sm:$0xf]  ;;  %v5053_v24 = vld [vmem:[%s5333_s26 + $0x3e4] sm:$0xf0]  ;;  %v4466_v19 = vld [vmem:[%s5333_s26 + $0x3e8] sm:$0xf0] }
 0x2f5   : > { %7360 = vst [vmem:[#allocation62_spill] sm:$0xff] %v6398_v21  ;;  %2515 = vmatmul.bf16.gmra.mxu1 %v6396_v40  ;;  %v5050_v21 = vld [vmem:[%s5333_s26 + $0x3d4] sm:$0xf] }
 0x2f6   : > { %2648 = vmatmul.bf16.gmra.mxu2 %v7362_v32  ;;  %v6416_v32 = vor.u32 %v5053_v24, %v4464_v23  ;;  %v6418_v13 = vor.u32 %v5050_v21, %v4466_v19  ;;  %v7371_v23 = vld [vmem:[#allocation65_spill] sm:$0xff]  ;;  %v5136_v19 = vld [vmem:[%s5270_s22 + $0x204] sm:$0xf] }
 0x2f7   : > { %2781 = vmatmul.bf16.gmra.mxu3 %v7363_v31  ;;  %v5104_v24 = vld [vmem:[%s5270_s22 + $0x104] sm:$0xf] }
 0x2f8   : > { %7366 = vst [vmem:[#allocation58_spill] sm:$0xff] %v6416_v32 }
 0x2f9   : > { %v2609_v9 = vpop.f32.mrf.mxu2  ;;  %v2345_v17 = vpop.f32.mrf.mxu0  ;;  %7367 = vst [vmem:[#allocation59_spill] sm:$0xff] %v6418_v13 }
 0x2fa   : > { %v2742_v44 = vpop.f32.mrf.mxu3  ;;  %v2346_v37 = vadd.f32 %v2345_v17, %v7365_v30  ;;  %v2478_v47 = vpop.f32.mrf.mxu1 }
 0x2fb   : > { %v6407_v60 = vadd.f32 %v2742_v44, %v2609_v9  ;;  %v7369_v44 = vld [vmem:[#allocation69_spill] sm:$0xff] }
 0x2fc   : > { %v6410_v55 = vadd.f32 %v2478_v47, %v2346_v37  ;;  %v7370_v47 = vld [vmem:[#allocation64_spill] sm:$0xff] }
 0x2fd   : > { %7364 = vst [vmem:[#allocation63_spill] sm:$0xff] %v6407_v60 }
 0x301   : > { %v2611_v40 = vpop.f32.mrf.mxu2  ;;  %v2348_v11 = vpop.f32.mrf.mxu0 }
 0x302   : > { %v2744_v31 = vpop.f32.mrf.mxu3  ;;  %v2349_v17 = vadd.f32 %v2348_v11, %v7369_v44  ;;  %v2481_v30 = vpop.f32.mrf.mxu1 }
 0x303   : > { %v6420_v9 = vadd.f32 %v2744_v31, %v2611_v40  ;;  %v4802_v40 = vld [vmem:[%s5270_s22 + $0x208] sm:$0xf0] }
 0x304   : > { %v6423_v37 = vadd.f32 %v2481_v30, %v2349_v17  ;;  %2387 = vmatmul.bf16.gmra.mxu0 %v6416_v32  ;;  %v4805_v44 = vor.u32 %v5136_v19, %v4802_v40  ;;  %v4674_v17 = vld [vmem:[%s5270_s22 + $0x108] sm:$0xf0]  ;;  %v5152_v30 = vld [vmem:[%s5270_s22 + $0x284] sm:$0xf]  ;;  %v4488_v19 = vld [vmem:[%s5333_s26 + $0x400] sm:$0xf] }
 0x305   : > { %7368 = vst [vmem:[#allocation68_spill] sm:$0xff] %v6420_v9  ;;  %2520 = vmatmul.bf16.gmra.mxu1 %v6418_v13  ;;  %v4866_v32 = vld [vmem:[%s5270_s22 + $0x288] sm:$0xf0]  ;;  %v4677_v60 = vor.u32 %v5104_v24, %v4674_v17  ;;  %v5059_v40 = vld [vmem:[%s5333_s26 + $0x414] sm:$0xf0] }
 0x306   : > { %2653 = vmatmul.bf16.gmra.mxu2 %v7370_v47  ;;  %v7373_v47 = vld [vmem:[#allocation74_spill] sm:$0xff]  ;;  %v4869_v29 = vor.u32 %v5152_v30, %v4866_v32 }
 0x307   : > { %2786 = vmatmul.bf16.gmra.mxu3 %v7371_v23  ;;  %3084 = vmatpush.bf16.msra.mxu2 %v4805_v44 }
 0x308   : > { %2818 = vmatpush.bf16.msra.mxu0 %v4677_v60  ;;  %3217 = vmatpush.bf16.msra.mxu3 %v4869_v29 }
 0x309   : > { %v2614_v21 = vpop.f32.mrf.mxu2  ;;  %v2350_v11 = vpop.f32.mrf.mxu0 }
 0x30a   : > { %v2747_v31 = vpop.f32.mrf.mxu3  ;;  %v2351_v23 = vadd.f32 %v2350_v11, %v7373_v47  ;;  %v2483_v9 = vpop.f32.mrf.mxu1 }
 0x30b   : > { %v6435_v13 = vadd.f32 %v2747_v31, %v2614_v21  ;;  %v4490_v21 = vld [vmem:[%s5333_s26 + $0x418] sm:$0xf0] }
 0x30c   : > { %v6440_v56 = vadd.f32 %v2483_v9, %v2351_v23  ;;  %v6448_v24 = vor.u32 %v5056_v45, %v4490_v21  ;;  %v7379_v9 = vld [vmem:[#allocation71_spill] sm:$0xff]  ;;  %v7381_v23 = vld [vmem:[#allocation80_spill] sm:$0xff] }
 0x30d   : > { %7372 = vst [vmem:[#allocation69_spill] sm:$0xff] %v6435_v13  ;;  %v6446_v13 = vor.u32 %v5059_v40, %v4488_v19 }
 0x30e   : > { %7375 = vst [vmem:[#allocation65_spill] sm:$0xff] %v6448_v24 }
 0x30f   : > { %7374 = vst [vmem:[#allocation64_spill] sm:$0xff] %v6446_v13 }
 0x311   : > { %v2616_v31 = vpop.f32.mrf.mxu2  ;;  %v2353_v47 = vpop.f32.mrf.mxu0 }
 0x312   : > { %v2749_v11 = vpop.f32.mrf.mxu3  ;;  %v2354_v15 = vadd.f32 %v2353_v47, %v7377_v52  ;;  %v2486_v29 = vpop.f32.mrf.mxu1  ;;  %v5062_v47 = vld [vmem:[%s5333_s26 + $0x434] sm:$0xf]  ;;  %v4514_v52 = vld [vmem:[%s5333_s26 + $0x448] sm:$0xf0] }
 0x313   : > { %v6450_v32 = vadd.f32 %v2749_v11, %v2616_v31  ;;  %v4512_v31 = vld [vmem:[%s5333_s26 + $0x430] sm:$0xf]  ;;  %v5065_v11 = vld [vmem:[%s5333_s26 + $0x444] sm:$0xf0] }
 0x314   : > { %v6453_v60 = vadd.f32 %v2486_v29, %v2354_v15  ;;  %2392 = vmatmul.bf16.gmra.mxu0 %v6446_v13  ;;  %v6468_v29 = vor.u32 %v5065_v11, %v4512_v31 }
 0x315   : > { %7376 = vst [vmem:[#allocation74_spill] sm:$0xff] %v6450_v32  ;;  %2525 = vmatmul.bf16.gmra.mxu1 %v6448_v24 }
 0x316   : > { %2658 = vmatmul.bf16.gmra.mxu2 %v7378_v50  ;;  %7382 = vst [vmem:[#allocation70_spill] sm:$0xff] %v6468_v29 }
 0x317   : > { %2791 = vmatmul.bf16.gmra.mxu3 %v7379_v9  ;;  %v6470_v9 = vor.u32 %v5062_v47, %v4514_v52 }
 0x319   : > { %v2619_v45 = vpop.f32.mrf.mxu2  ;;  %v2355_v17 = vpop.f32.mrf.mxu0  ;;  %7383 = vst [vmem:[#allocation71_spill] sm:$0xff] %v6470_v9 }
 0x31a   : > { %v2752_v44 = vpop.f32.mrf.mxu3  ;;  %v2356_v19 = vadd.f32 %v2355_v17, %v7381_v23  ;;  %v2488_v40 = vpop.f32.mrf.mxu1 }
 0x31b   : > { %v6459_v30 = vadd.f32 %v2752_v44, %v2619_v45  ;;  %v7385_v45 = vld [vmem:[#allocation81_spill] sm:$0xff] }
 0x31c   : > { %v6462_v21 = vadd.f32 %v2488_v40, %v2356_v19  ;;  %v7386_v19 = vld [vmem:[#allocation76_spill] sm:$0xff]  ;;  %v7387_v40 = vld [vmem:[#allocation77_spill] sm:$0xff] }
 0x31d   : > { %7380 = vst [vmem:[#allocation75_spill] sm:$0xff] %v6459_v30 }
 0x321   : > { %v2621_v15 = vpop.f32.mrf.mxu2  ;;  %v2358_v24 = vpop.f32.mrf.mxu0 }
 0x322   : > { %v2754_v50 = vpop.f32.mrf.mxu3  ;;  %v2359_v44 = vadd.f32 %v2358_v24, %v7385_v45  ;;  %v2491_v17 = vpop.f32.mrf.mxu1 }
 0x323   : > { %v6472_v13 = vadd.f32 %v2754_v50, %v2621_v15  ;;  %v7389_v15 = vld [vmem:[#allocation86_spill] sm:$0xff] }
 0x324   : > { %v6475_v23 = vadd.f32 %v2491_v17, %v2359_v44  ;;  %2397 = vmatmul.bf16.gmra.mxu0 %v6468_v29  ;;  %v4536_v44 = vld [vmem:[%s5333_s26 + $0x460] sm:$0xf]  ;;  %v5071_v17 = vld [vmem:[%s5333_s26 + $0x474] sm:$0xf0]  ;;  %v4538_v29 = vld [vmem:[%s5333_s26 + $0x478] sm:$0xf0] }
 0x325   : > { %7384 = vst [vmem:[#allocation80_spill] sm:$0xff] %v6472_v13  ;;  %2530 = vmatmul.bf16.gmra.mxu1 %v6470_v9  ;;  %v5068_v13 = vld [vmem:[%s5333_s26 + $0x464] sm:$0xf]  ;;  %v3575_v9 = vmul.f32 %v6144_v16, %v6144_v16  ;;  %v6492_v30 = vor.u32 %v5071_v17, %v4536_v44  ;;  %v3579_v17 = vmul.f32 %v6166_v7, %v6166_v7 }
 0x326   : > { %2663 = vmatmul.bf16.gmra.mxu2 %v7386_v19 }
 0x327   : > { %2796 = vmatmul.bf16.gmra.mxu3 %v7387_v40  ;;  %7390 = vst [vmem:[#allocation76_spill] sm:$0xff] %v6492_v30  ;;  %v3573_v40 = vmul.f32 %v6135_v27, %v6135_v27 }
 0x329   : > { %v2624_v31 = vpop.f32.mrf.mxu2  ;;  %v2360_v47 = vpop.f32.mrf.mxu0  ;;  %v3671_v44 = vadd.f32 %v3575_v9, %v3573_v40  ;;  %v7394_v9 = vld [vmem:[#allocation83_spill] sm:$0xff] }
 0x32a   : > { %v2757_v11 = vpop.f32.mrf.mxu3  ;;  %v2361_v24 = vadd.f32 %v2360_v47, %v7389_v15  ;;  %v2493_v50 = vpop.f32.mrf.mxu1  ;;  %v6498_v15 = vor.u32 %v5068_v13, %v4538_v29  ;;  %v3581_v29 = vmul.f32 %v6179_v62, %v6179_v62 }
 0x32b   : > { %v6481_v52 = vadd.f32 %v2757_v11, %v2624_v31  ;;  %v3577_v31 = vmul.f32 %v6157_v53, %v6157_v53 }
 0x32c   : > { %v6484_v45 = vadd.f32 %v2493_v50, %v2361_v24  ;;  %7391 = vst [vmem:[#allocation77_spill] sm:$0xff] %v6498_v15  ;;  %v3452_v24 = vadd.f32 %v6144_v16, %v6135_v27 }
 0x32d   : > { %7388 = vst [vmem:[#allocation81_spill] sm:$0xff] %v6481_v52  ;;  %v3672_v13 = vadd.f32 %v3671_v44, %v3577_v31  ;;  %v3585_v31 = vmul.f32 %v6209_v33, %v6209_v33 }
 0x32e   : > { %v3453_v2 = vadd.f32 %v3452_v24, %v6157_v53 }
 0x32f   : > { %v3673_v40 = vadd.f32 %v3672_v13, %v3579_v17 }
 0x331   : > { %v2626_v19 = vpop.f32.mrf.mxu2  ;;  %v2363_v47 = vpop.f32.mrf.mxu0 }
 0x332   : > { %v2759_v11 = vpop.f32.mrf.mxu3  ;;  %v2364_v52 = vadd.f32 %v2363_v47, %v5954_v35  ;;  %v2496_v32 = vpop.f32.mrf.mxu1  ;;  %v3454_v35 = vadd.f32 %v3453_v2, %v6166_v7  ;;  %v3674_v47 = vadd.f32 %v3673_v40, %v3581_v29 }
 0x333   : > { %v6502_v50 = vadd.f32 %v2759_v11, %v2626_v19  ;;  %v7393_v19 = vld [vmem:[#allocation82_spill] sm:$0xff] }
 0x334   : > { %v6508_v49 = vadd.f32 %v2496_v32, %v2364_v52  ;;  %2402 = vmatmul.bf16.gmra.mxu0 %v6492_v30  ;;  %v3583_v32 = vmul.f32 %v6188_v0, %v6188_v0  ;;  %v3455_v52 = vadd.f32 %v3454_v35, %v6179_v62  ;;  %v3589_v62 = vmul.f32 %v6231_v46, %v6231_v46 }
 0x335   : > { %7392 = vst [vmem:[#allocation86_spill] sm:$0xff] %v6502_v50  ;;  %2535 = vmatmul.bf16.gmra.mxu1 %v6498_v15  ;;  %v429_v15 = vld [vmem:[%s5333_s26 + $0x490] sm:$0xff] }
 0x336   : > { %2668 = vmatmul.bf16.gmra.mxu2 %v7393_v19  ;;  %v3456_v19 = vadd.f32 %v3455_v52, %v6188_v0  ;;  %v3675_v13 = vadd.f32 %v3674_v47, %v3583_v32  ;;  %v965_v40 = vunpack.c.l.b16 %v429_v15  ;;  %v966_v7 = vunpack.c.h.b16 %v429_v15 }
 0x337   : > { %2801 = vmatmul.bf16.gmra.mxu3 %v7394_v9  ;;  %v3587_v9 = vmul.f32 %v6218_v20, %v6218_v20 }
 0x338   : > { %v3457_v35 = vadd.f32 %v3456_v19, %v6209_v33  ;;  %v3676_v50 = vadd.f32 %v3675_v13, %v3585_v31  ;;  %v3593_v19 = vmul.f32 %v6253_v22, %v6253_v22 }
 0x339   : > { %v2629_v11 = vpop.f32.mrf.mxu2  ;;  %v2365_v44 = vpop.f32.mrf.mxu0 }
 0x33a   : > { %v2762_v24 = vpop.f32.mrf.mxu3  ;;  %v2366_v2 = vadd.f32 %v2365_v44, %v5966_v39  ;;  %v2498_v17 = vpop.f32.mrf.mxu1  ;;  %v3458_v52 = vadd.f32 %v3457_v35, %v6218_v20  ;;  %v3591_v39 = vmul.f32 %v6240_v41, %v6240_v41 }
 0x33b   : > { %v6524_v30 = vadd.f32 %v2762_v24, %v2629_v11  ;;  %v3677_v11 = vadd.f32 %v3676_v50, %v3587_v9  ;;  %v6538_v24 = vpack.c.b16 %v965_v40, %v965_v40  ;;  %v3595_v40 = vmul.f32 %v6262_v10, %v6262_v10 }
 0x33c   : > { %v6530_v29 = vadd.f32 %v2498_v17, %v2366_v2  ;;  %v3459_v32 = vadd.f32 %v3458_v52, %v6231_v46  ;;  %v6542_v17 = vpack.c.b16 %v966_v7, %v966_v7  ;;  %v3597_v7 = vmul.f32 %v6281_v43, %v6281_v43 }
 0x33d   : > { %7395 = vst [vmem:[#allocation82_spill] sm:$0xff] %v6538_v24  ;;  %v3678_v44 = vadd.f32 %v3677_v11, %v3589_v62 }
 0x33e   : > { %7396 = vst [vmem:[#allocation83_spill] sm:$0xff] %v6542_v17  ;;  %v3460_v15 = vadd.f32 %v3459_v32, %v6240_v41  ;;  %v3599_v32 = vmul.f32 %v6292_v61, %v6292_v61 }
 0x33f   : > { %v3679_v35 = vadd.f32 %v3678_v44, %v3591_v39 }
 0x340   : > { %v3461_v62 = vadd.f32 %v3460_v15, %v6253_v22 }
 0x341   : > { %v2631_v47 = vpop.f32.mrf.mxu2  ;;  %v2368_v2 = vpop.f32.mrf.mxu0  ;;  %v3680_v11 = vadd.f32 %v3679_v35, %v3593_v19  ;;  %v3601_v19 = vmul.f32 %v6305_v48, %v6305_v48 }
 0x342   : > { %v2764_v31 = vpop.f32.mrf.mxu3  ;;  %v2369_v50 = vadd.f32 %v2368_v2, %v5972_v3  ;;  %v2501_v9 = vpop.f32.mrf.mxu1  ;;  %v3462_v3 = vadd.f32 %v3461_v62, %v6262_v10 }
 0x343   : > { %v6545_v13 = vadd.f32 %v2764_v31, %v2631_v47  ;;  %v3681_v39 = vadd.f32 %v3680_v11, %v3595_v40  ;;  %v3603_v40 = vmul.f32 %v6314_v8, %v6314_v8 }
 0x344   : > { %v6551_v52 = vadd.f32 %v2501_v9, %v2369_v50  ;;  %2407 = vmatmul.bf16.gmra.mxu0 %v6538_v24  ;;  %v3463_v47 = vadd.f32 %v3462_v3, %v6281_v43  ;;  %v3605_v3 = vmul.f32 %v6327_v4, %v6327_v4 }
 0x345   : > { %2540 = vmatmul.bf16.gmra.mxu1 %v6542_v17  ;;  %v3682_v31 = vadd.f32 %v3681_v39, %v3597_v7  ;;  %v3613_v17 = vmul.f32 %v6379_v28, %v6379_v28 }
 0x346   : > { %2673 = vmatmul.bf16.gmra.mxu2 %v5958_v18  ;;  %v3464_v50 = vadd.f32 %v3463_v47, %v6292_v61 }
 0x347   : > { %2806 = vmatmul.bf16.gmra.mxu3 %v5960_v38  ;;  %v3683_v35 = vadd.f32 %v3682_v31, %v3599_v32 }
 0x348   : > { %v3465_v62 = vadd.f32 %v3464_v50, %v6305_v48 }
 0x349   : > { %v2634_v44 = vpop.f32.mrf.mxu2  ;;  %v2370_v15 = vpop.f32.mrf.mxu0  ;;  %v3684_v7 = vadd.f32 %v3683_v35, %v3601_v19 }
 0x34a   : > { %v2767_v2 = vpop.f32.mrf.mxu3  ;;  %v2371_v9 = vadd.f32 %v2370_v15, %v5982_v34  ;;  %v2503_v38 = vpop.f32.mrf.mxu1  ;;  %v3466_v39 = vadd.f32 %v3465_v62, %v6314_v8  ;;  %v3611_v62 = vmul.f32 %v6366_v6, %v6366_v6 }
 0x34b   : > { %v6566_v18 = vadd.f32 %v2767_v2, %v2634_v44  ;;  %v3685_v47 = vadd.f32 %v3684_v7, %v3603_v40  ;;  %v3607_v44 = vmul.f32 %v6336_v57, %v6336_v57  ;;  %v3609_v2 = vmul.f32 %v6351_v63, %v6351_v63 }
 0x34c   : > { %v6572_v11 = vadd.f32 %v2503_v38, %v2371_v9  ;;  %v3467_v34 = vadd.f32 %v3466_v39, %v6327_v4 }
 0x34d   : > { %7397 = vst [vmem:[#allocation139_spill] sm:$0xff] %v6566_v18  ;;  %v3686_v31 = vadd.f32 %v3685_v47, %v3605_v3  ;;  %v7399_v3 = vld [vmem:[#allocation2_spill] sm:$0xff]  ;;  %v3629_v18 = vmul.f32 %v6475_v23, %v6475_v23 }
 0x34e   : > { %v3468_v19 = vadd.f32 %v3467_v34, %v6336_v57  ;;  %v7400_v34 = vld [vmem:[#allocation3_spill] sm:$0xff] }
 0x34f   : > { %v3687_v40 = vadd.f32 %v3686_v31, %v3607_v44  ;;  %v7402_v44 = vld [vmem:[#allocation90_spill] sm:$0xff] }
 0x350   : > { %v3469_v7 = vadd.f32 %v3468_v19, %v6351_v63 }
 0x351   : > { %v2636_v32 = vpop.f32.mrf.mxu2  ;;  %v2373_v50 = vpop.f32.mrf.mxu0  ;;  %v3688_v47 = vadd.f32 %v3687_v40, %v3609_v2  ;;  %v3617_v2 = vmul.f32 %v6401_v42, %v6401_v42 }
 0x352   : > { %v2769_v15 = vpop.f32.mrf.mxu3  ;;  %v2374_v38 = vadd.f32 %v2373_v50, %v5988_v5  ;;  %v2506_v35 = vpop.f32.mrf.mxu1  ;;  %v3470_v5 = vadd.f32 %v3469_v7, %v6366_v6  ;;  %v7404_v7 = vld [vmem:[#allocation93_spill] sm:$0xff] }
 0x353   : > { %v6583_v9 = vadd.f32 %v2769_v15, %v2636_v32  ;;  %v7401_v32 = vld [vmem:[#allocation89_spill] sm:$0xff]  ;;  %v3689_v31 = vadd.f32 %v3688_v47, %v3611_v62  ;;  %v3615_v15 = vmul.f32 %v6388_v59, %v6388_v59  ;;  %v3619_v47 = vmul.f32 %v6410_v55, %v6410_v55 }
 0x354   : > { %v6589_v39 = vadd.f32 %v2506_v35, %v2374_v38  ;;  %2819 = vmatmul.bf16.vlgmr.msra.gmra.mxu0 %v7399_v3  ;;  %v3471_v50 = vadd.f32 %v3470_v5, %v6379_v28 }
 0x355   : > { %7398 = vst [vmem:[#allocation140_spill] sm:$0xff] %v6583_v9  ;;  %2952 = vmatmul.bf16.vlgmr.msra.gmra.mxu1 %v7400_v34  ;;  %v3690_v38 = vadd.f32 %v3689_v31, %v3613_v17  ;;  %v3621_v31 = vmul.f32 %v6423_v37, %v6423_v37 }
 0x356   : > { %3085 = vmatmul.bf16.vlgmr.msra.gmra.mxu2 %v7401_v32  ;;  %v3472_v3 = vadd.f32 %v3471_v50, %v6388_v59 }
 0x357   : > { %3218 = vmatmul.bf16.vlgmr.msra.gmra.mxu3 %v7402_v44  ;;  %v3691_v62 = vadd.f32 %v3690_v38, %v3615_v15 }
 0x358   : > { %v3473_v5 = vadd.f32 %v3472_v3, %v6401_v42 }
 0x359   : > { %v2639_v19 = vpop.f32.mrf.mxu2  ;;  %v2375_v40 = vpop.f32.mrf.mxu0  ;;  %v3692_v17 = vadd.f32 %v3691_v62, %v3617_v2 }
 0x35a   : > { %v2772_v35 = vpop.f32.mrf.mxu3  ;;  %v2376_v32 = vadd.f32 %v2375_v40, %v7404_v7  ;;  %v2508_v44 = vpop.f32.mrf.mxu1  ;;  %v3474_v24 = vadd.f32 %v3473_v5, %v6410_v55  ;;  %v3625_v40 = vmul.f32 %v6453_v60, %v6453_v60 }
 0x35b   : > { %v6604_v34 = vadd.f32 %v2772_v35, %v2639_v19  ;;  %v3693_v50 = vadd.f32 %v3692_v17, %v3619_v47  ;;  %v3623_v19 = vmul.f32 %v6440_v56, %v6440_v56  ;;  %v3627_v17 = vmul.f32 %v6462_v21, %v6462_v21 }
 0x35c   : > { %v6610_v9 = vadd.f32 %v2508_v44, %v2376_v32  ;;  %v3475_v35 = vadd.f32 %v3474_v24, %v6423_v37  ;;  %v7406_v44 = vld [vmem:[#allocation94_spill] sm:$0xff] }
 0x35d   : > { %7403 = vst [vmem:[#allocation2_spill] sm:$0xff] %v6604_v34  ;;  %v3694_v38 = vadd.f32 %v3693_v50, %v3621_v31  ;;  %v7407_v31 = vld [vmem:[#allocation4_spill] sm:$0xff] }
 0x35e   : > { %v3476_v2 = vadd.f32 %v3475_v35, %v6440_v56  ;;  %v7408_v35 = vld [vmem:[#allocation5_spill] sm:$0xff] }
 0x35f   : > { %v3695_v47 = vadd.f32 %v3694_v38, %v3623_v19  ;;  %v7410_v19 = vld [vmem:[#allocation92_spill] sm:$0xff] }
 0x360   : > { %v3477_v24 = vadd.f32 %v3476_v2, %v6453_v60 }
 0x361   : > { %v2641_v15 = vpop.f32.mrf.mxu2  ;;  %v2378_v7 = vpop.f32.mrf.mxu0  ;;  %v3696_v50 = vadd.f32 %v3695_v47, %v3625_v40  ;;  %v3633_v40 = vmul.f32 %v6508_v49, %v6508_v49 }
 0x362   : > { %v2774_v3 = vpop.f32.mrf.mxu3  ;;  %v2379_v62 = vadd.f32 %v2378_v7, %v7406_v44  ;;  %v2511_v5 = vpop.f32.mrf.mxu1  ;;  %v3631_v7 = vmul.f32 %v6484_v45, %v6484_v45 }
 0x363   : > { %v6621_v32 = vadd.f32 %v2774_v3, %v2641_v15  ;;  %v7409_v15 = vld [vmem:[#allocation91_spill] sm:$0xff]  ;;  %v3478_v3 = vadd.f32 %v3477_v24, %v6462_v21  ;;  %v3697_v38 = vadd.f32 %v3696_v50, %v3627_v17  ;;  %v3635_v50 = vmul.f32 %v6530_v29, %v6530_v29 }
 0x364   : > { %v6627_v34 = vadd.f32 %v2511_v5, %v2379_v62  ;;  %2824 = vmatmul.bf16.gmra.mxu0 %v7407_v31 }
 0x365   : > { %7405 = vst [vmem:[#allocation3_spill] sm:$0xff] %v6621_v32  ;;  %2957 = vmatmul.bf16.gmra.mxu1 %v7408_v35  ;;  %v3479_v2 = vadd.f32 %v3478_v3, %v6475_v23  ;;  %v3698_v62 = vadd.f32 %v3697_v38, %v3629_v18  ;;  %v3637_v38 = vmul.f32 %v6551_v52, %v6551_v52 }
 0x366   : > { %3090 = vmatmul.bf16.gmra.mxu2 %v7409_v15 }
 0x367   : > { %3223 = vmatmul.bf16.gmra.mxu3 %v7410_v19  ;;  %v3480_v31 = vadd.f32 %v3479_v2, %v6484_v45  ;;  %v3699_v17 = vadd.f32 %v3698_v62, %v3631_v7 }
 0x369   : > { %v2644_v44 = vpop.f32.mrf.mxu2  ;;  %v2380_v47 = vpop.f32.mrf.mxu0  ;;  %v3481_v3 = vadd.f32 %v3480_v31, %v6508_v49  ;;  %v3700_v18 = vadd.f32 %v3699_v17, %v3633_v40 }
 0x36a   : > { %v2777_v5 = vpop.f32.mrf.mxu3  ;;  %v2381_v24 = vadd.f32 %v2380_v47, %v6022_v12  ;;  %v2513_v15 = vpop.f32.mrf.mxu1 }
 0x36b   : > { %v6642_v35 = vadd.f32 %v2777_v5, %v2644_v44  ;;  %v3482_v32 = vadd.f32 %v3481_v3, %v6530_v29  ;;  %v3701_v2 = vadd.f32 %v3700_v18, %v3635_v50  ;;  %v3639_v44 = vmul.f32 %v6572_v11, %v6572_v11 }
 0x36c   : > { %v6648_v19 = vadd.f32 %v2513_v15, %v2381_v24  ;;  %v3641_v5 = vmul.f32 %v6589_v39, %v6589_v39  ;;  %v3643_v3 = vmul.f32 %v6610_v9, %v6610_v9 }
 0x36d   : > { %7411 = vst [vmem:[#allocation89_spill] sm:$0xff] %v6642_v35  ;;  %v3483_v12 = vadd.f32 %v3482_v32, %v6551_v52  ;;  %v3702_v62 = vadd.f32 %v3701_v2, %v3637_v38  ;;  %v7413_v38 = vld [vmem:[#allocation6_spill] sm:$0xff]  ;;  %v3645_v35 = vmul.f32 %v6627_v34, %v6627_v34 }
 0x36e   : > { %7412 = vst [vmem:[#allocation90_spill] sm:$0xff] %v6648_v19 }
 0x36f   : > { %v3484_v40 = vadd.f32 %v3483_v12, %v6572_v11  ;;  %v3703_v50 = vadd.f32 %v3702_v62, %v3639_v44  ;;  %v7414_v12 = vld [vmem:[#allocation7_spill] sm:$0xff]  ;;  %v3647_v62 = vmul.f32 %v6648_v19, %v6648_v19 }
 0x371   : > { %v2646_v7 = vpop.f32.mrf.mxu2  ;;  %v2383_v31 = vpop.f32.mrf.mxu0  ;;  %v3485_v32 = vadd.f32 %v3484_v40, %v6589_v39  ;;  %v3704_v2 = vadd.f32 %v3703_v50, %v3641_v5 }
 0x372   : > { %v2779_v47 = vpop.f32.mrf.mxu3  ;;  %v2384_v15 = vadd.f32 %v2383_v31, %v6028_v51  ;;  %v2516_v17 = vpop.f32.mrf.mxu1 }
 0x373   : > { %v6659_v24 = vadd.f32 %v2779_v47, %v2646_v7  ;;  %v3486_v51 = vadd.f32 %v3485_v32, %v6610_v9  ;;  %v3705_v44 = vadd.f32 %v3704_v2, %v3643_v3 }
 0x374   : > { %v6665_v18 = vadd.f32 %v2516_v17, %v2384_v15  ;;  %2829 = vmatmul.bf16.gmra.mxu0 %v7413_v38 }
 0x375   : > { %2962 = vmatmul.bf16.gmra.mxu1 %v7414_v12  ;;  %v3487_v7 = vadd.f32 %v3486_v51, %v6627_v34  ;;  %v3706_v31 = vadd.f32 %v3705_v44, %v3645_v35 }
 0x376   : > { %3095 = vmatmul.bf16.gmra.mxu2 %v6018_v26  ;;  %v3649_v17 = vmul.f32 %v6665_v18, %v6665_v18 }
 0x377   : > { %3228 = vmatmul.bf16.gmra.mxu3 %v6020_v1  ;;  %v3488_v15 = vadd.f32 %v3487_v7, %v6648_v19  ;;  %v3707_v3 = vadd.f32 %v3706_v31, %v3647_v62  ;;  %v7418_v31 = vld [vmem:[#allocation8_spill] sm:$0xff] }
 0x379   : > { %v2649_v47 = vpop.f32.mrf.mxu2  ;;  %v2385_v40 = vpop.f32.mrf.mxu0  ;;  %v3489_v32 = vadd.f32 %v3488_v15, %v6665_v18  ;;  %v3708_v2 = vadd.f32 %v3707_v3, %v3649_v17  ;;  %v7419_v15 = vld [vmem:[#allocation9_spill] sm:$0xff]  ;;  %v7420_v17 = vld [vmem:[#allocation95_spill] sm:$0xff]  ;;  %v7421_v3 = vld [vmem:[#allocation96_spill] sm:$0xff] }
 0x37a   : > { %v2782_v5 = vpop.f32.mrf.mxu3  ;;  %v2386_v50 = vadd.f32 %v2385_v40, %v6038_v58  ;;  %v2518_v1 = vpop.f32.mrf.mxu1 }
 0x37b   : > { %v6680_v26 = vadd.f32 %v2782_v5, %v2649_v47  ;;  %v7416_v5 = vld [vmem:[#allocation97_spill] sm:$0xff] }
 0x37c   : > { %v6684_v38 = vadd.f32 %v2518_v1, %v2386_v50 }
 0x37e   : > { %7415 = vst [vmem:[#allocation93_spill] sm:$0xff] %v6684_v38  ;;  %v3490_v35 = vadd.f32 %v3489_v32, %v6684_v38  ;;  %v3651_v12 = vmul.f32 %v6684_v38, %v6684_v38 }
 0x380   : > { %v3709_v51 = vadd.f32 %v3708_v2, %v3651_v12 }
 0x381   : > { %v2651_v44 = vpop.f32.mrf.mxu2  ;;  %v2388_v19 = vpop.f32.mrf.mxu0 }
 0x382   : > { %v2784_v7 = vpop.f32.mrf.mxu3  ;;  %v2389_v58 = vadd.f32 %v2388_v19, %v7416_v5  ;;  %v2521_v40 = vpop.f32.mrf.mxu1 }
 0x383   : > { %v6689_v47 = vadd.f32 %v2784_v7, %v2651_v44  ;;  %v7422_v7 = vld [vmem:[#allocation100_spill] sm:$0xff] }
 0x384   : > { %v6692_v62 = vadd.f32 %v2521_v40, %v2389_v58  ;;  %2834 = vmatmul.bf16.gmra.mxu0 %v7418_v31 }
 0x385   : > { %2967 = vmatmul.bf16.gmra.mxu1 %v7419_v15 }
 0x386   : > { %7417 = vst [vmem:[#allocation94_spill] sm:$0xff] %v6692_v62  ;;  %3100 = vmatmul.bf16.gmra.mxu2 %v7420_v17  ;;  %v3491_v50 = vadd.f32 %v3490_v35, %v6692_v62  ;;  %v3653_v1 = vmul.f32 %v6692_v62, %v6692_v62 }
 0x387   : > { %3233 = vmatmul.bf16.gmra.mxu3 %v7421_v3 }
 0x388   : > { %v3710_v32 = vadd.f32 %v3709_v51, %v3653_v1  ;;  %v7424_v1 = vld [vmem:[#allocation101_spill] sm:$0xff] }
 0x389   : > { %v2654_v2 = vpop.f32.mrf.mxu2  ;;  %v2390_v19 = vpop.f32.mrf.mxu0 }
 0x38a   : > { %v2787_v12 = vpop.f32.mrf.mxu3  ;;  %v2391_v5 = vadd.f32 %v2390_v19, %v7422_v7  ;;  %v2523_v58 = vpop.f32.mrf.mxu1  ;;  %v7426_v19 = vld [vmem:[#allocation10_spill] sm:$0xff]  ;;  %v7427_v7 = vld [vmem:[#allocation11_spill] sm:$0xff] }
 0x38b   : > { %v6701_v44 = vadd.f32 %v2787_v12, %v2654_v2 }
 0x38c   : > { %v6704_v40 = vadd.f32 %v2523_v58, %v2391_v5  ;;  %v7428_v5 = vld [vmem:[#allocation98_spill] sm:$0xff]  ;;  %v7429_v58 = vld [vmem:[#allocation99_spill] sm:$0xff] }
 0x38e   : > { %7423 = vst [vmem:[#allocation4_spill] sm:$0xff] %v6704_v40  ;;  %v3492_v31 = vadd.f32 %v3491_v50, %v6704_v40  ;;  %v3655_v35 = vmul.f32 %v6704_v40, %v6704_v40 }
 0x390   : > { %v3711_v15 = vadd.f32 %v3710_v32, %v3655_v35 }
 0x391   : > { %v2656_v17 = vpop.f32.mrf.mxu2  ;;  %v2393_v3 = vpop.f32.mrf.mxu0 }
 0x392   : > { %v2789_v62 = vpop.f32.mrf.mxu3  ;;  %v2394_v38 = vadd.f32 %v2393_v3, %v7424_v1  ;;  %v2526_v2 = vpop.f32.mrf.mxu1 }
 0x393   : > { %v6709_v51 = vadd.f32 %v2789_v62, %v2656_v17 }
 0x394   : > { %v6712_v12 = vadd.f32 %v2526_v2, %v2394_v38  ;;  %2839 = vmatmul.bf16.gmra.mxu0 %v7426_v19 }
 0x395   : > { %2972 = vmatmul.bf16.gmra.mxu1 %v7427_v7 }
 0x396   : > { %7425 = vst [vmem:[#allocation5_spill] sm:$0xff] %v6712_v12  ;;  %3105 = vmatmul.bf16.gmra.mxu2 %v7428_v5  ;;  %v3493_v50 = vadd.f32 %v3492_v31, %v6712_v12  ;;  %v3657_v32 = vmul.f32 %v6712_v12, %v6712_v12 }
 0x397   : > { %3238 = vmatmul.bf16.gmra.mxu3 %v7429_v58 }
 0x398   : > { %v3712_v62 = vadd.f32 %v3711_v15, %v3657_v32 }
 0x399   : > { %v2659_v35 = vpop.f32.mrf.mxu2  ;;  %v2395_v3 = vpop.f32.mrf.mxu0 }
 0x39a   : > { %v2792_v17 = vpop.f32.mrf.mxu3  ;;  %v2396_v38 = vadd.f32 %v2395_v3, %v6078_v36  ;;  %v2528_v2 = vpop.f32.mrf.mxu1  ;;  %v7434_v36 = vld [vmem:[#allocation12_spill] sm:$0xff]  ;;  %v7435_v3 = vld [vmem:[#allocation13_spill] sm:$0xff] }
 0x39b   : > { %v6721_v1 = vadd.f32 %v2792_v17, %v2659_v35 }
 0x39c   : > { %v6724_v19 = vadd.f32 %v2528_v2, %v2396_v38 }
 0x39d   : > { %7430 = vst [vmem:[#allocation91_spill] sm:$0xff] %v6721_v1  ;;  %v7472_v1 = vld [vmem:[#allocation22_spill] sm:$0xff] }
 0x39e   : > { %7431 = vst [vmem:[#allocation92_spill] sm:$0xff] %v6724_v19  ;;  %v3494_v7 = vadd.f32 %v3493_v50, %v6724_v19  ;;  %v3659_v31 = vmul.f32 %v6724_v19, %v6724_v19 }
 0x3a0   : > { %v3713_v5 = vadd.f32 %v3712_v62, %v3659_v31  ;;  %v7437_v31 = vld [vmem:[#allocation104_spill] sm:$0xff] }
 0x3a1   : > { %v2661_v12 = vpop.f32.mrf.mxu2  ;;  %v2398_v58 = vpop.f32.mrf.mxu0 }
 0x3a2   : > { %v2794_v40 = vpop.f32.mrf.mxu3  ;;  %v2399_v32 = vadd.f32 %v2398_v58, %v6084_v54  ;;  %v2531_v35 = vpop.f32.mrf.mxu1 }
 0x3a3   : > { %v6729_v15 = vadd.f32 %v2794_v40, %v2661_v12 }
 0x3a4   : > { %v6732_v17 = vadd.f32 %v2531_v35, %v2399_v32  ;;  %2844 = vmatmul.bf16.gmra.mxu0 %v7434_v36 }
 0x3a5   : > { %7432 = vst [vmem:[#allocation6_spill] sm:$0xff] %v6729_v15  ;;  %2977 = vmatmul.bf16.gmra.mxu1 %v7435_v3 }
 0x3a6   : > { %7433 = vst [vmem:[#allocation7_spill] sm:$0xff] %v6732_v17  ;;  %3110 = vmatmul.bf16.gmra.mxu2 %v6074_v25  ;;  %v3495_v50 = vadd.f32 %v3494_v7, %v6732_v17  ;;  %v3661_v62 = vmul.f32 %v6732_v17, %v6732_v17 }
 0x3a7   : > { %3243 = vmatmul.bf16.gmra.mxu3 %v6076_v14 }
 0x3a8   : > { %v3714_v40 = vadd.f32 %v3713_v5, %v3661_v62  ;;  %v7440_v62 = vld [vmem:[#allocation105_spill] sm:$0xff] }
 0x3a9   : > { %v2664_v12 = vpop.f32.mrf.mxu2  ;;  %v2400_v54 = vpop.f32.mrf.mxu0 }
 0x3aa   : > { %v2797_v38 = vpop.f32.mrf.mxu3  ;;  %v2401_v58 = vadd.f32 %v2400_v54, %v7437_v31  ;;  %v2533_v32 = vpop.f32.mrf.mxu1  ;;  %v7442_v54 = vld [vmem:[#allocation14_spill] sm:$0xff]  ;;  %v7443_v31 = vld [vmem:[#allocation15_spill] sm:$0xff] }
 0x3ab   : > { %v6741_v2 = vadd.f32 %v2797_v38, %v2664_v12 }
 0x3ac   : > { %v6744_v35 = vadd.f32 %v2533_v32, %v2401_v58  ;;  %v7444_v58 = vld [vmem:[#allocation102_spill] sm:$0xff]  ;;  %v7445_v32 = vld [vmem:[#allocation103_spill] sm:$0xff] }
 0x3ad   : > { %7436 = vst [vmem:[#allocation97_spill] sm:$0xff] %v6741_v2 }
 0x3ae   : > { %7438 = vst [vmem:[#allocation8_spill] sm:$0xff] %v6744_v35  ;;  %v3496_v25 = vadd.f32 %v3495_v50, %v6744_v35  ;;  %v3663_v7 = vmul.f32 %v6744_v35, %v6744_v35 }
 0x3b0   : > { %v3715_v36 = vadd.f32 %v3714_v40, %v3663_v7 }
 0x3b1   : > { %v2666_v3 = vpop.f32.mrf.mxu2  ;;  %v2403_v14 = vpop.f32.mrf.mxu0 }
 0x3b2   : > { %v2799_v17 = vpop.f32.mrf.mxu3  ;;  %v2404_v19 = vadd.f32 %v2403_v14, %v7440_v62  ;;  %v2536_v12 = vpop.f32.mrf.mxu1 }
 0x3b3   : > { %v6749_v5 = vadd.f32 %v2799_v17, %v2666_v3 }
 0x3b4   : > { %v6752_v38 = vadd.f32 %v2536_v12, %v2404_v19  ;;  %2849 = vmatmul.bf16.gmra.mxu0 %v7442_v54  ;;  %v7447_v19 = vld [vmem:[#allocation108_spill] sm:$0xff] }
 0x3b5   : > { %7439 = vst [vmem:[#allocation9_spill] sm:$0xff] %v6749_v5  ;;  %2982 = vmatmul.bf16.gmra.mxu1 %v7443_v31 }
 0x3b6   : > { %7441 = vst [vmem:[#allocation95_spill] sm:$0xff] %v6752_v38  ;;  %3115 = vmatmul.bf16.gmra.mxu2 %v7444_v58  ;;  %v3497_v50 = vadd.f32 %v3496_v25, %v6752_v38  ;;  %v3665_v40 = vmul.f32 %v6752_v38, %v6752_v38 }
 0x3b7   : > { %3248 = vmatmul.bf16.gmra.mxu3 %v7445_v32 }
 0x3b8   : > { %v3716_v17 = vadd.f32 %v3715_v36, %v3665_v40  ;;  %v7450_v40 = vld [vmem:[#allocation109_spill] sm:$0xff] }
 0x3b9   : > { %v2669_v7 = vpop.f32.mrf.mxu2  ;;  %v2405_v14 = vpop.f32.mrf.mxu0 }
 0x3ba   : > { %v2802_v3 = vpop.f32.mrf.mxu3  ;;  %v2406_v12 = vadd.f32 %v2405_v14, %v7447_v19  ;;  %v2538_v54 = vpop.f32.mrf.mxu1  ;;  %v7452_v14 = vld [vmem:[#allocation16_spill] sm:$0xff]  ;;  %v7453_v19 = vld [vmem:[#allocation17_spill] sm:$0xff] }
 0x3bb   : > { %v6761_v62 = vadd.f32 %v2802_v3, %v2669_v7 }
 0x3bc   : > { %v6764_v35 = vadd.f32 %v2538_v54, %v2406_v12  ;;  %v7454_v12 = vld [vmem:[#allocation106_spill] sm:$0xff]  ;;  %v7456_v54 = vld [vmem:[#allocation107_spill] sm:$0xff] }
 0x3bd   : > { %7446 = vst [vmem:[#allocation96_spill] sm:$0xff] %v6761_v62  ;;  %v7467_v62 = vld [vmem:[#allocation21_spill] sm:$0xff] }
 0x3be   : > { %7448 = vst [vmem:[#allocation100_spill] sm:$0xff] %v6764_v35  ;;  %v3498_v31 = vadd.f32 %v3497_v50, %v6764_v35  ;;  %v3667_v25 = vmul.f32 %v6764_v35, %v6764_v35  ;;  %v7460_v35 = vld [vmem:[#allocation18_spill] sm:$0xff] }
 0x3c0   : > { %v3717_v58 = vadd.f32 %v3716_v17, %v3667_v25 }
 0x3c1   : > { %v2671_v38 = vpop.f32.mrf.mxu2  ;;  %v2408_v32 = vpop.f32.mrf.mxu0 }
 0x3c2   : > { %v2804_v5 = vpop.f32.mrf.mxu3  ;;  %v2409_v2 = vadd.f32 %v2408_v32, %v7450_v40  ;;  %v2541_v7 = vpop.f32.mrf.mxu1 }
 0x3c3   : > { %v6769_v36 = vadd.f32 %v2804_v5, %v2671_v38 }
 0x3c4   : > { %v6772_v3 = vadd.f32 %v2541_v7, %v2409_v2  ;;  %2854 = vmatmul.bf16.gmra.mxu0 %v7452_v14 }
 0x3c5   : > { %7449 = vst [vmem:[#allocation101_spill] sm:$0xff] %v6769_v36  ;;  %2987 = vmatmul.bf16.gmra.mxu1 %v7453_v19 }
 0x3c6   : > { %7451 = vst [vmem:[#allocation10_spill] sm:$0xff] %v6772_v3  ;;  %3120 = vmatmul.bf16.gmra.mxu2 %v7454_v12  ;;  %v6778_v50 = vadd.f32 %v3498_v31, %v6772_v3  ;;  %v3669_v17 = vmul.f32 %v6772_v3, %v6772_v3  ;;  %v7459_v31 = vld [vmem:[#allocation112_spill] sm:$0xff]  ;;  %v7461_v3 = vld [vmem:[#allocation19_spill] sm:$0xff] }
 0x3c7   : > { %3253 = vmatmul.bf16.gmra.mxu3 %v7456_v54  ;;  %v7462_v54 = vld [vmem:[#allocation110_spill] sm:$0xff] }
 0x3c8   : > { %7455 = vst [vmem:[#allocation11_spill] sm:$0xff] %v6778_v50  ;;  %v6783_v5 = vadd.f32 %v3717_v58, %v3669_v17  ;;  %v7463_v58 = vld [vmem:[#allocation111_spill] sm:$0xff] }
 0x3c9   : > { %v2674_v38 = vpop.f32.mrf.mxu2  ;;  %v2410_v25 = vpop.f32.mrf.mxu0 }
 0x3ca   : > { %7457 = vst [vmem:[#allocation98_spill] sm:$0xff] %v6783_v5  ;;  %v2807_v2 = vpop.f32.mrf.mxu3  ;;  %v2543_v40 = vpop.f32.mrf.mxu1 }
 0x3cb   : > { %v6785_v32 = vadd.f32 %v2807_v2, %v2674_v38 }
 0x3cd   : > { %7458 = vst [vmem:[#allocation99_spill] sm:$0xff] %v6785_v32 }
 0x3d1   : > { %v2676_v7 = vpop.f32.mrf.mxu2  ;;  %v2820_v19 = vpop.f32.mrf.mxu0 }
 0x3d2   : > { %v2809_v14 = vpop.f32.mrf.mxu3  ;;  %v2953_v12 = vpop.f32.mrf.mxu1  ;;  %v2821_v50 = vadd.f32 %v2820_v19, %v7459_v31 }
 0x3d3   : > { %v7464_v14 = vld [vmem:[#allocation115_spill] sm:$0xff] }
 0x3d4   : > { %2859 = vmatmul.bf16.gmra.mxu0 %v7460_v35  ;;  %v2954_v17 = vadd.f32 %v2953_v12, %v2821_v50 }
 0x3d5   : > { %2992 = vmatmul.bf16.gmra.mxu1 %v7461_v3 }
 0x3d6   : > { %3125 = vmatmul.bf16.gmra.mxu2 %v7462_v54 }
 0x3d7   : > { %3258 = vmatmul.bf16.gmra.mxu3 %v7463_v58  ;;  %v7465_v58 = vld [vmem:[#allocation116_spill] sm:$0xff] }
 0x3d9   : > { %v3086_v5 = vpop.f32.mrf.mxu2  ;;  %v2822_v25 = vpop.f32.mrf.mxu0 }
 0x3da   : > { %v3087_v38 = vadd.f32 %v3086_v5, %v2954_v17  ;;  %v3219_v2 = vpop.f32.mrf.mxu3  ;;  %v2955_v40 = vpop.f32.mrf.mxu1  ;;  %v2823_v32 = vadd.f32 %v2822_v25, %v7464_v14 }
 0x3dc   : > { %v3220_v7 = vadd.f32 %v3219_v2, %v3087_v38  ;;  %v2956_v3 = vadd.f32 %v2955_v40, %v2823_v32  ;;  %v7466_v2 = vld [vmem:[#allocation20_spill] sm:$0xff]  ;;  %v7469_v32 = vld [vmem:[#allocation114_spill] sm:$0xff] }
 0x3de   : > { %v3343_v35 = vpack.c.bf16 %v3220_v7, %v6135_v27  ;;  %v3574_v38 = vmul.f32 %v3220_v7, %v3220_v7  ;;  %v7468_v27 = vld [vmem:[#allocation113_spill] sm:$0xff] }
 0x3e0   : > { %3392 = vst [vmem:[%s6797_s30] sm:$0xff] %v3343_v35 }
 0x3e1   : > { %v3088_v50 = vpop.f32.mrf.mxu2  ;;  %v2825_v12 = vpop.f32.mrf.mxu0 }
 0x3e2   : > { %v3089_v19 = vadd.f32 %v3088_v50, %v2956_v3  ;;  %v3221_v5 = vpop.f32.mrf.mxu3  ;;  %v2958_v31 = vpop.f32.mrf.mxu1  ;;  %v2826_v17 = vadd.f32 %v2825_v12, %v7465_v58 }
 0x3e4   : > { %v3222_v54 = vadd.f32 %v3221_v5, %v3089_v19  ;;  %2864 = vmatmul.bf16.gmra.mxu0 %v7466_v2  ;;  %v2959_v35 = vadd.f32 %v2958_v31, %v2826_v17  ;;  %v7470_v2 = vld [vmem:[#allocation120_spill] sm:$0xff] }
 0x3e5   : > { %2997 = vmatmul.bf16.gmra.mxu1 %v7467_v62 }
 0x3e6   : > { %v3344_v25 = vpack.c.bf16 %v3222_v54, %v6144_v16  ;;  %v3506_v14 = vadd.f32 %v3222_v54, %v3220_v7  ;;  %v3576_v36 = vmul.f32 %v3222_v54, %v3222_v54  ;;  %3130 = vmatmul.bf16.gmra.mxu2 %v7468_v27 }
 0x3e7   : > { %3263 = vmatmul.bf16.gmra.mxu3 %v7469_v32 }
 0x3e8   : > { %3393 = vst [vmem:[%s6797_s30 + $0x8] sm:$0xff] %v3344_v25  ;;  %v3725_v40 = vadd.f32 %v3576_v36, %v3574_v38 }
 0x3e9   : > { %v3091_v3 = vpop.f32.mrf.mxu2  ;;  %v2827_v5 = vpop.f32.mrf.mxu0 }
 0x3ea   : > { %v3092_v50 = vadd.f32 %v3091_v3, %v2959_v35  ;;  %v3224_v19 = vpop.f32.mrf.mxu3  ;;  %v2960_v12 = vpop.f32.mrf.mxu1  ;;  %v2828_v16 = vadd.f32 %v2827_v5, %v7470_v2  ;;  %v7471_v35 = vld [vmem:[#allocation122_spill] sm:$0xff] }
 0x3ec   : > { %v3225_v58 = vadd.f32 %v3224_v19, %v3092_v50  ;;  %v2961_v27 = vadd.f32 %v2960_v12, %v2828_v16  ;;  %v7473_v50 = vld [vmem:[#allocation117_spill] sm:$0xff] }
 0x3ee   : > { %v3345_v7 = vpack.c.bf16 %v3225_v58, %v6157_v53  ;;  %v3507_v54 = vadd.f32 %v3506_v14, %v3225_v58  ;;  %v3578_v62 = vmul.f32 %v3225_v58, %v3225_v58  ;;  %v7474_v14 = vld [vmem:[#allocation23_spill] sm:$0xff]  ;;  %v7475_v58 = vld [vmem:[#allocation118_spill] sm:$0xff] }
 0x3f0   : > { %3394 = vst [vmem:[%s6797_s30 + $0x10] sm:$0xff] %v3345_v7  ;;  %v3726_v15 = vadd.f32 %v3725_v40, %v3578_v62  ;;  %v7476_v40 = vld [vmem:[#allocation119_spill] sm:$0xff] }
 0x3f1   : > { %v3093_v32 = vpop.f32.mrf.mxu2  ;;  %v2830_v31 = vpop.f32.mrf.mxu0 }
 0x3f2   : > { %v3094_v25 = vadd.f32 %v3093_v32, %v2961_v27  ;;  %v3226_v36 = vpop.f32.mrf.mxu3  ;;  %v2963_v17 = vpop.f32.mrf.mxu1  ;;  %v2831_v3 = vadd.f32 %v2830_v31, %v7471_v35 }
 0x3f4   : > { %v3227_v38 = vadd.f32 %v3226_v36, %v3094_v25  ;;  %2869 = vmatmul.bf16.gmra.mxu0 %v7472_v1  ;;  %v2964_v2 = vadd.f32 %v2963_v17, %v2831_v3  ;;  %v7477_v25 = vld [vmem:[#allocation125_spill] sm:$0xff] }
 0x3f5   : > { %3002 = vmatmul.bf16.gmra.mxu1 %v7474_v14 }
 0x3f6   : > { %v3346_v19 = vpack.c.bf16 %v3227_v38, %v7473_v50  ;;  %v3508_v5 = vadd.f32 %v3507_v54, %v3227_v38  ;;  %v3580_v53 = vmul.f32 %v3227_v38, %v3227_v38  ;;  %3135 = vmatmul.bf16.gmra.mxu2 %v7475_v58  ;;  %v7478_v54 = vld [vmem:[#allocation121_spill] sm:$0xff] }
 0x3f7   : > { %3268 = vmatmul.bf16.gmra.mxu3 %v7476_v40  ;;  %v7479_v40 = vld [vmem:[#allocation126_spill] sm:$0xff] }
 0x3f8   : > { %3395 = vst [vmem:[%s6797_s30 + $0x18] sm:$0xff] %v3346_v19  ;;  %v3727_v12 = vadd.f32 %v3726_v15, %v3580_v53 }
 0x3f9   : > { %v3096_v16 = vpop.f32.mrf.mxu2  ;;  %v2832_v27 = vpop.f32.mrf.mxu0 }
 0x3fa   : > { %v3097_v7 = vadd.f32 %v3096_v16, %v2964_v2  ;;  %v3229_v62 = vpop.f32.mrf.mxu3  ;;  %v2965_v32 = vpop.f32.mrf.mxu1  ;;  %v2833_v36 = vadd.f32 %v2832_v27, %v7477_v25  ;;  %v7480_v16 = vld [vmem:[#allocation24_spill] sm:$0xff] }
 0x3fc   : > { %v3230_v1 = vadd.f32 %v3229_v62, %v3097_v7  ;;  %v2966_v14 = vadd.f32 %v2965_v32, %v2833_v36 }
 0x3fe   : > { %v3347_v31 = vpack.c.bf16 %v3230_v1, %v7478_v54  ;;  %v3509_v38 = vadd.f32 %v3508_v5, %v3230_v1  ;;  %v3582_v35 = vmul.f32 %v3230_v1, %v3230_v1  ;;  %v7481_v5 = vld [vmem:[#allocation25_spill] sm:$0xff]  ;;  %v7482_v1 = vld [vmem:[#allocation123_spill] sm:$0xff] }
 0x400   : > { %3396 = vst [vmem:[%s6797_s30 + $0x20] sm:$0xff] %v3347_v31  ;;  %v3728_v50 = vadd.f32 %v3727_v12, %v3582_v35  ;;  %v7483_v12 = vld [vmem:[#allocation124_spill] sm:$0xff] }
 0x401   : > { %v3098_v58 = vpop.f32.mrf.mxu2  ;;  %v2835_v17 = vpop.f32.mrf.mxu0 }
 0x402   : > { %v3099_v19 = vadd.f32 %v3098_v58, %v2966_v14  ;;  %v3231_v15 = vpop.f32.mrf.mxu3  ;;  %v2968_v3 = vpop.f32.mrf.mxu1  ;;  %v2836_v2 = vadd.f32 %v2835_v17, %v7479_v40 }
 0x404   : > { %v3232_v53 = vadd.f32 %v3231_v15, %v3099_v19  ;;  %2874 = vmatmul.bf16.gmra.mxu0 %v7480_v16  ;;  %v2969_v25 = vadd.f32 %v2968_v3, %v2836_v2  ;;  %v7484_v19 = vld [vmem:[#allocation129_spill] sm:$0xff] }
 0x405   : > { %3007 = vmatmul.bf16.gmra.mxu1 %v7481_v5  ;;  %v7485_v5 = vld [vmem:[#allocation130_spill] sm:$0xff] }
 0x406   : > { %v3348_v7 = vpack.c.bf16 %v3232_v53, %v6188_v0  ;;  %v3510_v62 = vadd.f32 %v3509_v38, %v3232_v53  ;;  %v3584_v27 = vmul.f32 %v3232_v53, %v3232_v53  ;;  %3140 = vmatmul.bf16.gmra.mxu2 %v7482_v1 }
 0x407   : > { %3273 = vmatmul.bf16.gmra.mxu3 %v7483_v12  ;;  %v7486_v12 = vld [vmem:[#allocation26_spill] sm:$0xff] }
 0x408   : > { %3397 = vst [vmem:[%s6797_s30 + $0x28] sm:$0xff] %v3348_v7  ;;  %v3729_v32 = vadd.f32 %v3728_v50, %v3584_v27 }
 0x409   : > { %v3101_v36 = vpop.f32.mrf.mxu2  ;;  %v2837_v35 = vpop.f32.mrf.mxu0 }
 0x40a   : > { %v3102_v54 = vadd.f32 %v3101_v36, %v2969_v25  ;;  %v3234_v31 = vpop.f32.mrf.mxu3  ;;  %v2970_v14 = vpop.f32.mrf.mxu1  ;;  %v2838_v0 = vadd.f32 %v2837_v35, %v7484_v19 }
 0x40c   : > { %v3235_v58 = vadd.f32 %v3234_v31, %v3102_v54  ;;  %v2971_v40 = vadd.f32 %v2970_v14, %v2838_v0  ;;  %v7488_v54 = vld [vmem:[#allocation127_spill] sm:$0xff] }
 0x40e   : > { %v3349_v38 = vpack.c.bf16 %v3235_v58, %v6209_v33  ;;  %v3511_v15 = vadd.f32 %v3510_v62, %v3235_v58  ;;  %v3586_v17 = vmul.f32 %v3235_v58, %v3235_v58  ;;  %v7487_v62 = vld [vmem:[#allocation27_spill] sm:$0xff] }
 0x410   : > { %3398 = vst [vmem:[%s6797_s30 + $0x30] sm:$0xff] %v3349_v38  ;;  %v3730_v53 = vadd.f32 %v3729_v32, %v3586_v17  ;;  %v7489_v32 = vld [vmem:[#allocation128_spill] sm:$0xff] }
 0x411   : > { %v3103_v16 = vpop.f32.mrf.mxu2  ;;  %v2840_v3 = vpop.f32.mrf.mxu0 }
 0x412   : > { %v3104_v7 = vadd.f32 %v3103_v16, %v2971_v40  ;;  %v3236_v50 = vpop.f32.mrf.mxu3  ;;  %v2973_v2 = vpop.f32.mrf.mxu1  ;;  %v2841_v1 = vadd.f32 %v2840_v3, %v7485_v5  ;;  %v7490_v40 = vld [vmem:[#allocation133_spill] sm:$0xff] }
 0x414   : > { %v3237_v27 = vadd.f32 %v3236_v50, %v3104_v7  ;;  %2879 = vmatmul.bf16.gmra.mxu0 %v7486_v12  ;;  %v2974_v35 = vadd.f32 %v2973_v2, %v2841_v1 }
 0x415   : > { %3012 = vmatmul.bf16.gmra.mxu1 %v7487_v62  ;;  %v7492_v62 = vld [vmem:[#allocation28_spill] sm:$0xff] }
 0x416   : > { %v3350_v25 = vpack.c.bf16 %v3237_v27, %v6218_v20  ;;  %v3512_v36 = vadd.f32 %v3511_v15, %v3237_v27  ;;  %v3588_v33 = vmul.f32 %v3237_v27, %v3237_v27  ;;  %3145 = vmatmul.bf16.gmra.mxu2 %v7488_v54 }
 0x417   : > { %3278 = vmatmul.bf16.gmra.mxu3 %v7489_v32 }
 0x418   : > { %3399 = vst [vmem:[%s6797_s30 + $0x38] sm:$0xff] %v3350_v25  ;;  %v3731_v31 = vadd.f32 %v3730_v53, %v3588_v33  ;;  %v7491_v25 = vld [vmem:[#allocation134_spill] sm:$0xff] }
 0x419   : > { %v3106_v14 = vpop.f32.mrf.mxu2  ;;  %v2842_v0 = vpop.f32.mrf.mxu0 }
 0x41a   : > { %v3107_v58 = vadd.f32 %v3106_v14, %v2974_v35  ;;  %v3239_v19 = vpop.f32.mrf.mxu3  ;;  %v2975_v38 = vpop.f32.mrf.mxu1  ;;  %v2843_v20 = vadd.f32 %v2842_v0, %v7490_v40  ;;  %v7494_v35 = vld [vmem:[#allocation131_spill] sm:$0xff] }
 0x41c   : > { %v3240_v17 = vadd.f32 %v3239_v19, %v3107_v58  ;;  %v2976_v3 = vadd.f32 %v2975_v38, %v2843_v20 }
 0x41e   : > { %v3351_v15 = vpack.c.bf16 %v3240_v17, %v6231_v46  ;;  %v3513_v16 = vadd.f32 %v3512_v36, %v3240_v17  ;;  %v3590_v7 = vmul.f32 %v3240_v17, %v3240_v17  ;;  %v7493_v36 = vld [vmem:[#allocation29_spill] sm:$0xff] }
 0x420   : > { %3400 = vst [vmem:[%s6797_s30 + $0x40] sm:$0xff] %v3351_v15  ;;  %v3732_v50 = vadd.f32 %v3731_v31, %v3590_v7  ;;  %v7495_v31 = vld [vmem:[#allocation132_spill] sm:$0xff]  ;;  %v7496_v15 = vld [vmem:[#allocation137_spill] sm:$0xff] }
 0x421   : > { %v3108_v27 = vpop.f32.mrf.mxu2  ;;  %v2845_v2 = vpop.f32.mrf.mxu0 }
 0x422   : > { %v3109_v5 = vadd.f32 %v3108_v27, %v2976_v3  ;;  %v3241_v53 = vpop.f32.mrf.mxu3  ;;  %v2978_v1 = vpop.f32.mrf.mxu1  ;;  %v2846_v33 = vadd.f32 %v2845_v2, %v7491_v25 }
 0x424   : > { %v3242_v12 = vadd.f32 %v3241_v53, %v3109_v5  ;;  %2884 = vmatmul.bf16.gmra.mxu0 %v7492_v62  ;;  %v2979_v58 = vadd.f32 %v2978_v1, %v2846_v33  ;;  %v7497_v33 = vld [vmem:[#allocation30_spill] sm:$0xff] }
 0x425   : > { %3017 = vmatmul.bf16.gmra.mxu1 %v7493_v36 }
 0x426   : > { %v3352_v54 = vpack.c.bf16 %v3242_v12, %v6240_v41  ;;  %v3514_v32 = vadd.f32 %v3513_v16, %v3242_v12  ;;  %v3592_v46 = vmul.f32 %v3242_v12, %v3242_v12  ;;  %3150 = vmatmul.bf16.gmra.mxu2 %v7494_v35  ;;  %v7500_v35 = vld [vmem:[#allocation135_spill] sm:$0xff] }
 0x427   : > { %3283 = vmatmul.bf16.gmra.mxu3 %v7495_v31  ;;  %v7501_v31 = vld [vmem:[#allocation136_spill] sm:$0xff] }
 0x428   : > { %3401 = vst [vmem:[%s6797_s30 + $0x48] sm:$0xff] %v3352_v54  ;;  %v3733_v14 = vadd.f32 %v3732_v50, %v3592_v46  ;;  %v7498_v54 = vld [vmem:[#allocation32_spill] sm:$0xff] }
 0x429   : > { %v3111_v19 = vpop.f32.mrf.mxu2  ;;  %v2847_v17 = vpop.f32.mrf.mxu0 }
 0x42a   : > { %v3112_v0 = vadd.f32 %v3111_v19, %v2979_v58  ;;  %v3244_v38 = vpop.f32.mrf.mxu3  ;;  %v2980_v40 = vpop.f32.mrf.mxu1  ;;  %v2848_v41 = vadd.f32 %v2847_v17, %v7496_v15  ;;  %v7502_v15 = vld [vmem:[#allocation138_spill] sm:$0xff] }
 0x42c   : > { %v3245_v20 = vadd.f32 %v3244_v38, %v3112_v0  ;;  %v2981_v5 = vadd.f32 %v2980_v40, %v2848_v41 }
 0x42e   : > { %v3353_v16 = vpack.c.bf16 %v3245_v20, %v6253_v22  ;;  %v3515_v7 = vadd.f32 %v3514_v32, %v3245_v20  ;;  %v3594_v3 = vmul.f32 %v3245_v20, %v3245_v20  ;;  %v7499_v32 = vld [vmem:[#allocation33_spill] sm:$0xff] }
 0x430   : > { %3402 = vst [vmem:[%s6797_s30 + $0x50] sm:$0xff] %v3353_v16  ;;  %v3734_v27 = vadd.f32 %v3733_v14, %v3594_v3 }
 0x431   : > { %v3113_v53 = vpop.f32.mrf.mxu2  ;;  %v2850_v1 = vpop.f32.mrf.mxu0 }
 0x432   : > { %v3114_v2 = vadd.f32 %v3113_v53, %v2981_v5  ;;  %v3246_v50 = vpop.f32.mrf.mxu3  ;;  %v2983_v12 = vpop.f32.mrf.mxu1  ;;  %v2851_v62 = vadd.f32 %v2850_v1, %v7497_v33 }
 0x434   : > { %v3247_v25 = vadd.f32 %v3246_v50, %v3114_v2  ;;  %2889 = vmatmul.bf16.gmra.mxu0 %v7498_v54  ;;  %v2984_v58 = vadd.f32 %v2983_v12, %v2851_v62  ;;  %v7504_v62 = vld [vmem:[#allocation36_spill] sm:$0xff] }
 0x435   : > { %3022 = vmatmul.bf16.gmra.mxu1 %v7499_v32  ;;  %v7507_v32 = vld [vmem:[#allocation38_spill] sm:$0xff] }
 0x436   : > { %v3354_v46 = vpack.c.bf16 %v3247_v25, %v6262_v10  ;;  %v3516_v36 = vadd.f32 %v3515_v7, %v3247_v25  ;;  %v3596_v22 = vmul.f32 %v3247_v25, %v3247_v25  ;;  %3155 = vmatmul.bf16.gmra.mxu2 %v7500_v35  ;;  %v7503_v25 = vld [vmem:[#allocation39_spill] sm:$0xff] }
 0x437   : > { %3288 = vmatmul.bf16.gmra.mxu3 %v7501_v31 }
 0x438   : > { %3403 = vst [vmem:[%s6797_s30 + $0x58] sm:$0xff] %v3354_v46  ;;  %v3735_v14 = vadd.f32 %v3734_v27, %v3596_v22  ;;  %v7506_v22 = vld [vmem:[#allocation31_spill] sm:$0xff] }
 0x439   : > { %v3116_v19 = vpop.f32.mrf.mxu2  ;;  %v2852_v17 = vpop.f32.mrf.mxu0 }
 0x43a   : > { %v3117_v0 = vadd.f32 %v3116_v19, %v2984_v58  ;;  %v3249_v38 = vpop.f32.mrf.mxu3  ;;  %v2985_v40 = vpop.f32.mrf.mxu1  ;;  %v2853_v10 = vadd.f32 %v2852_v17, %v7502_v15 }
 0x43c   : > { %v3250_v20 = vadd.f32 %v3249_v38, %v3117_v0  ;;  %v2986_v5 = vadd.f32 %v2985_v40, %v2853_v10  ;;  %v7508_v40 = vld [vmem:[#allocation44_spill] sm:$0xff] }
 0x43e   : > { %v3355_v41 = vpack.c.bf16 %v3250_v20, %v6281_v43  ;;  %v3517_v16 = vadd.f32 %v3516_v36, %v3250_v20  ;;  %v3598_v7 = vmul.f32 %v3250_v20, %v3250_v20  ;;  %v7505_v36 = vld [vmem:[#allocation37_spill] sm:$0xff] }
 0x440   : > { %3404 = vst [vmem:[%s6797_s30 + $0x60] sm:$0xff] %v3355_v41  ;;  %v3736_v3 = vadd.f32 %v3735_v14, %v3598_v7 }
 0x441   : > { %v3118_v53 = vpop.f32.mrf.mxu2  ;;  %v2855_v50 = vpop.f32.mrf.mxu0 }
 0x442   : > { %v3119_v2 = vadd.f32 %v3118_v53, %v2986_v5  ;;  %v3251_v27 = vpop.f32.mrf.mxu3  ;;  %v2988_v1 = vpop.f32.mrf.mxu1  ;;  %v2856_v33 = vadd.f32 %v2855_v50, %v7503_v25  ;;  %v7509_v50 = vld [vmem:[#allocation45_spill] sm:$0xff] }
 0x444   : > { %v3252_v12 = vadd.f32 %v3251_v27, %v3119_v2  ;;  %2894 = vmatmul.bf16.gmra.mxu0 %v7504_v62  ;;  %v2989_v31 = vadd.f32 %v2988_v1, %v2856_v33  ;;  %v7511_v62 = vld [vmem:[#allocation43_spill] sm:$0xff] }
 0x445   : > { %3027 = vmatmul.bf16.gmra.mxu1 %v7505_v36 }
 0x446   : > { %v3356_v54 = vpack.c.bf16 %v3252_v12, %v6292_v61  ;;  %v3518_v46 = vadd.f32 %v3517_v16, %v3252_v12  ;;  %v3600_v43 = vmul.f32 %v3252_v12, %v3252_v12  ;;  %3160 = vmatmul.bf16.gmra.mxu2 %v7506_v22  ;;  %v7510_v12 = vld [vmem:[#allocation42_spill] sm:$0xff] }
 0x447   : > { %3293 = vmatmul.bf16.gmra.mxu3 %v7507_v32 }
 0x448   : > { %3405 = vst [vmem:[%s6797_s30 + $0x68] sm:$0xff] %v3356_v54  ;;  %v3737_v35 = vadd.f32 %v3736_v3, %v3600_v43  ;;  %v7512_v54 = vld [vmem:[#allocation34_spill] sm:$0xff] }
 0x449   : > { %v3121_v14 = vpop.f32.mrf.mxu2  ;;  %v2857_v0 = vpop.f32.mrf.mxu0 }
 0x44a   : > { %v3122_v58 = vadd.f32 %v3121_v14, %v2989_v31  ;;  %v3254_v19 = vpop.f32.mrf.mxu3  ;;  %v2990_v38 = vpop.f32.mrf.mxu1  ;;  %v2858_v61 = vadd.f32 %v2857_v0, %v7508_v40 }
 0x44c   : > { %v3255_v17 = vadd.f32 %v3254_v19, %v3122_v58  ;;  %v2991_v16 = vadd.f32 %v2990_v38, %v2858_v61  ;;  %v7514_v19 = vld [vmem:[#allocation50_spill] sm:$0xff] }
 0x44e   : > { %v3357_v20 = vpack.c.bf16 %v3255_v17, %v6305_v48  ;;  %v3519_v15 = vadd.f32 %v3518_v46, %v3255_v17  ;;  %v3602_v10 = vmul.f32 %v3255_v17, %v3255_v17  ;;  %v7513_v46 = vld [vmem:[#allocation35_spill] sm:$0xff] }
 0x450   : > { %3406 = vst [vmem:[%s6797_s30 + $0x70] sm:$0xff] %v3357_v20  ;;  %v3738_v41 = vadd.f32 %v3737_v35, %v3602_v10 }
 0x451   : > { %v3123_v7 = vpop.f32.mrf.mxu2  ;;  %v2860_v53 = vpop.f32.mrf.mxu0 }
 0x452   : > { %v3124_v5 = vadd.f32 %v3123_v7, %v2991_v16  ;;  %v3256_v3 = vpop.f32.mrf.mxu3  ;;  %v2993_v2 = vpop.f32.mrf.mxu1  ;;  %v2861_v1 = vadd.f32 %v2860_v53, %v7509_v50  ;;  %v7516_v53 = vld [vmem:[#allocation48_spill] sm:$0xff]  ;;  %v7517_v50 = vld [vmem:[#allocation49_spill] sm:$0xff] }
 0x454   : > { %v3257_v27 = vadd.f32 %v3256_v3, %v3124_v5  ;;  %2899 = vmatmul.bf16.gmra.mxu0 %v7510_v12  ;;  %v2994_v36 = vadd.f32 %v2993_v2, %v2861_v1  ;;  %v7515_v5 = vld [vmem:[#allocation51_spill] sm:$0xff]  ;;  %v7518_v1 = vld [vmem:[#allocation40_spill] sm:$0xff]  ;;  %v7519_v12 = vld [vmem:[#allocation41_spill] sm:$0xff] }
 0x455   : > { %3032 = vmatmul.bf16.gmra.mxu1 %v7511_v62 }
 0x456   : > { %v3358_v25 = vpack.c.bf16 %v3257_v27, %v6314_v8  ;;  %v3520_v33 = vadd.f32 %v3519_v15, %v3257_v27  ;;  %v3604_v48 = vmul.f32 %v3257_v27, %v3257_v27  ;;  %3165 = vmatmul.bf16.gmra.mxu2 %v7512_v54 }
 0x457   : > { %3298 = vmatmul.bf16.gmra.mxu3 %v7513_v46 }
 0x458   : > { %3407 = vst [vmem:[%s6797_s30 + $0x78] sm:$0xff] %v3358_v25  ;;  %v3739_v43 = vadd.f32 %v3738_v41, %v3604_v48 }
 0x459   : > { %v3126_v22 = vpop.f32.mrf.mxu2  ;;  %v2862_v31 = vpop.f32.mrf.mxu0 }
 0x45a   : > { %v3127_v32 = vadd.f32 %v3126_v22, %v2994_v36  ;;  %v3259_v35 = vpop.f32.mrf.mxu3  ;;  %v2995_v14 = vpop.f32.mrf.mxu1  ;;  %v2863_v8 = vadd.f32 %v2862_v31, %v7514_v19  ;;  %v7520_v22 = vld [vmem:[#allocation56_spill] sm:$0xff] }
 0x45c   : > { %v3260_v58 = vadd.f32 %v3259_v35, %v3127_v32  ;;  %v2996_v61 = vadd.f32 %v2995_v14, %v2863_v8 }
 0x45e   : > { %v3359_v0 = vpack.c.bf16 %v3260_v58, %v6327_v4  ;;  %v3521_v38 = vadd.f32 %v3520_v33, %v3260_v58  ;;  %v3606_v17 = vmul.f32 %v3260_v58, %v3260_v58 }
 0x460   : > { %3408 = vst [vmem:[%s6797_s30 + $0x80] sm:$0xff] %v3359_v0  ;;  %v3740_v40 = vadd.f32 %v3739_v43, %v3606_v17 }
 0x461   : > { %v3128_v20 = vpop.f32.mrf.mxu2  ;;  %v2865_v41 = vpop.f32.mrf.mxu0 }
 0x462   : > { %v3129_v15 = vadd.f32 %v3128_v20, %v2996_v61  ;;  %v3261_v10 = vpop.f32.mrf.mxu3  ;;  %v2998_v16 = vpop.f32.mrf.mxu1  ;;  %v2866_v3 = vadd.f32 %v2865_v41, %v7515_v5  ;;  %v7521_v61 = vld [vmem:[#allocation57_spill] sm:$0xff]  ;;  %v7525_v5 = vld [vmem:[#allocation47_spill] sm:$0xff] }
 0x464   : > { %v3262_v7 = vadd.f32 %v3261_v10, %v3129_v15  ;;  %2904 = vmatmul.bf16.gmra.mxu0 %v7516_v53  ;;  %v2999_v33 = vadd.f32 %v2998_v16, %v2866_v3  ;;  %v7522_v15 = vld [vmem:[#allocation54_spill] sm:$0xff]  ;;  %v7523_v16 = vld [vmem:[#allocation55_spill] sm:$0xff] }
 0x465   : > { %3037 = vmatmul.bf16.gmra.mxu1 %v7517_v50 }
 0x466   : > { %v3360_v2 = vpack.c.bf16 %v3262_v7, %v6336_v57  ;;  %v3522_v27 = vadd.f32 %v3521_v38, %v3262_v7  ;;  %v3608_v4 = vmul.f32 %v3262_v7, %v3262_v7  ;;  %3170 = vmatmul.bf16.gmra.mxu2 %v7518_v1  ;;  %v7524_v7 = vld [vmem:[#allocation46_spill] sm:$0xff] }
 0x467   : > { %3303 = vmatmul.bf16.gmra.mxu3 %v7519_v12 }
 0x468   : > { %3409 = vst [vmem:[%s6797_s30 + $0x88] sm:$0xff] %v3360_v2  ;;  %v3741_v25 = vadd.f32 %v3740_v40, %v3608_v4 }
 0x469   : > { %v3131_v48 = vpop.f32.mrf.mxu2  ;;  %v2867_v46 = vpop.f32.mrf.mxu0 }
 0x46a   : > { %v3132_v62 = vadd.f32 %v3131_v48, %v2999_v33  ;;  %v3264_v54 = vpop.f32.mrf.mxu3  ;;  %v3000_v43 = vpop.f32.mrf.mxu1  ;;  %v2868_v57 = vadd.f32 %v2867_v46, %v7520_v22 }
 0x46c   : > { %v3265_v36 = vadd.f32 %v3264_v54, %v3132_v62  ;;  %v3001_v58 = vadd.f32 %v3000_v43, %v2868_v57 }
 0x46e   : > { %v3361_v32 = vpack.c.bf16 %v3265_v36, %v6351_v63  ;;  %v3523_v35 = vadd.f32 %v3522_v27, %v3265_v36  ;;  %v3610_v31 = vmul.f32 %v3265_v36, %v3265_v36 }
 0x470   : > { %3410 = vst [vmem:[%s6797_s30 + $0x90] sm:$0xff] %v3361_v32  ;;  %v3742_v14 = vadd.f32 %v3741_v25, %v3610_v31  ;;  %v7526_v25 = vld [vmem:[#allocation62_spill] sm:$0xff]  ;;  %v7527_v31 = vld [vmem:[#allocation63_spill] sm:$0xff] }
 0x471   : > { %v3133_v19 = vpop.f32.mrf.mxu2  ;;  %v2870_v38 = vpop.f32.mrf.mxu0 }
 0x472   : > { %v3134_v8 = vadd.f32 %v3133_v19, %v3001_v58  ;;  %v3266_v0 = vpop.f32.mrf.mxu3  ;;  %v3003_v17 = vpop.f32.mrf.mxu1  ;;  %v2871_v20 = vadd.f32 %v2870_v38, %v7521_v61  ;;  %v7528_v58 = vld [vmem:[#allocation60_spill] sm:$0xff] }
 0x473   : > { %v7530_v38 = vld [vmem:[#allocation52_spill] sm:$0xff] }
 0x474   : > { %v3267_v40 = vadd.f32 %v3266_v0, %v3134_v8  ;;  %2909 = vmatmul.bf16.gmra.mxu0 %v7522_v15  ;;  %v3004_v53 = vadd.f32 %v3003_v17, %v2871_v20  ;;  %v7529_v0 = vld [vmem:[#allocation61_spill] sm:$0xff] }
 0x475   : > { %3042 = vmatmul.bf16.gmra.mxu1 %v7523_v16  ;;  %v7531_v17 = vld [vmem:[#allocation53_spill] sm:$0xff] }
 0x476   : > { %v3362_v10 = vpack.c.bf16 %v3267_v40, %v6366_v6  ;;  %v3524_v41 = vadd.f32 %v3523_v35, %v3267_v40  ;;  %v3612_v63 = vmul.f32 %v3267_v40, %v3267_v40  ;;  %3175 = vmatmul.bf16.gmra.mxu2 %v7524_v7  ;;  %v7532_v7 = vld [vmem:[#allocation68_spill] sm:$0xff] }
 0x477   : > { %3308 = vmatmul.bf16.gmra.mxu3 %v7525_v5 }
 0x478   : > { %3411 = vst [vmem:[%s6797_s30 + $0x98] sm:$0xff] %v3362_v10  ;;  %v3743_v3 = vadd.f32 %v3742_v14, %v3612_v63 }
 0x479   : > { %v3136_v2 = vpop.f32.mrf.mxu2  ;;  %v2872_v50 = vpop.f32.mrf.mxu0 }
 0x47a   : > { %v3137_v27 = vadd.f32 %v3136_v2, %v3004_v53  ;;  %v3269_v4 = vpop.f32.mrf.mxu3  ;;  %v3005_v1 = vpop.f32.mrf.mxu1  ;;  %v2873_v6 = vadd.f32 %v2872_v50, %v7526_v25 }
 0x47c   : > { %v3270_v12 = vadd.f32 %v3269_v4, %v3137_v27  ;;  %v3006_v46 = vadd.f32 %v3005_v1, %v2873_v6 }
 0x47e   : > { %v3363_v33 = vpack.c.bf16 %v3270_v12, %v6379_v28  ;;  %v3525_v48 = vadd.f32 %v3524_v41, %v3270_v12  ;;  %v3614_v62 = vmul.f32 %v3270_v12, %v3270_v12 }
 0x480   : > { %3412 = vst [vmem:[%s6797_s30 + $0xa0] sm:$0xff] %v3363_v33  ;;  %v3744_v54 = vadd.f32 %v3743_v3, %v3614_v62  ;;  %v7533_v33 = vld [vmem:[#allocation69_spill] sm:$0xff]  ;;  %v7534_v62 = vld [vmem:[#allocation66_spill] sm:$0xff] }
 0x481   : > { %v3138_v43 = vpop.f32.mrf.mxu2  ;;  %v2875_v57 = vpop.f32.mrf.mxu0 }
 0x482   : > { %v3139_v36 = vadd.f32 %v3138_v43, %v3006_v46  ;;  %v3271_v22 = vpop.f32.mrf.mxu3  ;;  %v3008_v32 = vpop.f32.mrf.mxu1  ;;  %v2876_v14 = vadd.f32 %v2875_v57, %v7527_v31  ;;  %v7535_v43 = vld [vmem:[#allocation67_spill] sm:$0xff] }
 0x484   : > { %v3272_v35 = vadd.f32 %v3271_v22, %v3139_v36  ;;  %2914 = vmatmul.bf16.gmra.mxu0 %v7528_v58  ;;  %v3009_v61 = vadd.f32 %v3008_v32, %v2876_v14  ;;  %v7536_v36 = vld [vmem:[#allocation58_spill] sm:$0xff]  ;;  %v7537_v22 = vld [vmem:[#allocation59_spill] sm:$0xff] }
 0x485   : > { %3047 = vmatmul.bf16.gmra.mxu1 %v7529_v0 }
 0x486   : > { %v3364_v19 = vpack.c.bf16 %v3272_v35, %v6388_v59  ;;  %v3526_v8 = vadd.f32 %v3525_v48, %v3272_v35  ;;  %v3616_v28 = vmul.f32 %v3272_v35, %v3272_v35  ;;  %3180 = vmatmul.bf16.gmra.mxu2 %v7530_v38 }
 0x487   : > { %3313 = vmatmul.bf16.gmra.mxu3 %v7531_v17 }
 0x488   : > { %3413 = vst [vmem:[%s6797_s30 + $0xa8] sm:$0xff] %v3364_v19  ;;  %v3745_v40 = vadd.f32 %v3744_v54, %v3616_v28  ;;  %v7538_v28 = vld [vmem:[#allocation74_spill] sm:$0xff] }
 0x489   : > { %v3141_v20 = vpop.f32.mrf.mxu2  ;;  %v2877_v41 = vpop.f32.mrf.mxu0 }
 0x48a   : > { %v3142_v15 = vadd.f32 %v3141_v20, %v3009_v61  ;;  %v3274_v10 = vpop.f32.mrf.mxu3  ;;  %v3010_v63 = vpop.f32.mrf.mxu1  ;;  %v2878_v59 = vadd.f32 %v2877_v41, %v7532_v7  ;;  %v7539_v7 = vld [vmem:[#allocation75_spill] sm:$0xff] }
 0x48c   : > { %v3275_v16 = vadd.f32 %v3274_v10, %v3142_v15  ;;  %v3011_v27 = vadd.f32 %v3010_v63, %v2878_v59 }
 0x48e   : > { %v3365_v5 = vpack.c.bf16 %v3275_v16, %v6401_v42  ;;  %v3527_v3 = vadd.f32 %v3526_v8, %v3275_v16  ;;  %v3618_v53 = vmul.f32 %v3275_v16, %v3275_v16 }
 0x490   : > { %3414 = vst [vmem:[%s6797_s30 + $0xb0] sm:$0xff] %v3365_v5  ;;  %v3746_v2 = vadd.f32 %v3745_v40, %v3618_v53  ;;  %v7540_v5 = vld [vmem:[#allocation72_spill] sm:$0xff] }
 0x491   : > { %v3143_v4 = vpop.f32.mrf.mxu2  ;;  %v2880_v12 = vpop.f32.mrf.mxu0 }
 0x492   : > { %v3144_v50 = vadd.f32 %v3143_v4, %v3011_v27  ;;  %v3276_v1 = vpop.f32.mrf.mxu3  ;;  %v3013_v25 = vpop.f32.mrf.mxu1  ;;  %v2881_v48 = vadd.f32 %v2880_v12, %v7533_v33  ;;  %v7542_v27 = vld [vmem:[#allocation64_spill] sm:$0xff]  ;;  %v7543_v4 = vld [vmem:[#allocation65_spill] sm:$0xff] }
 0x494   : > { %v3277_v6 = vadd.f32 %v3276_v1, %v3144_v50  ;;  %2919 = vmatmul.bf16.gmra.mxu0 %v7534_v62  ;;  %v3014_v32 = vadd.f32 %v3013_v25, %v2881_v48 }
 0x495   : > { %3052 = vmatmul.bf16.gmra.mxu1 %v7535_v43 }
 0x496   : > { %v3366_v54 = vpack.c.bf16 %v3277_v6, %v6410_v55  ;;  %v3528_v46 = vadd.f32 %v3527_v3, %v3277_v6  ;;  %v3620_v42 = vmul.f32 %v3277_v6, %v3277_v6  ;;  %3185 = vmatmul.bf16.gmra.mxu2 %v7536_v36 }
 0x497   : > { %3318 = vmatmul.bf16.gmra.mxu3 %v7537_v22 }
 0x498   : > { %3415 = vst [vmem:[%s6797_s30 + $0xb8] sm:$0xff] %v3366_v54  ;;  %v3747_v57 = vadd.f32 %v3746_v2, %v3620_v42  ;;  %v7541_v2 = vld [vmem:[#allocation73_spill] sm:$0xff]  ;;  %v7544_v54 = vld [vmem:[#allocation80_spill] sm:$0xff] }
 0x499   : > { %v3146_v35 = vpop.f32.mrf.mxu2  ;;  %v2882_v58 = vpop.f32.mrf.mxu0 }
 0x49a   : > { %v3147_v31 = vadd.f32 %v3146_v35, %v3014_v32  ;;  %v3279_v14 = vpop.f32.mrf.mxu3  ;;  %v3015_v19 = vpop.f32.mrf.mxu1  ;;  %v2883_v55 = vadd.f32 %v2882_v58, %v7538_v28  ;;  %v7546_v28 = vld [vmem:[#allocation78_spill] sm:$0xff] }
 0x49c   : > { %v3280_v8 = vadd.f32 %v3279_v14, %v3147_v31  ;;  %v3016_v61 = vadd.f32 %v3015_v19, %v2883_v55  ;;  %v7545_v19 = vld [vmem:[#allocation81_spill] sm:$0xff] }
 0x49e   : > { %v3367_v0 = vpack.c.bf16 %v3280_v8, %v6423_v37  ;;  %v3529_v38 = vadd.f32 %v3528_v46, %v3280_v8  ;;  %v3622_v17 = vmul.f32 %v3280_v8, %v3280_v8 }
 0x4a0   : > { %3416 = vst [vmem:[%s6797_s30 + $0xc0] sm:$0xff] %v3367_v0  ;;  %v3748_v40 = vadd.f32 %v3747_v57, %v3622_v17  ;;  %v7548_v17 = vld [vmem:[#allocation70_spill] sm:$0xff] }
 0x4a1   : > { %v3148_v20 = vpop.f32.mrf.mxu2  ;;  %v2885_v41 = vpop.f32.mrf.mxu0 }
 0x4a2   : > { %v3149_v15 = vadd.f32 %v3148_v20, %v3016_v61  ;;  %v3281_v10 = vpop.f32.mrf.mxu3  ;;  %v3018_v63 = vpop.f32.mrf.mxu1  ;;  %v2886_v59 = vadd.f32 %v2885_v41, %v7539_v7 }
 0x4a4   : > { %v3282_v16 = vadd.f32 %v3281_v10, %v3149_v15  ;;  %2924 = vmatmul.bf16.gmra.mxu0 %v7540_v5  ;;  %v3019_v1 = vadd.f32 %v3018_v63, %v2886_v59  ;;  %v7550_v59 = vld [vmem:[#allocation86_spill] sm:$0xff] }
 0x4a5   : > { %3057 = vmatmul.bf16.gmra.mxu1 %v7541_v2 }
 0x4a6   : > { %v3368_v3 = vpack.c.bf16 %v3282_v16, %v6440_v56  ;;  %v3530_v53 = vadd.f32 %v3529_v38, %v3282_v16  ;;  %v3624_v37 = vmul.f32 %v3282_v16, %v3282_v16  ;;  %3190 = vmatmul.bf16.gmra.mxu2 %v7542_v27  ;;  %v7547_v38 = vld [vmem:[#allocation79_spill] sm:$0xff] }
 0x4a7   : > { %3323 = vmatmul.bf16.gmra.mxu3 %v7543_v4 }
 0x4a8   : > { %3417 = vst [vmem:[%s6797_s30 + $0xc8] sm:$0xff] %v3368_v3  ;;  %v3749_v50 = vadd.f32 %v3748_v40, %v3624_v37  ;;  %v7549_v40 = vld [vmem:[#allocation71_spill] sm:$0xff] }
 0x4a9   : > { %v3151_v12 = vpop.f32.mrf.mxu2  ;;  %v2887_v33 = vpop.f32.mrf.mxu0 }
 0x4aa   : > { %v3152_v25 = vadd.f32 %v3151_v12, %v3019_v1  ;;  %v3284_v6 = vpop.f32.mrf.mxu3  ;;  %v3020_v48 = vpop.f32.mrf.mxu1  ;;  %v2888_v56 = vadd.f32 %v2887_v33, %v7544_v54  ;;  %v7551_v33 = vld [vmem:[#allocation84_spill] sm:$0xff]  ;;  %v7552_v54 = vld [vmem:[#allocation85_spill] sm:$0xff] }
 0x4ac   : > { %v3285_v62 = vadd.f32 %v3284_v6, %v3152_v25  ;;  %v3021_v22 = vadd.f32 %v3020_v48, %v2888_v56  ;;  %v7553_v56 = vld [vmem:[#allocation76_spill] sm:$0xff] }
 0x4ae   : > { %v3369_v46 = vpack.c.bf16 %v3285_v62, %v6453_v60  ;;  %v3531_v42 = vadd.f32 %v3530_v53, %v3285_v62  ;;  %v3626_v43 = vmul.f32 %v3285_v62, %v3285_v62 }
 0x4b0   : > { %3418 = vst [vmem:[%s6797_s30 + $0xd0] sm:$0xff] %v3369_v46  ;;  %v3750_v36 = vadd.f32 %v3749_v50, %v3626_v43  ;;  %v7554_v46 = vld [vmem:[#allocation77_spill] sm:$0xff] }
 0x4b1   : > { %v3153_v57 = vpop.f32.mrf.mxu2  ;;  %v2890_v31 = vpop.f32.mrf.mxu0 }
 0x4b2   : > { %v3154_v32 = vadd.f32 %v3153_v57, %v3021_v22  ;;  %v3286_v35 = vpop.f32.mrf.mxu3  ;;  %v3023_v14 = vpop.f32.mrf.mxu1  ;;  %v2891_v8 = vadd.f32 %v2890_v31, %v7545_v19 }
 0x4b4   : > { %v3287_v58 = vadd.f32 %v3286_v35, %v3154_v32  ;;  %2929 = vmatmul.bf16.gmra.mxu0 %v7546_v28  ;;  %v3024_v20 = vadd.f32 %v3023_v14, %v2891_v8 }
 0x4b5   : > { %3062 = vmatmul.bf16.gmra.mxu1 %v7547_v38 }
 0x4b6   : > { %v3370_v55 = vpack.c.bf16 %v3287_v58, %v6462_v21  ;;  %v3532_v0 = vadd.f32 %v3531_v42, %v3287_v58  ;;  %v3628_v60 = vmul.f32 %v3287_v58, %v3287_v58  ;;  %3195 = vmatmul.bf16.gmra.mxu2 %v7548_v17 }
 0x4b7   : > { %3328 = vmatmul.bf16.gmra.mxu3 %v7549_v40  ;;  %v7555_v40 = vld [vmem:[#allocation139_spill] sm:$0xff] }
 0x4b8   : > { %3419 = vst [vmem:[%s6797_s30 + $0xd8] sm:$0xff] %v3370_v55  ;;  %v3751_v61 = vadd.f32 %v3750_v36, %v3628_v60 }
 0x4b9   : > { %v3156_v15 = vpop.f32.mrf.mxu2  ;;  %v2892_v63 = vpop.f32.mrf.mxu0 }
 0x4ba   : > { %v3157_v10 = vadd.f32 %v3156_v15, %v3024_v20  ;;  %v3289_v41 = vpop.f32.mrf.mxu3  ;;  %v3025_v16 = vpop.f32.mrf.mxu1  ;;  %v2893_v21 = vadd.f32 %v2892_v63, %v7550_v59  ;;  %v7556_v20 = vld [vmem:[#allocation87_spill] sm:$0xff] }
 0x4bb   : > { %v7559_v63 = vld [vmem:[#allocation83_spill] sm:$0xff] }
 0x4bc   : > { %v3290_v7 = vadd.f32 %v3289_v41, %v3157_v10  ;;  %v3026_v2 = vadd.f32 %v3025_v16, %v2893_v21  ;;  %v7557_v10 = vld [vmem:[#allocation88_spill] sm:$0xff]  ;;  %v7558_v41 = vld [vmem:[#allocation82_spill] sm:$0xff] }
 0x4be   : > { %v3371_v5 = vpack.c.bf16 %v3290_v7, %v6475_v23  ;;  %v3533_v3 = vadd.f32 %v3532_v0, %v3290_v7  ;;  %v3630_v53 = vmul.f32 %v3290_v7, %v3290_v7 }
 0x4c0   : > { %3420 = vst [vmem:[%s6797_s30 + $0xe0] sm:$0xff] %v3371_v5  ;;  %v3752_v37 = vadd.f32 %v3751_v61, %v3630_v53 }
 0x4c1   : > { %v3158_v27 = vpop.f32.mrf.mxu2  ;;  %v2895_v1 = vpop.f32.mrf.mxu0 }
 0x4c2   : > { %v3159_v4 = vadd.f32 %v3158_v27, %v3026_v2  ;;  %v3291_v50 = vpop.f32.mrf.mxu3  ;;  %v3028_v12 = vpop.f32.mrf.mxu1  ;;  %v2896_v6 = vadd.f32 %v2895_v1, %v6524_v30  ;;  %v7560_v2 = vld [vmem:[#allocation140_spill] sm:$0xff] }
 0x4c4   : > { %v3292_v25 = vadd.f32 %v3291_v50, %v3159_v4  ;;  %2934 = vmatmul.bf16.gmra.mxu0 %v7551_v33  ;;  %v3029_v43 = vadd.f32 %v3028_v12, %v2896_v6 }
 0x4c5   : > { %3067 = vmatmul.bf16.gmra.mxu1 %v7552_v54  ;;  %v7561_v54 = vld [vmem:[#allocation2_spill] sm:$0xff] }
 0x4c6   : > { %v3372_v48 = vpack.c.bf16 %v3292_v25, %v6484_v45  ;;  %v3534_v62 = vadd.f32 %v3533_v3, %v3292_v25  ;;  %v3632_v23 = vmul.f32 %v3292_v25, %v3292_v25  ;;  %3200 = vmatmul.bf16.gmra.mxu2 %v7553_v56 }
 0x4c7   : > { %3333 = vmatmul.bf16.gmra.mxu3 %v7554_v46 }
 0x4c8   : > { %3421 = vst [vmem:[%s6797_s30 + $0xe8] sm:$0xff] %v3372_v48  ;;  %v3753_v42 = vadd.f32 %v3752_v37, %v3632_v23 }
 0x4c9   : > { %v3161_v36 = vpop.f32.mrf.mxu2  ;;  %v2897_v30 = vpop.f32.mrf.mxu0 }
 0x4ca   : > { %v3162_v22 = vadd.f32 %v3161_v36, %v3029_v43  ;;  %v3294_v57 = vpop.f32.mrf.mxu3  ;;  %v3030_v32 = vpop.f32.mrf.mxu1  ;;  %v2898_v45 = vadd.f32 %v2897_v30, %v6545_v13 }
 0x4cc   : > { %v3295_v35 = vadd.f32 %v3294_v57, %v3162_v22  ;;  %v3031_v8 = vadd.f32 %v3030_v32, %v2898_v45 }
 0x4ce   : > { %v3373_v31 = vpack.c.bf16 %v3295_v35, %v6508_v49  ;;  %v3535_v14 = vadd.f32 %v3534_v62, %v3295_v35  ;;  %v3634_v58 = vmul.f32 %v3295_v35, %v3295_v35 }
 0x4d0   : > { %3422 = vst [vmem:[%s6797_s30 + $0xf0] sm:$0xff] %v3373_v31  ;;  %v3754_v19 = vadd.f32 %v3753_v42, %v3634_v58  ;;  %v7562_v31 = vld [vmem:[#allocation3_spill] sm:$0xff] }
 0x4d1   : > { %v3163_v28 = vpop.f32.mrf.mxu2  ;;  %v2900_v60 = vpop.f32.mrf.mxu0 }
 0x4d2   : > { %v3164_v55 = vadd.f32 %v3163_v28, %v3031_v8  ;;  %v3296_v0 = vpop.f32.mrf.mxu3  ;;  %v3033_v38 = vpop.f32.mrf.mxu1  ;;  %v2901_v61 = vadd.f32 %v2900_v60, %v7555_v40 }
 0x4d4   : > { %v3297_v17 = vadd.f32 %v3296_v0, %v3164_v55  ;;  %2939 = vmatmul.bf16.gmra.mxu0 %v7556_v20  ;;  %v3034_v7 = vadd.f32 %v3033_v38, %v2901_v61  ;;  %v7563_v61 = vld [vmem:[#allocation89_spill] sm:$0xff] }
 0x4d5   : > { %3072 = vmatmul.bf16.gmra.mxu1 %v7557_v10 }
 0x4d6   : > { %v3374_v13 = vpack.c.bf16 %v3297_v17, %v6530_v29  ;;  %v3536_v15 = vadd.f32 %v3535_v14, %v3297_v17  ;;  %v3636_v49 = vmul.f32 %v3297_v17, %v3297_v17  ;;  %3205 = vmatmul.bf16.gmra.mxu2 %v7558_v41 }
 0x4d7   : > { %3338 = vmatmul.bf16.gmra.mxu3 %v7559_v63 }
 0x4d8   : > { %3423 = vst [vmem:[%s6797_s30 + $0xf8] sm:$0xff] %v3374_v13  ;;  %v3755_v16 = vadd.f32 %v3754_v19, %v3636_v49 }
 0x4d9   : > { %v3166_v59 = vpop.f32.mrf.mxu2  ;;  %v2902_v3 = vpop.f32.mrf.mxu0 }
 0x4da   : > { %v3167_v21 = vadd.f32 %v3166_v59, %v3034_v7  ;;  %v3299_v5 = vpop.f32.mrf.mxu3  ;;  %v3035_v53 = vpop.f32.mrf.mxu1  ;;  %v2903_v29 = vadd.f32 %v2902_v3, %v7560_v2 }
 0x4dc   : > { %v3300_v37 = vadd.f32 %v3299_v5, %v3167_v21  ;;  %v3036_v12 = vadd.f32 %v3035_v53, %v2903_v29 }
 0x4de   : > { %v3375_v27 = vpack.c.bf16 %v3300_v37, %v6551_v52  ;;  %v3537_v4 = vadd.f32 %v3536_v15, %v3300_v37  ;;  %v3638_v50 = vmul.f32 %v3300_v37, %v3300_v37 }
 0x4e0   : > { %3424 = vst [vmem:[%s6797_s30 + $0x100] sm:$0xff] %v3375_v27  ;;  %v3756_v1 = vadd.f32 %v3755_v16, %v3638_v50 }
 0x4e1   : > { %v3168_v25 = vpop.f32.mrf.mxu2  ;;  %v2905_v48 = vpop.f32.mrf.mxu0 }
 0x4e2   : > { %v3169_v6 = vadd.f32 %v3168_v25, %v3036_v12  ;;  %v3301_v33 = vpop.f32.mrf.mxu3  ;;  %v3038_v62 = vpop.f32.mrf.mxu1  ;;  %v2906_v56 = vadd.f32 %v2905_v48, %v7561_v54 }
 0x4e4   : > { %v3302_v23 = vadd.f32 %v3301_v33, %v3169_v6  ;;  %v3039_v36 = vadd.f32 %v3038_v62, %v2906_v56  ;;  %v7564_v6 = vld [vmem:[#allocation90_spill] sm:$0xff] }
 0x4e6   : > { %v3376_v46 = vpack.c.bf16 %v3302_v23, %v6572_v11  ;;  %v3538_v42 = vadd.f32 %v3537_v4, %v3302_v23  ;;  %v3640_v43 = vmul.f32 %v3302_v23, %v3302_v23 }
 0x4e8   : > { %3425 = vst [vmem:[%s6797_s30 + $0x108] sm:$0xff] %v3376_v46  ;;  %v3757_v52 = vadd.f32 %v3756_v1, %v3640_v43 }
 0x4e9   : > { %v3171_v22 = vpop.f32.mrf.mxu2  ;;  %v2907_v32 = vpop.f32.mrf.mxu0 }
 0x4ea   : > { %v3172_v57 = vadd.f32 %v3171_v22, %v3039_v36  ;;  %v3304_v30 = vpop.f32.mrf.mxu3  ;;  %v3040_v35 = vpop.f32.mrf.mxu1  ;;  %v2908_v14 = vadd.f32 %v2907_v32, %v7562_v31 }
 0x4ec   : > { %v3305_v45 = vadd.f32 %v3304_v30, %v3172_v57  ;;  %v3041_v28 = vadd.f32 %v3040_v35, %v2908_v14 }
 0x4ee   : > { %v3377_v58 = vpack.c.bf16 %v3305_v45, %v6589_v39  ;;  %v3539_v19 = vadd.f32 %v3538_v42, %v3305_v45  ;;  %v3642_v8 = vmul.f32 %v3305_v45, %v3305_v45 }
 0x4f0   : > { %3426 = vst [vmem:[%s6797_s30 + $0x110] sm:$0xff] %v3377_v58  ;;  %v3758_v11 = vadd.f32 %v3757_v52, %v3642_v8  ;;  %v7565_v8 = vld [vmem:[#allocation93_spill] sm:$0xff] }
 0x4f1   : > { %v3173_v55 = vpop.f32.mrf.mxu2  ;;  %v2910_v38 = vpop.f32.mrf.mxu0 }
 0x4f2   : > { %v3174_v0 = vadd.f32 %v3173_v55, %v3041_v28  ;;  %v3306_v60 = vpop.f32.mrf.mxu3  ;;  %v3043_v17 = vpop.f32.mrf.mxu1  ;;  %v2911_v20 = vadd.f32 %v2910_v38, %v7563_v61 }
 0x4f4   : > { %v3307_v40 = vadd.f32 %v3306_v60, %v3174_v0  ;;  %v3044_v10 = vadd.f32 %v3043_v17, %v2911_v20 }
 0x4f6   : > { %v3378_v13 = vpack.c.bf16 %v3307_v40, %v6610_v9  ;;  %v3540_v15 = vadd.f32 %v3539_v19, %v3307_v40  ;;  %v3644_v49 = vmul.f32 %v3307_v40, %v3307_v40 }
 0x4f8   : > { %3427 = vst [vmem:[%s6797_s30 + $0x118] sm:$0xff] %v3378_v13  ;;  %v3759_v39 = vadd.f32 %v3758_v11, %v3644_v49  ;;  %v7566_v13 = vld [vmem:[#allocation94_spill] sm:$0xff] }
 0x4f9   : > { %v3176_v41 = vpop.f32.mrf.mxu2  ;;  %v2912_v7 = vpop.f32.mrf.mxu0 }
 0x4fa   : > { %v3177_v63 = vadd.f32 %v3176_v41, %v3044_v10  ;;  %v3309_v16 = vpop.f32.mrf.mxu3  ;;  %v3045_v59 = vpop.f32.mrf.mxu1  ;;  %v2913_v5 = vadd.f32 %v2912_v7, %v6659_v24 }
 0x4fc   : > { %v3310_v21 = vadd.f32 %v3309_v16, %v3177_v63  ;;  %v3046_v2 = vadd.f32 %v3045_v59, %v2913_v5  ;;  %v7567_v5 = vld [vmem:[#allocation91_spill] sm:$0xff] }
 0x4fe   : > { %v3379_v3 = vpack.c.bf16 %v3310_v21, %v6627_v34  ;;  %v3541_v53 = vadd.f32 %v3540_v15, %v3310_v21  ;;  %v3646_v37 = vmul.f32 %v3310_v21, %v3310_v21 }
 0x500   : > { %3428 = vst [vmem:[%s6797_s30 + $0x120] sm:$0xff] %v3379_v3  ;;  %v3760_v9 = vadd.f32 %v3759_v39, %v3646_v37 }
 0x501   : > { %v3178_v29 = vpop.f32.mrf.mxu2  ;;  %v2915_v50 = vpop.f32.mrf.mxu0 }
 0x502   : > { %v3179_v27 = vadd.f32 %v3178_v29, %v3046_v2  ;;  %v3311_v4 = vpop.f32.mrf.mxu3  ;;  %v3048_v1 = vpop.f32.mrf.mxu1  ;;  %v2916_v25 = vadd.f32 %v2915_v50, %v6680_v26 }
 0x504   : > { %v3312_v12 = vadd.f32 %v3311_v4, %v3179_v27  ;;  %v3049_v62 = vadd.f32 %v3048_v1, %v2916_v25 }
 0x506   : > { %v3380_v33 = vpack.c.bf16 %v3312_v12, %v7564_v6  ;;  %v3542_v24 = vadd.f32 %v3541_v53, %v3312_v12  ;;  %v3648_v48 = vmul.f32 %v3312_v12, %v3312_v12  ;;  %v7568_v53 = vld [vmem:[#allocation4_spill] sm:$0xff]  ;;  %v7569_v6 = vld [vmem:[#allocation6_spill] sm:$0xff] }
 0x508   : > { %3429 = vst [vmem:[%s6797_s30 + $0x128] sm:$0xff] %v3380_v33  ;;  %v3761_v34 = vadd.f32 %v3760_v9, %v3648_v48 }
 0x509   : > { %v3181_v23 = vpop.f32.mrf.mxu2  ;;  %v2917_v46 = vpop.f32.mrf.mxu0 }
 0x50a   : > { %v3182_v54 = vadd.f32 %v3181_v23, %v3049_v62  ;;  %v3314_v56 = vpop.f32.mrf.mxu3  ;;  %v3050_v42 = vpop.f32.mrf.mxu1  ;;  %v2918_v52 = vadd.f32 %v2917_v46, %v6689_v47 }
 0x50c   : > { %v3315_v43 = vadd.f32 %v3314_v56, %v3182_v54  ;;  %v3051_v30 = vadd.f32 %v3050_v42, %v2918_v52 }
 0x50e   : > { %v3381_v36 = vpack.c.bf16 %v3315_v43, %v6665_v18  ;;  %v3543_v26 = vadd.f32 %v3542_v24, %v3315_v43  ;;  %v3650_v22 = vmul.f32 %v3315_v43, %v3315_v43  ;;  %v7570_v24 = vld [vmem:[#allocation5_spill] sm:$0xff] }
 0x510   : > { %3430 = vst [vmem:[%s6797_s30 + $0x130] sm:$0xff] %v3381_v36  ;;  %v3762_v57 = vadd.f32 %v3761_v34, %v3650_v22 }
 0x511   : > { %v3183_v32 = vpop.f32.mrf.mxu2  ;;  %v2920_v31 = vpop.f32.mrf.mxu0 }
 0x512   : > { %v3184_v35 = vadd.f32 %v3183_v32, %v3051_v30  ;;  %v3316_v45 = vpop.f32.mrf.mxu3  ;;  %v3053_v14 = vpop.f32.mrf.mxu1  ;;  %v2921_v19 = vadd.f32 %v2920_v31, %v6701_v44 }
 0x514   : > { %v3317_v58 = vadd.f32 %v3316_v45, %v3184_v35  ;;  %v3054_v55 = vadd.f32 %v3053_v14, %v2921_v19 }
 0x516   : > { %v3382_v11 = vpack.c.bf16 %v3317_v58, %v7565_v8  ;;  %v3544_v47 = vadd.f32 %v3543_v26, %v3317_v58  ;;  %v3652_v28 = vmul.f32 %v3317_v58, %v3317_v58  ;;  %v7571_v26 = vld [vmem:[#allocation97_spill] sm:$0xff] }
 0x518   : > { %3431 = vst [vmem:[%s6797_s30 + $0x138] sm:$0xff] %v3382_v11  ;;  %v3763_v18 = vadd.f32 %v3762_v57, %v3652_v28  ;;  %v7572_v57 = vld [vmem:[#allocation92_spill] sm:$0xff]  ;;  %v7573_v28 = vld [vmem:[#allocation9_spill] sm:$0xff] }
 0x519   : > { %v3186_v0 = vpop.f32.mrf.mxu2  ;;  %v2922_v17 = vpop.f32.mrf.mxu0 }
 0x51a   : > { %v3187_v60 = vadd.f32 %v3186_v0, %v3054_v55  ;;  %v3319_v38 = vpop.f32.mrf.mxu3  ;;  %v3055_v40 = vpop.f32.mrf.mxu1  ;;  %v2923_v20 = vadd.f32 %v2922_v17, %v6709_v51  ;;  %v7574_v55 = vld [vmem:[#allocation7_spill] sm:$0xff] }
 0x51c   : > { %v3320_v61 = vadd.f32 %v3319_v38, %v3187_v60  ;;  %v3056_v10 = vadd.f32 %v3055_v40, %v2923_v20 }
 0x51e   : > { %v3383_v15 = vpack.c.bf16 %v3320_v61, %v7566_v13  ;;  %v3545_v44 = vadd.f32 %v3544_v47, %v3320_v61  ;;  %v3654_v49 = vmul.f32 %v3320_v61, %v3320_v61  ;;  %v3445_v61 = vlaneseq }
 0x520   : > { %3432 = vst [vmem:[%s6797_s30 + $0x140] sm:$0xff] %v3383_v15  ;;  %v3764_v39 = vadd.f32 %v3763_v18, %v3654_v49  ;;  %vm7008_vm0 = vcmp.lt.s32.totalorder %v3445_v61, 256 }
 0x521   : > { %v3188_v41 = vpop.f32.mrf.mxu2  ;;  %v2925_v7 = vpop.f32.mrf.mxu0 }
 0x522   : > { %v3189_v63 = vadd.f32 %v3188_v41, %v3056_v10  ;;  %v3321_v16 = vpop.f32.mrf.mxu3  ;;  %v3058_v59 = vpop.f32.mrf.mxu1  ;;  %v2926_v3 = vadd.f32 %v2925_v7, %v7567_v5  ;;  %v5220_v10 = vmov 0.0   ;;  %v7578_v7 = vld [vmem:[#allocation8_spill] sm:$0xff] }
 0x523   : > { %3449 = vst.msk [vmem:[%s7001_s8] sm:$0x3] %vm7008_vm0, %v5220_v10 }
 0x524   : > { %v3322_v21 = vadd.f32 %v3321_v16, %v3189_v63  ;;  %v3059_v29 = vadd.f32 %v3058_v59, %v2926_v3  ;;  %v7577_v63 = vld [vmem:[#allocation96_spill] sm:$0xff]  ;;  %3450 = vst.msk [vmem:[%s7006_s11] sm:$0x3] %vm7008_vm0, %v5220_v10 }
 0x526   : > { %v3384_v37 = vpack.c.bf16 %v3322_v21, %v7568_v53  ;;  %v3546_v51 = vadd.f32 %v3545_v44, %v3322_v21  ;;  %v3656_v9 = vmul.f32 %v3322_v21, %v3322_v21 }
 0x528   : > { %3433 = vst [vmem:[%s6797_s30 + $0x148] sm:$0xff] %v3384_v37  ;;  %v3765_v2 = vadd.f32 %v3764_v39, %v3656_v9 }
 0x529   : > { %v3191_v27 = vpop.f32.mrf.mxu2  ;;  %v2927_v1 = vpop.f32.mrf.mxu0 }
 0x52a   : > { %v3192_v4 = vadd.f32 %v3191_v27, %v3059_v29  ;;  %v3324_v50 = vpop.f32.mrf.mxu3  ;;  %v3060_v12 = vpop.f32.mrf.mxu1  ;;  %v2928_v33 = vadd.f32 %v2927_v1, %v7569_v6  ;;  %v7580_v1 = vld [vmem:[#allocation95_spill] sm:$0xff] }
 0x52c   : > { %v3325_v25 = vadd.f32 %v3324_v50, %v3192_v4  ;;  %v3061_v54 = vadd.f32 %v3060_v12, %v2928_v33  ;;  %v7579_v4 = vld [vmem:[#allocation101_spill] sm:$0xff] }
 0x52e   : > { %v3385_v48 = vpack.c.bf16 %v3325_v25, %v7570_v24  ;;  %v3547_v34 = vadd.f32 %v3546_v51, %v3325_v25  ;;  %v3658_v62 = vmul.f32 %v3325_v25, %v3325_v25 }
 0x530   : > { %3434 = vst [vmem:[%s6797_s30 + $0x150] sm:$0xff] %v3385_v48  ;;  %v3766_v23 = vadd.f32 %v3765_v2, %v3658_v62 }
 0x531   : > { %v3193_v56 = vpop.f32.mrf.mxu2  ;;  %v2930_v43 = vpop.f32.mrf.mxu0 }
 0x532   : > { %v3194_v46 = vadd.f32 %v3193_v56, %v3061_v54  ;;  %v3326_v42 = vpop.f32.mrf.mxu3  ;;  %v3063_v52 = vpop.f32.mrf.mxu1  ;;  %v2931_v22 = vadd.f32 %v2930_v43, %v7571_v26  ;;  %v7582_v43 = vld [vmem:[#allocation100_spill] sm:$0xff] }
 0x534   : > { %v3327_v36 = vadd.f32 %v3326_v42, %v3194_v46  ;;  %v3064_v31 = vadd.f32 %v3063_v52, %v2931_v22  ;;  %v7581_v46 = vld [vmem:[#allocation99_spill] sm:$0xff] }
 0x535   : > { %v7583_v22 = vld [vmem:[#allocation11_spill] sm:$0xff] }
 0x536   : > { %v3386_v30 = vpack.c.bf16 %v3327_v36, %v7572_v57  ;;  %v3548_v32 = vadd.f32 %v3547_v34, %v3327_v36  ;;  %v3660_v35 = vmul.f32 %v3327_v36, %v3327_v36  ;;  %v3500_v57 = vrot.slane %v7583_v22, 4 }
 0x538   : > { %3435 = vst [vmem:[%s6797_s30 + $0x158] sm:$0xff] %v3386_v30  ;;  %v3767_v45 = vadd.f32 %v3766_v23, %v3660_v35 }
 0x539   : > { %v3196_v14 = vpop.f32.mrf.mxu2  ;;  %v2932_v8 = vpop.f32.mrf.mxu0 }
 0x53a   : > { %v3197_v58 = vadd.f32 %v3196_v14, %v3064_v31  ;;  %v3329_v19 = vpop.f32.mrf.mxu3  ;;  %v3065_v11 = vpop.f32.mrf.mxu1  ;;  %v2933_v18 = vadd.f32 %v2932_v8, %v7573_v28 }
 0x53c   : > { %v3330_v47 = vadd.f32 %v3329_v19, %v3197_v58  ;;  %v3066_v40 = vadd.f32 %v3065_v11, %v2933_v18  ;;  %v3501_v11 = vadd.f32 %v3500_v57, %v7583_v22  ;;  %v7585_v18 = vld [vmem:[#allocation10_spill] sm:$0xff] }
 0x53e   : > { %v3387_v0 = vpack.c.bf16 %v3330_v47, %v7574_v55  ;;  %v3549_v60 = vadd.f32 %v3548_v32, %v3330_v47  ;;  %v3662_v38 = vmul.f32 %v3330_v47, %v3330_v47 }
 0x540   : > { %3436 = vst [vmem:[%s6797_s30 + $0x160] sm:$0xff] %v3387_v0  ;;  %v3768_v17 = vadd.f32 %v3767_v45, %v3662_v38  ;;  %v7584_v45 = vld [vmem:[#allocation98_spill] sm:$0xff]  ;;  %v3502_v38 = vrot.slane %v3501_v11, 2 }
 0x541   : > { %v3198_v20 = vpop.f32.mrf.mxu2  ;;  %v2935_v44 = vpop.f32.mrf.mxu0  ;;  %v3719_v31 = vrot.slane %v7584_v45, 4 }
 0x542   : > { %v3199_v13 = vadd.f32 %v3198_v20, %v3066_v40  ;;  %v3331_v15 = vpop.f32.mrf.mxu3  ;;  %v3068_v39 = vpop.f32.mrf.mxu1  ;;  %v2936_v16 = vadd.f32 %v2935_v44, %v7577_v63 }
 0x543   : > { %v3720_v28 = vadd.f32 %v3719_v31, %v7584_v45 }
 0x544   : > { %v3332_v41 = vadd.f32 %v3331_v15, %v3199_v13  ;;  %v3069_v53 = vadd.f32 %v3068_v39, %v2936_v16  ;;  %v3503_v39 = vadd.f32 %v3502_v38, %v3501_v11 }
 0x545   : > { %v3721_v20 = vrot.slane %v3720_v28, 2 }
 0x546   : > { %v3388_v59 = vpack.c.bf16 %v3332_v41, %v7578_v7  ;;  %v3550_v21 = vadd.f32 %v3549_v60, %v3332_v41  ;;  %v3664_v5 = vmul.f32 %v3332_v41, %v3332_v41 }
 0x547   : > { %v3722_v63 = vadd.f32 %v3721_v20, %v3720_v28 }
 0x548   : > { %3437 = vst [vmem:[%s6797_s30 + $0x168] sm:$0xff] %v3388_v59  ;;  %v3769_v3 = vadd.f32 %v3768_v17, %v3664_v5  ;;  %v3504_v59 = vrot.slane %v3503_v39, 1 }
 0x549   : > { %v3201_v37 = vpop.f32.mrf.mxu2  ;;  %v2937_v2 = vpop.f32.mrf.mxu0 }
 0x54a   : > { %v3202_v51 = vadd.f32 %v3201_v37, %v3069_v53  ;;  %v3334_v9 = vpop.f32.mrf.mxu3  ;;  %v3070_v29 = vpop.f32.mrf.mxu1  ;;  %v2938_v50 = vadd.f32 %v2937_v2, %v7579_v4 }
 0x54c   : > { %v3335_v27 = vadd.f32 %v3334_v9, %v3202_v51  ;;  %v3071_v24 = vadd.f32 %v3070_v29, %v2938_v50  ;;  %v3505_v51 = vadd.f32 %v3504_v59, %v3503_v39  ;;  %v3451_v9 = vld [vmem:[%s7001_s8] sm:$0x3] }
 0x54d   : > { %v3572_v50 = vld [vmem:[%s7006_s11] sm:$0x3] }
 0x54e   : > { %v3389_v12 = vpack.c.bf16 %v3335_v27, %v7580_v1  ;;  %v3551_v25 = vadd.f32 %v3550_v21, %v3335_v27  ;;  %v3666_v6 = vmul.f32 %v3335_v27, %v3335_v27 }
 0x550   : > { %3438 = vst [vmem:[%s6797_s30 + $0x170] sm:$0xff] %v3389_v12  ;;  %v3770_v33 = vadd.f32 %v3769_v3, %v3666_v6  ;;  %v3723_v3 = vrot.slane %v3722_v63, 1 }
 0x551   : > { %v3203_v48 = vpop.f32.mrf.mxu2  ;;  %v2940_v23 = vpop.f32.mrf.mxu0 }
 0x552   : > { %v3204_v34 = vadd.f32 %v3203_v48, %v3071_v24  ;;  %v3336_v62 = vpop.f32.mrf.mxu3  ;;  %v3073_v54 = vpop.f32.mrf.mxu1  ;;  %v2941_v42 = vadd.f32 %v2940_v23, %v7581_v46  ;;  %v3724_v27 = vadd.f32 %v3723_v3, %v3722_v63 }
 0x554   : > { %v3337_v56 = vadd.f32 %v3336_v62, %v3204_v34  ;;  %v3074_v32 = vadd.f32 %v3073_v54, %v2941_v42 }
 0x556   : > { %v3390_v52 = vpack.c.bf16 %v3337_v56, %v7582_v43  ;;  %v3552_v36 = vadd.f32 %v3551_v25, %v3337_v56  ;;  %v3668_v26 = vmul.f32 %v3337_v56, %v3337_v56 }
 0x558   : > { %3439 = vst [vmem:[%s6797_s30 + $0x178] sm:$0xff] %v3390_v52  ;;  %v3771_v30 = vadd.f32 %v3770_v33, %v3668_v26 }
 0x559   : > { %v3206_v35 = vpop.f32.mrf.mxu2  ;;  %v2942_v19 = vpop.f32.mrf.mxu0 }
 0x55a   : > { %v3207_v14 = vadd.f32 %v3206_v35, %v3074_v32  ;;  %v3339_v58 = vpop.f32.mrf.mxu3  ;;  %v3075_v8 = vpop.f32.mrf.mxu1 }
 0x55c   : > { %v3340_v47 = vadd.f32 %v3339_v58, %v3207_v14 }
 0x55e   : > { %v3391_v55 = vpack.c.bf16 %v3340_v47, %v7585_v18  ;;  %v3553_v0 = vadd.f32 %v3552_v36, %v3340_v47  ;;  %v3670_v60 = vmul.f32 %v3340_v47, %v3340_v47 }
 0x560   : > { %3440 = vst [vmem:[%s6797_s30 + $0x180] sm:$0xff] %v3391_v55  ;;  %v3554_v17 = vrot.slane %v3553_v0, 4  ;;  %v3772_v40 = vadd.f32 %v3771_v30, %v3670_v60 }
 0x561   : > { %v3208_v61 = vpop.f32.mrf.mxu2 }
 0x562   : > { %v3555_v13 = vadd.f32 %v3554_v17, %v3553_v0  ;;  %v3773_v15 = vrot.slane %v3772_v40, 4  ;;  %v3341_v44 = vpop.f32.mrf.mxu3 }
 0x564   : > { %v3556_v10 = vrot.slane %v3555_v13, 2  ;;  %v3774_v41 = vadd.f32 %v3773_v15, %v3772_v40 }
 0x566   : > { %v3557_v16 = vadd.f32 %v3556_v10, %v3555_v13  ;;  %v3775_v7 = vrot.slane %v3774_v41, 2 }
 0x568   : > { %v3558_v21 = vrot.slane %v3557_v16, 1  ;;  %v3776_v5 = vadd.f32 %v3775_v7, %v3774_v41 }
 0x56a   : > { %v3559_v53 = vadd.f32 %v3558_v21, %v3557_v16  ;;  %v3777_v37 = vrot.slane %v3776_v5, 1 }
 0x56c   : > { %v3562_v2 = vrot.slane %v3559_v53, 7  ;;  %v3778_v29 = vadd.f32 %v3777_v37, %v3776_v5 }
 0x56e   : > { %v3564_v4 = vsel %vm3563_vm1, %v3505_v51, %v3562_v2  ;;  %v3781_v1 = vrot.slane %v3778_v29, 7 }
 0x56f   : > { %v3566_v12 = vadd.f32 %v3564_v4, %v3451_v9 }
 0x570   : > { %v3782_v25 = vsel %vm3563_vm1, %v3724_v27, %v3781_v1 }
 0x571   : > { %3571 = vst.msk [vmem:[%s7001_s8] sm:$0x3] %vm7008_vm0, %v3566_v12  ;;  %v3784_v6 = vadd.f32 %v3782_v25, %v3572_v50 }
 0x573   : > { %3785 = vst.msk [vmem:[%s7006_s11] sm:$0x3] %vm7008_vm0, %v3784_v6 }
 0x574 PF: > { %s15_s17 = sadd.s32 1, %s5218_s17   ;;  %s7586_s15 = smov %s5214_s16 }
 0x575   : > { %p12_p5 = scmp.ge.s32.totalorder %s15_s17, 4   ;;  %s7587_s16 = smov %s7589_s18 }
 0x577   :  { %14 = sbr.rel (!%p12_p5) target bundleno = 2 (0x2), region = 89 }

// kernel: dc_generator_forward.7
= control target key start
LH: loop header
LB: loop body
LE: loop exit
PB: predicated region body
PF: predicated region fallthrough
CT: control target
= control target key end

     0   :  { %s5101_s12 = smov 0   ;;  %s6446_s0 = inlined_call_operand.vmem [shape: bf16[1568,1152], index: 0, kind: input, shape index: {}]   ;;  %s6447_s1 = inlined_call_operand.vmem [shape: bf16[1152,128], index: 1, kind: input, shape index: {}]   ;;  %s6448_s2 = inlined_call_operand.vmem [shape: f32[1,128], index: 2, kind: input, shape index: {}]   ;;  %s6449_s3 = inlined_call_operand.vmem [shape: f32[1568,128], index: 3, kind: output, shape index: {}]  }
   0x1 LB: > { %s3489_s13 = sadd.s32 4294967295, %s5079_s12   ;;  %p3493_p0 = scmp.ge.s32.totalorder %s5079_s12, 1  ;;  %s5079_s12 = sphi %s5101_s12, %s13_s12  }
   0x2   : > { %p139_p1 = scmp.lt.s32.totalorder %s5079_s12, 5 }
   0x4   : > { %p140_p2 = pnand %p3493_p0, %p139_p1 }
   0x6   : > { %143 = sbr.rel (%p140_p2) target bundleno = 1085 (0x43d), region = 32 }
   0xb   : > { %v4873_v0 = vld [vmem:[%s6447_s1 + $0x38] sm:$0xff]  ;;  %v4872_v1 = vld [vmem:[%s6447_s1 + $0x30] sm:$0xff]  ;;  %v4871_v2 = vld [vmem:[%s6447_s1 + $0x28] sm:$0xff]  ;;  %s164_s20 = smul.u32 49, %s3489_s13 }
   0xc   : > { %4938 = vmatpush.bf16.msra.mxu1 %v4873_v0  ;;  %4939 = vmatpush.bf16.msra.mxu2 %v4873_v0  ;;  %v4870_v3 = vld [vmem:[%s6447_s1 + $0x20] sm:$0xff]  ;;  %v4869_v4 = vld [vmem:[%s6447_s1 + $0x18] sm:$0xff]  ;;  %v4868_v5 = vld [vmem:[%s6447_s1 + $0x10] sm:$0xff] }
   0xd   : > { %2138 = vmatpush.bf16.msra.mxu0 %v4873_v0  ;;  %4940 = vmatpush.bf16.msra.mxu3 %v4873_v0  ;;  %p165_p3 = scmp.lt.s32.totalorder %s164_s20, 195  ;;  %v4867_v6 = vld [vmem:[%s6447_s1 + $0x8] sm:$0xff]  ;;  %v4866_v7 = vld [vmem:[%s6447_s1] sm:$0xff]  ;;  %v4889_v12 = vld [vmem:[%s6447_s1 + $0xb8] sm:$0xff] }
   0xe   : > { %v4881_v15 = vld [vmem:[%s6447_s1 + $0x78] sm:$0xff]  ;;  %v4888_v20 = vld [vmem:[%s6447_s1 + $0xb0] sm:$0xff]  ;;  %v4887_v25 = vld [vmem:[%s6447_s1 + $0xa8] sm:$0xff] }
   0xf   : > { %s6495_s20 = smov (!%p165_p3, %s164_s20), 195  ;;  %v4905_v16 = vld [vmem:[%s6447_s1 + $0x138] sm:$0xff]  ;;  %v4880_v21 = vld [vmem:[%s6447_s1 + $0x70] sm:$0xff]  ;;  %v4879_v27 = vld [vmem:[%s6447_s1 + $0x68] sm:$0xff] }
  0x10   : > { %4941 = vmatpush.bf16.msra.mxu1 %v4872_v1  ;;  %4942 = vmatpush.bf16.msra.mxu2 %v4872_v1  ;;  %s4962_s27 = smul.u32 36, %s6495_s20  ;;  %v4904_v22 = vld [vmem:[%s6447_s1 + $0x130] sm:$0xff]  ;;  %v4903_v28 = vld [vmem:[%s6447_s1 + $0x128] sm:$0xff]  ;;  %v4886_v29 = vld [vmem:[%s6447_s1 + $0xa0] sm:$0xff]  ;;  %s3495_s22 = sshll.u32 %s6495_s20, 3 }
  0x11   : > { %2139 = vmatpush.bf16.msra.mxu0 %v4872_v1  ;;  %4943 = vmatpush.bf16.msra.mxu3 %v4872_v1  ;;  %v4878_v30 = vld [vmem:[%s6447_s1 + $0x60] sm:$0xff]  ;;  %v4897_v40 = vld [vmem:[%s6447_s1 + $0xf8] sm:$0xff]  ;;  %v4896_v46 = vld [vmem:[%s6447_s1 + $0xf0] sm:$0xff]  ;;  %s6137_s25 = scalar_lea.vmem %s6449_s3, %s3495_s22 }
  0x12   : > { %s5136_s5 = scalar_lea.vmem %s6446_s0, %s4962_s27  ;;  %v4902_v41 = vld [vmem:[%s6447_s1 + $0x120] sm:$0xff]  ;;  %v4885_v42 = vld [vmem:[%s6447_s1 + $0x98] sm:$0xff]  ;;  %v4895_v57 = vld [vmem:[%s6447_s1 + $0xe8] sm:$0xff] }
  0x13   : > { %v3750_v8 = vld [vmem:[%s5136_s5 + $0x1f8] sm:$0xf]  ;;  %v4717_v9 = vld [vmem:[%s5136_s5 + $0x218] sm:$0xf0]  ;;  %v4002_v10 = vld [vmem:[%s5136_s5 + $0x3f0] sm:$0xf] }
  0x14   : > { %4944 = vmatpush.bf16.msra.mxu1 %v4871_v2  ;;  %4945 = vmatpush.bf16.msra.mxu2 %v4871_v2  ;;  %v4780_v11 = vld [vmem:[%s5136_s5 + $0x410] sm:$0xf0]  ;;  %v3498_v13 = vld [vmem:[%s5136_s5] sm:$0xf]  ;;  %v4654_v14 = vld [vmem:[%s5136_s5 + $0x20] sm:$0xf0]  ;;  %v3751_v17 = vor.u32 %v4717_v9, %v3750_v8 }
  0x15   : > { %2140 = vmatpush.bf16.msra.mxu0 %v4871_v2  ;;  %4946 = vmatpush.bf16.msra.mxu3 %v4871_v2  ;;  %v4003_v18 = vor.u32 %v4780_v11, %v4002_v10  ;;  %v3499_v19 = vor.u32 %v4654_v14, %v3498_v13  ;;  %v4254_v23 = vld [vmem:[%s5136_s5 + $0x5e8] sm:$0xf]  ;;  %v4843_v24 = vld [vmem:[%s5136_s5 + $0x608] sm:$0xf0]  ;;  %v3786_v31 = vld [vmem:[%s5136_s5 + $0x240] sm:$0xf] }
  0x16   : > { %v4255_v26 = vor.u32 %v4843_v24, %v4254_v23  ;;  %v4726_v32 = vld [vmem:[%s5136_s5 + $0x260] sm:$0xf0]  ;;  %v4038_v33 = vld [vmem:[%s5136_s5 + $0x438] sm:$0xf]  ;;  %v4789_v34 = vld [vmem:[%s5136_s5 + $0x458] sm:$0xf0] }
  0x17   : > { %v3534_v35 = vld [vmem:[%s5136_s5 + $0x48] sm:$0xf]  ;;  %v4663_v36 = vld [vmem:[%s5136_s5 + $0x68] sm:$0xf0]  ;;  %v3787_v37 = vor.u32 %v4726_v32, %v3786_v31  ;;  %v4039_v38 = vor.u32 %v4789_v34, %v4038_v33  ;;  %v4290_v43 = vld [vmem:[%s5136_s5 + $0x630] sm:$0xf] }
  0x18   : > { %4947 = vmatpush.bf16.msra.mxu1 %v4870_v3  ;;  %4948 = vmatpush.bf16.msra.mxu2 %v4870_v3  ;;  %v3535_v39 = vor.u32 %v4663_v36, %v3534_v35  ;;  %v4852_v44 = vld [vmem:[%s5136_s5 + $0x650] sm:$0xf0]  ;;  %v4877_v47 = vld [vmem:[%s6447_s1 + $0x58] sm:$0xff]  ;;  %v3822_v48 = vld [vmem:[%s5136_s5 + $0x288] sm:$0xf] }
  0x19   : > { %2141 = vmatpush.bf16.msra.mxu0 %v4870_v3  ;;  %4949 = vmatpush.bf16.msra.mxu3 %v4870_v3  ;;  %v4291_v45 = vor.u32 %v4852_v44, %v4290_v43  ;;  %v4735_v49 = vld [vmem:[%s5136_s5 + $0x2a8] sm:$0xf0]  ;;  %v4074_v50 = vld [vmem:[%s5136_s5 + $0x480] sm:$0xf]  ;;  %v4798_v51 = vld [vmem:[%s5136_s5 + $0x4a0] sm:$0xf0] }
  0x1a   : > { %v3570_v52 = vld [vmem:[%s5136_s5 + $0x90] sm:$0xf]  ;;  %v4672_v53 = vld [vmem:[%s5136_s5 + $0xb0] sm:$0xf0]  ;;  %v3823_v54 = vor.u32 %v4735_v49, %v3822_v48  ;;  %v4075_v55 = vor.u32 %v4798_v51, %v4074_v50  ;;  %v4901_v58 = vld [vmem:[%s6447_s1 + $0x118] sm:$0xff] }
  0x1b   : > { %v3571_v56 = vor.u32 %v4672_v53, %v3570_v52  ;;  %v4884_v59 = vld [vmem:[%s6447_s1 + $0x90] sm:$0xff]  ;;  %v4326_v60 = vld [vmem:[%s5136_s5 + $0x678] sm:$0xf]  ;;  %v4861_v61 = vld [vmem:[%s5136_s5 + $0x698] sm:$0xf0] }
  0x1c   : > { %4950 = vmatpush.bf16.msra.mxu1 %v4869_v4  ;;  %4951 = vmatpush.bf16.msra.mxu2 %v4869_v4  ;;  %v4876_v62 = vld [vmem:[%s6447_s1 + $0x50] sm:$0xff]  ;;  %v4327_v63 = vor.u32 %v4861_v61, %v4326_v60  ;;  %v4894_v0 = vld [vmem:[%s6447_s1 + $0xe0] sm:$0xff]  ;;  %v4110_v3 = vld [vmem:[%s5136_s5 + $0x4c8] sm:$0xf] }
  0x1d   : > { %2142 = vmatpush.bf16.msra.mxu0 %v4869_v4  ;;  %4952 = vmatpush.bf16.msra.mxu3 %v4869_v4  ;;  %v3858_v1 = vld [vmem:[%s5136_s5 + $0x2d0] sm:$0xf]  ;;  %v4744_v2 = vld [vmem:[%s5136_s5 + $0x2f0] sm:$0xf0]  ;;  %v4807_v4 = vld [vmem:[%s5136_s5 + $0x4e8] sm:$0xf0] }
  0x1e   : > { %v4111_v8 = vor.u32 %v4807_v4, %v4110_v3  ;;  %v4900_v10 = vld [vmem:[%s6447_s1 + $0x110] sm:$0xff]  ;;  %v4893_v11 = vld [vmem:[%s6447_s1 + $0xd8] sm:$0xff]  ;;  %v4875_v13 = vld [vmem:[%s6447_s1 + $0x48] sm:$0xff] }
  0x1f   : > { %v417_v14 = vld [vmem:[%s5136_s5 + $0x6c0] sm:$0xff]  ;;  %v4651_v32 = vld [vmem:[%s5136_s5 + $0xc] sm:$0xf]  ;;  %v3508_v33 = vld [vmem:[%s5136_s5 + $0x2c] sm:$0xf0] }
  0x20   : > { %4953 = vmatpush.bf16.msra.mxu1 %v4868_v5  ;;  %4954 = vmatpush.bf16.msra.mxu2 %v4868_v5  ;;  %v3642_v23 = vld [vmem:[%s5136_s5 + $0x120] sm:$0xf]  ;;  %v4690_v24 = vld [vmem:[%s5136_s5 + $0x140] sm:$0xf0]  ;;  %v3511_v35 = vor.u32 %v4651_v32, %v3508_v33  ;;  %v4937_v48 = vld [vmem:[%s6447_s1 + $0x238] sm:$0xff] }
  0x21   : > { %2143 = vmatpush.bf16.msra.mxu0 %v4868_v5  ;;  %4955 = vmatpush.bf16.msra.mxu3 %v4868_v5  ;;  %v3606_v5 = vld [vmem:[%s5136_s5 + $0xd8] sm:$0xf]  ;;  %v4890_v31 = vld [vmem:[%s6447_s1 + $0xc0] sm:$0xff]  ;;  %v4660_v49 = vld [vmem:[%s5136_s5 + $0x54] sm:$0xf] }
  0x22   : > { %v4898_v34 = vld [vmem:[%s6447_s1 + $0x100] sm:$0xff]  ;;  %v3544_v50 = vld [vmem:[%s5136_s5 + $0x74] sm:$0xf0]  ;;  %v3966_v52 = vld [vmem:[%s5136_s5 + $0x3a8] sm:$0xf] }
  0x23   : > { %v3930_v36 = vld [vmem:[%s5136_s5 + $0x360] sm:$0xf]  ;;  %v3547_v51 = vor.u32 %v4660_v49, %v3544_v50  ;;  %v4771_v53 = vld [vmem:[%s5136_s5 + $0x3c8] sm:$0xf0]  ;;  %v4669_v61 = vld [vmem:[%s5136_s5 + $0x9c] sm:$0xf] }
  0x24   : > { %4956 = vmatpush.bf16.msra.mxu1 %v4867_v6  ;;  %4957 = vmatpush.bf16.msra.mxu2 %v4867_v6  ;;  %v4655_v3 = vld [vmem:[%s5136_s5 + $0x28] sm:$0xf0]  ;;  %v3514_v4 = vld [vmem:[%s5136_s5 + $0x10] sm:$0xf]  ;;  %v3572_v33 = vld [vmem:[%s5136_s5 + $0xb4] sm:$0xf0] }
  0x25   : > { %2144 = vmatpush.bf16.msra.mxu0 %v4867_v6  ;;  %4958 = vmatpush.bf16.msra.mxu3 %v4867_v6  ;;  %v4681_v6 = vld [vmem:[%s5136_s5 + $0xf8] sm:$0xf0]  ;;  %v4696_v50 = vld [vmem:[%s5136_s5 + $0x174] sm:$0xf] }
  0x26   : > { %v3607_v9 = vor.u32 %v4681_v6, %v3606_v5  ;;  %v4656_v5 = vld [vmem:[%s5136_s5 + $0x30] sm:$0xf0] }
  0x28   : > { %4959 = vmatpush.bf16.msra.mxu1 %v4866_v7  ;;  %4960 = vmatpush.bf16.msra.mxu2 %v4866_v7 }
  0x29   : > { %2145 = vmatpush.bf16.msra.mxu0 %v4866_v7  ;;  %4961 = vmatpush.bf16.msra.mxu3 %v4866_v7  ;;  %v3859_v7 = vor.u32 %v4744_v2, %v3858_v1  ;;  %v3500_v1 = vld [vmem:[%s5136_s5 + $0x24] sm:$0xf0] }
  0x2a   : > { %v3506_v2 = vld [vmem:[%s5136_s5 + $0x8] sm:$0xf] }
  0x2b   : > { %2181 = vmatmul.bf16.vlgmr.msra.gmra.mxu1 %v3751_v17  ;;  %2216 = vmatmul.bf16.vlgmr.msra.gmra.mxu2 %v4003_v18  ;;  %v4892_v17 = vld [vmem:[%s6447_s1 + $0xd0] sm:$0xff] }
  0x2c   : > { %2404 = vmatpush.bf16.msrb.mxu2 %v4889_v12  ;;  %2271 = vmatpush.bf16.msrb.mxu1 %v4881_v15  ;;  %v4883_v12 = vld [vmem:[%s6447_s1 + $0x88] sm:$0xff] }
  0x2d   : > { %2670 = vmatpush.bf16.msrb.mxu0 %v4905_v16  ;;  %2251 = vmatmul.bf16.vlgmr.msra.gmra.mxu3 %v4255_v26  ;;  %v4899_v15 = vld [vmem:[%s6447_s1 + $0x108] sm:$0xff]  ;;  %v1247_v16 = vunpack.c.l.b16 %v417_v14  ;;  %v3542_v14 = vld [vmem:[%s5136_s5 + $0x50] sm:$0xf] }
  0x2e   : > { %2146 = vmatmul.bf16.vlgmr.msra.gmra.mxu0 %v3499_v19  ;;  %2537 = vmatpush.bf16.msrb.mxu3 %v4897_v40  ;;  %v3894_v19 = vld [vmem:[%s5136_s5 + $0x318] sm:$0xf]  ;;  %v3678_v40 = vld [vmem:[%s5136_s5 + $0x168] sm:$0xf] }
  0x2f   : > { %v1472_v18 = vpack.c.b16 %v1247_v16, %v1247_v16  ;;  %v3550_v16 = vld [vmem:[%s5136_s5 + $0x58] sm:$0xf] }
  0x30   : > { %2405 = vmatpush.bf16.msrb.mxu2 %v4888_v20  ;;  %2272 = vmatpush.bf16.msrb.mxu1 %v4880_v21  ;;  %v4753_v20 = vld [vmem:[%s5136_s5 + $0x338] sm:$0xf0]  ;;  %v4146_v21 = vld [vmem:[%s5136_s5 + $0x510] sm:$0xf] }
  0x31   : > { %2671 = vmatpush.bf16.msrb.mxu0 %v4904_v22  ;;  %v4816_v22 = vld [vmem:[%s5136_s5 + $0x530] sm:$0xf0] }
  0x32   : > { %2538 = vmatpush.bf16.msrb.mxu3 %v4896_v46  ;;  %v4147_v26 = vor.u32 %v4816_v22, %v4146_v21  ;;  %v4929_v46 = vld [vmem:[%s6447_s1 + $0x1f8] sm:$0xff] }
  0x34   : > { %2406 = vmatpush.bf16.msrb.mxu2 %v4887_v25  ;;  %2273 = vmatpush.bf16.msrb.mxu1 %v4879_v27  ;;  %v3895_v25 = vor.u32 %v4753_v20, %v3894_v19  ;;  %v3643_v27 = vor.u32 %v4690_v24, %v3642_v23  ;;  %v4920_v23 = vld [vmem:[%s6447_s1 + $0x1b0] sm:$0xff] }
  0x35   : > { %2672 = vmatpush.bf16.msrb.mxu0 %v4903_v28  ;;  %v4882_v28 = vld [vmem:[%s6447_s1 + $0x80] sm:$0xff] }
  0x36   : > { %2539 = vmatpush.bf16.msrb.mxu3 %v4895_v57  ;;  %v4708_v57 = vld [vmem:[%s5136_s5 + $0x1d0] sm:$0xf0] }
  0x38   : > { %2407 = vmatpush.bf16.msrb.mxu2 %v4886_v29  ;;  %2274 = vmatpush.bf16.msrb.mxu1 %v4878_v30  ;;  %v4891_v29 = vld [vmem:[%s6447_s1 + $0xc8] sm:$0xff]  ;;  %v4874_v30 = vld [vmem:[%s6447_s1 + $0x40] sm:$0xff] }
  0x39   : > { %2673 = vmatpush.bf16.msrb.mxu0 %v4902_v41  ;;  %v4699_v41 = vld [vmem:[%s5136_s5 + $0x188] sm:$0xf0] }
  0x3a   : > { %2540 = vmatpush.bf16.msrb.mxu3 %v4894_v0  ;;  %v3679_v44 = vor.u32 %v4699_v41, %v3678_v40  ;;  %v4936_v41 = vld [vmem:[%s6447_s1 + $0x230] sm:$0xff] }
  0x3b   : > { %2186 = vmatmul.bf16.gmra.mxu1 %v3787_v37  ;;  %2221 = vmatmul.bf16.gmra.mxu2 %v4039_v38  ;;  %v4762_v37 = vld [vmem:[%s5136_s5 + $0x380] sm:$0xf0]  ;;  %v4182_v38 = vld [vmem:[%s5136_s5 + $0x558] sm:$0xf] }
  0x3c   : > { %2408 = vmatpush.bf16.msrb.mxu2 %v4885_v42  ;;  %2275 = vmatpush.bf16.msrb.mxu1 %v4877_v47  ;;  %v3931_v42 = vor.u32 %v4762_v37, %v3930_v36  ;;  %v4913_v47 = vld [vmem:[%s6447_s1 + $0x178] sm:$0xff]  ;;  %v3586_v36 = vld [vmem:[%s5136_s5 + $0xa0] sm:$0xf]  ;;  %v4674_v37 = vld [vmem:[%s5136_s5 + $0xc0] sm:$0xf0] }
  0x3d   : > { %2256 = vmatmul.bf16.gmra.mxu3 %v4291_v45  ;;  %2674 = vmatpush.bf16.msrb.mxu0 %v4901_v58  ;;  %v4921_v45 = vld [vmem:[%s6447_s1 + $0x1b8] sm:$0xff]  ;;  %v3967_v58 = vor.u32 %v4771_v53, %v3966_v52 }
  0x3e   : > { %2151 = vmatmul.bf16.gmra.mxu0 %v3535_v39  ;;  %2541 = vmatpush.bf16.msrb.mxu3 %v4893_v11  ;;  %v4825_v39 = vld [vmem:[%s5136_s5 + $0x578] sm:$0xf0]  ;;  %v4659_v11 = vld [vmem:[%s5136_s5 + $0x4c] sm:$0xf] }
  0x3f   : > { %v4183_v43 = vor.u32 %v4825_v39, %v4182_v38  ;;  %v4677_v52 = vld [vmem:[%s5136_s5 + $0xdc] sm:$0xf] }
  0x40   : > { %2409 = vmatpush.bf16.msrb.mxu2 %v4884_v59  ;;  %2276 = vmatpush.bf16.msrb.mxu1 %v4876_v62  ;;  %v3580_v62 = vld [vmem:[%s5136_s5 + $0xbc] sm:$0xf0] }
  0x41   : > { %2675 = vmatpush.bf16.msrb.mxu0 %v4900_v10  ;;  %v3583_v0 = vor.u32 %v4669_v61, %v3580_v62  ;;  %v3616_v10 = vld [vmem:[%s5136_s5 + $0x104] sm:$0xf0] }
  0x42   : > { %2542 = vmatpush.bf16.msrb.mxu3 %v4892_v17  ;;  %v4665_v17 = vld [vmem:[%s5136_s5 + $0x78] sm:$0xf0] }
  0x43   : > { %v3551_v21 = vor.u32 %v4665_v17, %v3550_v16 }
  0x44   : > { %2410 = vmatpush.bf16.msrb.mxu2 %v4883_v12  ;;  %2277 = vmatpush.bf16.msrb.mxu1 %v4875_v13  ;;  %v3536_v13 = vld [vmem:[%s5136_s5 + $0x6c] sm:$0xf0] }
  0x45   : > { %2676 = vmatpush.bf16.msrb.mxu0 %v4899_v15  ;;  %v4664_v15 = vld [vmem:[%s5136_s5 + $0x70] sm:$0xf0] }
  0x46   : > { %2543 = vmatpush.bf16.msrb.mxu3 %v4891_v29  ;;  %v3543_v19 = vor.u32 %v4664_v15, %v3542_v14  ;;  %v4687_v29 = vld [vmem:[%s5136_s5 + $0x12c] sm:$0xf]  ;;  %v4692_v14 = vld [vmem:[%s5136_s5 + $0x150] sm:$0xf0] }
  0x48   : > { %2411 = vmatpush.bf16.msrb.mxu2 %v4882_v28  ;;  %2278 = vmatpush.bf16.msrb.mxu1 %v4874_v30  ;;  %v4912_v28 = vld [vmem:[%s6447_s1 + $0x170] sm:$0xff] }
  0x49   : > { %2677 = vmatpush.bf16.msrb.mxu0 %v4898_v34  ;;  %v3652_v30 = vld [vmem:[%s5136_s5 + $0x14c] sm:$0xf0]  ;;  %v3578_v34 = vld [vmem:[%s5136_s5 + $0x98] sm:$0xf] }
  0x4a   : > { %2544 = vmatpush.bf16.msrb.mxu3 %v4890_v31  ;;  %v4668_v31 = vld [vmem:[%s5136_s5 + $0x94] sm:$0xf]  ;;  %v3655_v32 = vor.u32 %v4687_v29, %v3652_v30 }
  0x4b   : > { %2191 = vmatmul.bf16.gmra.mxu1 %v3823_v54  ;;  %2226 = vmatmul.bf16.gmra.mxu2 %v4075_v55  ;;  %v4218_v54 = vld [vmem:[%s5136_s5 + $0x5a0] sm:$0xf]  ;;  %v4834_v55 = vld [vmem:[%s5136_s5 + $0x5c0] sm:$0xf0]  ;;  %v3575_v39 = vor.u32 %v4668_v31, %v3572_v33  ;;  %v4911_v33 = vld [vmem:[%s6447_s1 + $0x168] sm:$0xff] }
  0x4c   : > { %2936 = vmatpush.bf16.msra.mxu2 %v4921_v45  ;;  %2803 = vmatpush.bf16.msra.mxu1 %v4913_v47  ;;  %v4219_v59 = vor.u32 %v4834_v55, %v4218_v54  ;;  %v3608_v54 = vld [vmem:[%s5136_s5 + $0xfc] sm:$0xf0] }
  0x4d   : > { %2261 = vmatmul.bf16.gmra.mxu3 %v4327_v63  ;;  %3202 = vmatpush.bf16.msra.mxu0 %v4937_v48  ;;  %v4650_v63 = vld [vmem:[%s5136_s5 + $0x4] sm:$0xf]  ;;  %v3614_v55 = vld [vmem:[%s5136_s5 + $0xe0] sm:$0xf] }
  0x4e   : > { %2156 = vmatmul.bf16.gmra.mxu0 %v3571_v56  ;;  %3069 = vmatpush.bf16.msra.mxu3 %v4929_v46  ;;  %v3714_v56 = vld [vmem:[%s5136_s5 + $0x1b0] sm:$0xf]  ;;  %v3503_v6 = vor.u32 %v4650_v63, %v3500_v1 }
  0x4f   : > { %v3715_v60 = vor.u32 %v4708_v57, %v3714_v56  ;;  %v4682_v56 = vld [vmem:[%s5136_s5 + $0x100] sm:$0xf0]  ;;  %v3622_v57 = vld [vmem:[%s5136_s5 + $0xe8] sm:$0xf] }
  0x50   : > { %2937 = vmatpush.bf16.msra.mxu2 %v4920_v23  ;;  %2804 = vmatpush.bf16.msra.mxu1 %v4912_v28  ;;  %v3615_v61 = vor.u32 %v4682_v56, %v3614_v55  ;;  %v4919_v28 = vld [vmem:[%s6447_s1 + $0x1a8] sm:$0xff] }
  0x51   : > { %3203 = vmatpush.bf16.msra.mxu0 %v4936_v41  ;;  %v4700_v41 = vld [vmem:[%s5136_s5 + $0x190] sm:$0xf0] }
  0x54   : > { %2938 = vmatpush.bf16.msra.mxu2 %v4919_v28  ;;  %2805 = vmatpush.bf16.msra.mxu1 %v4911_v33 }
  0x5b   : > { %2196 = vmatmul.bf16.gmra.mxu1 %v3859_v7  ;;  %2231 = vmatmul.bf16.gmra.mxu2 %v4111_v8  ;;  %v3507_v7 = vor.u32 %v4655_v3, %v3506_v2  ;;  %v3515_v8 = vor.u32 %v4656_v5, %v3514_v4 }
  0x5d   : > { %2266 = vmatmul.bf16.gmra.mxu3 %v1472_v18  ;;  %v3539_v18 = vor.u32 %v4659_v11, %v3536_v13  ;;  %v3650_v11 = vld [vmem:[%s5136_s5 + $0x128] sm:$0xf]  ;;  %v3658_v13 = vld [vmem:[%s5136_s5 + $0x130] sm:$0xf] }
  0x5e   : > { %2161 = vmatmul.bf16.gmra.mxu0 %v3607_v9  ;;  %v4678_v9 = vld [vmem:[%s5136_s5 + $0xe4] sm:$0xf] }
  0x5f   : > { %v3619_v12 = vor.u32 %v4678_v9, %v3616_v10  ;;  %v3644_v10 = vld [vmem:[%s5136_s5 + $0x144] sm:$0xf0] }
  0x6b   : > { %2201 = vmatmul.bf16.gmra.mxu1 %v3895_v25  ;;  %2236 = vmatmul.bf16.gmra.mxu2 %v4147_v26  ;;  %v4928_v25 = vld [vmem:[%s6447_s1 + $0x1f0] sm:$0xff] }
  0x6c   : > { %3070 = vmatpush.bf16.msra.mxu3 %v4928_v25 }
  0x6d   : > { %2545 = vmatmul.bf16.vlgmr.msrb.gmra.mxu3 %v3511_v35  ;;  %v4673_v35 = vld [vmem:[%s5136_s5 + $0xb8] sm:$0xf0] }
  0x6e   : > { %2166 = vmatmul.bf16.gmra.mxu0 %v3643_v27  ;;  %v3579_v40 = vor.u32 %v4673_v35, %v3578_v34  ;;  %v4714_v34 = vld [vmem:[%s5136_s5 + $0x204] sm:$0xf]  ;;  %v3760_v35 = vld [vmem:[%s5136_s5 + $0x224] sm:$0xf0] }
  0x7b   : > { %2206 = vmatmul.bf16.gmra.mxu1 %v3931_v42  ;;  %2241 = vmatmul.bf16.gmra.mxu2 %v4183_v43  ;;  %v3587_v43 = vor.u32 %v4674_v37, %v3586_v36  ;;  %v4695_v36 = vld [vmem:[%s5136_s5 + $0x16c] sm:$0xf]  ;;  %v3763_v37 = vor.u32 %v4714_v34, %v3760_v35 }
  0x7d   : > { %2550 = vmatmul.bf16.gmra.mxu3 %v3547_v51  ;;  %v3688_v51 = vld [vmem:[%s5136_s5 + $0x194] sm:$0xf0] }
  0x7e   : > { %2171 = vmatmul.bf16.gmra.mxu0 %v3679_v44  ;;  %v3691_v53 = vor.u32 %v4696_v50, %v3688_v51  ;;  %v4701_v50 = vld [vmem:[%s5136_s5 + $0x198] sm:$0xf0] }
  0x8b   : > { %2211 = vmatmul.bf16.gmra.mxu1 %v3967_v58  ;;  %2246 = vmatmul.bf16.gmra.mxu2 %v4219_v59  ;;  %v4683_v58 = vld [vmem:[%s5136_s5 + $0x108] sm:$0xf0] }
  0x8c   : > { %v3623_v63 = vor.u32 %v4683_v58, %v3622_v57  ;;  %v4935_v58 = vld [vmem:[%s6447_s1 + $0x228] sm:$0xff] }
  0x8d   : > { %2555 = vmatmul.bf16.gmra.mxu3 %v3583_v0  ;;  %3204 = vmatpush.bf16.msra.mxu0 %v4935_v58  ;;  %v4718_v58 = vld [vmem:[%s5136_s5 + $0x220] sm:$0xf0] }
  0x8e   : > { %2176 = vmatmul.bf16.gmra.mxu0 %v3715_v60  ;;  %v3611_v60 = vor.u32 %v4677_v52, %v3608_v54 }
  0x9b   : > { %2279 = vmatmul.bf16.vlgmr.msrb.gmra.mxu1 %v3503_v6  ;;  %2412 = vmatmul.bf16.vlgmr.msrb.gmra.mxu2 %v3507_v7  ;;  %v4705_v6 = vld [vmem:[%s5136_s5 + $0x1bc] sm:$0xf]  ;;  %v3724_v7 = vld [vmem:[%s5136_s5 + $0x1dc] sm:$0xf0] }
  0x9c   : > { %v3727_v9 = vor.u32 %v4705_v6, %v3724_v7  ;;  %v4723_v7 = vld [vmem:[%s5136_s5 + $0x24c] sm:$0xf] }
  0x9d   : > { %2560 = vmatmul.bf16.gmra.mxu3 %v3619_v12  ;;  %v4691_v12 = vld [vmem:[%s5136_s5 + $0x148] sm:$0xf0] }
  0x9e   : > { %2678 = vmatmul.bf16.vlgmr.msrb.gmra.mxu0 %v3515_v8  ;;  %v4686_v8 = vld [vmem:[%s5136_s5 + $0x124] sm:$0xf]  ;;  %v3651_v17 = vor.u32 %v4691_v12, %v3650_v11  ;;  %v3716_v11 = vld [vmem:[%s5136_s5 + $0x1d4] sm:$0xf0] }
  0x9f   : > { %v3647_v16 = vor.u32 %v4686_v8, %v3644_v10  ;;  %v3796_v8 = vld [vmem:[%s5136_s5 + $0x26c] sm:$0xf0]  ;;  %v3722_v12 = vld [vmem:[%s5136_s5 + $0x1b8] sm:$0xf] }
  0xa0   : > { %v3799_v10 = vor.u32 %v4723_v7, %v3796_v8  ;;  %v4719_v7 = vld [vmem:[%s5136_s5 + $0x228] sm:$0xf0] }
  0xa8   : > { %v5318_v20 = vpop.f32.mrf.mxu1 }
  0xab   : > { %v5320_v22 = vpop.f32.mrf.mxu0  ;;  %2284 = vmatmul.bf16.gmra.mxu1 %v3539_v18  ;;  %2417 = vmatmul.bf16.gmra.mxu2 %v3543_v19  ;;  %v3659_v19 = vor.u32 %v4692_v14, %v3658_v13  ;;  %v4709_v13 = vld [vmem:[%s5136_s5 + $0x1d8] sm:$0xf0]  ;;  %v3730_v14 = vld [vmem:[%s5136_s5 + $0x1c0] sm:$0xf] }
  0xac   : > { %v3723_v28 = vor.u32 %v4709_v13, %v3722_v12 }
  0xad   : > { %2565 = vmatmul.bf16.gmra.mxu3 %v3655_v32  ;;  %v4927_v32 = vld [vmem:[%s6447_s1 + $0x1e8] sm:$0xff] }
  0xae   : > { %2683 = vmatmul.bf16.gmra.mxu0 %v3551_v21  ;;  %v5325_v24 = vpop.f32.mrf.mxu2  ;;  %3071 = vmatpush.bf16.msra.mxu3 %v4927_v32 }
  0xb0   : > { %v5330_v26 = vpop.f32.mrf.mxu1  ;;  %v5352_v44 = vpop.f32.mrf.mxu3 }
  0xb1   : > { %6450 = vst [vmem:[#allocation2_spill] sm:$0xff] %v5352_v44  ;;  %v3830_v44 = vld [vmem:[%s5136_s5 + $0x290] sm:$0xf] }
  0xb3   : > { %v5332_v27 = vpop.f32.mrf.mxu0 }
  0xb6   : > { %v5345_v38 = vpop.f32.mrf.mxu2 }
  0xb8   : > { %v5350_v42 = vpop.f32.mrf.mxu1  ;;  %v5360_v48 = vpop.f32.mrf.mxu3 }
  0xb9   : > { %6451 = vst [vmem:[#allocation3_spill] sm:$0xff] %v5360_v48  ;;  %v3824_v48 = vld [vmem:[%s5136_s5 + $0x2ac] sm:$0xf0] }
  0xbb   : > { %v5354_v45 = vpop.f32.mrf.mxu0  ;;  %2289 = vmatmul.bf16.gmra.mxu1 %v3575_v39  ;;  %2422 = vmatmul.bf16.gmra.mxu2 %v3579_v40  ;;  %v3680_v39 = vld [vmem:[%s5136_s5 + $0x18c] sm:$0xf0] }
  0xbc   : > { %v3686_v40 = vld [vmem:[%s5136_s5 + $0x170] sm:$0xf]  ;;  %v3683_v52 = vor.u32 %v4695_v36, %v3680_v39 }
  0xbd   : > { %2570 = vmatmul.bf16.gmra.mxu3 %v3691_v53  ;;  %v3687_v53 = vor.u32 %v4700_v41, %v3686_v40  ;;  %v4732_v41 = vld [vmem:[%s5136_s5 + $0x294] sm:$0xf] }
  0xbe   : > { %2688 = vmatmul.bf16.gmra.mxu0 %v3587_v43  ;;  %v5356_v46 = vpop.f32.mrf.mxu2  ;;  %v3694_v43 = vld [vmem:[%s5136_s5 + $0x178] sm:$0xf] }
  0xbf   : > { %v3695_v55 = vor.u32 %v4701_v50, %v3694_v43  ;;  %v3832_v43 = vld [vmem:[%s5136_s5 + $0x2b4] sm:$0xf0] }
  0xc0   : > { %v5358_v47 = vpop.f32.mrf.mxu1  ;;  %v5376_v0 = vpop.f32.mrf.mxu3  ;;  %v3835_v50 = vor.u32 %v4732_v41, %v3832_v43  ;;  %v4918_v41 = vld [vmem:[%s6447_s1 + $0x1a0] sm:$0xff] }
  0xc1   : > { %6452 = vst [vmem:[#allocation4_spill] sm:$0xff] %v5376_v0  ;;  %v4926_v43 = vld [vmem:[%s6447_s1 + $0x1e0] sm:$0xff]  ;;  %2939 = vmatpush.bf16.msra.mxu2 %v4918_v41 }
  0xc2   : > { %3072 = vmatpush.bf16.msra.mxu3 %v4926_v43 }
  0xc3   : > { %v5362_v49 = vpop.f32.mrf.mxu0 }
  0xc6   : > { %v5372_v59 = vpop.f32.mrf.mxu2 }
  0xc8   : > { %v5374_v62 = vpop.f32.mrf.mxu1  ;;  %v5384_v4 = vpop.f32.mrf.mxu3 }
  0xc9   : > { %6453 = vst [vmem:[#allocation5_spill] sm:$0xff] %v5384_v4 }
  0xcb   : > { %v5378_v1 = vpop.f32.mrf.mxu0  ;;  %2294 = vmatmul.bf16.gmra.mxu1 %v3611_v60  ;;  %2427 = vmatmul.bf16.gmra.mxu2 %v3615_v61 }
  0xcd   : > { %2575 = vmatmul.bf16.gmra.mxu3 %v3727_v9  ;;  %v4704_v9 = vld [vmem:[%s5136_s5 + $0x1b4] sm:$0xf] }
  0xce   : > { %2693 = vmatmul.bf16.gmra.mxu0 %v3623_v63  ;;  %v5380_v2 = vpop.f32.mrf.mxu2 }
  0xd0   : > { %v5382_v3 = vpop.f32.mrf.mxu1  ;;  %v5400_v21 = vpop.f32.mrf.mxu3 }
  0xd1   : > { %6454 = vst [vmem:[#allocation6_spill] sm:$0xff] %v5400_v21 }
  0xd3   : > { %v5386_v5 = vpop.f32.mrf.mxu0 }
  0xd6   : > { %v5396_v15 = vpop.f32.mrf.mxu2 }
  0xd8   : > { %v5398_v18 = vpop.f32.mrf.mxu1  ;;  %v5411_v30 = vpop.f32.mrf.mxu3 }
  0xd9   : > { %6455 = vst [vmem:[#allocation7_spill] sm:$0xff] %v5411_v30 }
  0xdb   : > { %v5402_v23 = vpop.f32.mrf.mxu0  ;;  %2299 = vmatmul.bf16.gmra.mxu1 %v3647_v16  ;;  %2432 = vmatmul.bf16.gmra.mxu2 %v3651_v17  ;;  %v4710_v16 = vld [vmem:[%s5136_s5 + $0x1e0] sm:$0xf0] }
  0xdc   : > { %v3731_v33 = vor.u32 %v4710_v16, %v3730_v14 }
  0xdd   : > { %2580 = vmatmul.bf16.gmra.mxu3 %v3763_v37 }
  0xde   : > { %2698 = vmatmul.bf16.gmra.mxu0 %v3659_v19  ;;  %v5404_v25 = vpop.f32.mrf.mxu2  ;;  %v3719_v19 = vor.u32 %v4704_v9, %v3716_v11 }
  0xe0   : > { %v5409_v29 = vpop.f32.mrf.mxu1  ;;  %v5433_v56 = vpop.f32.mrf.mxu3 }
  0xe1   : > { %6456 = vst [vmem:[#allocation8_spill] sm:$0xff] %v5433_v56  ;;  %v4728_v56 = vld [vmem:[%s5136_s5 + $0x270] sm:$0xf0] }
  0xe3   : > { %v5413_v31 = vpop.f32.mrf.mxu0 }
  0xe6   : > { %v5429_v51 = vpop.f32.mrf.mxu2 }
  0xe8   : > { %v5431_v54 = vpop.f32.mrf.mxu1  ;;  %v2269_v63 = vpop.f32.mrf.mxu3 }
  0xe9   : > { %v3766_v63 = vld [vmem:[%s5136_s5 + $0x208] sm:$0xf] }
  0xea   : > { %v3767_v12 = vor.u32 %v4719_v7, %v3766_v63  ;;  %v3788_v63 = vld [vmem:[%s5136_s5 + $0x264] sm:$0xf0] }
  0xeb   : > { %v5435_v57 = vpop.f32.mrf.mxu0  ;;  %2304 = vmatmul.bf16.gmra.mxu1 %v3683_v52  ;;  %2437 = vmatmul.bf16.gmra.mxu2 %v3687_v53  ;;  %v4713_v52 = vld [vmem:[%s5136_s5 + $0x1fc] sm:$0xf]  ;;  %v3752_v53 = vld [vmem:[%s5136_s5 + $0x21c] sm:$0xf0]  ;;  %v3794_v7 = vld [vmem:[%s5136_s5 + $0x248] sm:$0xf] }
  0xec   : > { %v3755_v9 = vor.u32 %v4713_v52, %v3752_v53  ;;  %v3868_v52 = vld [vmem:[%s5136_s5 + $0x2fc] sm:$0xf0] }
  0xed   : > { %2585 = vmatmul.bf16.gmra.mxu3 %v3799_v10  ;;  %v4910_v53 = vld [vmem:[%s6447_s1 + $0x160] sm:$0xff] }
  0xee   : > { %2703 = vmatmul.bf16.gmra.mxu0 %v3695_v55  ;;  %v5440_v60 = vpop.f32.mrf.mxu2  ;;  %v3758_v55 = vld [vmem:[%s5136_s5 + $0x200] sm:$0xf]  ;;  %2806 = vmatpush.bf16.msra.mxu1 %v4910_v53 }
  0xef   : > { %v3759_v10 = vor.u32 %v4718_v58, %v3758_v55  ;;  %v4722_v55 = vld [vmem:[%s5136_s5 + $0x244] sm:$0xf] }
  0xf0   : > { %v5442_v61 = vpop.f32.mrf.mxu1  ;;  %v5458_v34 = vpop.f32.mrf.mxu3  ;;  %v3791_v41 = vor.u32 %v4722_v55, %v3788_v63 }
  0xf3   : > { %v5444_v6 = vpop.f32.mrf.mxu0 }
  0xf6   : > { %v5454_v17 = vpop.f32.mrf.mxu2 }
  0xf8   : > { %v5456_v32 = vpop.f32.mrf.mxu1  ;;  %v5466_v39 = vpop.f32.mrf.mxu3 }
  0xfb   : > { %v5460_v35 = vpop.f32.mrf.mxu0  ;;  %2309 = vmatmul.bf16.gmra.mxu1 %v3719_v19  ;;  %2442 = vmatmul.bf16.gmra.mxu2 %v3723_v28 }
  0xfd   : > { %2590 = vmatmul.bf16.gmra.mxu3 %v3835_v50  ;;  %v4741_v50 = vld [vmem:[%s5136_s5 + $0x2dc] sm:$0xf] }
  0xfe   : > { %2708 = vmatmul.bf16.gmra.mxu0 %v3731_v33  ;;  %v5462_v36 = vpop.f32.mrf.mxu2  ;;  %v3871_v58 = vor.u32 %v4741_v50, %v3868_v52 }
  0xff   : > { %6457 = vst [vmem:[#allocation9_spill] sm:$0xff] %v5462_v36 }
 0x100   : > { %v5464_v37 = vpop.f32.mrf.mxu1  ;;  %v5482_v13 = vpop.f32.mrf.mxu3 }
 0x103   : > { %v5468_v40 = vpop.f32.mrf.mxu0 }
 0x106   : > { %v5478_v8 = vpop.f32.mrf.mxu2 }
 0x107   : > { %6458 = vst [vmem:[#allocation10_spill] sm:$0xff] %v5478_v8 }
 0x108   : > { %v5480_v11 = vpop.f32.mrf.mxu1  ;;  %v5490_v28 = vpop.f32.mrf.mxu3 }
 0x10b   : > { %v5484_v14 = vpop.f32.mrf.mxu0  ;;  %2314 = vmatmul.bf16.gmra.mxu1 %v3755_v9  ;;  %2447 = vmatmul.bf16.gmra.mxu2 %v3759_v10  ;;  %v4727_v9 = vld [vmem:[%s5136_s5 + $0x268] sm:$0xf0]  ;;  %v5512_v10 = vld [vmem:[%s6448_s2] ss:$0 sm:$0xff] }
 0x10c   : > { %v2148_v21 = vadd.f32 %v5512_v10, %v5320_v22  ;;  %v3795_v43 = vor.u32 %v4727_v9, %v3794_v7 }
 0x10d   : > { %2595 = vmatmul.bf16.gmra.mxu3 %v3871_v58  ;;  %v4934_v58 = vld [vmem:[%s6447_s1 + $0x220] sm:$0xff] }
 0x10e   : > { %2713 = vmatmul.bf16.gmra.mxu0 %v3767_v12  ;;  %v5486_v16 = vpop.f32.mrf.mxu2  ;;  %v3802_v12 = vld [vmem:[%s5136_s5 + $0x250] sm:$0xf] }
 0x10f   : > { %6459 = vst [vmem:[#allocation11_spill] sm:$0xff] %v5486_v16  ;;  %v3803_v52 = vor.u32 %v4728_v56, %v3802_v12  ;;  %3205 = vmatpush.bf16.msra.mxu0 %v4934_v58  ;;  %v2150_v56 = vadd.f32 %v5512_v10, %v5332_v27  ;;  %v3838_v16 = vld [vmem:[%s5136_s5 + $0x298] sm:$0xf]  ;;  %v4737_v27 = vld [vmem:[%s5136_s5 + $0x2b8] sm:$0xf0] }
 0x110   : > { %v5488_v19 = vpop.f32.mrf.mxu1  ;;  %v5520_v4 = vpop.f32.mrf.mxu3 }
 0x113   : > { %v5492_v33 = vpop.f32.mrf.mxu0 }
 0x116   : > { %v5516_v30 = vpop.f32.mrf.mxu2 }
 0x117   : > { %6460 = vst [vmem:[#allocation12_spill] sm:$0xff] %v5516_v30  ;;  %v4736_v30 = vld [vmem:[%s5136_s5 + $0x2b0] sm:$0xf0] }
 0x118   : > { %v2280_v50 = vpop.f32.mrf.mxu1  ;;  %v5527_v63 = vpop.f32.mrf.mxu3 }
 0x119   : > { %v2281_v53 = vadd.f32 %v2280_v50, %v2148_v21 }
 0x11b   : > { %v2679_v0 = vpop.f32.mrf.mxu0  ;;  %2319 = vmatmul.bf16.gmra.mxu1 %v3791_v41  ;;  %2452 = vmatmul.bf16.gmra.mxu2 %v3795_v43  ;;  %v4750_v41 = vld [vmem:[%s5136_s5 + $0x324] sm:$0xf]  ;;  %v3904_v43 = vld [vmem:[%s5136_s5 + $0x344] sm:$0xf0] }
 0x11c   : > { %v3907_v50 = vor.u32 %v4750_v41, %v3904_v43 }
 0x11e   : > { %2718 = vmatmul.bf16.gmra.mxu0 %v3803_v52  ;;  %v2413_v22 = vpop.f32.mrf.mxu2  ;;  %v4731_v52 = vld [vmem:[%s5136_s5 + $0x28c] sm:$0xf]  ;;  %2600 = vmatmul.bf16.gmra.mxu3 %v3907_v50 }
 0x11f   : > { %v2414_v21 = vadd.f32 %v2413_v22, %v2281_v53  ;;  %v2153_v22 = vadd.f32 %v5512_v10, %v5354_v45  ;;  %v2155_v45 = vadd.f32 %v5512_v10, %v5362_v49  ;;  %v4759_v50 = vld [vmem:[%s5136_s5 + $0x36c] sm:$0xf]  ;;  %v4746_v49 = vld [vmem:[%s5136_s5 + $0x300] sm:$0xf0] }
 0x120   : > { %v2282_v55 = vpop.f32.mrf.mxu1  ;;  %v5542_v36 = vpop.f32.mrf.mxu3 }
 0x121   : > { %v2547_v7 = vadd.f32 %v5458_v34, %v2414_v21  ;;  %v2283_v9 = vadd.f32 %v2282_v55, %v2150_v56  ;;  %v3827_v34 = vor.u32 %v4731_v52, %v3824_v48  ;;  %v3831_v56 = vor.u32 %v4736_v30, %v3830_v44 }
 0x122   : > { %v3839_v55 = vor.u32 %v4737_v27, %v3838_v16  ;;  %v4740_v27 = vld [vmem:[%s5136_s5 + $0x2d4] sm:$0xf] }
 0x123   : > { %v2681_v12 = vpop.f32.mrf.mxu0  ;;  %v5533_v58 = vadd.f32 %v2679_v0, %v2547_v7 }
 0x126   : > { %v2415_v53 = vpop.f32.mrf.mxu2 }
 0x127   : > { %v2416_v8 = vadd.f32 %v2415_v53, %v2283_v9 }
 0x128   : > { %v2285_v21 = vpop.f32.mrf.mxu1 }
 0x129   : > { %v2549_v0 = vadd.f32 %v5466_v39, %v2416_v8  ;;  %v2286_v7 = vadd.f32 %v2285_v21, %v2153_v22  ;;  %v5549_v39 = vpop.f32.mrf.mxu3  ;;  %v3860_v22 = vld [vmem:[%s5136_s5 + $0x2f4] sm:$0xf0]  ;;  %v3874_v21 = vld [vmem:[%s5136_s5 + $0x2e0] sm:$0xf] }
 0x12b   : > { %v2684_v41 = vpop.f32.mrf.mxu0  ;;  %2324 = vmatmul.bf16.gmra.mxu1 %v3827_v34  ;;  %2457 = vmatmul.bf16.gmra.mxu2 %v3831_v56  ;;  %v5545_v43 = vadd.f32 %v2681_v12, %v2549_v0  ;;  %v3940_v12 = vld [vmem:[%s5136_s5 + $0x38c] sm:$0xf0]  ;;  %v3866_v34 = vld [vmem:[%s5136_s5 + $0x2d8] sm:$0xf]  ;;  %v4745_v56 = vld [vmem:[%s5136_s5 + $0x2f8] sm:$0xf0]  ;;  %v2158_v0 = vadd.f32 %v5512_v10, %v5378_v1 }
 0x12c   : > { %v3943_v52 = vor.u32 %v4759_v50, %v3940_v12 }
 0x12e   : > { %2723 = vmatmul.bf16.gmra.mxu0 %v3839_v55  ;;  %v2418_v44 = vpop.f32.mrf.mxu2  ;;  %2605 = vmatmul.bf16.gmra.mxu3 %v3943_v52 }
 0x12f   : > { %v2419_v48 = vadd.f32 %v2418_v44, %v2286_v7  ;;  %v3867_v44 = vor.u32 %v4745_v56, %v3866_v34 }
 0x130   : > { %v2287_v30 = vpop.f32.mrf.mxu1 }
 0x131   : > { %v2552_v8 = vadd.f32 %v5482_v13, %v2419_v48  ;;  %v2288_v16 = vadd.f32 %v2287_v30, %v2155_v45  ;;  %v3863_v13 = vor.u32 %v4740_v27, %v3860_v22  ;;  %v3875_v48 = vor.u32 %v4746_v49, %v3874_v21  ;;  %v5564_v30 = vpop.f32.mrf.mxu3  ;;  %v4768_v21 = vld [vmem:[%s5136_s5 + $0x3b4] sm:$0xf]  ;;  %v3976_v49 = vld [vmem:[%s5136_s5 + $0x3d4] sm:$0xf0] }
 0x133   : > { %v2686_v9 = vpop.f32.mrf.mxu0  ;;  %v5555_v53 = vadd.f32 %v2684_v41, %v2552_v8 }
 0x136   : > { %v2420_v55 = vpop.f32.mrf.mxu2 }
 0x137   : > { %v2421_v7 = vadd.f32 %v2420_v55, %v2288_v16  ;;  %v2160_v16 = vadd.f32 %v5512_v10, %v5386_v5  ;;  %v3979_v55 = vor.u32 %v4768_v21, %v3976_v49  ;;  %v4925_v5 = vld [vmem:[%s6447_s1 + $0x1d8] sm:$0xff] }
 0x138   : > { %v2290_v45 = vpop.f32.mrf.mxu1  ;;  %3073 = vmatpush.bf16.msra.mxu3 %v4925_v5  ;;  %v4909_v5 = vld [vmem:[%s6447_s1 + $0x158] sm:$0xff] }
 0x139   : > { %v2554_v41 = vadd.f32 %v5490_v28, %v2421_v7  ;;  %v2291_v8 = vadd.f32 %v2290_v45, %v2158_v0  ;;  %v5571_v28 = vpop.f32.mrf.mxu3  ;;  %v4749_v0 = vld [vmem:[%s5136_s5 + $0x31c] sm:$0xf]  ;;  %v3910_v45 = vld [vmem:[%s5136_s5 + $0x328] sm:$0xf]  ;;  %2807 = vmatpush.bf16.msra.mxu1 %v4909_v5  ;;  %v2168_v5 = vadd.f32 %v5512_v10, %v5435_v57 }
 0x13b   : > { %v2689_v50 = vpop.f32.mrf.mxu0  ;;  %2329 = vmatmul.bf16.gmra.mxu1 %v3863_v13  ;;  %2462 = vmatmul.bf16.gmra.mxu2 %v3867_v44  ;;  %v5567_v12 = vadd.f32 %v2686_v9, %v2554_v41  ;;  %v4917_v9 = vld [vmem:[%s6447_s1 + $0x198] sm:$0xff]  ;;  %v3896_v13 = vld [vmem:[%s5136_s5 + $0x33c] sm:$0xf0]  ;;  %v4754_v44 = vld [vmem:[%s5136_s5 + $0x340] sm:$0xf0] }
 0x13c   : > { %2940 = vmatpush.bf16.msra.mxu2 %v4917_v9 }
 0x13e   : > { %2728 = vmatmul.bf16.gmra.mxu0 %v3875_v48  ;;  %v2423_v1 = vpop.f32.mrf.mxu2  ;;  %v4755_v48 = vld [vmem:[%s5136_s5 + $0x348] sm:$0xf0]  ;;  %2610 = vmatmul.bf16.gmra.mxu3 %v3979_v55  ;;  %v2165_v55 = vadd.f32 %v5512_v10, %v5413_v31  ;;  %v4764_v31 = vld [vmem:[%s5136_s5 + $0x390] sm:$0xf0] }
 0x13f   : > { %v2424_v52 = vadd.f32 %v2423_v1, %v2291_v8  ;;  %v2163_v8 = vadd.f32 %v5512_v10, %v5402_v23  ;;  %v3911_v21 = vor.u32 %v4755_v48, %v3910_v45  ;;  %v4777_v48 = vld [vmem:[%s5136_s5 + $0x3fc] sm:$0xf] }
 0x140   : > { %v2292_v27 = vpop.f32.mrf.mxu1 }
 0x141   : > { %v2557_v22 = vadd.f32 %v5520_v4, %v2424_v52  ;;  %v2293_v34 = vadd.f32 %v2292_v27, %v2160_v16  ;;  %v3902_v4 = vld [vmem:[%s5136_s5 + $0x320] sm:$0xf]  ;;  %v3899_v16 = vor.u32 %v4749_v0, %v3896_v13  ;;  %v5592_v49 = vpop.f32.mrf.mxu3 }
 0x142   : > { %v3903_v52 = vor.u32 %v4754_v44, %v3902_v4 }
 0x143   : > { %v2691_v56 = vpop.f32.mrf.mxu0  ;;  %v5583_v7 = vadd.f32 %v2689_v50, %v2557_v22 }
 0x146   : > { %v2425_v41 = vpop.f32.mrf.mxu2 }
 0x147   : > { %v2426_v1 = vadd.f32 %v2425_v41, %v2293_v34  ;;  %v4012_v41 = vld [vmem:[%s5136_s5 + $0x41c] sm:$0xf0] }
 0x148   : > { %v2295_v27 = vpop.f32.mrf.mxu1 }
 0x149   : > { %v2559_v50 = vadd.f32 %v5527_v63, %v2426_v1  ;;  %v2296_v22 = vadd.f32 %v2295_v27, %v2163_v8  ;;  %v4933_v63 = vld [vmem:[%s6447_s1 + $0x218] sm:$0xff]  ;;  %v5605_v13 = vpop.f32.mrf.mxu3  ;;  %v4015_v8 = vor.u32 %v4777_v48, %v4012_v41  ;;  %v4758_v1 = vld [vmem:[%s5136_s5 + $0x364] sm:$0xf]  ;;  %v3938_v27 = vld [vmem:[%s5136_s5 + $0x368] sm:$0xf] }
 0x14a   : > { %3206 = vmatpush.bf16.msra.mxu0 %v4933_v63 }
 0x14b   : > { %v2694_v9 = vpop.f32.mrf.mxu0  ;;  %2334 = vmatmul.bf16.gmra.mxu1 %v3899_v16  ;;  %2467 = vmatmul.bf16.gmra.mxu2 %v3903_v52  ;;  %v5598_v23 = vadd.f32 %v2691_v56, %v2559_v50  ;;  %v3932_v52 = vld [vmem:[%s5136_s5 + $0x384] sm:$0xf0]  ;;  %v3946_v50 = vld [vmem:[%s5136_s5 + $0x370] sm:$0xf] }
 0x14e   : > { %2733 = vmatmul.bf16.gmra.mxu0 %v3911_v21  ;;  %v2428_v34 = vpop.f32.mrf.mxu2  ;;  %v4763_v21 = vld [vmem:[%s5136_s5 + $0x388] sm:$0xf0]  ;;  %2615 = vmatmul.bf16.gmra.mxu3 %v4015_v8 }
 0x14f   : > { %v2429_v0 = vadd.f32 %v2428_v34, %v2296_v22  ;;  %v3939_v34 = vor.u32 %v4763_v21, %v3938_v27 }
 0x150   : > { %v2297_v56 = vpop.f32.mrf.mxu1 }
 0x151   : > { %v2562_v4 = vadd.f32 %v5542_v36, %v2429_v0  ;;  %v2298_v44 = vadd.f32 %v2297_v56, %v2165_v55  ;;  %v3935_v36 = vor.u32 %v4758_v1, %v3932_v52  ;;  %v3947_v0 = vor.u32 %v4764_v31, %v3946_v50  ;;  %v5620_v56 = vpop.f32.mrf.mxu3  ;;  %v4786_v50 = vld [vmem:[%s5136_s5 + $0x444] sm:$0xf] }
 0x153   : > { %v2696_v45 = vpop.f32.mrf.mxu0  ;;  %v5611_v16 = vadd.f32 %v2694_v9, %v2562_v4 }
 0x156   : > { %v2430_v22 = vpop.f32.mrf.mxu2 }
 0x157   : > { %v2431_v63 = vadd.f32 %v2430_v22, %v2298_v44  ;;  %v2170_v44 = vadd.f32 %v5512_v10, %v5444_v6  ;;  %v4767_v22 = vld [vmem:[%s5136_s5 + $0x3ac] sm:$0xf]  ;;  %v4773_v6 = vld [vmem:[%s5136_s5 + $0x3d8] sm:$0xf0] }
 0x158   : > { %v2300_v55 = vpop.f32.mrf.mxu1 }
 0x159   : > { %v2564_v9 = vadd.f32 %v5549_v39, %v2431_v63  ;;  %v2301_v4 = vadd.f32 %v2300_v55, %v2168_v5  ;;  %v5627_v1 = vpop.f32.mrf.mxu3  ;;  %v3968_v63 = vld [vmem:[%s5136_s5 + $0x3cc] sm:$0xf0]  ;;  %v3982_v55 = vld [vmem:[%s5136_s5 + $0x3b8] sm:$0xf] }
 0x15b   : > { %v2699_v48 = vpop.f32.mrf.mxu0  ;;  %2339 = vmatmul.bf16.gmra.mxu1 %v3935_v36  ;;  %2472 = vmatmul.bf16.gmra.mxu2 %v3939_v34  ;;  %v5623_v41 = vadd.f32 %v2696_v45, %v2564_v9  ;;  %v4048_v45 = vld [vmem:[%s5136_s5 + $0x464] sm:$0xf0]  ;;  %v3974_v36 = vld [vmem:[%s5136_s5 + $0x3b0] sm:$0xf]  ;;  %v4772_v34 = vld [vmem:[%s5136_s5 + $0x3d0] sm:$0xf0]  ;;  %v2173_v9 = vadd.f32 %v5512_v10, %v5460_v35 }
 0x15c   : > { %v4051_v31 = vor.u32 %v4786_v50, %v4048_v45 }
 0x15e   : > { %2738 = vmatmul.bf16.gmra.mxu0 %v3947_v0  ;;  %v2433_v57 = vpop.f32.mrf.mxu2  ;;  %2620 = vmatmul.bf16.gmra.mxu3 %v4051_v31 }
 0x15f   : > { %v2434_v8 = vadd.f32 %v2433_v57, %v2301_v4  ;;  %v3975_v57 = vor.u32 %v4772_v34, %v3974_v36 }
 0x160   : > { %v2302_v39 = vpop.f32.mrf.mxu1 }
 0x161   : > { %v2567_v52 = vadd.f32 %v5564_v30, %v2434_v8  ;;  %v2303_v27 = vadd.f32 %v2302_v39, %v2170_v44  ;;  %v3971_v30 = vor.u32 %v4767_v22, %v3968_v63  ;;  %v3983_v8 = vor.u32 %v4773_v6, %v3982_v55  ;;  %v5642_v39 = vpop.f32.mrf.mxu3  ;;  %v4084_v55 = vld [vmem:[%s5136_s5 + $0x4ac] sm:$0xf0] }
 0x162   : > { %v4916_v6 = vld [vmem:[%s6447_s1 + $0x190] sm:$0xff] }
 0x163   : > { %v2701_v21 = vpop.f32.mrf.mxu0  ;;  %v5633_v5 = vadd.f32 %v2699_v48, %v2567_v52  ;;  %2941 = vmatpush.bf16.msra.mxu2 %v4916_v6  ;;  %v4924_v6 = vld [vmem:[%s6447_s1 + $0x1d0] sm:$0xff] }
 0x164   : > { %3074 = vmatpush.bf16.msra.mxu3 %v4924_v6  ;;  %v2183_v6 = vadd.f32 %v5512_v10, %v5318_v20 }
 0x166   : > { %v2435_v0 = vpop.f32.mrf.mxu2 }
 0x167   : > { %v2436_v4 = vadd.f32 %v2435_v0, %v2303_v27  ;;  %v2175_v27 = vadd.f32 %v5512_v10, %v5468_v40 }
 0x168   : > { %v2305_v44 = vpop.f32.mrf.mxu1 }
 0x169   : > { %v2569_v48 = vadd.f32 %v5571_v28, %v2436_v4  ;;  %v2306_v52 = vadd.f32 %v2305_v44, %v2173_v9  ;;  %v5649_v28 = vpop.f32.mrf.mxu3  ;;  %v4776_v9 = vld [vmem:[%s5136_s5 + $0x3f4] sm:$0xf]  ;;  %v4004_v4 = vld [vmem:[%s5136_s5 + $0x414] sm:$0xf0]  ;;  %v4018_v44 = vld [vmem:[%s5136_s5 + $0x400] sm:$0xf] }
 0x16b   : > { %v2704_v50 = vpop.f32.mrf.mxu0  ;;  %2344 = vmatmul.bf16.gmra.mxu1 %v3971_v30  ;;  %2477 = vmatmul.bf16.gmra.mxu2 %v3975_v57  ;;  %v5645_v45 = vadd.f32 %v2701_v21, %v2569_v48  ;;  %v4795_v21 = vld [vmem:[%s5136_s5 + $0x48c] sm:$0xf]  ;;  %v4010_v30 = vld [vmem:[%s5136_s5 + $0x3f8] sm:$0xf]  ;;  %v4781_v57 = vld [vmem:[%s5136_s5 + $0x418] sm:$0xf0]  ;;  %v2178_v48 = vadd.f32 %v5512_v10, %v5484_v14 }
 0x16c   : > { %v4087_v0 = vor.u32 %v4795_v21, %v4084_v55 }
 0x16e   : > { %2743 = vmatmul.bf16.gmra.mxu0 %v3983_v8  ;;  %v2438_v35 = vpop.f32.mrf.mxu2  ;;  %v4782_v8 = vld [vmem:[%s5136_s5 + $0x420] sm:$0xf0]  ;;  %2625 = vmatmul.bf16.gmra.mxu3 %v4087_v0  ;;  %v4908_v0 = vld [vmem:[%s6447_s1 + $0x150] sm:$0xff] }
 0x16f   : > { %v2439_v31 = vadd.f32 %v2438_v35, %v2306_v52  ;;  %v4007_v35 = vor.u32 %v4776_v9, %v4004_v4  ;;  %2808 = vmatpush.bf16.msra.mxu1 %v4908_v0 }
 0x170   : > { %v2307_v22 = vpop.f32.mrf.mxu1 }
 0x171   : > { %v2572_v63 = vadd.f32 %v5592_v49, %v2439_v31  ;;  %v2308_v36 = vadd.f32 %v2307_v22, %v2175_v27  ;;  %v4011_v27 = vor.u32 %v4781_v57, %v4010_v30  ;;  %v4019_v22 = vor.u32 %v4782_v8, %v4018_v44  ;;  %v5667_v21 = vpop.f32.mrf.mxu3  ;;  %v4932_v8 = vld [vmem:[%s6447_s1 + $0x210] sm:$0xff] }
 0x172   : > { %3207 = vmatpush.bf16.msra.mxu0 %v4932_v8 }
 0x173   : > { %v2706_v34 = vpop.f32.mrf.mxu0  ;;  %v5658_v40 = vadd.f32 %v2704_v50, %v2572_v63 }
 0x176   : > { %v2440_v49 = vpop.f32.mrf.mxu2 }
 0x177   : > { %v2441_v52 = vadd.f32 %v2440_v49, %v2308_v36  ;;  %v2180_v36 = vadd.f32 %v5512_v10, %v5492_v33  ;;  %v4804_v49 = vld [vmem:[%s5136_s5 + $0x4d4] sm:$0xf] }
 0x178   : > { %v2310_v31 = vpop.f32.mrf.mxu1 }
 0x179   : > { %v2574_v50 = vadd.f32 %v5605_v13, %v2441_v52  ;;  %v2311_v63 = vadd.f32 %v2310_v31, %v2178_v48  ;;  %v5680_v30 = vpop.f32.mrf.mxu3  ;;  %v4120_v48 = vld [vmem:[%s5136_s5 + $0x4f4] sm:$0xf0]  ;;  %v4046_v31 = vld [vmem:[%s5136_s5 + $0x440] sm:$0xf] }
 0x17a   : > { %v4123_v52 = vor.u32 %v4804_v49, %v4120_v48 }
 0x17b   : > { %v2709_v55 = vpop.f32.mrf.mxu0  ;;  %2349 = vmatmul.bf16.gmra.mxu1 %v4007_v35  ;;  %2482 = vmatmul.bf16.gmra.mxu2 %v4011_v27  ;;  %v5676_v14 = vadd.f32 %v2706_v34, %v2574_v50  ;;  %v4785_v35 = vld [vmem:[%s5136_s5 + $0x43c] sm:$0xf]  ;;  %v4040_v27 = vld [vmem:[%s5136_s5 + $0x45c] sm:$0xf0]  ;;  %v4054_v50 = vld [vmem:[%s5136_s5 + $0x448] sm:$0xf] }
 0x17e   : > { %2748 = vmatmul.bf16.gmra.mxu0 %v4019_v22  ;;  %v2443_v13 = vpop.f32.mrf.mxu2  ;;  %v4790_v22 = vld [vmem:[%s5136_s5 + $0x460] sm:$0xf0]  ;;  %2630 = vmatmul.bf16.gmra.mxu3 %v4123_v52 }
 0x17f   : > { %v2444_v9 = vadd.f32 %v2443_v13, %v2311_v63  ;;  %v4791_v63 = vld [vmem:[%s5136_s5 + $0x468] sm:$0xf0]  ;;  %v4043_v13 = vor.u32 %v4785_v35, %v4040_v27 }
 0x180   : > { %v2312_v4 = vpop.f32.mrf.mxu1 }
 0x181   : > { %v2577_v34 = vadd.f32 %v5620_v56, %v2444_v9  ;;  %v2313_v57 = vadd.f32 %v2312_v4, %v2180_v36  ;;  %v4047_v36 = vor.u32 %v4790_v22, %v4046_v31  ;;  %v4055_v4 = vor.u32 %v4791_v63, %v4054_v50  ;;  %v5698_v49 = vpop.f32.mrf.mxu3  ;;  %v4813_v50 = vld [vmem:[%s5136_s5 + $0x51c] sm:$0xf] }
 0x183   : > { %v2711_v44 = vpop.f32.mrf.mxu0  ;;  %v5689_v33 = vadd.f32 %v2709_v55, %v2577_v34 }
 0x186   : > { %v2445_v56 = vpop.f32.mrf.mxu2 }
 0x187   : > { %v2446_v0 = vadd.f32 %v2445_v56, %v2313_v57  ;;  %v2185_v57 = vadd.f32 %v5512_v10, %v5330_v26  ;;  %v4794_v56 = vld [vmem:[%s5136_s5 + $0x484] sm:$0xf]  ;;  %v4800_v26 = vld [vmem:[%s5136_s5 + $0x4b0] sm:$0xf0] }
 0x188   : > { %v2315_v9 = vpop.f32.mrf.mxu1 }
 0x189   : > { %v2579_v55 = vadd.f32 %v5627_v1, %v2446_v0  ;;  %v2316_v34 = vadd.f32 %v2315_v9, %v2183_v6  ;;  %v5705_v35 = vpop.f32.mrf.mxu3  ;;  %v4076_v0 = vld [vmem:[%s5136_s5 + $0x4a4] sm:$0xf0]  ;;  %v4090_v9 = vld [vmem:[%s5136_s5 + $0x490] sm:$0xf] }
 0x18b   : > { %v2714_v8 = vpop.f32.mrf.mxu0  ;;  %2354 = vmatmul.bf16.gmra.mxu1 %v4043_v13  ;;  %2487 = vmatmul.bf16.gmra.mxu2 %v4047_v36  ;;  %v5701_v48 = vadd.f32 %v2711_v44, %v2579_v55  ;;  %v4156_v44 = vld [vmem:[%s5136_s5 + $0x53c] sm:$0xf0]  ;;  %v4082_v13 = vld [vmem:[%s5136_s5 + $0x488] sm:$0xf]  ;;  %v4799_v36 = vld [vmem:[%s5136_s5 + $0x4a8] sm:$0xf0]  ;;  %v2188_v55 = vadd.f32 %v5512_v10, %v5350_v42 }
 0x18c   : > { %v4159_v63 = vor.u32 %v4813_v50, %v4156_v44 }
 0x18e   : > { %2753 = vmatmul.bf16.gmra.mxu0 %v4055_v4  ;;  %v2448_v20 = vpop.f32.mrf.mxu2  ;;  %2635 = vmatmul.bf16.gmra.mxu3 %v4159_v63 }
 0x18f   : > { %v2449_v52 = vadd.f32 %v2448_v20, %v2316_v34  ;;  %v4083_v20 = vor.u32 %v4799_v36, %v4082_v13 }
 0x190   : > { %v2317_v1 = vpop.f32.mrf.mxu1 }
 0x191   : > { %v2582_v27 = vadd.f32 %v5642_v39, %v2449_v52  ;;  %v2318_v31 = vadd.f32 %v2317_v1, %v2185_v57  ;;  %v4079_v39 = vor.u32 %v4794_v56, %v4076_v0  ;;  %v4091_v52 = vor.u32 %v4800_v26, %v4090_v9  ;;  %v5720_v1 = vpop.f32.mrf.mxu3  ;;  %v4822_v9 = vld [vmem:[%s5136_s5 + $0x564] sm:$0xf] }
 0x193   : > { %v2716_v22 = vpop.f32.mrf.mxu0  ;;  %v5711_v6 = vadd.f32 %v2714_v8, %v2582_v27 }
 0x196   : > { %v2450_v4 = vpop.f32.mrf.mxu2 }
 0x197   : > { %v2451_v34 = vadd.f32 %v2450_v4, %v2318_v31  ;;  %v2190_v31 = vadd.f32 %v5512_v10, %v5358_v47  ;;  %v4803_v4 = vld [vmem:[%s5136_s5 + $0x4cc] sm:$0xf]  ;;  %v4809_v47 = vld [vmem:[%s5136_s5 + $0x4f8] sm:$0xf0] }
 0x198   : > { %v2320_v57 = vpop.f32.mrf.mxu1 }
 0x199   : > { %v2584_v8 = vadd.f32 %v5649_v28, %v2451_v34  ;;  %v2321_v27 = vadd.f32 %v2320_v57, %v2188_v55  ;;  %v5727_v56 = vpop.f32.mrf.mxu3  ;;  %v4112_v34 = vld [vmem:[%s5136_s5 + $0x4ec] sm:$0xf0]  ;;  %v4126_v57 = vld [vmem:[%s5136_s5 + $0x4d8] sm:$0xf] }
 0x19b   : > { %v2719_v50 = vpop.f32.mrf.mxu0  ;;  %2359 = vmatmul.bf16.gmra.mxu1 %v4079_v39  ;;  %2492 = vmatmul.bf16.gmra.mxu2 %v4083_v20  ;;  %v5723_v44 = vadd.f32 %v2716_v22, %v2584_v8  ;;  %v4192_v22 = vld [vmem:[%s5136_s5 + $0x584] sm:$0xf0]  ;;  %v4118_v39 = vld [vmem:[%s5136_s5 + $0x4d0] sm:$0xf]  ;;  %v4808_v20 = vld [vmem:[%s5136_s5 + $0x4f0] sm:$0xf0]  ;;  %v2193_v8 = vadd.f32 %v5512_v10, %v5374_v62 }
 0x19c   : > { %v4195_v26 = vor.u32 %v4822_v9, %v4192_v22  ;;  %v4915_v22 = vld [vmem:[%s6447_s1 + $0x188] sm:$0xff] }
 0x19d   : > { %v4907_v62 = vld [vmem:[%s6447_s1 + $0x148] sm:$0xff]  ;;  %2942 = vmatpush.bf16.msra.mxu2 %v4915_v22  ;;  %v4818_v22 = vld [vmem:[%s5136_s5 + $0x540] sm:$0xf0] }
 0x19e   : > { %2758 = vmatmul.bf16.gmra.mxu0 %v4091_v52  ;;  %v2453_v42 = vpop.f32.mrf.mxu2  ;;  %2640 = vmatmul.bf16.gmra.mxu3 %v4195_v26  ;;  %v4923_v26 = vld [vmem:[%s6447_s1 + $0x1c8] sm:$0xff] }
 0x19f   : > { %v2454_v63 = vadd.f32 %v2453_v42, %v2321_v27  ;;  %v4119_v42 = vor.u32 %v4808_v20, %v4118_v39  ;;  %3075 = vmatpush.bf16.msra.mxu3 %v4923_v26  ;;  %2809 = vmatpush.bf16.msra.mxu1 %v4907_v62  ;;  %v2198_v26 = vadd.f32 %v5512_v10, %v5398_v18 }
 0x1a0   : > { %v2322_v28 = vpop.f32.mrf.mxu1 }
 0x1a1   : > { %v2587_v0 = vadd.f32 %v5667_v21, %v2454_v63  ;;  %v2323_v13 = vadd.f32 %v2322_v28, %v2190_v31  ;;  %v4115_v21 = vor.u32 %v4803_v4, %v4112_v34  ;;  %v4127_v63 = vor.u32 %v4809_v47, %v4126_v57  ;;  %v5742_v28 = vpop.f32.mrf.mxu3 }
 0x1a2   : > { %v2195_v4 = vadd.f32 %v5512_v10, %v5382_v3 }
 0x1a3   : > { %v2721_v36 = vpop.f32.mrf.mxu0  ;;  %v5733_v55 = vadd.f32 %v2719_v50, %v2587_v0 }
 0x1a6   : > { %v2455_v52 = vpop.f32.mrf.mxu2 }
 0x1a7   : > { %v2456_v27 = vadd.f32 %v2455_v52, %v2323_v13  ;;  %v4931_v52 = vld [vmem:[%s6447_s1 + $0x208] sm:$0xff] }
 0x1a8   : > { %v2325_v31 = vpop.f32.mrf.mxu1  ;;  %3208 = vmatpush.bf16.msra.mxu0 %v4931_v52 }
 0x1a9   : > { %v2589_v50 = vadd.f32 %v5680_v30, %v2456_v27  ;;  %v2326_v0 = vadd.f32 %v2325_v31, %v2193_v8  ;;  %v5758_v20 = vpop.f32.mrf.mxu3  ;;  %v4831_v8 = vld [vmem:[%s5136_s5 + $0x5ac] sm:$0xf]  ;;  %v4228_v27 = vld [vmem:[%s5136_s5 + $0x5cc] sm:$0xf0]  ;;  %v4148_v31 = vld [vmem:[%s5136_s5 + $0x534] sm:$0xf0] }
 0x1ab   : > { %v2724_v9 = vpop.f32.mrf.mxu0  ;;  %2364 = vmatmul.bf16.gmra.mxu1 %v4115_v21  ;;  %2497 = vmatmul.bf16.gmra.mxu2 %v4119_v42  ;;  %v5754_v13 = vadd.f32 %v2721_v36, %v2589_v50  ;;  %v4231_v21 = vor.u32 %v4831_v8, %v4228_v27  ;;  %v4812_v42 = vld [vmem:[%s5136_s5 + $0x514] sm:$0xf]  ;;  %v4817_v50 = vld [vmem:[%s5136_s5 + $0x538] sm:$0xf0] }
 0x1ae   : > { %2763 = vmatmul.bf16.gmra.mxu0 %v4127_v63  ;;  %v2458_v30 = vpop.f32.mrf.mxu2  ;;  %v4154_v63 = vld [vmem:[%s5136_s5 + $0x518] sm:$0xf]  ;;  %2645 = vmatmul.bf16.gmra.mxu3 %v4231_v21 }
 0x1af   : > { %v2459_v34 = vadd.f32 %v2458_v30, %v2326_v0  ;;  %v4162_v0 = vld [vmem:[%s5136_s5 + $0x520] sm:$0xf]  ;;  %v4151_v30 = vor.u32 %v4812_v42, %v4148_v31 }
 0x1b0   : > { %v2327_v39 = vpop.f32.mrf.mxu1 }
 0x1b1   : > { %v2592_v36 = vadd.f32 %v5698_v49, %v2459_v34  ;;  %v2328_v57 = vadd.f32 %v2327_v39, %v2195_v4  ;;  %v4155_v4 = vor.u32 %v4817_v50, %v4154_v63  ;;  %v4163_v39 = vor.u32 %v4818_v22, %v4162_v0  ;;  %v5776_v8 = vpop.f32.mrf.mxu3  ;;  %v4840_v0 = vld [vmem:[%s5136_s5 + $0x5f4] sm:$0xf] }
 0x1b3   : > { %v2726_v47 = vpop.f32.mrf.mxu0  ;;  %v5767_v3 = vadd.f32 %v2724_v9, %v2592_v36 }
 0x1b6   : > { %v2460_v49 = vpop.f32.mrf.mxu2 }
 0x1b7   : > { %v2461_v62 = vadd.f32 %v2460_v49, %v2328_v57  ;;  %v2200_v57 = vadd.f32 %v5512_v10, %v5409_v29  ;;  %v4821_v49 = vld [vmem:[%s5136_s5 + $0x55c] sm:$0xf]  ;;  %v4827_v29 = vld [vmem:[%s5136_s5 + $0x588] sm:$0xf0] }
 0x1b8   : > { %v2330_v34 = vpop.f32.mrf.mxu1 }
 0x1b9   : > { %v2594_v9 = vadd.f32 %v5705_v35, %v2461_v62  ;;  %v2331_v36 = vadd.f32 %v2330_v34, %v2198_v26  ;;  %v5783_v42 = vpop.f32.mrf.mxu3  ;;  %v4184_v62 = vld [vmem:[%s5136_s5 + $0x57c] sm:$0xf0]  ;;  %v4198_v34 = vld [vmem:[%s5136_s5 + $0x568] sm:$0xf] }
 0x1bb   : > { %v2729_v52 = vpop.f32.mrf.mxu0  ;;  %2369 = vmatmul.bf16.gmra.mxu1 %v4151_v30  ;;  %2502 = vmatmul.bf16.gmra.mxu2 %v4155_v4  ;;  %v5779_v27 = vadd.f32 %v2726_v47, %v2594_v9  ;;  %v4264_v47 = vld [vmem:[%s5136_s5 + $0x614] sm:$0xf0]  ;;  %v4190_v30 = vld [vmem:[%s5136_s5 + $0x560] sm:$0xf]  ;;  %v4826_v4 = vld [vmem:[%s5136_s5 + $0x580] sm:$0xf0]  ;;  %v2203_v9 = vadd.f32 %v5512_v10, %v5431_v54 }
 0x1bc   : > { %v4267_v22 = vor.u32 %v4840_v0, %v4264_v47 }
 0x1be   : > { %2768 = vmatmul.bf16.gmra.mxu0 %v4163_v39  ;;  %v2463_v18 = vpop.f32.mrf.mxu2  ;;  %2650 = vmatmul.bf16.gmra.mxu3 %v4267_v22 }
 0x1bf   : > { %v2464_v21 = vadd.f32 %v2463_v18, %v2331_v36  ;;  %v4191_v18 = vor.u32 %v4826_v4, %v4190_v30 }
 0x1c0   : > { %v2332_v35 = vpop.f32.mrf.mxu1 }
 0x1c1   : > { %v2597_v31 = vadd.f32 %v5720_v1, %v2464_v21  ;;  %v2333_v63 = vadd.f32 %v2332_v35, %v2200_v57  ;;  %v4187_v1 = vor.u32 %v4821_v49, %v4184_v62  ;;  %v4199_v21 = vor.u32 %v4827_v29, %v4198_v34  ;;  %v5798_v35 = vpop.f32.mrf.mxu3  ;;  %v4849_v34 = vld [vmem:[%s5136_s5 + $0x63c] sm:$0xf] }
 0x1c3   : > { %v2731_v50 = vpop.f32.mrf.mxu0  ;;  %v5789_v26 = vadd.f32 %v2729_v52, %v2597_v31 }
 0x1c6   : > { %v2465_v39 = vpop.f32.mrf.mxu2 }
 0x1c7   : > { %v2466_v36 = vadd.f32 %v2465_v39, %v2333_v63  ;;  %v2205_v63 = vadd.f32 %v5512_v10, %v5442_v61  ;;  %v4830_v39 = vld [vmem:[%s5136_s5 + $0x5a4] sm:$0xf]  ;;  %v4836_v61 = vld [vmem:[%s5136_s5 + $0x5d0] sm:$0xf0] }
 0x1c8   : > { %v2335_v57 = vpop.f32.mrf.mxu1 }
 0x1c9   : > { %v2599_v52 = vadd.f32 %v5727_v56, %v2466_v36  ;;  %v2336_v31 = vadd.f32 %v2335_v57, %v2203_v9  ;;  %v5805_v49 = vpop.f32.mrf.mxu3  ;;  %v4220_v36 = vld [vmem:[%s5136_s5 + $0x5c4] sm:$0xf0]  ;;  %v4234_v57 = vld [vmem:[%s5136_s5 + $0x5b0] sm:$0xf] }
 0x1cb   : > { %v2734_v0 = vpop.f32.mrf.mxu0  ;;  %2374 = vmatmul.bf16.gmra.mxu1 %v4187_v1  ;;  %2507 = vmatmul.bf16.gmra.mxu2 %v4191_v18  ;;  %v5801_v47 = vadd.f32 %v2731_v50, %v2599_v52  ;;  %v4300_v50 = vld [vmem:[%s5136_s5 + $0x65c] sm:$0xf0]  ;;  %v4226_v1 = vld [vmem:[%s5136_s5 + $0x5a8] sm:$0xf]  ;;  %v4835_v18 = vld [vmem:[%s5136_s5 + $0x5c8] sm:$0xf0]  ;;  %v2208_v52 = vadd.f32 %v5512_v10, %v5456_v32 }
 0x1cc   : > { %v4303_v29 = vor.u32 %v4849_v34, %v4300_v50  ;;  %v4914_v50 = vld [vmem:[%s6447_s1 + $0x180] sm:$0xff] }
 0x1cd   : > { %v4922_v32 = vld [vmem:[%s6447_s1 + $0x1c0] sm:$0xff]  ;;  %2943 = vmatpush.bf16.msra.mxu2 %v4914_v50  ;;  %v4845_v50 = vld [vmem:[%s5136_s5 + $0x618] sm:$0xf0] }
 0x1ce   : > { %2773 = vmatmul.bf16.gmra.mxu0 %v4199_v21  ;;  %v2468_v54 = vpop.f32.mrf.mxu2  ;;  %2655 = vmatmul.bf16.gmra.mxu3 %v4303_v29 }
 0x1cf   : > { %v2469_v22 = vadd.f32 %v2468_v54, %v2336_v31  ;;  %v4227_v54 = vor.u32 %v4835_v18, %v4226_v1  ;;  %3076 = vmatpush.bf16.msra.mxu3 %v4922_v32  ;;  %v2213_v32 = vadd.f32 %v5512_v10, %v5480_v11 }
 0x1d0   : > { %v2337_v56 = vpop.f32.mrf.mxu1 }
 0x1d1   : > { %v2602_v62 = vadd.f32 %v5742_v28, %v2469_v22  ;;  %v2338_v30 = vadd.f32 %v2337_v56, %v2205_v63  ;;  %v4223_v28 = vor.u32 %v4830_v39, %v4220_v36  ;;  %v4235_v22 = vor.u32 %v4836_v61, %v4234_v57  ;;  %v5820_v56 = vpop.f32.mrf.mxu3 }
 0x1d2   : > { %v2210_v39 = vadd.f32 %v5512_v10, %v5464_v37 }
 0x1d3   : > { %v2736_v4 = vpop.f32.mrf.mxu0  ;;  %v5811_v9 = vadd.f32 %v2734_v0, %v2602_v62 }
 0x1d6   : > { %v2470_v21 = vpop.f32.mrf.mxu2 }
 0x1d7   : > { %v2471_v31 = vadd.f32 %v2470_v21, %v2338_v30  ;;  %v4930_v21 = vld [vmem:[%s6447_s1 + $0x200] sm:$0xff] }
 0x1d8   : > { %v2340_v63 = vpop.f32.mrf.mxu1  ;;  %3209 = vmatpush.bf16.msra.mxu0 %v4930_v21 }
 0x1d9   : > { %v2604_v0 = vadd.f32 %v5758_v20, %v2471_v31  ;;  %v2341_v62 = vadd.f32 %v2340_v63, %v2208_v52  ;;  %v4906_v20 = vld [vmem:[%s6447_s1 + $0x140] sm:$0xff]  ;;  %v5836_v1 = vpop.f32.mrf.mxu3  ;;  %v4336_v31 = vld [vmem:[%s5136_s5 + $0x6a4] sm:$0xf0]  ;;  %v4256_v63 = vld [vmem:[%s5136_s5 + $0x60c] sm:$0xf0] }
 0x1da   : > { %2810 = vmatpush.bf16.msra.mxu1 %v4906_v20  ;;  %v4858_v52 = vld [vmem:[%s5136_s5 + $0x684] sm:$0xf] }
 0x1db   : > { %v2739_v34 = vpop.f32.mrf.mxu0  ;;  %2379 = vmatmul.bf16.gmra.mxu1 %v4223_v28  ;;  %2512 = vmatmul.bf16.gmra.mxu2 %v4227_v54  ;;  %v5829_v30 = vadd.f32 %v2736_v4, %v2604_v0  ;;  %v4339_v28 = vor.u32 %v4858_v52, %v4336_v31  ;;  %v4839_v54 = vld [vmem:[%s5136_s5 + $0x5ec] sm:$0xf]  ;;  %v4844_v0 = vld [vmem:[%s5136_s5 + $0x610] sm:$0xf0] }
 0x1de   : > { %2778 = vmatmul.bf16.gmra.mxu0 %v4235_v22  ;;  %v2473_v29 = vpop.f32.mrf.mxu2  ;;  %v4262_v22 = vld [vmem:[%s5136_s5 + $0x5f0] sm:$0xf]  ;;  %2660 = vmatmul.bf16.gmra.mxu3 %v4339_v28 }
 0x1df   : > { %v2474_v36 = vadd.f32 %v2473_v29, %v2341_v62  ;;  %v4270_v62 = vld [vmem:[%s5136_s5 + $0x5f8] sm:$0xf]  ;;  %v4259_v29 = vor.u32 %v4839_v54, %v4256_v63  ;;  %v5864_v63 = vld [vmem:[%s5136_s5 + $0x6c8] sm:$0xff] }
 0x1e0   : > { %v2342_v4 = vpop.f32.mrf.mxu1 }
 0x1e1   : > { %v2607_v18 = vadd.f32 %v5776_v8, %v2474_v36  ;;  %v2343_v57 = vadd.f32 %v2342_v4, %v2210_v39  ;;  %v4263_v39 = vor.u32 %v4844_v0, %v4262_v22  ;;  %v4271_v4 = vor.u32 %v4845_v50, %v4270_v62  ;;  %v5854_v52 = vpop.f32.mrf.mxu3  ;;  %v4848_v50 = vld [vmem:[%s5136_s5 + $0x634] sm:$0xf] }
 0x1e2   : > { %v1250_v62 = vunpack.c.h.b16 %v5864_v63 }
 0x1e3   : > { %v2741_v61 = vpop.f32.mrf.mxu0  ;;  %v5845_v37 = vadd.f32 %v2739_v34, %v2607_v18 }
 0x1e6   : > { %v2475_v8 = vpop.f32.mrf.mxu2 }
 0x1e7   : > { %v2476_v20 = vadd.f32 %v2475_v8, %v2343_v57  ;;  %v2215_v57 = vadd.f32 %v5512_v10, %v5488_v19  ;;  %v1475_v8 = vpack.c.b16 %v1250_v62, %v1250_v62  ;;  %v4853_v19 = vld [vmem:[%s5136_s5 + $0x658] sm:$0xf0]  ;;  %v4306_v10 = vld [vmem:[%s5136_s5 + $0x640] sm:$0xf] }
 0x1e8   : > { %v2345_v36 = vpop.f32.mrf.mxu1 }
 0x1e9   : > { %v2609_v34 = vadd.f32 %v5783_v42, %v2476_v20  ;;  %v2346_v18 = vadd.f32 %v2345_v36, %v2213_v32  ;;  %v5861_v42 = vpop.f32.mrf.mxu3  ;;  %v4292_v20 = vld [vmem:[%s5136_s5 + $0x654] sm:$0xf0] }
 0x1eb   : > { %v2744_v21 = vpop.f32.mrf.mxu0  ;;  %2384 = vmatmul.bf16.gmra.mxu1 %v4259_v29  ;;  %2517 = vmatmul.bf16.gmra.mxu2 %v4263_v39  ;;  %v5857_v31 = vadd.f32 %v2741_v61, %v2609_v34  ;;  %v4298_v29 = vld [vmem:[%s5136_s5 + $0x638] sm:$0xf]  ;;  %v4854_v39 = vld [vmem:[%s5136_s5 + $0x660] sm:$0xf0] }
 0x1ee   : > { %2783 = vmatmul.bf16.gmra.mxu0 %v4271_v4  ;;  %v2478_v11 = vpop.f32.mrf.mxu2  ;;  %2665 = vmatmul.bf16.gmra.mxu3 %v1475_v8  ;;  %v5879_v4 = vld [vmem:[%s6448_s2] ss:$0 sm:$0xff] }
 0x1ef   : > { %v2479_v28 = vadd.f32 %v2478_v11, %v2346_v18  ;;  %v4295_v18 = vor.u32 %v4848_v50, %v4292_v20  ;;  %v4299_v11 = vor.u32 %v4853_v19, %v4298_v29 }
 0x1f0   : > { %v2347_v54 = vpop.f32.mrf.mxu1 }
 0x1f1   : > { %v2612_v22 = vadd.f32 %v5798_v35, %v2479_v28  ;;  %v2348_v0 = vadd.f32 %v2347_v54, %v2215_v57  ;;  %v2218_v35 = vadd.f32 %v5879_v4, %v5325_v24  ;;  %v4307_v57 = vor.u32 %v4854_v39, %v4306_v10  ;;  %v5883_v28 = vpop.f32.mrf.mxu3  ;;  %v4653_v39 = vld [vmem:[%s5136_s5 + $0x1c] sm:$0xf] }
 0x1f3   : > { %v2746_v61 = vpop.f32.mrf.mxu0  ;;  %v5869_v32 = vadd.f32 %v2744_v21, %v2612_v22 }
 0x1f6   : > { %v2480_v36 = vpop.f32.mrf.mxu2 }
 0x1f7   : > { %v2481_v34 = vadd.f32 %v2480_v36, %v2348_v0  ;;  %v2220_v0 = vadd.f32 %v5879_v4, %v5345_v38  ;;  %v4863_v38 = vld [vmem:[%s5136_s5 + $0x6a8] sm:$0xf0] }
 0x1f8   : > { %v2350_v21 = vpop.f32.mrf.mxu1 }
 0x1f9   : > { %v2614_v54 = vadd.f32 %v5805_v49, %v2481_v34  ;;  %v2351_v22 = vadd.f32 %v2350_v21, %v2218_v35  ;;  %v5890_v20 = vpop.f32.mrf.mxu3  ;;  %v4857_v35 = vld [vmem:[%s5136_s5 + $0x67c] sm:$0xf]  ;;  %v4862_v21 = vld [vmem:[%s5136_s5 + $0x6a0] sm:$0xf0] }
 0x1fb   : > { %v2749_v62 = vpop.f32.mrf.mxu0  ;;  %2389 = vmatmul.bf16.gmra.mxu1 %v4295_v18  ;;  %2522 = vmatmul.bf16.gmra.mxu2 %v4299_v11  ;;  %v5886_v8 = vadd.f32 %v2746_v61, %v2614_v54  ;;  %v3524_v61 = vld [vmem:[%s5136_s5 + $0x3c] sm:$0xf0] }
 0x1fc   : > { %v3527_v36 = vor.u32 %v4653_v39, %v3524_v61  ;;  %v4328_v18 = vld [vmem:[%s5136_s5 + $0x69c] sm:$0xf0] }
 0x1fd   : > { %6461 = vst [vmem:[#allocation13_spill] sm:$0xff] %v5886_v8  ;;  %v4334_v11 = vld [vmem:[%s5136_s5 + $0x680] sm:$0xf] }
 0x1fe   : > { %2788 = vmatmul.bf16.gmra.mxu0 %v4307_v57  ;;  %v2483_v24 = vpop.f32.mrf.mxu2  ;;  %v4342_v57 = vld [vmem:[%s5136_s5 + $0x688] sm:$0xf]  ;;  %3077 = vmatmul.bf16.vlgmr.msra.gmra.mxu3 %v3527_v36 }
 0x1ff   : > { %v2484_v50 = vadd.f32 %v2483_v24, %v2351_v22  ;;  %v2223_v22 = vadd.f32 %v5879_v4, %v5356_v46 }
 0x200   : > { %v2352_v49 = vpop.f32.mrf.mxu1 }
 0x201   : > { %v2617_v29 = vadd.f32 %v5820_v56, %v2484_v50  ;;  %v2353_v19 = vadd.f32 %v2352_v49, %v2220_v0  ;;  %v4331_v56 = vor.u32 %v4857_v35, %v4328_v18  ;;  %v4335_v0 = vor.u32 %v4862_v21, %v4334_v11  ;;  %v5905_v8 = vpop.f32.mrf.mxu3 }
 0x202   : > { %v4343_v49 = vor.u32 %v4863_v38, %v4342_v57  ;;  %v419_v57 = vld [vmem:[%s5136_s5 + $0x6d0] sm:$0xff]  ;;  %v4662_v38 = vld [vmem:[%s5136_s5 + $0x64] sm:$0xf] }
 0x203   : > { %v2751_v10 = vpop.f32.mrf.mxu0  ;;  %v5896_v34 = vadd.f32 %v2749_v62, %v2617_v29 }
 0x206   : > { %v2485_v54 = vpop.f32.mrf.mxu2 }
 0x207   : > { %v2486_v24 = vadd.f32 %v2485_v54, %v2353_v19  ;;  %v2225_v19 = vadd.f32 %v5879_v4, %v5372_v59  ;;  %v3560_v54 = vld [vmem:[%s5136_s5 + $0x84] sm:$0xf0] }
 0x208   : > { %v2355_v50 = vpop.f32.mrf.mxu1 }
 0x209   : > { %v2619_v62 = vadd.f32 %v5836_v1, %v2486_v24  ;;  %v2356_v29 = vadd.f32 %v2355_v50, %v2223_v22  ;;  %v5912_v18 = vpop.f32.mrf.mxu3  ;;  %v3563_v22 = vor.u32 %v4662_v38, %v3560_v54  ;;  %v5071_v24 = vld [vmem:[%s5136_s5 + $0x6c0] sm:$0xff]  ;;  %v1251_v50 = vunpack.c.l.b16 %v419_v57 }
 0x20b   : > { %v2754_v39 = vpop.f32.mrf.mxu0  ;;  %2394 = vmatmul.bf16.gmra.mxu1 %v4331_v56  ;;  %2527 = vmatmul.bf16.gmra.mxu2 %v4335_v0  ;;  %v5908_v61 = vadd.f32 %v2751_v10, %v2619_v62  ;;  %v1248_v10 = vunpack.c.h.b16 %v5071_v24  ;;  %v1249_v56 = vunpack.c.l.b16 %v5864_v63 }
 0x20e   : > { %2793 = vmatmul.bf16.gmra.mxu0 %v4343_v49  ;;  %v2488_v46 = vpop.f32.mrf.mxu2  ;;  %3082 = vmatmul.bf16.gmra.mxu3 %v3563_v22  ;;  %v2228_v49 = vadd.f32 %v5879_v4, %v5380_v2 }
 0x20f   : > { %v2489_v36 = vadd.f32 %v2488_v46, %v2356_v29  ;;  %v1474_v29 = vpack.c.b16 %v1249_v56, %v1249_v56 }
 0x210   : > { %v2357_v35 = vpop.f32.mrf.mxu1 }
 0x211   : > { %v2622_v1 = vadd.f32 %v5854_v52, %v2489_v36  ;;  %v2358_v11 = vadd.f32 %v2357_v35, %v2225_v19  ;;  %v1473_v52 = vpack.c.b16 %v1248_v10, %v1248_v10  ;;  %v1476_v19 = vpack.c.b16 %v1251_v50, %v1251_v50  ;;  %v5924_v36 = vpop.f32.mrf.mxu3  ;;  %v4671_v10 = vld [vmem:[%s5136_s5 + $0xac] sm:$0xf]  ;;  %v4652_v50 = vld [vmem:[%s5136_s5 + $0x14] sm:$0xf] }
 0x213   : > { %v2756_v21 = vpop.f32.mrf.mxu0  ;;  %v5920_v0 = vadd.f32 %v2754_v39, %v2622_v1 }
 0x216   : > { %v2490_v59 = vpop.f32.mrf.mxu2 }
 0x217   : > { %v2491_v62 = vadd.f32 %v2490_v59, %v2358_v11  ;;  %v2230_v11 = vadd.f32 %v5879_v4, %v5396_v15  ;;  %v4658_v15 = vld [vmem:[%s5136_s5 + $0x40] sm:$0xf0] }
 0x218   : > { %v2360_v46 = vpop.f32.mrf.mxu1 }
 0x219   : > { %v2624_v35 = vadd.f32 %v5861_v42, %v2491_v62  ;;  %v2361_v63 = vadd.f32 %v2360_v46, %v2228_v49  ;;  %v5931_v38 = vpop.f32.mrf.mxu3  ;;  %v3516_v49 = vld [vmem:[%s5136_s5 + $0x34] sm:$0xf0] }
 0x21a   : > { %v3522_v62 = vld [vmem:[%s5136_s5 + $0x18] sm:$0xf] }
 0x21b   : > { %v2759_v39 = vpop.f32.mrf.mxu0  ;;  %2399 = vmatmul.bf16.gmra.mxu1 %v1473_v52  ;;  %2532 = vmatmul.bf16.gmra.mxu2 %v1474_v29  ;;  %v5927_v1 = vadd.f32 %v2756_v21, %v2624_v35  ;;  %v3596_v21 = vld [vmem:[%s5136_s5 + $0xcc] sm:$0xf0]  ;;  %v4657_v52 = vld [vmem:[%s5136_s5 + $0x38] sm:$0xf0]  ;;  %v3530_v29 = vld [vmem:[%s5136_s5 + $0x20] sm:$0xf] }
 0x21c   : > { %v3599_v56 = vor.u32 %v4671_v10, %v3596_v21 }
 0x21e   : > { %2798 = vmatmul.bf16.gmra.mxu0 %v1476_v19  ;;  %v2493_v2 = vpop.f32.mrf.mxu2  ;;  %3087 = vmatmul.bf16.gmra.mxu3 %v3599_v56  ;;  %v2233_v19 = vadd.f32 %v5879_v4, %v5404_v25 }
 0x21f   : > { %v2494_v57 = vadd.f32 %v2493_v2, %v2361_v63  ;;  %v3523_v63 = vor.u32 %v4657_v52, %v3522_v62  ;;  %v4680_v52 = vld [vmem:[%s5136_s5 + $0xf4] sm:$0xf] }
 0x220   : > { %v2362_v42 = vpop.f32.mrf.mxu1 }
 0x221   : > { %v2627_v54 = vadd.f32 %v5883_v28, %v2494_v57  ;;  %v2363_v22 = vadd.f32 %v2362_v42, %v2230_v11  ;;  %v3519_v28 = vor.u32 %v4652_v50, %v3516_v49  ;;  %v3531_v11 = vor.u32 %v4658_v15, %v3530_v29  ;;  %v5946_v57 = vpop.f32.mrf.mxu3  ;;  %v4661_v15 = vld [vmem:[%s5136_s5 + $0x5c] sm:$0xf] }
 0x223   : > { %v2761_v24 = vpop.f32.mrf.mxu0  ;;  %v5937_v59 = vadd.f32 %v2759_v39, %v2627_v54 }
 0x226   : > { %v2495_v46 = vpop.f32.mrf.mxu2 }
 0x227   : > { %v2496_v35 = vadd.f32 %v2495_v46, %v2363_v22  ;;  %v2235_v22 = vadd.f32 %v5879_v4, %v5429_v51  ;;  %v4667_v51 = vld [vmem:[%s5136_s5 + $0x88] sm:$0xf0] }
 0x228   : > { %v2365_v2 = vpop.f32.mrf.mxu1 }
 0x229   : > { %v2629_v39 = vadd.f32 %v5890_v20, %v2496_v35  ;;  %v2366_v42 = vadd.f32 %v2365_v2, %v2233_v19  ;;  %v5953_v56 = vpop.f32.mrf.mxu3  ;;  %v3552_v19 = vld [vmem:[%s5136_s5 + $0x7c] sm:$0xf0] }
 0x22a   : > { %v3558_v35 = vld [vmem:[%s5136_s5 + $0x60] sm:$0xf] }
 0x22b   : > { %v2764_v54 = vpop.f32.mrf.mxu0  ;;  %2811 = vmatmul.bf16.vlgmr.msra.gmra.mxu1 %v3519_v28  ;;  %2944 = vmatmul.bf16.vlgmr.msra.gmra.mxu2 %v3523_v63  ;;  %v5949_v10 = vadd.f32 %v2761_v24, %v2629_v39  ;;  %v3632_v24 = vld [vmem:[%s5136_s5 + $0x114] sm:$0xf0]  ;;  %v4666_v28 = vld [vmem:[%s5136_s5 + $0x80] sm:$0xf0]  ;;  %v3566_v63 = vld [vmem:[%s5136_s5 + $0x68] sm:$0xf] }
 0x22c   : > { %v3635_v29 = vor.u32 %v4680_v52, %v3632_v24 }
 0x22e   : > { %3210 = vmatmul.bf16.vlgmr.msra.gmra.mxu0 %v3531_v11  ;;  %v2498_v25 = vpop.f32.mrf.mxu2  ;;  %3092 = vmatmul.bf16.gmra.mxu3 %v3635_v29  ;;  %v2238_v11 = vadd.f32 %v5879_v4, %v5440_v60 }
 0x22f   : > { %v2499_v21 = vadd.f32 %v2498_v25, %v2366_v42  ;;  %v3559_v42 = vor.u32 %v4666_v28, %v3558_v35  ;;  %v4689_v28 = vld [vmem:[%s5136_s5 + $0x13c] sm:$0xf] }
 0x230   : > { %v2367_v20 = vpop.f32.mrf.mxu1 }
 0x231   : > { %v2632_v50 = vadd.f32 %v5905_v8, %v2499_v21  ;;  %v2368_v49 = vadd.f32 %v2367_v20, %v2235_v22  ;;  %v3555_v8 = vor.u32 %v4661_v15, %v3552_v19  ;;  %v3567_v22 = vor.u32 %v4667_v51, %v3566_v63  ;;  %v5968_v21 = vpop.f32.mrf.mxu3  ;;  %v4670_v51 = vld [vmem:[%s5136_s5 + $0xa4] sm:$0xf] }
 0x233   : > { %v2766_v62 = vpop.f32.mrf.mxu0  ;;  %v5959_v46 = vadd.f32 %v2764_v54, %v2632_v50 }
 0x236   : > { %v2500_v2 = vpop.f32.mrf.mxu2 }
 0x237   : > { %v2501_v39 = vadd.f32 %v2500_v2, %v2368_v49  ;;  %v2240_v49 = vadd.f32 %v5879_v4, %v5454_v17  ;;  %v4676_v17 = vld [vmem:[%s5136_s5 + $0xd0] sm:$0xf0] }
 0x238   : > { %v2370_v25 = vpop.f32.mrf.mxu1 }
 0x239   : > { %v2634_v54 = vadd.f32 %v5912_v18, %v2501_v39  ;;  %v2371_v20 = vadd.f32 %v2370_v25, %v2238_v11  ;;  %v5975_v29 = vpop.f32.mrf.mxu3  ;;  %v3588_v11 = vld [vmem:[%s5136_s5 + $0xc4] sm:$0xf0] }
 0x23a   : > { %v3594_v39 = vld [vmem:[%s5136_s5 + $0xa8] sm:$0xf] }
 0x23b   : > { %v2769_v50 = vpop.f32.mrf.mxu0  ;;  %2816 = vmatmul.bf16.gmra.mxu1 %v3555_v8  ;;  %2949 = vmatmul.bf16.gmra.mxu2 %v3559_v42  ;;  %v5971_v52 = vadd.f32 %v2766_v62, %v2634_v54  ;;  %v3668_v62 = vld [vmem:[%s5136_s5 + $0x15c] sm:$0xf0]  ;;  %v4675_v8 = vld [vmem:[%s5136_s5 + $0xc8] sm:$0xf0]  ;;  %v3602_v42 = vld [vmem:[%s5136_s5 + $0xb0] sm:$0xf] }
 0x23c   : > { %v3671_v63 = vor.u32 %v4689_v28, %v3668_v62 }
 0x23e   : > { %3215 = vmatmul.bf16.gmra.mxu0 %v3567_v22  ;;  %v2503_v60 = vpop.f32.mrf.mxu2  ;;  %3097 = vmatmul.bf16.gmra.mxu3 %v3671_v63  ;;  %v6463_v22 = vld [vmem:[#allocation9_spill] sm:$0xff]  ;;  %v6465_v63 = vld [vmem:[#allocation10_spill] sm:$0xff] }
 0x23f   : > { %v2504_v24 = vadd.f32 %v2503_v60, %v2371_v20  ;;  %v2243_v54 = vadd.f32 %v5879_v4, %v6463_v22  ;;  %v3595_v60 = vor.u32 %v4675_v8, %v3594_v39 }
 0x240   : > { %v2372_v18 = vpop.f32.mrf.mxu1 }
 0x241   : > { %v2637_v15 = vadd.f32 %v5924_v36, %v2504_v24  ;;  %v2373_v19 = vadd.f32 %v2372_v18, %v2240_v49  ;;  %v3591_v36 = vor.u32 %v4670_v51, %v3588_v11  ;;  %v3603_v24 = vor.u32 %v4676_v17, %v3602_v42  ;;  %v5990_v18 = vpop.f32.mrf.mxu3 }
 0x242   : > { %v2245_v51 = vadd.f32 %v5879_v4, %v6465_v63 }
 0x243   : > { %v2771_v35 = vpop.f32.mrf.mxu0  ;;  %v5981_v2 = vadd.f32 %v2769_v50, %v2637_v15 }
 0x245   : > { %6462 = vst [vmem:[#allocation14_spill] sm:$0xff] %v5981_v2 }
 0x246   : > { %v2505_v25 = vpop.f32.mrf.mxu2 }
 0x247   : > { %v2506_v20 = vadd.f32 %v2505_v25, %v2373_v19  ;;  %v4698_v25 = vld [vmem:[%s5136_s5 + $0x184] sm:$0xf] }
 0x248   : > { %v2375_v49 = vpop.f32.mrf.mxu1 }
 0x249   : > { %v2639_v50 = vadd.f32 %v5931_v38, %v2506_v20  ;;  %v2376_v15 = vadd.f32 %v2375_v49, %v2243_v54  ;;  %v5997_v39 = vpop.f32.mrf.mxu3  ;;  %v4679_v54 = vld [vmem:[%s5136_s5 + $0xec] sm:$0xf]  ;;  %v4684_v49 = vld [vmem:[%s5136_s5 + $0x110] sm:$0xf0] }
 0x24b   : > { %v2774_v28 = vpop.f32.mrf.mxu0  ;;  %2821 = vmatmul.bf16.gmra.mxu1 %v3591_v36  ;;  %2954 = vmatmul.bf16.gmra.mxu2 %v3595_v60  ;;  %v5993_v62 = vadd.f32 %v2771_v35, %v2639_v50  ;;  %v3704_v35 = vld [vmem:[%s5136_s5 + $0x1a4] sm:$0xf0]  ;;  %v3624_v36 = vld [vmem:[%s5136_s5 + $0x10c] sm:$0xf0]  ;;  %v4685_v50 = vld [vmem:[%s5136_s5 + $0x118] sm:$0xf0] }
 0x24c   : > { %v3707_v22 = vor.u32 %v4698_v25, %v3704_v35  ;;  %v3630_v60 = vld [vmem:[%s5136_s5 + $0xf0] sm:$0xf] }
 0x24d   : > { %6464 = vst [vmem:[#allocation9_spill] sm:$0xff] %v5993_v62 }
 0x24e   : > { %3220 = vmatmul.bf16.gmra.mxu0 %v3603_v24  ;;  %v2508_v19 = vpop.f32.mrf.mxu2  ;;  %v3638_v24 = vld [vmem:[%s5136_s5 + $0xf8] sm:$0xf]  ;;  %3102 = vmatmul.bf16.gmra.mxu3 %v3707_v22  ;;  %v6469_v22 = vld [vmem:[#allocation12_spill] sm:$0xff] }
 0x24f   : > { %v2509_v11 = vadd.f32 %v2508_v19, %v2376_v15  ;;  %v6467_v19 = vld [vmem:[#allocation11_spill] sm:$0xff] }
 0x250   : > { %v2377_v38 = vpop.f32.mrf.mxu1  ;;  %v2248_v63 = vadd.f32 %v5879_v4, %v6467_v19  ;;  %v4688_v19 = vld [vmem:[%s5136_s5 + $0x134] sm:$0xf] }
 0x251   : > { %v2642_v8 = vadd.f32 %v5946_v57, %v2509_v11  ;;  %v2378_v42 = vadd.f32 %v2377_v38, %v2245_v51  ;;  %v3627_v57 = vor.u32 %v4679_v54, %v3624_v36  ;;  %v3631_v51 = vor.u32 %v4684_v49, %v3630_v60  ;;  %v6012_v2 = vpop.f32.mrf.mxu3 }
 0x252   : > { %v3639_v38 = vor.u32 %v4685_v50, %v3638_v24  ;;  %v2250_v54 = vadd.f32 %v5879_v4, %v6469_v22  ;;  %v4707_v50 = vld [vmem:[%s5136_s5 + $0x1cc] sm:$0xf] }
 0x253   : > { %v2776_v17 = vpop.f32.mrf.mxu0  ;;  %v6003_v20 = vadd.f32 %v2774_v28, %v2642_v8 }
 0x255   : > { %6466 = vst [vmem:[#allocation10_spill] sm:$0xff] %v6003_v20 }
 0x256   : > { %v2510_v15 = vpop.f32.mrf.mxu2 }
 0x257   : > { %v2511_v62 = vadd.f32 %v2510_v15, %v2378_v42 }
 0x258   : > { %v2380_v11 = vpop.f32.mrf.mxu1 }
 0x259   : > { %v2644_v28 = vadd.f32 %v5953_v56, %v2511_v62  ;;  %v2381_v8 = vadd.f32 %v2380_v11, %v2248_v63  ;;  %v6019_v62 = vpop.f32.mrf.mxu3  ;;  %v4693_v11 = vld [vmem:[%s5136_s5 + $0x158] sm:$0xf0] }
 0x25b   : > { %v2779_v25 = vpop.f32.mrf.mxu0  ;;  %2826 = vmatmul.bf16.gmra.mxu1 %v3627_v57  ;;  %2959 = vmatmul.bf16.gmra.mxu2 %v3631_v51  ;;  %v6015_v35 = vadd.f32 %v2776_v17, %v2644_v28  ;;  %v3740_v17 = vld [vmem:[%s5136_s5 + $0x1ec] sm:$0xf0]  ;;  %v3660_v57 = vld [vmem:[%s5136_s5 + $0x154] sm:$0xf0]  ;;  %v4694_v28 = vld [vmem:[%s5136_s5 + $0x160] sm:$0xf0] }
 0x25c   : > { %v3743_v15 = vor.u32 %v4707_v50, %v3740_v17  ;;  %v3666_v51 = vld [vmem:[%s5136_s5 + $0x138] sm:$0xf] }
 0x25d   : > { %6468 = vst [vmem:[#allocation11_spill] sm:$0xff] %v6015_v35 }
 0x25e   : > { %3225 = vmatmul.bf16.gmra.mxu0 %v3639_v38  ;;  %v2513_v42 = vpop.f32.mrf.mxu2  ;;  %v3674_v38 = vld [vmem:[%s5136_s5 + $0x140] sm:$0xf]  ;;  %3107 = vmatmul.bf16.gmra.mxu3 %v3743_v15  ;;  %v6473_v15 = vld [vmem:[#allocation3_spill] sm:$0xff] }
 0x25f   : > { %v2514_v36 = vadd.f32 %v2513_v42, %v2381_v8  ;;  %v6471_v42 = vld [vmem:[#allocation2_spill] sm:$0xff] }
 0x260   : > { %v2382_v56 = vpop.f32.mrf.mxu1  ;;  %v2253_v22 = vadd.f32 %v5879_v4, %v6471_v42  ;;  %v4697_v42 = vld [vmem:[%s5136_s5 + $0x17c] sm:$0xf] }
 0x261   : > { %v2647_v60 = vadd.f32 %v5968_v21, %v2514_v36  ;;  %v2383_v49 = vadd.f32 %v2382_v56, %v2250_v54  ;;  %v3663_v21 = vor.u32 %v4688_v19, %v3660_v57  ;;  %v3667_v54 = vor.u32 %v4693_v11, %v3666_v51  ;;  %v6034_v20 = vpop.f32.mrf.mxu3 }
 0x262   : > { %v3675_v56 = vor.u32 %v4694_v28, %v3674_v38  ;;  %v2255_v19 = vadd.f32 %v5879_v4, %v6473_v15  ;;  %v4716_v28 = vld [vmem:[%s5136_s5 + $0x214] sm:$0xf] }
 0x263   : > { %v2781_v24 = vpop.f32.mrf.mxu0  ;;  %v6025_v63 = vadd.f32 %v2779_v25, %v2647_v60 }
 0x265   : > { %6470 = vst [vmem:[#allocation12_spill] sm:$0xff] %v6025_v63 }
 0x266   : > { %v2515_v8 = vpop.f32.mrf.mxu2 }
 0x267   : > { %v2516_v35 = vadd.f32 %v2515_v8, %v2383_v49 }
 0x268   : > { %v2385_v36 = vpop.f32.mrf.mxu1 }
 0x269   : > { %v2649_v25 = vadd.f32 %v5975_v29, %v2516_v35  ;;  %v2386_v60 = vadd.f32 %v2385_v36, %v2253_v22  ;;  %v6041_v35 = vpop.f32.mrf.mxu3  ;;  %v4702_v36 = vld [vmem:[%s5136_s5 + $0x1a0] sm:$0xf0] }
 0x26b   : > { %v2784_v50 = vpop.f32.mrf.mxu0  ;;  %2831 = vmatmul.bf16.gmra.mxu1 %v3663_v21  ;;  %2964 = vmatmul.bf16.gmra.mxu2 %v3667_v54  ;;  %v6037_v17 = vadd.f32 %v2781_v24, %v2649_v25  ;;  %v3776_v24 = vld [vmem:[%s5136_s5 + $0x234] sm:$0xf0]  ;;  %v3696_v21 = vld [vmem:[%s5136_s5 + $0x19c] sm:$0xf0]  ;;  %v4703_v25 = vld [vmem:[%s5136_s5 + $0x1a8] sm:$0xf0] }
 0x26c   : > { %v3779_v8 = vor.u32 %v4716_v28, %v3776_v24  ;;  %v3702_v54 = vld [vmem:[%s5136_s5 + $0x180] sm:$0xf] }
 0x26d   : > { %6472 = vst [vmem:[#allocation2_spill] sm:$0xff] %v6037_v17 }
 0x26e   : > { %3230 = vmatmul.bf16.gmra.mxu0 %v3675_v56  ;;  %v2518_v49 = vpop.f32.mrf.mxu2  ;;  %v3710_v56 = vld [vmem:[%s5136_s5 + $0x188] sm:$0xf]  ;;  %3112 = vmatmul.bf16.gmra.mxu3 %v3779_v8  ;;  %v6476_v8 = vld [vmem:[#allocation5_spill] sm:$0xff] }
 0x26f   : > { %v2519_v57 = vadd.f32 %v2518_v49, %v2386_v60  ;;  %v6474_v49 = vld [vmem:[#allocation4_spill] sm:$0xff] }
 0x270   : > { %v2387_v29 = vpop.f32.mrf.mxu1  ;;  %v2258_v15 = vadd.f32 %v5879_v4, %v6474_v49  ;;  %v4706_v49 = vld [vmem:[%s5136_s5 + $0x1c4] sm:$0xf] }
 0x271   : > { %v2652_v51 = vadd.f32 %v5990_v18, %v2519_v57  ;;  %v2388_v11 = vadd.f32 %v2387_v29, %v2255_v19  ;;  %v3699_v18 = vor.u32 %v4697_v42, %v3696_v21  ;;  %v3703_v19 = vor.u32 %v4702_v36, %v3702_v54  ;;  %v6056_v63 = vpop.f32.mrf.mxu3 }
 0x272   : > { %v3711_v29 = vor.u32 %v4703_v25, %v3710_v56  ;;  %v2260_v42 = vadd.f32 %v5879_v4, %v6476_v8  ;;  %v4725_v25 = vld [vmem:[%s5136_s5 + $0x25c] sm:$0xf] }
 0x273   : > { %v2786_v38 = vpop.f32.mrf.mxu0  ;;  %v6047_v22 = vadd.f32 %v2784_v50, %v2652_v51 }
 0x276   : > { %v2520_v60 = vpop.f32.mrf.mxu2 }
 0x277   : > { %v2521_v17 = vadd.f32 %v2520_v60, %v2388_v11  ;;  %v3812_v60 = vld [vmem:[%s5136_s5 + $0x27c] sm:$0xf0] }
 0x278   : > { %v2390_v57 = vpop.f32.mrf.mxu1 }
 0x279   : > { %v2654_v50 = vadd.f32 %v5997_v39, %v2521_v17  ;;  %v2391_v51 = vadd.f32 %v2390_v57, %v2258_v15  ;;  %v2668_v17 = vpop.f32.mrf.mxu3  ;;  %v4711_v57 = vld [vmem:[%s5136_s5 + $0x1e8] sm:$0xf0] }
 0x27b   : > { %v2789_v28 = vpop.f32.mrf.mxu0  ;;  %2836 = vmatmul.bf16.gmra.mxu1 %v3699_v18  ;;  %2969 = vmatmul.bf16.gmra.mxu2 %v3703_v19  ;;  %v6059_v24 = vadd.f32 %v2786_v38, %v2654_v50  ;;  %v3815_v38 = vor.u32 %v4725_v25, %v3812_v60  ;;  %v3732_v18 = vld [vmem:[%s5136_s5 + $0x1e4] sm:$0xf0]  ;;  %v4712_v50 = vld [vmem:[%s5136_s5 + $0x1f0] sm:$0xf0] }
 0x27c   : > { %v3738_v19 = vld [vmem:[%s5136_s5 + $0x1c8] sm:$0xf] }
 0x27d   : > { %6475 = vst [vmem:[#allocation3_spill] sm:$0xff] %v6059_v24 }
 0x27e   : > { %3235 = vmatmul.bf16.gmra.mxu0 %v3711_v29  ;;  %v2523_v11 = vpop.f32.mrf.mxu2  ;;  %v3746_v29 = vld [vmem:[%s5136_s5 + $0x1d0] sm:$0xf]  ;;  %3117 = vmatmul.bf16.gmra.mxu3 %v3815_v38  ;;  %v6479_v38 = vld [vmem:[#allocation7_spill] sm:$0xff] }
 0x27f   : > { %v2524_v21 = vadd.f32 %v2523_v11, %v2391_v51  ;;  %v6477_v51 = vld [vmem:[#allocation6_spill] sm:$0xff] }
 0x280   : > { %v2392_v39 = vpop.f32.mrf.mxu1  ;;  %v2263_v11 = vadd.f32 %v5879_v4, %v6477_v51  ;;  %v4715_v51 = vld [vmem:[%s5136_s5 + $0x20c] sm:$0xf] }
 0x281   : > { %v2657_v54 = vadd.f32 %v6012_v2, %v2524_v21  ;;  %v2393_v36 = vadd.f32 %v2392_v39, %v2260_v42  ;;  %v3735_v2 = vor.u32 %v4706_v49, %v3732_v18  ;;  %v3739_v42 = vor.u32 %v4711_v57, %v3738_v19  ;;  %v6076_v24 = vpop.f32.mrf.mxu3 }
 0x282   : > { %v3747_v39 = vor.u32 %v4712_v50, %v3746_v29  ;;  %v2265_v49 = vadd.f32 %v5879_v4, %v6479_v38 }
 0x283   : > { %v2791_v56 = vpop.f32.mrf.mxu0  ;;  %v6067_v15 = vadd.f32 %v2789_v28, %v2657_v54 }
 0x286   : > { %v2525_v8 = vpop.f32.mrf.mxu2 }
 0x287   : > { %v2526_v17 = vadd.f32 %v2525_v8, %v2393_v36  ;;  %v4734_v8 = vld [vmem:[%s5136_s5 + $0x2a4] sm:$0xf] }
 0x288   : > { %v2395_v21 = vpop.f32.mrf.mxu1 }
 0x289   : > { %v2659_v28 = vadd.f32 %v6019_v62, %v2526_v17  ;;  %v2396_v54 = vadd.f32 %v2395_v21, %v2263_v11  ;;  %v6083_v19 = vpop.f32.mrf.mxu3  ;;  %v4720_v21 = vld [vmem:[%s5136_s5 + $0x230] sm:$0xf0] }
 0x28b   : > { %v2794_v25 = vpop.f32.mrf.mxu0  ;;  %2841 = vmatmul.bf16.gmra.mxu1 %v3735_v2  ;;  %2974 = vmatmul.bf16.gmra.mxu2 %v3739_v42  ;;  %v6079_v60 = vadd.f32 %v2791_v56, %v2659_v28  ;;  %v3848_v56 = vld [vmem:[%s5136_s5 + $0x2c4] sm:$0xf0]  ;;  %v3768_v2 = vld [vmem:[%s5136_s5 + $0x22c] sm:$0xf0]  ;;  %v4721_v28 = vld [vmem:[%s5136_s5 + $0x238] sm:$0xf0] }
 0x28c   : > { %v3851_v11 = vor.u32 %v4734_v8, %v3848_v56  ;;  %v3774_v42 = vld [vmem:[%s5136_s5 + $0x210] sm:$0xf] }
 0x28d   : > { %6478 = vst [vmem:[#allocation4_spill] sm:$0xff] %v6079_v60 }
 0x28e   : > { %3240 = vmatmul.bf16.gmra.mxu0 %v3747_v39  ;;  %v2528_v36 = vpop.f32.mrf.mxu2  ;;  %v3782_v39 = vld [vmem:[%s5136_s5 + $0x218] sm:$0xf]  ;;  %3122 = vmatmul.bf16.gmra.mxu3 %v3851_v11 }
 0x28f   : > { %v2529_v18 = vadd.f32 %v2528_v36, %v2396_v54  ;;  %v6480_v36 = vld [vmem:[#allocation8_spill] sm:$0xff] }
 0x290   : > { %v2397_v62 = vpop.f32.mrf.mxu1  ;;  %v2268_v38 = vadd.f32 %v5879_v4, %v6480_v36  ;;  %v3804_v36 = vld [vmem:[%s5136_s5 + $0x274] sm:$0xf0] }
 0x291   : > { %v2662_v57 = vadd.f32 %v6034_v20, %v2529_v18  ;;  %v2398_v29 = vadd.f32 %v2397_v62, %v2265_v49  ;;  %v3771_v20 = vor.u32 %v4715_v51, %v3768_v2  ;;  %v3775_v49 = vor.u32 %v4720_v21, %v3774_v42  ;;  %v6098_v8 = vpop.f32.mrf.mxu3  ;;  %v3884_v21 = vld [vmem:[%s5136_s5 + $0x30c] sm:$0xf0] }
 0x292   : > { %v3783_v62 = vor.u32 %v4721_v28, %v3782_v39  ;;  %v4724_v39 = vld [vmem:[%s5136_s5 + $0x254] sm:$0xf] }
 0x293   : > { %v2796_v50 = vpop.f32.mrf.mxu0  ;;  %v6089_v17 = vadd.f32 %v2794_v25, %v2662_v57 }
 0x296   : > { %v2530_v54 = vpop.f32.mrf.mxu2 }
 0x297   : > { %v2531_v60 = vadd.f32 %v2530_v54, %v2398_v29 }
 0x298   : > { %v2400_v18 = vpop.f32.mrf.mxu1 }
 0x299   : > { %v2664_v25 = vadd.f32 %v6041_v35, %v2531_v60  ;;  %v2401_v57 = vadd.f32 %v2400_v18, %v2268_v38  ;;  %v6103_v2 = vpop.f32.mrf.mxu3  ;;  %v4743_v60 = vld [vmem:[%s5136_s5 + $0x2ec] sm:$0xf]  ;;  %v4729_v38 = vld [vmem:[%s5136_s5 + $0x278] sm:$0xf0] }
 0x29a   : > { %v3887_v28 = vor.u32 %v4743_v60, %v3884_v21 }
 0x29b   : > { %v2799_v56 = vpop.f32.mrf.mxu0  ;;  %2846 = vmatmul.bf16.gmra.mxu1 %v3771_v20  ;;  %2979 = vmatmul.bf16.gmra.mxu2 %v3775_v49  ;;  %v6101_v4 = vadd.f32 %v2796_v50, %v2664_v25  ;;  %v3810_v50 = vld [vmem:[%s5136_s5 + $0x258] sm:$0xf]  ;;  %v3818_v20 = vld [vmem:[%s5136_s5 + $0x260] sm:$0xf]  ;;  %v4730_v49 = vld [vmem:[%s5136_s5 + $0x280] sm:$0xf0] }
 0x29c   : > { %v3811_v25 = vor.u32 %v4729_v38, %v3810_v50  ;;  %v4733_v38 = vld [vmem:[%s5136_s5 + $0x29c] sm:$0xf] }
 0x29d   : > { %6481 = vst [vmem:[#allocation5_spill] sm:$0xff] %v6101_v4 }
 0x29e   : > { %3245 = vmatmul.bf16.gmra.mxu0 %v3783_v62  ;;  %v2533_v29 = vpop.f32.mrf.mxu2  ;;  %3127 = vmatmul.bf16.gmra.mxu3 %v3887_v28  ;;  %v3807_v62 = vor.u32 %v4724_v39, %v3804_v36  ;;  %v4752_v28 = vld [vmem:[%s5136_s5 + $0x334] sm:$0xf]  ;;  %v3920_v36 = vld [vmem:[%s5136_s5 + $0x354] sm:$0xf0] }
 0x29f   : > { %v2534_v51 = vadd.f32 %v2533_v29, %v2401_v57 }
 0x2a0   : > { %v2402_v11 = vpop.f32.mrf.mxu1 }
 0x2a1   : > { %v2667_v42 = vadd.f32 %v6056_v63, %v2534_v51  ;;  %v3819_v63 = vor.u32 %v4730_v49, %v3818_v20  ;;  %v6116_v29 = vpop.f32.mrf.mxu3  ;;  %v3923_v20 = vor.u32 %v4752_v28, %v3920_v36  ;;  %v3840_v49 = vld [vmem:[%s5136_s5 + $0x2bc] sm:$0xf0] }
 0x2a3   : > { %v2801_v35 = vpop.f32.mrf.mxu0  ;;  %v6109_v54 = vadd.f32 %v2799_v56, %v2667_v42 }
 0x2a5   : > { %6482 = vst [vmem:[#allocation6_spill] sm:$0xff] %v6109_v54 }
 0x2a6   : > { %v2535_v18 = vpop.f32.mrf.mxu2 }
 0x2a7   : > { %v3846_v18 = vld [vmem:[%s5136_s5 + $0x2a0] sm:$0xf] }
 0x2a8   : > { %v2812_v57 = vpop.f32.mrf.mxu1 }
 0x2a9   : > { %v2813_v56 = vadd.f32 %v2812_v57, %v5533_v58  ;;  %v6119_v60 = vpop.f32.mrf.mxu3  ;;  %v4739_v57 = vld [vmem:[%s5136_s5 + $0x2c8] sm:$0xf0] }
 0x2ab   : > { %v3211_v51 = vpop.f32.mrf.mxu0  ;;  %2851 = vmatmul.bf16.gmra.mxu1 %v3807_v62  ;;  %2984 = vmatmul.bf16.gmra.mxu2 %v3811_v25  ;;  %v4738_v62 = vld [vmem:[%s5136_s5 + $0x2c0] sm:$0xf0]  ;;  %v3854_v25 = vld [vmem:[%s5136_s5 + $0x2a8] sm:$0xf] }
 0x2ac   : > { %v3855_v54 = vor.u32 %v4739_v57, %v3854_v25  ;;  %v3876_v25 = vld [vmem:[%s5136_s5 + $0x304] sm:$0xf0] }
 0x2ae   : > { %3250 = vmatmul.bf16.gmra.mxu0 %v3819_v63  ;;  %v2945_v11 = vpop.f32.mrf.mxu2  ;;  %3132 = vmatmul.bf16.gmra.mxu3 %v3923_v20 }
 0x2af   : > { %v2946_v42 = vadd.f32 %v2945_v11, %v2813_v56  ;;  %v3843_v11 = vor.u32 %v4733_v38, %v3840_v49  ;;  %v4761_v49 = vld [vmem:[%s5136_s5 + $0x37c] sm:$0xf] }
 0x2b0   : > { %v2814_v35 = vpop.f32.mrf.mxu1 }
 0x2b1   : > { %v3079_v21 = vadd.f32 %v6076_v24, %v2946_v42  ;;  %v2815_v58 = vadd.f32 %v2814_v35, %v5545_v43  ;;  %v3847_v24 = vor.u32 %v4738_v62, %v3846_v18  ;;  %v6132_v4 = vpop.f32.mrf.mxu3  ;;  %v3956_v18 = vld [vmem:[%s5136_s5 + $0x39c] sm:$0xf0] }
 0x2b2   : > { %v3959_v57 = vor.u32 %v4761_v49, %v3956_v18 }
 0x2b3   : > { %v3213_v39 = vpop.f32.mrf.mxu0  ;;  %v3212_v50 = vadd.f32 %v3211_v51, %v3079_v21 }
 0x2b5   : > { %4972 = vtanh.f32 %v3212_v50 }
 0x2b6   : > { %v2947_v63 = vpop.f32.mrf.mxu2 }
 0x2b7   : > { %v2948_v56 = vadd.f32 %v2947_v63, %v2815_v58  ;;  %v4742_v58 = vld [vmem:[%s5136_s5 + $0x2e4] sm:$0xf]  ;;  %v4747_v63 = vld [vmem:[%s5136_s5 + $0x308] sm:$0xf0] }
 0x2b8   : > { %v2817_v42 = vpop.f32.mrf.mxu1 }
 0x2b9   : > { %v3081_v43 = vadd.f32 %v6083_v19, %v2948_v56  ;;  %v2818_v28 = vadd.f32 %v2817_v42, %v5555_v53  ;;  %v6142_v38 = vpop.f32.mrf.mxu3  ;;  %v3882_v53 = vld [vmem:[%s5136_s5 + $0x2e8] sm:$0xf] }
 0x2bb   : > { %v3216_v51 = vpop.f32.mrf.mxu0  ;;  %v4973_v35 = vpop.eup %4972  ;;  %v3214_v21 = vadd.f32 %v3213_v39, %v3081_v43  ;;  %2856 = vmatmul.bf16.gmra.mxu1 %v3843_v11  ;;  %2989 = vmatmul.bf16.gmra.mxu2 %v3847_v24  ;;  %v3890_v11 = vld [vmem:[%s5136_s5 + $0x2f0] sm:$0xf]  ;;  %v4748_v24 = vld [vmem:[%s5136_s5 + $0x310] sm:$0xf0]  ;;  %v3879_v43 = vor.u32 %v4742_v58, %v3876_v25  ;;  %v4770_v58 = vld [vmem:[%s5136_s5 + $0x3c4] sm:$0xf] }
 0x2bc   : > { %3384 = vst [vmem:[%s6137_s25] sm:$0xff] %v4973_v35  ;;  %v3883_v35 = vor.u32 %v4747_v63, %v3882_v53  ;;  %v3992_v25 = vld [vmem:[%s5136_s5 + $0x3e4] sm:$0xf0]  ;;  %v4751_v63 = vld [vmem:[%s5136_s5 + $0x32c] sm:$0xf] }
 0x2bd   : > { %4974 = vtanh.f32 %v3214_v21 }
 0x2be   : > { %3255 = vmatmul.bf16.gmra.mxu0 %v3855_v54  ;;  %v2950_v36 = vpop.f32.mrf.mxu2  ;;  %3137 = vmatmul.bf16.gmra.mxu3 %v3959_v57 }
 0x2bf   : > { %v2951_v50 = vadd.f32 %v2950_v36, %v2818_v28  ;;  %v3891_v28 = vor.u32 %v4748_v24, %v3890_v11  ;;  %v3995_v11 = vor.u32 %v4770_v58, %v3992_v25  ;;  %v4756_v24 = vld [vmem:[%s5136_s5 + $0x350] sm:$0xf0] }
 0x2c0   : > { %v2819_v19 = vpop.f32.mrf.mxu1 }
 0x2c1   : > { %v3084_v39 = vadd.f32 %v6098_v8, %v2951_v50  ;;  %v2820_v56 = vadd.f32 %v2819_v19, %v5567_v12 }
 0x2c3   : > { %v3218_v20 = vpop.f32.mrf.mxu0  ;;  %v4975_v62 = vpop.eup %4974  ;;  %v3217_v54 = vadd.f32 %v3216_v51, %v3084_v39 }
 0x2c4   : > { %3385 = vst [vmem:[%s6137_s25 + $0x8] sm:$0xff] %v4975_v62  ;;  %v6155_v51 = vpop.f32.mrf.mxu3 }
 0x2c5   : > { %4976 = vtanh.f32 %v3217_v54 }
 0x2c6   : > { %v2952_v42 = vpop.f32.mrf.mxu2 }
 0x2c7   : > { %v2953_v8 = vadd.f32 %v2952_v42, %v2820_v56  ;;  %v3912_v56 = vld [vmem:[%s5136_s5 + $0x34c] sm:$0xf0] }
 0x2c8   : > { %v2822_v21 = vpop.f32.mrf.mxu1 }
 0x2c9   : > { %v3086_v36 = vadd.f32 %v6103_v2, %v2953_v8  ;;  %v2823_v12 = vadd.f32 %v2822_v21, %v5583_v7  ;;  %v3918_v7 = vld [vmem:[%s5136_s5 + $0x330] sm:$0xf]  ;;  %v3926_v8 = vld [vmem:[%s5136_s5 + $0x338] sm:$0xf]  ;;  %v3915_v21 = vor.u32 %v4751_v63, %v3912_v56 }
 0x2cb   : > { %v3221_v50 = vpop.f32.mrf.mxu0  ;;  %v4977_v39 = vpop.eup %4976  ;;  %v3219_v49 = vadd.f32 %v3218_v20, %v3086_v36  ;;  %2861 = vmatmul.bf16.gmra.mxu1 %v3879_v43  ;;  %2994 = vmatmul.bf16.gmra.mxu2 %v3883_v35  ;;  %v4757_v43 = vld [vmem:[%s5136_s5 + $0x358] sm:$0xf0] }
 0x2cc   : > { %3386 = vst [vmem:[%s6137_s25 + $0x10] sm:$0xff] %v4977_v39  ;;  %v6160_v62 = vpop.f32.mrf.mxu3  ;;  %v3927_v39 = vor.u32 %v4757_v43, %v3926_v8  ;;  %v3962_v43 = vld [vmem:[%s5136_s5 + $0x380] sm:$0xf] }
 0x2cd   : > { %4978 = vtanh.f32 %v3219_v49 }
 0x2ce   : > { %3260 = vmatmul.bf16.gmra.mxu0 %v3891_v28  ;;  %v2955_v19 = vpop.f32.mrf.mxu2  ;;  %3142 = vmatmul.bf16.gmra.mxu3 %v3995_v11  ;;  %v3919_v28 = vor.u32 %v4756_v24, %v3918_v7  ;;  %v4760_v11 = vld [vmem:[%s5136_s5 + $0x374] sm:$0xf]  ;;  %v3948_v7 = vld [vmem:[%s5136_s5 + $0x394] sm:$0xf0] }
 0x2cf   : > { %v2956_v18 = vadd.f32 %v2955_v19, %v2823_v12 }
 0x2d0   : > { %v2824_v2 = vpop.f32.mrf.mxu1 }
 0x2d1   : > { %v3089_v20 = vadd.f32 %v6116_v29, %v2956_v18  ;;  %v2825_v42 = vadd.f32 %v2824_v2, %v5598_v23 }
 0x2d3   : > { %v3223_v54 = vpop.f32.mrf.mxu0  ;;  %v4979_v57 = vpop.eup %4978  ;;  %v3222_v53 = vadd.f32 %v3221_v50, %v3089_v20 }
 0x2d4   : > { %3387 = vst [vmem:[%s6137_s25 + $0x18] sm:$0xff] %v4979_v57  ;;  %v6173_v50 = vpop.f32.mrf.mxu3  ;;  %v4779_v57 = vld [vmem:[%s5136_s5 + $0x40c] sm:$0xf] }
 0x2d5   : > { %4980 = vtanh.f32 %v3222_v53  ;;  %v4028_v53 = vld [vmem:[%s5136_s5 + $0x42c] sm:$0xf0] }
 0x2d6   : > { %v2957_v35 = vpop.f32.mrf.mxu2  ;;  %v4031_v24 = vor.u32 %v4779_v57, %v4028_v53  ;;  %v4788_v57 = vld [vmem:[%s5136_s5 + $0x454] sm:$0xf]  ;;  %v4064_v53 = vld [vmem:[%s5136_s5 + $0x474] sm:$0xf0] }
 0x2d7   : > { %v2958_v29 = vadd.f32 %v2957_v35, %v2825_v42  ;;  %v4765_v42 = vld [vmem:[%s5136_s5 + $0x398] sm:$0xf0]  ;;  %v4766_v35 = vld [vmem:[%s5136_s5 + $0x3a0] sm:$0xf0] }
 0x2d8   : > { %v2827_v36 = vpop.f32.mrf.mxu1 }
 0x2d9   : > { %v3091_v49 = vadd.f32 %v6119_v60, %v2958_v29  ;;  %v2828_v23 = vadd.f32 %v2827_v36, %v5611_v16  ;;  %v3954_v16 = vld [vmem:[%s5136_s5 + $0x378] sm:$0xf] }
 0x2db   : > { %v3226_v12 = vpop.f32.mrf.mxu0  ;;  %v4981_v19 = vpop.eup %4980  ;;  %v3224_v18 = vadd.f32 %v3223_v54, %v3091_v49  ;;  %2866 = vmatmul.bf16.gmra.mxu1 %v3915_v21  ;;  %2999 = vmatmul.bf16.gmra.mxu2 %v3919_v28  ;;  %v3951_v21 = vor.u32 %v4760_v11, %v3948_v7  ;;  %v3955_v28 = vor.u32 %v4765_v42, %v3954_v16  ;;  %v4769_v11 = vld [vmem:[%s5136_s5 + $0x3bc] sm:$0xf]  ;;  %v3984_v7 = vld [vmem:[%s5136_s5 + $0x3dc] sm:$0xf0]  ;;  %v4774_v16 = vld [vmem:[%s5136_s5 + $0x3e0] sm:$0xf0] }
 0x2dc   : > { %3388 = vst [vmem:[%s6137_s25 + $0x20] sm:$0xff] %v4981_v19  ;;  %v6178_v58 = vpop.f32.mrf.mxu3 }
 0x2dd   : > { %4982 = vtanh.f32 %v3224_v18 }
 0x2de   : > { %3265 = vmatmul.bf16.gmra.mxu0 %v3927_v39  ;;  %v2960_v2 = vpop.f32.mrf.mxu2  ;;  %3147 = vmatmul.bf16.gmra.mxu3 %v4031_v24  ;;  %v3963_v39 = vor.u32 %v4766_v35, %v3962_v43  ;;  %v4067_v24 = vor.u32 %v4788_v57, %v4064_v53  ;;  %v4775_v43 = vld [vmem:[%s5136_s5 + $0x3e8] sm:$0xf0] }
 0x2df   : > { %v2961_v20 = vadd.f32 %v2960_v2, %v2828_v23 }
 0x2e0   : > { %v2829_v60 = vpop.f32.mrf.mxu1 }
 0x2e1   : > { %v3094_v54 = vadd.f32 %v6132_v4, %v2961_v20  ;;  %v2830_v8 = vadd.f32 %v2829_v60, %v5623_v41 }
 0x2e3   : > { %v3228_v25 = vpop.f32.mrf.mxu0  ;;  %v4983_v63 = vpop.eup %4982  ;;  %v3227_v56 = vadd.f32 %v3226_v12, %v3094_v54 }
 0x2e4   : > { %3389 = vst [vmem:[%s6137_s25 + $0x28] sm:$0xff] %v4983_v63  ;;  %v6191_v49 = vpop.f32.mrf.mxu3 }
 0x2e5   : > { %4984 = vtanh.f32 %v3227_v56 }
 0x2e6   : > { %v2962_v29 = vpop.f32.mrf.mxu2 }
 0x2e7   : > { %v2963_v4 = vadd.f32 %v2962_v29, %v2830_v8  ;;  %v3998_v8 = vld [vmem:[%s5136_s5 + $0x3c8] sm:$0xf]  ;;  %v3987_v29 = vor.u32 %v4769_v11, %v3984_v7  ;;  %v4783_v7 = vld [vmem:[%s5136_s5 + $0x428] sm:$0xf0] }
 0x2e8   : > { %v2832_v36 = vpop.f32.mrf.mxu1 }
 0x2e9   : > { %v3096_v12 = vadd.f32 %v6142_v38, %v2963_v4  ;;  %v2833_v41 = vadd.f32 %v2832_v36, %v5633_v5  ;;  %v3990_v5 = vld [vmem:[%s5136_s5 + $0x3c0] sm:$0xf] }
 0x2ea   : > { %v3991_v4 = vor.u32 %v4774_v16, %v3990_v5  ;;  %v4034_v5 = vld [vmem:[%s5136_s5 + $0x410] sm:$0xf]  ;;  %v4784_v16 = vld [vmem:[%s5136_s5 + $0x430] sm:$0xf0] }
 0x2eb   : > { %v3231_v19 = vpop.f32.mrf.mxu0  ;;  %v4985_v18 = vpop.eup %4984  ;;  %v3229_v23 = vadd.f32 %v3228_v25, %v3096_v12  ;;  %2871 = vmatmul.bf16.gmra.mxu1 %v3951_v21  ;;  %3004 = vmatmul.bf16.gmra.mxu2 %v3955_v28  ;;  %v3999_v28 = vor.u32 %v4775_v43, %v3998_v8 }
 0x2ec   : > { %3390 = vst [vmem:[%s6137_s25 + $0x30] sm:$0xff] %v4985_v18  ;;  %v6196_v60 = vpop.f32.mrf.mxu3 }
 0x2ed   : > { %4986 = vtanh.f32 %v3229_v23 }
 0x2ee   : > { %3270 = vmatmul.bf16.gmra.mxu0 %v3963_v39  ;;  %v2965_v2 = vpop.f32.mrf.mxu2  ;;  %3152 = vmatmul.bf16.gmra.mxu3 %v4067_v24 }
 0x2ef   : > { %v2966_v20 = vadd.f32 %v2965_v2, %v2833_v41 }
 0x2f0   : > { %v2834_v38 = vpop.f32.mrf.mxu1 }
 0x2f1   : > { %v3099_v54 = vadd.f32 %v6155_v51, %v2966_v20  ;;  %v2835_v42 = vadd.f32 %v2834_v38, %v5645_v45 }
 0x2f3   : > { %v3233_v25 = vpop.f32.mrf.mxu0  ;;  %v4987_v63 = vpop.eup %4986  ;;  %v3232_v56 = vadd.f32 %v3231_v19, %v3099_v54  ;;  %v4797_v54 = vld [vmem:[%s5136_s5 + $0x49c] sm:$0xf] }
 0x2f4   : > { %3391 = vst [vmem:[%s6137_s25 + $0x38] sm:$0xff] %v4987_v63  ;;  %v6209_v36 = vpop.f32.mrf.mxu3  ;;  %v4778_v63 = vld [vmem:[%s5136_s5 + $0x404] sm:$0xf] }
 0x2f5   : > { %4988 = vtanh.f32 %v3232_v56  ;;  %v4020_v56 = vld [vmem:[%s5136_s5 + $0x424] sm:$0xf0] }
 0x2f6   : > { %v2967_v35 = vpop.f32.mrf.mxu2  ;;  %v4023_v8 = vor.u32 %v4778_v63, %v4020_v56  ;;  %v4070_v56 = vld [vmem:[%s5136_s5 + $0x458] sm:$0xf] }
 0x2f7   : > { %v2968_v51 = vadd.f32 %v2967_v35, %v2835_v42 }
 0x2f8   : > { %v2837_v21 = vpop.f32.mrf.mxu1 }
 0x2f9   : > { %v3101_v39 = vadd.f32 %v6160_v62, %v2968_v51  ;;  %v2838_v45 = vadd.f32 %v2837_v21, %v5658_v40  ;;  %v4026_v40 = vld [vmem:[%s5136_s5 + $0x408] sm:$0xf]  ;;  %v4035_v51 = vor.u32 %v4784_v16, %v4034_v5 }
 0x2fa   : > { %v4027_v43 = vor.u32 %v4783_v7, %v4026_v40 }
 0x2fb   : > { %v3236_v12 = vpop.f32.mrf.mxu0  ;;  %v4989_v19 = vpop.eup %4988  ;;  %v3234_v18 = vadd.f32 %v3233_v25, %v3101_v39  ;;  %2876 = vmatmul.bf16.gmra.mxu1 %v3987_v29  ;;  %3009 = vmatmul.bf16.gmra.mxu2 %v3991_v4  ;;  %v4100_v25 = vld [vmem:[%s5136_s5 + $0x4bc] sm:$0xf0] }
 0x2fc   : > { %3392 = vst [vmem:[%s6137_s25 + $0x40] sm:$0xff] %v4989_v19  ;;  %v6214_v2 = vpop.f32.mrf.mxu3  ;;  %v4103_v11 = vor.u32 %v4797_v54, %v4100_v25  ;;  %v4787_v54 = vld [vmem:[%s5136_s5 + $0x44c] sm:$0xf]  ;;  %v4056_v25 = vld [vmem:[%s5136_s5 + $0x46c] sm:$0xf0] }
 0x2fd   : > { %4990 = vtanh.f32 %v3234_v18  ;;  %v4059_v7 = vor.u32 %v4787_v54, %v4056_v25  ;;  %v4802_v54 = vld [vmem:[%s5136_s5 + $0x4c0] sm:$0xf0] }
 0x2fe   : > { %3275 = vmatmul.bf16.gmra.mxu0 %v3999_v28  ;;  %v2970_v23 = vpop.f32.mrf.mxu2  ;;  %3157 = vmatmul.bf16.gmra.mxu3 %v4103_v11  ;;  %v4793_v11 = vld [vmem:[%s5136_s5 + $0x478] sm:$0xf0] }
 0x2ff   : > { %v2971_v41 = vadd.f32 %v2970_v23, %v2838_v45  ;;  %v4071_v16 = vor.u32 %v4793_v11, %v4070_v56 }
 0x300   : > { %v2839_v62 = vpop.f32.mrf.mxu1 }
 0x301   : > { %v3104_v20 = vadd.f32 %v6173_v50, %v2971_v41  ;;  %v2840_v24 = vadd.f32 %v2839_v62, %v5676_v14  ;;  %v4806_v41 = vld [vmem:[%s5136_s5 + $0x4e4] sm:$0xf]  ;;  %v4136_v62 = vld [vmem:[%s5136_s5 + $0x504] sm:$0xf0] }
 0x303   : > { %v3238_v38 = vpop.f32.mrf.mxu0  ;;  %v4991_v57 = vpop.eup %4990  ;;  %v3237_v53 = vadd.f32 %v3236_v12, %v3104_v20 }
 0x304   : > { %3393 = vst [vmem:[%s6137_s25 + $0x48] sm:$0xff] %v4991_v57  ;;  %v6227_v29 = vpop.f32.mrf.mxu3  ;;  %v4139_v57 = vor.u32 %v4806_v41, %v4136_v62  ;;  %v4801_v62 = vld [vmem:[%s5136_s5 + $0x4b8] sm:$0xf0] }
 0x305   : > { %4992 = vtanh.f32 %v3237_v53  ;;  %v4792_v53 = vld [vmem:[%s5136_s5 + $0x470] sm:$0xf0] }
 0x306   : > { %v2972_v42 = vpop.f32.mrf.mxu2 }
 0x307   : > { %v2973_v50 = vadd.f32 %v2972_v42, %v2840_v24 }
 0x308   : > { %v2842_v35 = vpop.f32.mrf.mxu1 }
 0x309   : > { %v3106_v4 = vadd.f32 %v6178_v58, %v2973_v50  ;;  %v2843_v14 = vadd.f32 %v2842_v35, %v5689_v33  ;;  %v4062_v33 = vld [vmem:[%s5136_s5 + $0x450] sm:$0xf] }
 0x30a   : > { %v4063_v24 = vor.u32 %v4792_v53, %v4062_v33 }
 0x30b   : > { %v3241_v21 = vpop.f32.mrf.mxu0  ;;  %v4993_v28 = vpop.eup %4992  ;;  %v3239_v39 = vadd.f32 %v3238_v38, %v3106_v4  ;;  %2881 = vmatmul.bf16.gmra.mxu1 %v4023_v8  ;;  %3014 = vmatmul.bf16.gmra.mxu2 %v4027_v43 }
 0x30c   : > { %3394 = vst [vmem:[%s6137_s25 + $0x50] sm:$0xff] %v4993_v28  ;;  %v6232_v18 = vpop.f32.mrf.mxu3 }
 0x30d   : > { %4994 = vtanh.f32 %v3239_v39 }
 0x30e   : > { %3280 = vmatmul.bf16.gmra.mxu0 %v4035_v51  ;;  %v2975_v12 = vpop.f32.mrf.mxu2  ;;  %3162 = vmatmul.bf16.gmra.mxu3 %v4139_v57 }
 0x30f   : > { %v2976_v19 = vadd.f32 %v2975_v12, %v2843_v14  ;;  %v4815_v14 = vld [vmem:[%s5136_s5 + $0x52c] sm:$0xf]  ;;  %v4172_v12 = vld [vmem:[%s5136_s5 + $0x54c] sm:$0xf0] }
 0x310   : > { %v2844_v58 = vpop.f32.mrf.mxu1  ;;  %v4175_v41 = vor.u32 %v4815_v14, %v4172_v12  ;;  %v4142_v12 = vld [vmem:[%s5136_s5 + $0x4e8] sm:$0xf] }
 0x311   : > { %v3109_v45 = vadd.f32 %v6191_v49, %v2976_v19  ;;  %v2845_v63 = vadd.f32 %v2844_v58, %v5701_v48 }
 0x313   : > { %v3243_v23 = vpop.f32.mrf.mxu0  ;;  %v4995_v20 = vpop.eup %4994  ;;  %v3242_v38 = vadd.f32 %v3241_v21, %v3109_v45  ;;  %v4796_v45 = vld [vmem:[%s5136_s5 + $0x494] sm:$0xf] }
 0x314   : > { %3395 = vst [vmem:[%s6137_s25 + $0x58] sm:$0xff] %v4995_v20  ;;  %v6245_v42 = vpop.f32.mrf.mxu3 }
 0x315   : > { %4996 = vtanh.f32 %v3242_v38  ;;  %v4106_v38 = vld [vmem:[%s5136_s5 + $0x4a0] sm:$0xf] }
 0x316   : > { %v2977_v40 = vpop.f32.mrf.mxu2 }
 0x317   : > { %v2978_v49 = vadd.f32 %v2977_v40, %v2845_v63  ;;  %v4107_v63 = vor.u32 %v4802_v54, %v4106_v38 }
 0x318   : > { %v2847_v5 = vpop.f32.mrf.mxu1 }
 0x319   : > { %v3111_v50 = vadd.f32 %v6196_v60, %v2978_v49  ;;  %v2848_v48 = vadd.f32 %v2847_v5, %v5711_v6  ;;  %v4098_v6 = vld [vmem:[%s5136_s5 + $0x498] sm:$0xf] }
 0x31a   : > { %v4099_v33 = vor.u32 %v4801_v62, %v4098_v6 }
 0x31b   : > { %v3246_v8 = vpop.f32.mrf.mxu0  ;;  %v4997_v43 = vpop.eup %4996  ;;  %v3244_v35 = vadd.f32 %v3243_v23, %v3111_v50  ;;  %2886 = vmatmul.bf16.gmra.mxu1 %v4059_v7  ;;  %3019 = vmatmul.bf16.gmra.mxu2 %v4063_v24  ;;  %v4092_v23 = vld [vmem:[%s5136_s5 + $0x4b4] sm:$0xf0] }
 0x31c   : > { %3396 = vst [vmem:[%s6137_s25 + $0x60] sm:$0xff] %v4997_v43  ;;  %v6250_v21 = vpop.f32.mrf.mxu3  ;;  %v4095_v57 = vor.u32 %v4796_v45, %v4092_v23  ;;  %v4824_v43 = vld [vmem:[%s5136_s5 + $0x574] sm:$0xf] }
 0x31d   : > { %4998 = vtanh.f32 %v3244_v35  ;;  %v4208_v35 = vld [vmem:[%s5136_s5 + $0x594] sm:$0xf0] }
 0x31e   : > { %3285 = vmatmul.bf16.gmra.mxu0 %v4071_v16  ;;  %v2980_v51 = vpop.f32.mrf.mxu2  ;;  %3167 = vmatmul.bf16.gmra.mxu3 %v4175_v41 }
 0x31f   : > { %v2981_v4 = vadd.f32 %v2980_v51, %v2848_v48 }
 0x320   : > { %v2849_v60 = vpop.f32.mrf.mxu1 }
 0x321   : > { %v3114_v28 = vadd.f32 %v6209_v36, %v2981_v4  ;;  %v2850_v20 = vadd.f32 %v2849_v60, %v5723_v44  ;;  %v4805_v4 = vld [vmem:[%s5136_s5 + $0x4dc] sm:$0xf]  ;;  %v4128_v60 = vld [vmem:[%s5136_s5 + $0x4fc] sm:$0xf0] }
 0x322   : > { %v4131_v45 = vor.u32 %v4805_v4, %v4128_v60 }
 0x323   : > { %v3248_v39 = vpop.f32.mrf.mxu0  ;;  %v4999_v19 = vpop.eup %4998  ;;  %v3247_v58 = vadd.f32 %v3246_v8, %v3114_v28  ;;  %v4211_v28 = vor.u32 %v4824_v43, %v4208_v35  ;;  %v4820_v43 = vld [vmem:[%s5136_s5 + $0x550] sm:$0xf0] }
 0x324   : > { %3397 = vst [vmem:[%s6137_s25 + $0x68] sm:$0xff] %v4999_v19  ;;  %v6263_v56 = vpop.f32.mrf.mxu3  ;;  %v4811_v19 = vld [vmem:[%s5136_s5 + $0x508] sm:$0xf0] }
 0x325   : > { %5000 = vtanh.f32 %v3247_v58  ;;  %v4143_v6 = vor.u32 %v4811_v19, %v4142_v12 }
 0x326   : > { %v2982_v25 = vpop.f32.mrf.mxu2 }
 0x327   : > { %v2983_v36 = vadd.f32 %v2982_v25, %v2850_v20 }
 0x328   : > { %v2852_v53 = vpop.f32.mrf.mxu1 }
 0x329   : > { %v3116_v11 = vadd.f32 %v6214_v2, %v2983_v36  ;;  %v2853_v44 = vadd.f32 %v2852_v53, %v5733_v55  ;;  %v4134_v55 = vld [vmem:[%s5136_s5 + $0x4e0] sm:$0xf] }
 0x32b   : > { %v3251_v40 = vpop.f32.mrf.mxu0  ;;  %v5001_v49 = vpop.eup %5000  ;;  %v3249_v7 = vadd.f32 %v3248_v39, %v3116_v11  ;;  %2891 = vmatmul.bf16.gmra.mxu1 %v4095_v57  ;;  %3024 = vmatmul.bf16.gmra.mxu2 %v4099_v33  ;;  %v4810_v39 = vld [vmem:[%s5136_s5 + $0x500] sm:$0xf0]  ;;  %v4833_v11 = vld [vmem:[%s5136_s5 + $0x5bc] sm:$0xf] }
 0x32c   : > { %3398 = vst [vmem:[%s6137_s25 + $0x70] sm:$0xff] %v5001_v49  ;;  %v6268_v16 = vpop.f32.mrf.mxu3  ;;  %v4135_v23 = vor.u32 %v4810_v39, %v4134_v55 }
 0x32d   : > { %5002 = vtanh.f32 %v3249_v7 }
 0x32e   : > { %3290 = vmatmul.bf16.gmra.mxu0 %v4107_v63  ;;  %v2985_v24 = vpop.f32.mrf.mxu2  ;;  %3172 = vmatmul.bf16.gmra.mxu3 %v4211_v28 }
 0x32f   : > { %v2986_v5 = vadd.f32 %v2985_v24, %v2853_v44  ;;  %v4814_v44 = vld [vmem:[%s5136_s5 + $0x524] sm:$0xf]  ;;  %v4164_v24 = vld [vmem:[%s5136_s5 + $0x544] sm:$0xf0] }
 0x330   : > { %v2854_v2 = vpop.f32.mrf.mxu1 }
 0x331   : > { %v3119_v50 = vadd.f32 %v6227_v29, %v2986_v5  ;;  %v2855_v14 = vadd.f32 %v2854_v2, %v5754_v13  ;;  %v4819_v2 = vld [vmem:[%s5136_s5 + $0x548] sm:$0xf0] }
 0x333   : > { %v3253_v8 = vpop.f32.mrf.mxu0  ;;  %v5003_v48 = vpop.eup %5002  ;;  %v3252_v51 = vadd.f32 %v3251_v40, %v3119_v50  ;;  %v4244_v40 = vld [vmem:[%s5136_s5 + $0x5dc] sm:$0xf0] }
 0x334   : > { %3399 = vst [vmem:[%s6137_s25 + $0x78] sm:$0xff] %v5003_v48  ;;  %v6281_v62 = vpop.f32.mrf.mxu3  ;;  %v4247_v5 = vor.u32 %v4833_v11, %v4244_v40  ;;  %v4167_v48 = vor.u32 %v4814_v44, %v4164_v24 }
 0x335   : > { %5004 = vtanh.f32 %v3252_v51 }
 0x336   : > { %v2987_v58 = vpop.f32.mrf.mxu2 }
 0x337   : > { %v2988_v29 = vadd.f32 %v2987_v58, %v2855_v14 }
 0x338   : > { %v2857_v41 = vpop.f32.mrf.mxu1 }
 0x339   : > { %v3121_v20 = vadd.f32 %v6232_v18, %v2988_v29  ;;  %v2858_v13 = vadd.f32 %v2857_v41, %v5767_v3  ;;  %v4170_v3 = vld [vmem:[%s5136_s5 + $0x528] sm:$0xf]  ;;  %v4842_v41 = vld [vmem:[%s5136_s5 + $0x604] sm:$0xf] }
 0x33a   : > { %v4171_v51 = vor.u32 %v4819_v2, %v4170_v3 }
 0x33b   : > { %v3256_v38 = vpop.f32.mrf.mxu0  ;;  %v5005_v54 = vpop.eup %5004  ;;  %v3254_v25 = vadd.f32 %v3253_v8, %v3121_v20  ;;  %2896 = vmatmul.bf16.gmra.mxu1 %v4131_v45  ;;  %3029 = vmatmul.bf16.gmra.mxu2 %v4135_v23  ;;  %v4178_v8 = vld [vmem:[%s5136_s5 + $0x530] sm:$0xf] }
 0x33c   : > { %3400 = vst [vmem:[%s6137_s25 + $0x80] sm:$0xff] %v5005_v54  ;;  %v6286_v33 = vpop.f32.mrf.mxu3  ;;  %v4179_v60 = vor.u32 %v4820_v43, %v4178_v8  ;;  %v4823_v54 = vld [vmem:[%s5136_s5 + $0x56c] sm:$0xf] }
 0x33d   : > { %5006 = vtanh.f32 %v3254_v25  ;;  %v4200_v25 = vld [vmem:[%s5136_s5 + $0x58c] sm:$0xf0] }
 0x33e   : > { %3295 = vmatmul.bf16.gmra.mxu0 %v4143_v6  ;;  %v2990_v36 = vpop.f32.mrf.mxu2  ;;  %3177 = vmatmul.bf16.gmra.mxu3 %v4247_v5  ;;  %v4280_v6 = vld [vmem:[%s5136_s5 + $0x624] sm:$0xf0]  ;;  %v4203_v11 = vor.u32 %v4823_v54, %v4200_v25 }
 0x33f   : > { %v2991_v57 = vadd.f32 %v2990_v36, %v2858_v13  ;;  %v4283_v13 = vor.u32 %v4842_v41, %v4280_v6  ;;  %v4828_v36 = vld [vmem:[%s5136_s5 + $0x590] sm:$0xf0] }
 0x340   : > { %v2859_v18 = vpop.f32.mrf.mxu1 }
 0x341   : > { %v3124_v53 = vadd.f32 %v6245_v42, %v2991_v57  ;;  %v2860_v50 = vadd.f32 %v2859_v18, %v5779_v27  ;;  %v4214_v18 = vld [vmem:[%s5136_s5 + $0x578] sm:$0xf] }
 0x343   : > { %v3258_v63 = vpop.f32.mrf.mxu0  ;;  %v5007_v49 = vpop.eup %5006  ;;  %v3257_v7 = vadd.f32 %v3256_v38, %v3124_v53  ;;  %v4829_v53 = vld [vmem:[%s5136_s5 + $0x598] sm:$0xf0] }
 0x344   : > { %3401 = vst [vmem:[%s6137_s25 + $0x88] sm:$0xff] %v5007_v49  ;;  %v6299_v28 = vpop.f32.mrf.mxu3 }
 0x345   : > { %5008 = vtanh.f32 %v3257_v7  ;;  %v4215_v7 = vor.u32 %v4829_v53, %v4214_v18 }
 0x346   : > { %v2992_v35 = vpop.f32.mrf.mxu2 }
 0x347   : > { %v2993_v42 = vadd.f32 %v2992_v35, %v2860_v50 }
 0x348   : > { %v2862_v4 = vpop.f32.mrf.mxu1 }
 0x349   : > { %v3126_v55 = vadd.f32 %v6250_v21, %v2993_v42  ;;  %v2863_v27 = vadd.f32 %v2862_v4, %v5789_v26  ;;  %v4206_v26 = vld [vmem:[%s5136_s5 + $0x570] sm:$0xf] }
 0x34a   : > { %v4207_v40 = vor.u32 %v4828_v36, %v4206_v26 }
 0x34b   : > { %v3261_v39 = vpop.f32.mrf.mxu0  ;;  %v5009_v14 = vpop.eup %5008  ;;  %v3259_v12 = vadd.f32 %v3258_v63, %v3126_v55  ;;  %2901 = vmatmul.bf16.gmra.mxu1 %v4167_v48  ;;  %3034 = vmatmul.bf16.gmra.mxu2 %v4171_v51  ;;  %v4851_v48 = vld [vmem:[%s5136_s5 + $0x64c] sm:$0xf]  ;;  %v4316_v51 = vld [vmem:[%s5136_s5 + $0x66c] sm:$0xf0]  ;;  %v4832_v55 = vld [vmem:[%s5136_s5 + $0x5b4] sm:$0xf] }
 0x34c   : > { %3402 = vst [vmem:[%s6137_s25 + $0x90] sm:$0xff] %v5009_v14  ;;  %v6304_v29 = vpop.f32.mrf.mxu3  ;;  %v4319_v14 = vor.u32 %v4851_v48, %v4316_v51 }
 0x34d   : > { %5010 = vtanh.f32 %v3259_v12  ;;  %v4837_v12 = vld [vmem:[%s5136_s5 + $0x5d8] sm:$0xf0] }
 0x34e   : > { %3300 = vmatmul.bf16.gmra.mxu0 %v4179_v60  ;;  %v2995_v19 = vpop.f32.mrf.mxu2  ;;  %3182 = vmatmul.bf16.gmra.mxu3 %v4283_v13 }
 0x34f   : > { %v2996_v58 = vadd.f32 %v2995_v19, %v2863_v27  ;;  %v4250_v19 = vld [vmem:[%s5136_s5 + $0x5c0] sm:$0xf] }
 0x350   : > { %v2864_v21 = vpop.f32.mrf.mxu1 }
 0x351   : > { %v3129_v45 = vadd.f32 %v6263_v56, %v2996_v58  ;;  %v2865_v57 = vadd.f32 %v2864_v21, %v5801_v47  ;;  %v4838_v58 = vld [vmem:[%s5136_s5 + $0x5e0] sm:$0xf0] }
 0x352   : > { %v4251_v6 = vor.u32 %v4838_v58, %v4250_v19 }
 0x353   : > { %v3263_v23 = vpop.f32.mrf.mxu0  ;;  %v5011_v20 = vpop.eup %5010  ;;  %v3262_v38 = vadd.f32 %v3261_v39, %v3129_v45  ;;  %v4236_v39 = vld [vmem:[%s5136_s5 + $0x5d4] sm:$0xf0] }
 0x354   : > { %3403 = vst [vmem:[%s6137_s25 + $0x98] sm:$0xff] %v5011_v20  ;;  %v6317_v44 = vpop.f32.mrf.mxu3  ;;  %v4239_v45 = vor.u32 %v4832_v55, %v4236_v39 }
 0x355   : > { %5012 = vtanh.f32 %v3262_v38 }
 0x356   : > { %v2997_v63 = vpop.f32.mrf.mxu2 }
 0x357   : > { %v2998_v56 = vadd.f32 %v2997_v63, %v2865_v57  ;;  %v4860_v63 = vld [vmem:[%s5136_s5 + $0x694] sm:$0xf] }
 0x358   : > { %v2867_v49 = vpop.f32.mrf.mxu1 }
 0x359   : > { %v3131_v24 = vadd.f32 %v6268_v16, %v2998_v56  ;;  %v2868_v47 = vadd.f32 %v2867_v49, %v5811_v9  ;;  %v4242_v9 = vld [vmem:[%s5136_s5 + $0x5b8] sm:$0xf]  ;;  %v4841_v49 = vld [vmem:[%s5136_s5 + $0x5fc] sm:$0xf] }
 0x35a   : > { %v4352_v56 = vld [vmem:[%s5136_s5 + $0x6b4] sm:$0xf0] }
 0x35b   : > { %v3266_v5 = vpop.f32.mrf.mxu0  ;;  %v5013_v3 = vpop.eup %5012  ;;  %v3264_v2 = vadd.f32 %v3263_v23, %v3131_v24  ;;  %2906 = vmatmul.bf16.gmra.mxu1 %v4203_v11  ;;  %3039 = vmatmul.bf16.gmra.mxu2 %v4207_v40  ;;  %v4243_v23 = vor.u32 %v4837_v12, %v4242_v9  ;;  %v4355_v24 = vor.u32 %v4860_v63, %v4352_v56  ;;  %v6361_v12 = vld [vmem:[%s5136_s5 + $0x6d8] sm:$0xff] }
 0x35c   : > { %3404 = vst [vmem:[%s6137_s25 + $0xa0] sm:$0xff] %v5013_v3  ;;  %v6322_v43 = vpop.f32.mrf.mxu3  ;;  %v1254_v58 = vunpack.c.h.b16 %v6361_v12 }
 0x35d   : > { %5014 = vtanh.f32 %v3264_v2  ;;  %v4286_v2 = vld [vmem:[%s5136_s5 + $0x608] sm:$0xf] }
 0x35e   : > { %3305 = vmatmul.bf16.gmra.mxu0 %v4215_v7  ;;  %v3000_v50 = vpop.f32.mrf.mxu2  ;;  %3187 = vmatmul.bf16.gmra.mxu3 %v4319_v14  ;;  %v4272_v7 = vld [vmem:[%s5136_s5 + $0x61c] sm:$0xf0] }
 0x35f   : > { %v3001_v8 = vadd.f32 %v3000_v50, %v2868_v47  ;;  %v4847_v47 = vld [vmem:[%s5136_s5 + $0x628] sm:$0xf0] }
 0x360   : > { %v2869_v16 = vpop.f32.mrf.mxu1 }
 0x361   : > { %v3134_v35 = vadd.f32 %v6281_v62, %v3001_v8  ;;  %v2870_v27 = vadd.f32 %v2869_v16, %v5829_v30  ;;  %v4275_v8 = vor.u32 %v4841_v49, %v4272_v7 }
 0x363   : > { %v3268_v42 = vpop.f32.mrf.mxu0  ;;  %v5015_v4 = vpop.eup %5014  ;;  %v3267_v60 = vadd.f32 %v3266_v5, %v3134_v35  ;;  %v4846_v5 = vld [vmem:[%s5136_s5 + $0x620] sm:$0xf0] }
 0x364   : > { %3405 = vst [vmem:[%s6137_s25 + $0xa8] sm:$0xff] %v5015_v4  ;;  %v6335_v20 = vpop.f32.mrf.mxu3 }
 0x365   : > { %5016 = vtanh.f32 %v3267_v60 }
 0x366   : > { %v3002_v21 = vpop.f32.mrf.mxu2 }
 0x367   : > { %v3003_v62 = vadd.f32 %v3002_v21, %v2870_v27 }
 0x368   : > { %v2872_v41 = vpop.f32.mrf.mxu1 }
 0x369   : > { %v3136_v38 = vadd.f32 %v6286_v33, %v3003_v62  ;;  %v2873_v30 = vadd.f32 %v2872_v41, %v5845_v37  ;;  %v4278_v37 = vld [vmem:[%s5136_s5 + $0x600] sm:$0xf]  ;;  %v4314_v41 = vld [vmem:[%s5136_s5 + $0x648] sm:$0xf] }
 0x36a   : > { %v4279_v16 = vor.u32 %v4846_v5, %v4278_v37 }
 0x36b   : > { %v3271_v54 = vpop.f32.mrf.mxu0  ;;  %v5017_v25 = vpop.eup %5016  ;;  %v3269_v13 = vadd.f32 %v3268_v42, %v3136_v38  ;;  %2911 = vmatmul.bf16.gmra.mxu1 %v4239_v45  ;;  %3044 = vmatmul.bf16.gmra.mxu2 %v4243_v23  ;;  %v4287_v42 = vor.u32 %v4847_v47, %v4286_v2  ;;  %v4850_v45 = vld [vmem:[%s5136_s5 + $0x644] sm:$0xf]  ;;  %v4308_v23 = vld [vmem:[%s5136_s5 + $0x664] sm:$0xf0]  ;;  %v6483_v38 = vld [vmem:[#allocation13_spill] sm:$0xff] }
 0x36c   : > { %3406 = vst [vmem:[%s6137_s25 + $0xb0] sm:$0xff] %v5017_v25  ;;  %v6340_v57 = vpop.f32.mrf.mxu3  ;;  %v4322_v25 = vld [vmem:[%s5136_s5 + $0x650] sm:$0xf] }
 0x36d   : > { %5018 = vtanh.f32 %v3269_v13  ;;  %v4856_v13 = vld [vmem:[%s5136_s5 + $0x670] sm:$0xf0] }
 0x36e   : > { %3310 = vmatmul.bf16.gmra.mxu0 %v4251_v6  ;;  %v3005_v26 = vpop.f32.mrf.mxu2  ;;  %3192 = vmatmul.bf16.gmra.mxu3 %v4355_v24  ;;  %v4855_v6 = vld [vmem:[%s5136_s5 + $0x668] sm:$0xf0] }
 0x36f   : > { %v3006_v36 = vadd.f32 %v3005_v26, %v2873_v30  ;;  %v4311_v26 = vor.u32 %v4850_v45, %v4308_v23 }
 0x370   : > { %v2874_v33 = vpop.f32.mrf.mxu1 }
 0x371   : > { %v3139_v18 = vadd.f32 %v6299_v28, %v3006_v36  ;;  %v2875_v3 = vadd.f32 %v2874_v33, %v5857_v31  ;;  %v4315_v36 = vor.u32 %v4855_v6, %v4314_v41 }
 0x373   : > { %v3273_v53 = vpop.f32.mrf.mxu0  ;;  %v5019_v11 = vpop.eup %5018  ;;  %v3272_v40 = vadd.f32 %v3271_v54, %v3139_v18  ;;  %v4323_v18 = vor.u32 %v4856_v13, %v4322_v25  ;;  %v1253_v25 = vunpack.c.l.b16 %v6361_v12 }
 0x374   : > { %3407 = vst [vmem:[%s6137_s25 + $0xb8] sm:$0xff] %v5019_v11  ;;  %v6353_v48 = vpop.f32.mrf.mxu3 }
 0x375   : > { %5020 = vtanh.f32 %v3272_v40 }
 0x376   : > { %v3007_v50 = vpop.f32.mrf.mxu2 }
 0x377   : > { %v3008_v28 = vadd.f32 %v3007_v50, %v2875_v3  ;;  %v4859_v50 = vld [vmem:[%s5136_s5 + $0x68c] sm:$0xf] }
 0x378   : > { %v2877_v35 = vpop.f32.mrf.mxu1 }
 0x379   : > { %v3141_v51 = vadd.f32 %v6304_v29, %v3008_v28  ;;  %v2878_v31 = vadd.f32 %v2877_v35, %v5869_v32  ;;  %v1479_v32 = vpack.c.b16 %v1254_v58, %v1254_v58  ;;  %v4344_v28 = vld [vmem:[%s5136_s5 + $0x6ac] sm:$0xf0]  ;;  %v4358_v35 = vld [vmem:[%s5136_s5 + $0x698] sm:$0xf] }
 0x37b   : > { %v3276_v4 = vpop.f32.mrf.mxu0  ;;  %v5021_v60 = vpop.eup %5020  ;;  %v3274_v55 = vadd.f32 %v3273_v53, %v3141_v51  ;;  %2916 = vmatmul.bf16.gmra.mxu1 %v4275_v8  ;;  %3049 = vmatmul.bf16.gmra.mxu2 %v4279_v16  ;;  %v4350_v8 = vld [vmem:[%s5136_s5 + $0x690] sm:$0xf]  ;;  %v4864_v16 = vld [vmem:[%s5136_s5 + $0x6b0] sm:$0xf0] }
 0x37c   : > { %3408 = vst [vmem:[%s6137_s25 + $0xc0] sm:$0xff] %v5021_v60  ;;  %v6358_v29 = vpop.f32.mrf.mxu3  ;;  %v4347_v60 = vor.u32 %v4859_v50, %v4344_v28 }
 0x37d   : > { %5022 = vtanh.f32 %v3274_v55  ;;  %v4351_v55 = vor.u32 %v4864_v16, %v4350_v8 }
 0x37e   : > { %3315 = vmatmul.bf16.gmra.mxu0 %v4287_v42  ;;  %v3010_v39 = vpop.f32.mrf.mxu2  ;;  %3197 = vmatmul.bf16.gmra.mxu3 %v1479_v32  ;;  %v4865_v42 = vld [vmem:[%s5136_s5 + $0x6b8] sm:$0xf0]  ;;  %v421_v32 = vld [vmem:[%s5136_s5 + $0x6e0] sm:$0xf] }
 0x37f   : > { %v3011_v14 = vadd.f32 %v3010_v39, %v2878_v31  ;;  %v1255_v13 = vunpack.c.l.b16 %v421_v32 }
 0x380   : > { %v2879_v9 = vpop.f32.mrf.mxu1 }
 0x381   : > { %v3144_v27 = vadd.f32 %v6317_v44, %v3011_v14  ;;  %v2880_v54 = vadd.f32 %v2879_v9, %v6483_v38  ;;  %v5072_v38 = vld [vmem:[%s5136_s5 + $0x6d0] sm:$0xff] }
 0x383   : > { %v3278_v19 = vpop.f32.mrf.mxu0  ;;  %v5023_v21 = vpop.eup %5022  ;;  %v3277_v62 = vadd.f32 %v3276_v4, %v3144_v27 }
 0x384   : > { %3409 = vst [vmem:[%s6137_s25 + $0xc8] sm:$0xff] %v5023_v21  ;;  %v6373_v53 = vpop.f32.mrf.mxu3 }
 0x385   : > { %5024 = vtanh.f32 %v3277_v62 }
 0x386   : > { %v3012_v30 = vpop.f32.mrf.mxu2 }
 0x387   : > { %v3013_v44 = vadd.f32 %v3012_v30, %v2880_v54  ;;  %v1252_v54 = vunpack.c.h.b16 %v5072_v38 }
 0x388   : > { %v2882_v33 = vpop.f32.mrf.mxu1 }
 0x389   : > { %v3146_v63 = vadd.f32 %v6322_v43, %v3013_v44  ;;  %v2883_v49 = vadd.f32 %v2882_v33, %v5896_v34 }
 0x38b   : > { %v3281_v56 = vpop.f32.mrf.mxu0  ;;  %v5025_v11 = vpop.eup %5024  ;;  %v3279_v40 = vadd.f32 %v3278_v19, %v3146_v63  ;;  %2921 = vmatmul.bf16.gmra.mxu1 %v4311_v26  ;;  %3054 = vmatmul.bf16.gmra.mxu2 %v4315_v36  ;;  %v1477_v26 = vpack.c.b16 %v1252_v54, %v1252_v54  ;;  %v1478_v36 = vpack.c.b16 %v1253_v25, %v1253_v25  ;;  %v6485_v25 = vld [vmem:[#allocation9_spill] sm:$0xff] }
 0x38c   : > { %3410 = vst [vmem:[%s6137_s25 + $0xd0] sm:$0xff] %v5025_v11  ;;  %v6378_v37 = vpop.f32.mrf.mxu3 }
 0x38d   : > { %5026 = vtanh.f32 %v3279_v40 }
 0x38e   : > { %3320 = vmatmul.bf16.gmra.mxu0 %v4323_v18  ;;  %v3015_v7 = vpop.f32.mrf.mxu2 }
 0x38f   : > { %v3016_v24 = vadd.f32 %v3015_v7, %v2883_v49 }
 0x390   : > { %v2884_v43 = vpop.f32.mrf.mxu1 }
 0x391   : > { %v3149_v5 = vadd.f32 %v6335_v20, %v3016_v24  ;;  %v2885_v34 = vadd.f32 %v2884_v43, %v5908_v61  ;;  %v4359_v20 = vor.u32 %v4865_v42, %v4358_v35 }
 0x393   : > { %v3283_v3 = vpop.f32.mrf.mxu0  ;;  %v5027_v2 = vpop.eup %5026  ;;  %v3282_v47 = vadd.f32 %v3281_v56, %v3149_v5 }
 0x394   : > { %3411 = vst [vmem:[%s6137_s25 + $0xd8] sm:$0xff] %v5027_v2  ;;  %v6389_v39 = vpop.f32.mrf.mxu3 }
 0x395   : > { %5028 = vtanh.f32 %v3282_v47 }
 0x396   : > { %v3017_v51 = vpop.f32.mrf.mxu2 }
 0x397   : > { %v3018_v4 = vadd.f32 %v3017_v51, %v2885_v34 }
 0x398   : > { %v2887_v31 = vpop.f32.mrf.mxu1 }
 0x399   : > { %v3151_v14 = vadd.f32 %v6340_v57, %v3018_v4  ;;  %v2888_v61 = vadd.f32 %v2887_v31, %v5920_v0 }
 0x39b   : > { %v3286_v9 = vpop.f32.mrf.mxu0  ;;  %v5029_v27 = vpop.eup %5028  ;;  %v3284_v19 = vadd.f32 %v3283_v3, %v3151_v14  ;;  %2926 = vmatmul.bf16.gmra.mxu1 %v4347_v60  ;;  %3059 = vmatmul.bf16.gmra.mxu2 %v4351_v55 }
 0x39c   : > { %3412 = vst [vmem:[%s6137_s25 + $0xe0] sm:$0xff] %v5029_v27  ;;  %v6394_v45 = vpop.f32.mrf.mxu3 }
 0x39d   : > { %5030 = vtanh.f32 %v3284_v19 }
 0x39e   : > { %3325 = vmatmul.bf16.gmra.mxu0 %v4359_v20  ;;  %v3020_v58 = vpop.f32.mrf.mxu2 }
 0x39f   : > { %v3021_v21 = vadd.f32 %v3020_v58, %v2888_v61 }
 0x3a0   : > { %v2889_v62 = vpop.f32.mrf.mxu1 }
 0x3a1   : > { %v3154_v57 = vadd.f32 %v6353_v48, %v3021_v21  ;;  %v2890_v0 = vadd.f32 %v2889_v62, %v5927_v1  ;;  %v1480_v48 = vpack.c.b16 %v1255_v13, %v1255_v13 }
 0x3a3   : > { %v3288_v23 = vpop.f32.mrf.mxu0  ;;  %v5031_v41 = vpop.eup %5030  ;;  %v3287_v6 = vadd.f32 %v3286_v9, %v3154_v57 }
 0x3a4   : > { %3413 = vst [vmem:[%s6137_s25 + $0xe8] sm:$0xff] %v5031_v41  ;;  %v3168_v18 = vpop.f32.mrf.mxu3 }
 0x3a5   : > { %5032 = vtanh.f32 %v3287_v6 }
 0x3a6   : > { %v3022_v30 = vpop.f32.mrf.mxu2 }
 0x3a7   : > { %v3023_v44 = vadd.f32 %v3022_v30, %v2890_v0 }
 0x3a8   : > { %v2892_v33 = vpop.f32.mrf.mxu1 }
 0x3a9   : > { %v3156_v63 = vadd.f32 %v6358_v29, %v3023_v44  ;;  %v2893_v1 = vadd.f32 %v2892_v33, %v5937_v59 }
 0x3ab   : > { %v3291_v56 = vpop.f32.mrf.mxu0  ;;  %v5033_v11 = vpop.eup %5032  ;;  %v3289_v40 = vadd.f32 %v3288_v23, %v3156_v63  ;;  %2931 = vmatmul.bf16.gmra.mxu1 %v1477_v26  ;;  %3064 = vmatmul.bf16.gmra.mxu2 %v1478_v36  ;;  %v6486_v63 = vld [vmem:[#allocation10_spill] sm:$0xff] }
 0x3ac   : > { %3414 = vst [vmem:[%s6137_s25 + $0xf0] sm:$0xff] %v5033_v11  ;;  %v3170_v24 = vpop.f32.mrf.mxu3 }
 0x3ad   : > { %5034 = vtanh.f32 %v3289_v40 }
 0x3ae   : > { %3330 = vmatmul.bf16.gmra.mxu0 %v1480_v48  ;;  %v3025_v12 = vpop.f32.mrf.mxu2 }
 0x3af   : > { %v3026_v49 = vadd.f32 %v3025_v12, %v2893_v1 }
 0x3b0   : > { %v2894_v7 = vpop.f32.mrf.mxu1 }
 0x3b1   : > { %v3159_v43 = vadd.f32 %v6373_v53, %v3026_v49  ;;  %v2895_v2 = vadd.f32 %v2894_v7, %v5949_v10 }
 0x3b3   : > { %v3293_v5 = vpop.f32.mrf.mxu0  ;;  %v5035_v29 = vpop.eup %5034  ;;  %v3292_v3 = vadd.f32 %v3291_v56, %v3159_v43 }
 0x3b4   : > { %3415 = vst [vmem:[%s6137_s25 + $0xf8] sm:$0xff] %v5035_v29  ;;  %v3173_v8 = vpop.f32.mrf.mxu3 }
 0x3b5   : > { %5036 = vtanh.f32 %v3292_v3 }
 0x3b6   : > { %v3027_v47 = vpop.f32.mrf.mxu2 }
 0x3b7   : > { %v3028_v50 = vadd.f32 %v3027_v47, %v2895_v2 }
 0x3b8   : > { %v2897_v28 = vpop.f32.mrf.mxu1 }
 0x3b9   : > { %v3161_v59 = vadd.f32 %v6378_v37, %v3028_v50  ;;  %v2898_v53 = vadd.f32 %v2897_v28, %v5959_v46 }
 0x3bb   : > { %v3296_v16 = vpop.f32.mrf.mxu0  ;;  %v5037_v34 = vpop.eup %5036  ;;  %v3294_v35 = vadd.f32 %v3293_v5, %v3161_v59  ;;  %v6487_v5 = vld [vmem:[#allocation11_spill] sm:$0xff] }
 0x3bc   : > { %3416 = vst [vmem:[%s6137_s25 + $0x100] sm:$0xff] %v5037_v34  ;;  %v3175_v60 = vpop.f32.mrf.mxu3  ;;  %v6488_v34 = vld [vmem:[#allocation12_spill] sm:$0xff] }
 0x3bd   : > { %5038 = vtanh.f32 %v3294_v35 }
 0x3be   : > { %v3030_v42 = vpop.f32.mrf.mxu2 }
 0x3bf   : > { %v3031_v51 = vadd.f32 %v3030_v42, %v2898_v53 }
 0x3c0   : > { %v2899_v4 = vpop.f32.mrf.mxu1 }
 0x3c1   : > { %v3164_v10 = vadd.f32 %v6389_v39, %v3031_v51  ;;  %v2900_v37 = vadd.f32 %v2899_v4, %v5971_v52  ;;  %v6484_v39 = vld [vmem:[#allocation14_spill] sm:$0xff] }
 0x3c3   : > { %v3298_v55 = vpop.f32.mrf.mxu0  ;;  %v5039_v31 = vpop.eup %5038  ;;  %v3297_v20 = vadd.f32 %v3296_v16, %v3164_v10 }
 0x3c4   : > { %3417 = vst [vmem:[%s6137_s25 + $0x108] sm:$0xff] %v5039_v31  ;;  %v3178_v19 = vpop.f32.mrf.mxu3 }
 0x3c5   : > { %5040 = vtanh.f32 %v3297_v20  ;;  %v6489_v20 = vld [vmem:[#allocation2_spill] sm:$0xff] }
 0x3c6   : > { %v3032_v14 = vpop.f32.mrf.mxu2 }
 0x3c7   : > { %v3033_v9 = vadd.f32 %v3032_v14, %v2900_v37 }
 0x3c8   : > { %v2902_v27 = vpop.f32.mrf.mxu1 }
 0x3c9   : > { %v3166_v46 = vadd.f32 %v6394_v45, %v3033_v9  ;;  %v2903_v62 = vadd.f32 %v2902_v27, %v6484_v39 }
 0x3cb   : > { %v3301_v61 = vpop.f32.mrf.mxu0  ;;  %v5041_v58 = vpop.eup %5040  ;;  %v3299_v21 = vadd.f32 %v3298_v55, %v3166_v46 }
 0x3cc   : > { %3418 = vst [vmem:[%s6137_s25 + $0x110] sm:$0xff] %v5041_v58  ;;  %v3180_v41 = vpop.f32.mrf.mxu3 }
 0x3cd   : > { %5042 = vtanh.f32 %v3299_v21 }
 0x3ce   : > { %v3035_v57 = vpop.f32.mrf.mxu2 }
 0x3cf   : > { %v3036_v23 = vadd.f32 %v3035_v57, %v2903_v62 }
 0x3d0   : > { %v2904_v32 = vpop.f32.mrf.mxu1 }
 0x3d1   : > { %v3169_v52 = vadd.f32 %v3168_v18, %v3036_v23  ;;  %v2905_v45 = vadd.f32 %v2904_v32, %v6485_v25 }
 0x3d3   : > { %v3303_v6 = vpop.f32.mrf.mxu0  ;;  %v5043_v38 = vpop.eup %5042  ;;  %v3302_v54 = vadd.f32 %v3301_v61, %v3169_v52 }
 0x3d4   : > { %3419 = vst [vmem:[%s6137_s25 + $0x118] sm:$0xff] %v5043_v38  ;;  %v3183_v44 = vpop.f32.mrf.mxu3 }
 0x3d5   : > { %5044 = vtanh.f32 %v3302_v54  ;;  %v6490_v54 = vld [vmem:[#allocation3_spill] sm:$0xff] }
 0x3d6   : > { %v3037_v13 = vpop.f32.mrf.mxu2 }
 0x3d7   : > { %v3038_v0 = vadd.f32 %v3037_v13, %v2905_v45 }
 0x3d8   : > { %v2907_v30 = vpop.f32.mrf.mxu1 }
 0x3d9   : > { %v3171_v26 = vadd.f32 %v3170_v24, %v3038_v0  ;;  %v2908_v18 = vadd.f32 %v2907_v30, %v6486_v63 }
 0x3db   : > { %v3306_v36 = vpop.f32.mrf.mxu0  ;;  %v5045_v33 = vpop.eup %5044  ;;  %v3304_v48 = vadd.f32 %v3303_v6, %v3171_v26 }
 0x3dc   : > { %3420 = vst [vmem:[%s6137_s25 + $0x120] sm:$0xff] %v5045_v33  ;;  %v3185_v1 = vpop.f32.mrf.mxu3 }
 0x3dd   : > { %5046 = vtanh.f32 %v3304_v48 }
 0x3de   : > { %v3040_v56 = vpop.f32.mrf.mxu2 }
 0x3df   : > { %v3041_v11 = vadd.f32 %v3040_v56, %v2908_v18 }
 0x3e0   : > { %v2909_v40 = vpop.f32.mrf.mxu1 }
 0x3e1   : > { %v3174_v12 = vadd.f32 %v3173_v8, %v3041_v11  ;;  %v2910_v24 = vadd.f32 %v2909_v40, %v6487_v5 }
 0x3e3   : > { %v3308_v49 = vpop.f32.mrf.mxu0  ;;  %v5047_v7 = vpop.eup %5046  ;;  %v3307_v43 = vadd.f32 %v3306_v36, %v3174_v12 }
 0x3e4   : > { %3421 = vst [vmem:[%s6137_s25 + $0x128] sm:$0xff] %v5047_v7  ;;  %v3188_v47 = vpop.f32.mrf.mxu3 }
 0x3e5   : > { %5048 = vtanh.f32 %v3307_v43 }
 0x3e6   : > { %v3042_v29 = vpop.f32.mrf.mxu2 }
 0x3e7   : > { %v3043_v3 = vadd.f32 %v3042_v29, %v2910_v24 }
 0x3e8   : > { %v2912_v2 = vpop.f32.mrf.mxu1 }
 0x3e9   : > { %v3176_v50 = vadd.f32 %v3175_v60, %v3043_v3  ;;  %v2913_v8 = vadd.f32 %v2912_v2, %v6488_v34 }
 0x3eb   : > { %v3311_v28 = vpop.f32.mrf.mxu0  ;;  %v5049_v59 = vpop.eup %5048  ;;  %v3309_v16 = vadd.f32 %v3308_v49, %v3176_v50  ;;  %v6491_v49 = vld [vmem:[#allocation4_spill] sm:$0xff] }
 0x3ec   : > { %3422 = vst [vmem:[%s6137_s25 + $0x130] sm:$0xff] %v5049_v59  ;;  %v3190_v51 = vpop.f32.mrf.mxu3 }
 0x3ed   : > { %5050 = vtanh.f32 %v3309_v16 }
 0x3ee   : > { %v3045_v35 = vpop.f32.mrf.mxu2 }
 0x3ef   : > { %v3046_v53 = vadd.f32 %v3045_v35, %v2913_v8  ;;  %v6492_v35 = vld [vmem:[#allocation5_spill] sm:$0xff] }
 0x3f0   : > { %v2914_v42 = vpop.f32.mrf.mxu1 }
 0x3f1   : > { %v3179_v4 = vadd.f32 %v3178_v19, %v3046_v53  ;;  %v2915_v60 = vadd.f32 %v2914_v42, %v6489_v20  ;;  %v6493_v20 = vld [vmem:[#allocation6_spill] sm:$0xff] }
 0x3f3   : > { %v3313_v10 = vpop.f32.mrf.mxu0  ;;  %v5051_v55 = vpop.eup %5050  ;;  %v3312_v31 = vadd.f32 %v3311_v28, %v3179_v4 }
 0x3f4   : > { %3423 = vst [vmem:[%s6137_s25 + $0x138] sm:$0xff] %v5051_v55  ;;  %v3193_v27 = vpop.f32.mrf.mxu3 }
 0x3f5   : > { %5052 = vtanh.f32 %v3312_v31 }
 0x3f6   : > { %v3047_v37 = vpop.f32.mrf.mxu2 }
 0x3f7   : > { %v3048_v14 = vadd.f32 %v3047_v37, %v2915_v60 }
 0x3f8   : > { %v2917_v9 = vpop.f32.mrf.mxu1 }
 0x3f9   : > { %v3181_v46 = vadd.f32 %v3180_v41, %v3048_v14  ;;  %v2918_v19 = vadd.f32 %v2917_v9, %v6047_v22 }
 0x3fb   : > { %v3316_v61 = vpop.f32.mrf.mxu0  ;;  %v5053_v58 = vpop.eup %5052  ;;  %v3314_v21 = vadd.f32 %v3313_v10, %v3181_v46 }
 0x3fc   : > { %3424 = vst [vmem:[%s6137_s25 + $0x140] sm:$0xff] %v5053_v58  ;;  %v3195_v23 = vpop.f32.mrf.mxu3 }
 0x3fd   : > { %5054 = vtanh.f32 %v3314_v21 }
 0x3fe   : > { %v3050_v39 = vpop.f32.mrf.mxu2 }
 0x3ff   : > { %v3051_v62 = vadd.f32 %v3050_v39, %v2918_v19 }
 0x400   : > { %v2919_v57 = vpop.f32.mrf.mxu1 }
 0x401   : > { %v3184_v32 = vadd.f32 %v3183_v44, %v3051_v62  ;;  %v2920_v41 = vadd.f32 %v2919_v57, %v6490_v54 }
 0x403   : > { %v3318_v52 = vpop.f32.mrf.mxu0  ;;  %v5055_v6 = vpop.eup %5054  ;;  %v3317_v38 = vadd.f32 %v3316_v61, %v3184_v32 }
 0x404   : > { %3425 = vst [vmem:[%s6137_s25 + $0x148] sm:$0xff] %v5055_v6  ;;  %v3198_v0 = vpop.f32.mrf.mxu3 }
 0x405   : > { %5056 = vtanh.f32 %v3317_v38 }
 0x406   : > { %v3052_v25 = vpop.f32.mrf.mxu2 }
 0x407   : > { %v3053_v45 = vadd.f32 %v3052_v25, %v2920_v41 }
 0x408   : > { %v2922_v13 = vpop.f32.mrf.mxu1 }
 0x409   : > { %v3186_v30 = vadd.f32 %v3185_v1, %v3053_v45  ;;  %v2923_v44 = vadd.f32 %v2922_v13, %v6067_v15 }
 0x40b   : > { %v3321_v22 = vpop.f32.mrf.mxu0  ;;  %v5057_v26 = vpop.eup %5056  ;;  %v3319_v36 = vadd.f32 %v3318_v52, %v3186_v30 }
 0x40c   : > { %3426 = vst [vmem:[%s6137_s25 + $0x150] sm:$0xff] %v5057_v26  ;;  %v3200_v18 = vpop.f32.mrf.mxu3 }
 0x40d   : > { %5058 = vtanh.f32 %v3319_v36 }
 0x40e   : > { %v3055_v33 = vpop.f32.mrf.mxu2 }
 0x40f   : > { %v3056_v48 = vadd.f32 %v3055_v33, %v2923_v44 }
 0x410   : > { %v2924_v63 = vpop.f32.mrf.mxu1 }
 0x411   : > { %v3189_v56 = vadd.f32 %v3188_v47, %v3056_v48  ;;  %v2925_v1 = vadd.f32 %v2924_v63, %v6491_v49 }
 0x413   : > { %v3323_v11 = vpop.f32.mrf.mxu0  ;;  %v5059_v40 = vpop.eup %5058  ;;  %v3322_v12 = vadd.f32 %v3321_v22, %v3189_v56 }
 0x414   : > { %3427 = vst [vmem:[%s6137_s25 + $0x158] sm:$0xff] %v5059_v40 }
 0x415   : > { %5060 = vtanh.f32 %v3322_v12 }
 0x416   : > { %v3057_v7 = vpop.f32.mrf.mxu2 }
 0x417   : > { %v3058_v43 = vadd.f32 %v3057_v7, %v2925_v1 }
 0x418   : > { %v2927_v5 = vpop.f32.mrf.mxu1 }
 0x419   : > { %v3191_v24 = vadd.f32 %v3190_v51, %v3058_v43  ;;  %v2928_v2 = vadd.f32 %v2927_v5, %v6089_v17 }
 0x41b   : > { %v3326_v29 = vpop.f32.mrf.mxu0  ;;  %v5061_v15 = vpop.eup %5060  ;;  %v3324_v3 = vadd.f32 %v3323_v11, %v3191_v24 }
 0x41c   : > { %3428 = vst [vmem:[%s6137_s25 + $0x160] sm:$0xff] %v5061_v15 }
 0x41d   : > { %5062 = vtanh.f32 %v3324_v3 }
 0x41e   : > { %v3060_v47 = vpop.f32.mrf.mxu2 }
 0x41f   : > { %v3061_v50 = vadd.f32 %v3060_v47, %v2928_v2 }
 0x420   : > { %v2929_v28 = vpop.f32.mrf.mxu1 }
 0x421   : > { %v3194_v59 = vadd.f32 %v3193_v27, %v3061_v50  ;;  %v2930_v53 = vadd.f32 %v2929_v28, %v6492_v35 }
 0x423   : > { %v3328_v16 = vpop.f32.mrf.mxu0  ;;  %v5063_v34 = vpop.eup %5062  ;;  %v3327_v8 = vadd.f32 %v3326_v29, %v3194_v59 }
 0x424   : > { %3429 = vst [vmem:[%s6137_s25 + $0x168] sm:$0xff] %v5063_v34 }
 0x425   : > { %5064 = vtanh.f32 %v3327_v8 }
 0x426   : > { %v3062_v42 = vpop.f32.mrf.mxu2 }
 0x427   : > { %v3063_v51 = vadd.f32 %v3062_v42, %v2930_v53 }
 0x428   : > { %v2932_v4 = vpop.f32.mrf.mxu1 }
 0x429   : > { %v3196_v10 = vadd.f32 %v3195_v23, %v3063_v51  ;;  %v2933_v60 = vadd.f32 %v2932_v4, %v6493_v20 }
 0x42b   : > { %v3331_v55 = vpop.f32.mrf.mxu0  ;;  %v5065_v31 = vpop.eup %5064  ;;  %v3329_v17 = vadd.f32 %v3328_v16, %v3196_v10 }
 0x42c   : > { %3430 = vst [vmem:[%s6137_s25 + $0x170] sm:$0xff] %v5065_v31 }
 0x42d   : > { %5066 = vtanh.f32 %v3329_v17 }
 0x42e   : > { %v3065_v37 = vpop.f32.mrf.mxu2 }
 0x42f   : > { %v3066_v14 = vadd.f32 %v3065_v37, %v2933_v60 }
 0x430   : > { %v2934_v9 = vpop.f32.mrf.mxu1 }
 0x431   : > { %v3199_v27 = vadd.f32 %v3198_v0, %v3066_v14 }
 0x433   : > { %v3333_v46 = vpop.f32.mrf.mxu0  ;;  %v5067_v61 = vpop.eup %5066  ;;  %v3332_v58 = vadd.f32 %v3331_v55, %v3199_v27 }
 0x434   : > { %3431 = vst [vmem:[%s6137_s25 + $0x178] sm:$0xff] %v5067_v61 }
 0x435   : > { %5068 = vtanh.f32 %v3332_v58 }
 0x436   : > { %v3067_v21 = vpop.f32.mrf.mxu2 }
 0x43b   : > { %v5069_v19 = vpop.eup %5068 }
 0x43c   : > { %3432 = vst [vmem:[%s6137_s25 + $0x180] sm:$0xff] %v5069_v19 }
 0x43d PF: > { %s13_s12 = sadd.s32 1, %s5079_s12  }
 0x43e   : > { %p10_p4 = scmp.ge.s32.totalorder %s13_s12, 6  }
 0x440   :  { %12 = sbr.rel (!%p10_p4) target bundleno = 1 (0x1), region = 62 }

</bundles_post_ra>
